<compile_context>
chip_gen: v5e
topology: v5e:2x2
jax: 0.10.0
libtpu: 0.0.40
codegen_flags: <defaults>
</compile_context>

<pallas_src>
import functools
import math

import jax
import jax.numpy as jnp
from jax import lax
from jax.experimental import pallas as pl
from jax.experimental.pallas import tpu as pltpu


# ----------------------------- config ---------------------------------------

CFG = dict(
    vocab_size=64,
    d_model=32,
    n_heads=4,
    max_seq_len=8,
    n_layers=2,
    mlp_ratio=4,
    init_std=0.02,
)

LANE = 128


# ------------------------- in-kernel helpers (f32) ---------------------------

def _layernorm(x, w, b, eps=1e-5):
    mu = jnp.mean(x, axis=-1, keepdims=True)
    xc = x - mu
    var = jnp.mean(xc * xc, axis=-1, keepdims=True)
    return xc * lax.rsqrt(var + eps) * w + b


def _gelu_exact(x):
    return 0.5 * x * (1.0 + lax.erf(x * (1.0 / math.sqrt(2.0))))


# ------------------------------ fused kernel ---------------------------------

def _gpt_fused_kernel(x_ref, vec_ref, wqkv_ref, wo_ref, wup_ref, wdn_ref,
                      lnf_ref, wlm_ref, out_ref, *, S, D, H, L):
    """Grid = (batch,). One grid step = full L-layer stack + ln_f + lm_head for
    one batch row.  Layers are unrolled (static L); residual stream is a value.

    vec_ref : (L, 8, W) packed per-layer vectors
              rows: 0 ln1_w, 1 ln1_b, 2 b_qkv (q part pre-scaled), 3 b_o,
                    4 ln2_w, 5 ln2_b, 6 b_up, 7 b_dn
    wqkv_ref: (L, D, Wq)  fused [Wq|Wk|Wv] (q cols pre-scaled), zero-padded
    wo_ref  : (L, D, D)   ; wup_ref: (L, D, R*D) ; wdn_ref: (L, R*D, D)
    lnf_ref : (2, D)      ; wlm_ref: (D, Vpad)
    """
    hd = D // H
    wq_width = wqkv_ref.shape[-1]
    rd = wup_ref.shape[-1]

    # Additive float tril mask (+1.0 allowed / +0.0 future) -- reference quirk.
    row = lax.broadcasted_iota(jnp.int32, (S, S), 0)
    col = lax.broadcasted_iota(jnp.int32, (S, S), 1)
    add_mask = (row >= col).astype(jnp.float32)

    x = x_ref[...]                                        # (S, D) f32 residual

    for l in range(L):                                    # static unroll, L=2
        vecs = vec_ref[l]                                 # (8, W) f32
        ln1_w, ln1_b = vecs[0:1, :D], vecs[1:2, :D]
        b_qkv = vecs[2:3, :wq_width]
        b_o = vecs[3:4, :D]
        ln2_w, ln2_b = vecs[4:5, :D], vecs[5:6, :D]
        b_up = vecs[6:7, :rd]
        b_dn = vecs[7:8, :D]

        # ---------------- attention ----------------
        a = _layernorm(x, ln1_w, ln1_b)
        # single lane-dense fused QKV matmul (q weight/bias carry 1/sqrt(hd))
        qkv = jnp.dot(a, wqkv_ref[l],
                      preferred_element_type=jnp.float32) + b_qkv     # (S, 128)
        q = qkv[:, 0:D]
        k = qkv[:, D:2 * D]
        v = qkv[:, 2 * D:3 * D]

        qh = q.reshape(S, H, hd).transpose(1, 0, 2)       # (H, S, hd)
        kh = k.reshape(S, H, hd).transpose(1, 0, 2)
        vh = v.reshape(S, H, hd).transpose(1, 0, 2)

        # QK^T / PV on the VPU (broadcast-multiply + reduce); no tiny MXU ops.
        s = jnp.sum(qh[:, :, None, :] * kh[:, None, :, :], axis=-1)   # (H,S,S)
        s = s + add_mask[None, :, :]
        s = s - jnp.max(s, axis=-1, keepdims=True)
        p = jnp.exp(s)
        p = p / jnp.sum(p, axis=-1, keepdims=True)                    # exact
        ctx = jnp.sum(p[:, :, :, None] * vh[:, None, :, :], axis=2)   # (H,S,hd)
        attn = ctx.transpose(1, 0, 2).reshape(S, D)

        attn_out = jnp.dot(attn, wo_ref[l],
                           preferred_element_type=jnp.float32) + b_o
        x = x + attn_out                                  # resid_attn_dropout == id

        # ---------------- MLP ----------------
        m = _layernorm(x, ln2_w, ln2_b)
        up = jnp.dot(m, wup_ref[l],
                     preferred_element_type=jnp.float32) + b_up
        act = _gelu_exact(up)
        dn = jnp.dot(act, wdn_ref[l],
                     preferred_element_type=jnp.float32) + b_dn
        x = x + dn                                        # resid_mlp_dropout == id

    # ---------------- final ln_f + lm_head (lane-dense output) ----------------
    lnf = lnf_ref[...]
    h = _layernorm(x, lnf[0:1, :], lnf[1:2, :])
    out_ref[...] = jnp.dot(h, wlm_ref[...], preferred_element_type=jnp.float32)


# ------------------------------- wrapper --------------------------------------

def gpt_forward(input_ids, kparams, cfg, key_padding_mask=None):
    B, S = input_ids.shape
    D = cfg["d_model"]
    H = cfg["n_heads"]
    L = cfg["n_layers"]
    V = cfg["vocab_size"]
    assert S <= cfg["max_seq_len"]
    Vpad = kparams["lm_head_w"].shape[-1]

    # embeddings (gather is glue, done in plain JAX)
    pos = jnp.arange(S, dtype=jnp.int32)
    tok_emb = jnp.take(kparams["wte"], input_ids, axis=0)       # (B, S, D)
    pos_emb = jnp.take(kparams["wpe"], pos, axis=0)[None]       # (1, S, D)
    x = (tok_emb + pos_emb).astype(jnp.float32)                 # emb_drop == identity

    weights = (kparams["vecs"], kparams["wqkv"], kparams["wo"],
               kparams["wup"], kparams["wdn"], kparams["lnf"],
               kparams["lm_head_w"])

    def shared_spec(arr):
        # Full array resident in VMEM; constant block index -> loaded once.
        nd = arr.ndim
        return pl.BlockSpec(arr.shape, lambda b, _nd=nd: (0,) * _nd)

    in_specs = ([pl.BlockSpec((None, S, D), lambda b: (b, 0, 0))]   # x per-batch
                + [shared_spec(a) for a in weights])
    out_spec = pl.BlockSpec((None, S, Vpad), lambda b: (b, 0, 0))

    logits_pad = pl.pallas_call(
        functools.partial(_gpt_fused_kernel, S=S, D=D, H=H, L=L),
        out_shape=jax.ShapeDtypeStruct((B, S, Vpad), jnp.float32),
        grid_spec=pltpu.PrefetchScalarGridSpec(
            num_scalar_prefetch=0,
            grid=(B,),                          # layers fully unrolled in-kernel
            in_specs=in_specs,
            out_specs=out_spec,
        ),
        compiler_params=pltpu.CompilerParams(
            dimension_semantics=("parallel",)),  # 2 TCs on v7x; no-op on v5e/v6e
    )(x, *weights)

    return logits_pad[..., :V]


# --------------------------- parameter init ----------------------------------

def init_params(cfg, key):
    """PyTorch-layout parameters (Linear weights are (out_features, in_features))."""
    D = cfg["d_model"]
    V = cfg["vocab_size"]
    Smax = cfg["max_seq_len"]
    L = cfg["n_layers"]
    R = cfg["mlp_ratio"]
    std = cfg["init_std"]
    resid_std = std / math.sqrt(2 * L)          # _is_residual linears

    keys = iter(jax.random.split(key, 8 + 8 * L))

    def nrm(shape, s):
        return (s * jax.random.normal(next(keys), shape)).astype(jnp.float32)

    params = {
        "wte": nrm((V, D), std),
        "wpe": nrm((Smax, D), std),
        "ln_f_w": jnp.ones((D,), jnp.float32),
        "ln_f_b": jnp.zeros((D,), jnp.float32),
        "lm_head_w": nrm((V, D), std),
        "blocks": [],
    }
    for _ in range(L):
        params["blocks"].append(dict(
            ln1_w=jnp.ones((D,), jnp.float32), ln1_b=jnp.zeros((D,), jnp.float32),
            w_qkv=nrm((3 * D, D), std),        b_qkv=jnp.zeros((3 * D,), jnp.float32),
            w_o=nrm((D, D), resid_std),        b_o=jnp.zeros((D,), jnp.float32),
            ln2_w=jnp.ones((D,), jnp.float32), ln2_b=jnp.zeros((D,), jnp.float32),
            w_up=nrm((R * D, D), std),         b_up=jnp.zeros((R * D,), jnp.float32),
            w_dn=nrm((D, R * D), resid_std),   b_dn=jnp.zeros((D,), jnp.float32),
        ))
    return params


def pack_params(params, cfg):
    """Convert PyTorch-layout params to the packed, kernel-friendly layout."""
    D = cfg["d_model"]
    H = cfg["n_heads"]
    V = cfg["vocab_size"]
    R = cfg["mlp_ratio"]
    hd = D // H
    scale = 1.0 / math.sqrt(hd)

    vpad = ((V + LANE - 1) // LANE) * LANE
    qkv_pad = ((3 * D + LANE - 1) // LANE) * LANE            # 96 -> 128
    W = max(qkv_pad, R * D, D)                                # packed-vector width
    W = ((W + LANE - 1) // LANE) * LANE

    def stack(name):
        return jnp.stack([blk[name] for blk in params["blocks"]])

    # Fused QKV: (L, 3D, D) torch layout -> (L, D, 3D) -> pad cols to 128;
    # fold 1/sqrt(head_dim) into the q columns / q bias.
    w_qkv = stack("w_qkv")                                    # (L, 3D, D)
    b_qkv = stack("b_qkv")                                    # (L, 3D)
    q_scale = jnp.concatenate([jnp.full((D,), scale, jnp.float32),
                               jnp.ones((2 * D,), jnp.float32)])
    wqkv_t = jnp.swapaxes(w_qkv, 1, 2) * q_scale[None, None, :]
    wqkv = jnp.pad(wqkv_t, ((0, 0), (0, 0), (0, qkv_pad - 3 * D)))
    bqkv = jnp.pad(b_qkv * q_scale[None, :], ((0, 0), (0, qkv_pad - 3 * D)))

    def t_w(name):                                            # (L, in, out)
        return jnp.swapaxes(stack(name), 1, 2)

    def pad_row(v):                                           # (L, d) -> (L, W)
        return jnp.pad(v, ((0, 0), (0, W - v.shape[-1])))

    # One packed (L, 8, W) array for all tiny per-layer vectors.
    vecs = jnp.stack([
        pad_row(stack("ln1_w")), pad_row(stack("ln1_b")),
        pad_row(bqkv),
        pad_row(stack("b_o")),
        pad_row(stack("ln2_w")), pad_row(stack("ln2_b")),
        pad_row(stack("b_up")),
        pad_row(stack("b_dn")),
    ], axis=1)

    # lm_head: (V, D) -> (D, V) -> pad vocab to a lane-dense multiple of 128.
    lm_w = jnp.pad(params["lm_head_w"].T, ((0, 0), (0, vpad - V)))

    return dict(
        wte=params["wte"],
        wpe=params["wpe"],
        vecs=vecs,
        wqkv=wqkv,
        wo=t_w("w_o"),
        wup=t_w("w_up"),
        wdn=t_w("w_dn"),
        lnf=jnp.stack([params["ln_f_w"], params["ln_f_b"]]),   # (2, D)
        lm_head_w=lm_w,
    )


# ------------------------------- main -----------------------------------------

if __name__ == "__main__":
    key = jax.random.PRNGKey(0)
    pkey, dkey = jax.random.split(key)

    params = init_params(CFG, pkey)
    kparams = pack_params(params, CFG)

    B, S = 2, CFG["max_seq_len"]                  # reference registers the full
    input_ids = jax.random.randint(               # (max_seq_len, max_seq_len) mask
        dkey, (B, S), 0, CFG["vocab_size"], dtype=jnp.int32)

    fwd = jax.jit(functools.partial(gpt_forward, cfg=CFG))
    logits = jax.block_until_ready(fwd(input_ids, kparams))

    assert logits.shape == (B, S, CFG["vocab_size"])
    assert logits.dtype == jnp.float32
    assert bool(jnp.all(jnp.isfinite(logits)))
    print("KERNEL_OK")
</pallas_src>

<mosaic_0001>
module attributes {stable_mosaic.version = 11 : i64} {
  func.func @_gpt_fused_kernel(%arg0: i32, %arg1: memref<1x8x32xf32, #tpu.memory_space<vmem>>, %arg2: memref<2x8x128xf32, #tpu.memory_space<vmem>>, %arg3: memref<2x32x128xf32, #tpu.memory_space<vmem>>, %arg4: memref<2x32x32xf32, #tpu.memory_space<vmem>>, %arg5: memref<2x32x128xf32, #tpu.memory_space<vmem>>, %arg6: memref<2x128x32xf32, #tpu.memory_space<vmem>>, %arg7: memref<2x32xf32, #tpu.memory_space<vmem>>, %arg8: memref<32x128xf32, #tpu.memory_space<vmem>>, %arg9: memref<1x8x128xf32, #tpu.memory_space<vmem>>) attributes {dimension_semantics = [#tpu.dimension_semantics<parallel>], iteration_bounds = array<i64: 2>, scalar_prefetch = 0 : i64, scratch_operands = 0 : i64, tpu.core_type = #tpu.core_type<tc>, window_params = [{transform_indices = @transform_0, window_bounds = array<i64: 1, 8, 32>}, {pipeline_mode = #tpu.pipeline_mode<synchronous>, transform_indices = @transform_1, window_bounds = array<i64: 2, 8, 128>}, {pipeline_mode = #tpu.pipeline_mode<synchronous>, transform_indices = @transform_2, window_bounds = array<i64: 2, 32, 128>}, {pipeline_mode = #tpu.pipeline_mode<synchronous>, transform_indices = @transform_3, window_bounds = array<i64: 2, 32, 32>}, {pipeline_mode = #tpu.pipeline_mode<synchronous>, transform_indices = @transform_4, window_bounds = array<i64: 2, 32, 128>}, {pipeline_mode = #tpu.pipeline_mode<synchronous>, transform_indices = @transform_5, window_bounds = array<i64: 2, 128, 32>}, {pipeline_mode = #tpu.pipeline_mode<synchronous>, transform_indices = @transform_6, window_bounds = array<i64: 2, 32>}, {pipeline_mode = #tpu.pipeline_mode<synchronous>, transform_indices = @transform_7, window_bounds = array<i64: 32, 128>}, {transform_indices = @transform_8, window_bounds = array<i64: 1, 8, 128>}]} {
    %0 = tpu.iota {dimensions = array<i32: 0>} : vector<8x8xi32>
    %1 = tpu.iota {dimensions = array<i32: 1>} : vector<8x8xi32>
    %2 = arith.cmpi sge, %0, %1 : vector<8x8xi32>
    %3 = arith.extui %2 : vector<8x8xi1> to vector<8x8xi32>
    %4 = arith.sitofp %3 : vector<8x8xi32> to vector<8x8xf32>
    %c0 = arith.constant 0 : index
    %c0_0 = arith.constant 0 : index
    %c0_1 = arith.constant 0 : index
    %5 = vector.load %arg1[%c0, %c0_0, %c0_1] : memref<1x8x32xf32, #tpu.memory_space<vmem>>, vector<1x8x32xf32>
    %6 = vector.shape_cast %5 : vector<1x8x32xf32> to vector<8x32xf32>
    %c0_2 = arith.constant 0 : index
    %c0_3 = arith.constant 0 : index
    %c0_4 = arith.constant 0 : index
    %7 = vector.load %arg2[%c0_2, %c0_3, %c0_4] : memref<2x8x128xf32, #tpu.memory_space<vmem>>, vector<1x8x128xf32>
    %8 = vector.shape_cast %7 : vector<1x8x128xf32> to vector<8x128xf32>
    %9 = vector.extract_strided_slice %8 {offsets = [0, 0], sizes = [1, 32], strides = [1, 1]} : vector<8x128xf32> to vector<1x32xf32>
    %10 = vector.extract_strided_slice %8 {offsets = [1, 0], sizes = [1, 32], strides = [1, 1]} : vector<8x128xf32> to vector<1x32xf32>
    %11 = vector.extract_strided_slice %8 {offsets = [2, 0], sizes = [1, 128], strides = [1, 1]} : vector<8x128xf32> to vector<1x128xf32>
    %12 = vector.extract_strided_slice %8 {offsets = [3, 0], sizes = [1, 32], strides = [1, 1]} : vector<8x128xf32> to vector<1x32xf32>
    %13 = vector.extract_strided_slice %8 {offsets = [4, 0], sizes = [1, 32], strides = [1, 1]} : vector<8x128xf32> to vector<1x32xf32>
    %14 = vector.extract_strided_slice %8 {offsets = [5, 0], sizes = [1, 32], strides = [1, 1]} : vector<8x128xf32> to vector<1x32xf32>
    %15 = vector.extract_strided_slice %8 {offsets = [6, 0], sizes = [1, 128], strides = [1, 1]} : vector<8x128xf32> to vector<1x128xf32>
    %16 = vector.extract_strided_slice %8 {offsets = [7, 0], sizes = [1, 32], strides = [1, 1]} : vector<8x128xf32> to vector<1x32xf32>
    %cst = arith.constant dense<0.000000e+00> : vector<8xf32>
    %17 = vector.multi_reduction <add>, %6, %cst [1] : vector<8x32xf32> to vector<8xf32>
    %18 = vector.shape_cast %17 : vector<8xf32> to vector<8x1xf32>
    %cst_5 = arith.constant 3.200000e+01 : f32
    %19 = vector.broadcast %cst_5 : f32 to vector<8x1xf32>
    %20 = arith.divf %18, %19 : vector<8x1xf32>
    %21 = vector.broadcast %20 : vector<8x1xf32> to vector<8x32xf32>
    %22 = arith.subf %6, %21 : vector<8x32xf32>
    %23 = arith.mulf %22, %22 : vector<8x32xf32>
    %cst_6 = arith.constant dense<0.000000e+00> : vector<8xf32>
    %24 = vector.multi_reduction <add>, %23, %cst_6 [1] : vector<8x32xf32> to vector<8xf32>
    %25 = vector.shape_cast %24 : vector<8xf32> to vector<8x1xf32>
    %cst_7 = arith.constant 3.200000e+01 : f32
    %26 = vector.broadcast %cst_7 : f32 to vector<8x1xf32>
    %27 = arith.divf %25, %26 : vector<8x1xf32>
    %cst_8 = arith.constant 9.99999974E-6 : f32
    %28 = vector.broadcast %cst_8 : f32 to vector<8x1xf32>
    %29 = arith.addf %27, %28 : vector<8x1xf32>
    %30 = math.rsqrt %29 : vector<8x1xf32>
    %31 = vector.broadcast %30 : vector<8x1xf32> to vector<8x32xf32>
    %32 = arith.mulf %22, %31 : vector<8x32xf32>
    %33 = vector.broadcast %9 : vector<1x32xf32> to vector<8x32xf32>
    %34 = arith.mulf %32, %33 : vector<8x32xf32>
    %35 = vector.broadcast %10 : vector<1x32xf32> to vector<8x32xf32>
    %36 = arith.addf %34, %35 : vector<8x32xf32>
    %c0_9 = arith.constant 0 : index
    %c0_10 = arith.constant 0 : index
    %c0_11 = arith.constant 0 : index
    %37 = vector.load %arg3[%c0_9, %c0_10, %c0_11] : memref<2x32x128xf32, #tpu.memory_space<vmem>>, vector<1x32x128xf32>
    %38 = vector.shape_cast %37 : vector<1x32x128xf32> to vector<32x128xf32>
    %cst_12 = arith.constant dense<0.000000e+00> : vector<8x128xf32>
    %39 = tpu.matmul %36, %38, %cst_12 {dimension_numbers = #tpu.dot_dimension_numbers<[1], [0], [0], [1], [0, 0, 1, 1], [], []>} : vector<8x32xf32>, vector<32x128xf32>, vector<8x128xf32> -> vector<8x128xf32>
    %40 = vector.broadcast %11 : vector<1x128xf32> to vector<8x128xf32>
    %41 = arith.addf %39, %40 : vector<8x128xf32>
    %42 = vector.extract_strided_slice %41 {offsets = [0, 0], sizes = [8, 32], strides = [1, 1]} : vector<8x128xf32> to vector<8x32xf32>
    %43 = vector.extract_strided_slice %41 {offsets = [0, 32], sizes = [8, 32], strides = [1, 1]} : vector<8x128xf32> to vector<8x32xf32>
    %44 = vector.extract_strided_slice %41 {offsets = [0, 64], sizes = [8, 32], strides = [1, 1]} : vector<8x128xf32> to vector<8x32xf32>
    %45 = vector.shape_cast %42 : vector<8x32xf32> to vector<8x4x8xf32>
    %46 = tpu.transpose %45, [1, 0, 2] : vector<8x4x8xf32> -> vector<4x8x8xf32>
    %47 = vector.shape_cast %43 : vector<8x32xf32> to vector<8x4x8xf32>
    %48 = tpu.transpose %47, [1, 0, 2] : vector<8x4x8xf32> -> vector<4x8x8xf32>
    %49 = vector.shape_cast %44 : vector<8x32xf32> to vector<8x4x8xf32>
    %50 = tpu.transpose %49, [1, 0, 2] : vector<8x4x8xf32> -> vector<4x8x8xf32>
    %51 = vector.shape_cast %46 : vector<4x8x8xf32> to vector<4x8x1x8xf32>
    %52 = vector.shape_cast %48 : vector<4x8x8xf32> to vector<4x1x8x8xf32>
    %53 = vector.broadcast %51 : vector<4x8x1x8xf32> to vector<4x8x8x8xf32>
    %54 = vector.broadcast %52 : vector<4x1x8x8xf32> to vector<4x8x8x8xf32>
    %55 = arith.mulf %53, %54 : vector<4x8x8x8xf32>
    %cst_13 = arith.constant dense<0.000000e+00> : vector<4x8x8xf32>
    %56 = vector.multi_reduction <add>, %55, %cst_13 [3] : vector<4x8x8x8xf32> to vector<4x8x8xf32>
    %57 = vector.shape_cast %4 : vector<8x8xf32> to vector<1x8x8xf32>
    %58 = vector.broadcast %57 : vector<1x8x8xf32> to vector<4x8x8xf32>
    %59 = arith.addf %56, %58 : vector<4x8x8xf32>
    %cst_14 = arith.constant dense<0xFF800000> : vector<4x8xf32>
    %60 = vector.multi_reduction <maximumf>, %59, %cst_14 [2] : vector<4x8x8xf32> to vector<4x8xf32>
    %61 = vector.shape_cast %60 : vector<4x8xf32> to vector<4x8x1xf32>
    %62 = vector.broadcast %61 : vector<4x8x1xf32> to vector<4x8x8xf32>
    %63 = arith.subf %59, %62 : vector<4x8x8xf32>
    %64 = math.exp %63 : vector<4x8x8xf32>
    %cst_15 = arith.constant dense<0.000000e+00> : vector<4x8xf32>
    %65 = vector.multi_reduction <add>, %64, %cst_15 [2] : vector<4x8x8xf32> to vector<4x8xf32>
    %66 = vector.shape_cast %65 : vector<4x8xf32> to vector<4x8x1xf32>
    %67 = vector.broadcast %66 : vector<4x8x1xf32> to vector<4x8x8xf32>
    %68 = arith.divf %64, %67 : vector<4x8x8xf32>
    %69 = vector.shape_cast %68 : vector<4x8x8xf32> to vector<4x8x8x1xf32>
    %70 = vector.shape_cast %50 : vector<4x8x8xf32> to vector<4x1x8x8xf32>
    %71 = vector.broadcast %69 : vector<4x8x8x1xf32> to vector<4x8x8x8xf32>
    %72 = vector.broadcast %70 : vector<4x1x8x8xf32> to vector<4x8x8x8xf32>
    %73 = arith.mulf %71, %72 : vector<4x8x8x8xf32>
    %cst_16 = arith.constant dense<0.000000e+00> : vector<4x8x8xf32>
    %74 = vector.multi_reduction <add>, %73, %cst_16 [2] : vector<4x8x8x8xf32> to vector<4x8x8xf32>
    %75 = tpu.transpose %74, [1, 0, 2] : vector<4x8x8xf32> -> vector<8x4x8xf32>
    %76 = vector.shape_cast %75 : vector<8x4x8xf32> to vector<8x32xf32>
    %c0_17 = arith.constant 0 : index
    %c0_18 = arith.constant 0 : index
    %c0_19 = arith.constant 0 : index
    %77 = vector.load %arg4[%c0_17, %c0_18, %c0_19] : memref<2x32x32xf32, #tpu.memory_space<vmem>>, vector<1x32x32xf32>
    %78 = vector.shape_cast %77 : vector<1x32x32xf32> to vector<32x32xf32>
    %cst_20 = arith.constant dense<0.000000e+00> : vector<8x32xf32>
    %79 = tpu.matmul %76, %78, %cst_20 {dimension_numbers = #tpu.dot_dimension_numbers<[1], [0], [0], [1], [0, 0, 1, 1], [], []>} : vector<8x32xf32>, vector<32x32xf32>, vector<8x32xf32> -> vector<8x32xf32>
    %80 = vector.broadcast %12 : vector<1x32xf32> to vector<8x32xf32>
    %81 = arith.addf %79, %80 : vector<8x32xf32>
    %82 = arith.addf %6, %81 : vector<8x32xf32>
    %cst_21 = arith.constant dense<0.000000e+00> : vector<8xf32>
    %83 = vector.multi_reduction <add>, %82, %cst_21 [1] : vector<8x32xf32> to vector<8xf32>
    %84 = vector.shape_cast %83 : vector<8xf32> to vector<8x1xf32>
    %cst_22 = arith.constant 3.200000e+01 : f32
    %85 = vector.broadcast %cst_22 : f32 to vector<8x1xf32>
    %86 = arith.divf %84, %85 : vector<8x1xf32>
    %87 = vector.broadcast %86 : vector<8x1xf32> to vector<8x32xf32>
    %88 = arith.subf %82, %87 : vector<8x32xf32>
    %89 = arith.mulf %88, %88 : vector<8x32xf32>
    %cst_23 = arith.constant dense<0.000000e+00> : vector<8xf32>
    %90 = vector.multi_reduction <add>, %89, %cst_23 [1] : vector<8x32xf32> to vector<8xf32>
    %91 = vector.shape_cast %90 : vector<8xf32> to vector<8x1xf32>
    %cst_24 = arith.constant 3.200000e+01 : f32
    %92 = vector.broadcast %cst_24 : f32 to vector<8x1xf32>
    %93 = arith.divf %91, %92 : vector<8x1xf32>
    %cst_25 = arith.constant 9.99999974E-6 : f32
    %94 = vector.broadcast %cst_25 : f32 to vector<8x1xf32>
    %95 = arith.addf %93, %94 : vector<8x1xf32>
    %96 = math.rsqrt %95 : vector<8x1xf32>
    %97 = vector.broadcast %96 : vector<8x1xf32> to vector<8x32xf32>
    %98 = arith.mulf %88, %97 : vector<8x32xf32>
    %99 = vector.broadcast %13 : vector<1x32xf32> to vector<8x32xf32>
    %100 = arith.mulf %98, %99 : vector<8x32xf32>
    %101 = vector.broadcast %14 : vector<1x32xf32> to vector<8x32xf32>
    %102 = arith.addf %100, %101 : vector<8x32xf32>
    %c0_26 = arith.constant 0 : index
    %c0_27 = arith.constant 0 : index
    %c0_28 = arith.constant 0 : index
    %103 = vector.load %arg5[%c0_26, %c0_27, %c0_28] : memref<2x32x128xf32, #tpu.memory_space<vmem>>, vector<1x32x128xf32>
    %104 = vector.shape_cast %103 : vector<1x32x128xf32> to vector<32x128xf32>
    %cst_29 = arith.constant dense<0.000000e+00> : vector<8x128xf32>
    %105 = tpu.matmul %102, %104, %cst_29 {dimension_numbers = #tpu.dot_dimension_numbers<[1], [0], [0], [1], [0, 0, 1, 1], [], []>} : vector<8x32xf32>, vector<32x128xf32>, vector<8x128xf32> -> vector<8x128xf32>
    %106 = vector.broadcast %15 : vector<1x128xf32> to vector<8x128xf32>
    %107 = arith.addf %105, %106 : vector<8x128xf32>
    %cst_30 = arith.constant 5.000000e-01 : f32
    %108 = vector.broadcast %cst_30 : f32 to vector<8x128xf32>
    %109 = arith.mulf %108, %107 : vector<8x128xf32>
    %cst_31 = arith.constant 0.707106769 : f32
    %110 = vector.broadcast %cst_31 : f32 to vector<8x128xf32>
    %111 = arith.mulf %107, %110 : vector<8x128xf32>
    %112 = math.erf %111 : vector<8x128xf32>
    %cst_32 = arith.constant 1.000000e+00 : f32
    %113 = vector.broadcast %cst_32 : f32 to vector<8x128xf32>
    %114 = arith.addf %113, %112 : vector<8x128xf32>
    %115 = arith.mulf %109, %114 : vector<8x128xf32>
    %c0_33 = arith.constant 0 : index
    %c0_34 = arith.constant 0 : index
    %c0_35 = arith.constant 0 : index
    %116 = vector.load %arg6[%c0_33, %c0_34, %c0_35] : memref<2x128x32xf32, #tpu.memory_space<vmem>>, vector<1x128x32xf32>
    %117 = vector.shape_cast %116 : vector<1x128x32xf32> to vector<128x32xf32>
    %cst_36 = arith.constant dense<0.000000e+00> : vector<8x32xf32>
    %118 = tpu.matmul %115, %117, %cst_36 {dimension_numbers = #tpu.dot_dimension_numbers<[1], [0], [0], [1], [0, 0, 1, 1], [], []>} : vector<8x128xf32>, vector<128x32xf32>, vector<8x32xf32> -> vector<8x32xf32>
    %119 = vector.broadcast %16 : vector<1x32xf32> to vector<8x32xf32>
    %120 = arith.addf %118, %119 : vector<8x32xf32>
    %121 = arith.addf %82, %120 : vector<8x32xf32>
    %c1 = arith.constant 1 : index
    %c0_37 = arith.constant 0 : index
    %c0_38 = arith.constant 0 : index
    %122 = vector.load %arg2[%c1, %c0_37, %c0_38] : memref<2x8x128xf32, #tpu.memory_space<vmem>>, vector<1x8x128xf32>
    %123 = vector.shape_cast %122 : vector<1x8x128xf32> to vector<8x128xf32>
    %124 = vector.extract_strided_slice %123 {offsets = [0, 0], sizes = [1, 32], strides = [1, 1]} : vector<8x128xf32> to vector<1x32xf32>
    %125 = vector.extract_strided_slice %123 {offsets = [1, 0], sizes = [1, 32], strides = [1, 1]} : vector<8x128xf32> to vector<1x32xf32>
    %126 = vector.extract_strided_slice %123 {offsets = [2, 0], sizes = [1, 128], strides = [1, 1]} : vector<8x128xf32> to vector<1x128xf32>
    %127 = vector.extract_strided_slice %123 {offsets = [3, 0], sizes = [1, 32], strides = [1, 1]} : vector<8x128xf32> to vector<1x32xf32>
    %128 = vector.extract_strided_slice %123 {offsets = [4, 0], sizes = [1, 32], strides = [1, 1]} : vector<8x128xf32> to vector<1x32xf32>
    %129 = vector.extract_strided_slice %123 {offsets = [5, 0], sizes = [1, 32], strides = [1, 1]} : vector<8x128xf32> to vector<1x32xf32>
    %130 = vector.extract_strided_slice %123 {offsets = [6, 0], sizes = [1, 128], strides = [1, 1]} : vector<8x128xf32> to vector<1x128xf32>
    %131 = vector.extract_strided_slice %123 {offsets = [7, 0], sizes = [1, 32], strides = [1, 1]} : vector<8x128xf32> to vector<1x32xf32>
    %cst_39 = arith.constant dense<0.000000e+00> : vector<8xf32>
    %132 = vector.multi_reduction <add>, %121, %cst_39 [1] : vector<8x32xf32> to vector<8xf32>
    %133 = vector.shape_cast %132 : vector<8xf32> to vector<8x1xf32>
    %cst_40 = arith.constant 3.200000e+01 : f32
    %134 = vector.broadcast %cst_40 : f32 to vector<8x1xf32>
    %135 = arith.divf %133, %134 : vector<8x1xf32>
    %136 = vector.broadcast %135 : vector<8x1xf32> to vector<8x32xf32>
    %137 = arith.subf %121, %136 : vector<8x32xf32>
    %138 = arith.mulf %137, %137 : vector<8x32xf32>
    %cst_41 = arith.constant dense<0.000000e+00> : vector<8xf32>
    %139 = vector.multi_reduction <add>, %138, %cst_41 [1] : vector<8x32xf32> to vector<8xf32>
    %140 = vector.shape_cast %139 : vector<8xf32> to vector<8x1xf32>
    %cst_42 = arith.constant 3.200000e+01 : f32
    %141 = vector.broadcast %cst_42 : f32 to vector<8x1xf32>
    %142 = arith.divf %140, %141 : vector<8x1xf32>
    %cst_43 = arith.constant 9.99999974E-6 : f32
    %143 = vector.broadcast %cst_43 : f32 to vector<8x1xf32>
    %144 = arith.addf %142, %143 : vector<8x1xf32>
    %145 = math.rsqrt %144 : vector<8x1xf32>
    %146 = vector.broadcast %145 : vector<8x1xf32> to vector<8x32xf32>
    %147 = arith.mulf %137, %146 : vector<8x32xf32>
    %148 = vector.broadcast %124 : vector<1x32xf32> to vector<8x32xf32>
    %149 = arith.mulf %147, %148 : vector<8x32xf32>
    %150 = vector.broadcast %125 : vector<1x32xf32> to vector<8x32xf32>
    %151 = arith.addf %149, %150 : vector<8x32xf32>
    %c1_44 = arith.constant 1 : index
    %c0_45 = arith.constant 0 : index
    %c0_46 = arith.constant 0 : index
    %152 = vector.load %arg3[%c1_44, %c0_45, %c0_46] : memref<2x32x128xf32, #tpu.memory_space<vmem>>, vector<1x32x128xf32>
    %153 = vector.shape_cast %152 : vector<1x32x128xf32> to vector<32x128xf32>
    %cst_47 = arith.constant dense<0.000000e+00> : vector<8x128xf32>
    %154 = tpu.matmul %151, %153, %cst_47 {dimension_numbers = #tpu.dot_dimension_numbers<[1], [0], [0], [1], [0, 0, 1, 1], [], []>} : vector<8x32xf32>, vector<32x128xf32>, vector<8x128xf32> -> vector<8x128xf32>
    %155 = vector.broadcast %126 : vector<1x128xf32> to vector<8x128xf32>
    %156 = arith.addf %154, %155 : vector<8x128xf32>
    %157 = vector.extract_strided_slice %156 {offsets = [0, 0], sizes = [8, 32], strides = [1, 1]} : vector<8x128xf32> to vector<8x32xf32>
    %158 = vector.extract_strided_slice %156 {offsets = [0, 32], sizes = [8, 32], strides = [1, 1]} : vector<8x128xf32> to vector<8x32xf32>
    %159 = vector.extract_strided_slice %156 {offsets = [0, 64], sizes = [8, 32], strides = [1, 1]} : vector<8x128xf32> to vector<8x32xf32>
    %160 = vector.shape_cast %157 : vector<8x32xf32> to vector<8x4x8xf32>
    %161 = tpu.transpose %160, [1, 0, 2] : vector<8x4x8xf32> -> vector<4x8x8xf32>
    %162 = vector.shape_cast %158 : vector<8x32xf32> to vector<8x4x8xf32>
    %163 = tpu.transpose %162, [1, 0, 2] : vector<8x4x8xf32> -> vector<4x8x8xf32>
    %164 = vector.shape_cast %159 : vector<8x32xf32> to vector<8x4x8xf32>
    %165 = tpu.transpose %164, [1, 0, 2] : vector<8x4x8xf32> -> vector<4x8x8xf32>
    %166 = vector.shape_cast %161 : vector<4x8x8xf32> to vector<4x8x1x8xf32>
    %167 = vector.shape_cast %163 : vector<4x8x8xf32> to vector<4x1x8x8xf32>
    %168 = vector.broadcast %166 : vector<4x8x1x8xf32> to vector<4x8x8x8xf32>
    %169 = vector.broadcast %167 : vector<4x1x8x8xf32> to vector<4x8x8x8xf32>
    %170 = arith.mulf %168, %169 : vector<4x8x8x8xf32>
    %cst_48 = arith.constant dense<0.000000e+00> : vector<4x8x8xf32>
    %171 = vector.multi_reduction <add>, %170, %cst_48 [3] : vector<4x8x8x8xf32> to vector<4x8x8xf32>
    %172 = vector.shape_cast %4 : vector<8x8xf32> to vector<1x8x8xf32>
    %173 = vector.broadcast %172 : vector<1x8x8xf32> to vector<4x8x8xf32>
    %174 = arith.addf %171, %173 : vector<4x8x8xf32>
    %cst_49 = arith.constant dense<0xFF800000> : vector<4x8xf32>
    %175 = vector.multi_reduction <maximumf>, %174, %cst_49 [2] : vector<4x8x8xf32> to vector<4x8xf32>
    %176 = vector.shape_cast %175 : vector<4x8xf32> to vector<4x8x1xf32>
    %177 = vector.broadcast %176 : vector<4x8x1xf32> to vector<4x8x8xf32>
    %178 = arith.subf %174, %177 : vector<4x8x8xf32>
    %179 = math.exp %178 : vector<4x8x8xf32>
    %cst_50 = arith.constant dense<0.000000e+00> : vector<4x8xf32>
    %180 = vector.multi_reduction <add>, %179, %cst_50 [2] : vector<4x8x8xf32> to vector<4x8xf32>
    %181 = vector.shape_cast %180 : vector<4x8xf32> to vector<4x8x1xf32>
    %182 = vector.broadcast %181 : vector<4x8x1xf32> to vector<4x8x8xf32>
    %183 = arith.divf %179, %182 : vector<4x8x8xf32>
    %184 = vector.shape_cast %183 : vector<4x8x8xf32> to vector<4x8x8x1xf32>
    %185 = vector.shape_cast %165 : vector<4x8x8xf32> to vector<4x1x8x8xf32>
    %186 = vector.broadcast %184 : vector<4x8x8x1xf32> to vector<4x8x8x8xf32>
    %187 = vector.broadcast %185 : vector<4x1x8x8xf32> to vector<4x8x8x8xf32>
    %188 = arith.mulf %186, %187 : vector<4x8x8x8xf32>
    %cst_51 = arith.constant dense<0.000000e+00> : vector<4x8x8xf32>
    %189 = vector.multi_reduction <add>, %188, %cst_51 [2] : vector<4x8x8x8xf32> to vector<4x8x8xf32>
    %190 = tpu.transpose %189, [1, 0, 2] : vector<4x8x8xf32> -> vector<8x4x8xf32>
    %191 = vector.shape_cast %190 : vector<8x4x8xf32> to vector<8x32xf32>
    %c1_52 = arith.constant 1 : index
    %c0_53 = arith.constant 0 : index
    %c0_54 = arith.constant 0 : index
    %192 = vector.load %arg4[%c1_52, %c0_53, %c0_54] : memref<2x32x32xf32, #tpu.memory_space<vmem>>, vector<1x32x32xf32>
    %193 = vector.shape_cast %192 : vector<1x32x32xf32> to vector<32x32xf32>
    %cst_55 = arith.constant dense<0.000000e+00> : vector<8x32xf32>
    %194 = tpu.matmul %191, %193, %cst_55 {dimension_numbers = #tpu.dot_dimension_numbers<[1], [0], [0], [1], [0, 0, 1, 1], [], []>} : vector<8x32xf32>, vector<32x32xf32>, vector<8x32xf32> -> vector<8x32xf32>
    %195 = vector.broadcast %127 : vector<1x32xf32> to vector<8x32xf32>
    %196 = arith.addf %194, %195 : vector<8x32xf32>
    %197 = arith.addf %121, %196 : vector<8x32xf32>
    %cst_56 = arith.constant dense<0.000000e+00> : vector<8xf32>
    %198 = vector.multi_reduction <add>, %197, %cst_56 [1] : vector<8x32xf32> to vector<8xf32>
    %199 = vector.shape_cast %198 : vector<8xf32> to vector<8x1xf32>
    %cst_57 = arith.constant 3.200000e+01 : f32
    %200 = vector.broadcast %cst_57 : f32 to vector<8x1xf32>
    %201 = arith.divf %199, %200 : vector<8x1xf32>
    %202 = vector.broadcast %201 : vector<8x1xf32> to vector<8x32xf32>
    %203 = arith.subf %197, %202 : vector<8x32xf32>
    %204 = arith.mulf %203, %203 : vector<8x32xf32>
    %cst_58 = arith.constant dense<0.000000e+00> : vector<8xf32>
    %205 = vector.multi_reduction <add>, %204, %cst_58 [1] : vector<8x32xf32> to vector<8xf32>
    %206 = vector.shape_cast %205 : vector<8xf32> to vector<8x1xf32>
    %cst_59 = arith.constant 3.200000e+01 : f32
    %207 = vector.broadcast %cst_59 : f32 to vector<8x1xf32>
    %208 = arith.divf %206, %207 : vector<8x1xf32>
    %cst_60 = arith.constant 9.99999974E-6 : f32
    %209 = vector.broadcast %cst_60 : f32 to vector<8x1xf32>
    %210 = arith.addf %208, %209 : vector<8x1xf32>
    %211 = math.rsqrt %210 : vector<8x1xf32>
    %212 = vector.broadcast %211 : vector<8x1xf32> to vector<8x32xf32>
    %213 = arith.mulf %203, %212 : vector<8x32xf32>
    %214 = vector.broadcast %128 : vector<1x32xf32> to vector<8x32xf32>
    %215 = arith.mulf %213, %214 : vector<8x32xf32>
    %216 = vector.broadcast %129 : vector<1x32xf32> to vector<8x32xf32>
    %217 = arith.addf %215, %216 : vector<8x32xf32>
    %c1_61 = arith.constant 1 : index
    %c0_62 = arith.constant 0 : index
    %c0_63 = arith.constant 0 : index
    %218 = vector.load %arg5[%c1_61, %c0_62, %c0_63] : memref<2x32x128xf32, #tpu.memory_space<vmem>>, vector<1x32x128xf32>
    %219 = vector.shape_cast %218 : vector<1x32x128xf32> to vector<32x128xf32>
    %cst_64 = arith.constant dense<0.000000e+00> : vector<8x128xf32>
    %220 = tpu.matmul %217, %219, %cst_64 {dimension_numbers = #tpu.dot_dimension_numbers<[1], [0], [0], [1], [0, 0, 1, 1], [], []>} : vector<8x32xf32>, vector<32x128xf32>, vector<8x128xf32> -> vector<8x128xf32>
    %221 = vector.broadcast %130 : vector<1x128xf32> to vector<8x128xf32>
    %222 = arith.addf %220, %221 : vector<8x128xf32>
    %cst_65 = arith.constant 5.000000e-01 : f32
    %223 = vector.broadcast %cst_65 : f32 to vector<8x128xf32>
    %224 = arith.mulf %223, %222 : vector<8x128xf32>
    %cst_66 = arith.constant 0.707106769 : f32
    %225 = vector.broadcast %cst_66 : f32 to vector<8x128xf32>
    %226 = arith.mulf %222, %225 : vector<8x128xf32>
    %227 = math.erf %226 : vector<8x128xf32>
    %cst_67 = arith.constant 1.000000e+00 : f32
    %228 = vector.broadcast %cst_67 : f32 to vector<8x128xf32>
    %229 = arith.addf %228, %227 : vector<8x128xf32>
    %230 = arith.mulf %224, %229 : vector<8x128xf32>
    %c1_68 = arith.constant 1 : index
    %c0_69 = arith.constant 0 : index
    %c0_70 = arith.constant 0 : index
    %231 = vector.load %arg6[%c1_68, %c0_69, %c0_70] : memref<2x128x32xf32, #tpu.memory_space<vmem>>, vector<1x128x32xf32>
    %232 = vector.shape_cast %231 : vector<1x128x32xf32> to vector<128x32xf32>
    %cst_71 = arith.constant dense<0.000000e+00> : vector<8x32xf32>
    %233 = tpu.matmul %230, %232, %cst_71 {dimension_numbers = #tpu.dot_dimension_numbers<[1], [0], [0], [1], [0, 0, 1, 1], [], []>} : vector<8x128xf32>, vector<128x32xf32>, vector<8x32xf32> -> vector<8x32xf32>
    %234 = vector.broadcast %131 : vector<1x32xf32> to vector<8x32xf32>
    %235 = arith.addf %233, %234 : vector<8x32xf32>
    %236 = arith.addf %197, %235 : vector<8x32xf32>
    %c0_72 = arith.constant 0 : index
    %c0_73 = arith.constant 0 : index
    %237 = vector.load %arg7[%c0_72, %c0_73] : memref<2x32xf32, #tpu.memory_space<vmem>>, vector<2x32xf32>
    %238 = vector.extract_strided_slice %237 {offsets = [0, 0], sizes = [1, 32], strides = [1, 1]} : vector<2x32xf32> to vector<1x32xf32>
    %239 = vector.extract_strided_slice %237 {offsets = [1, 0], sizes = [1, 32], strides = [1, 1]} : vector<2x32xf32> to vector<1x32xf32>
    %cst_74 = arith.constant dense<0.000000e+00> : vector<8xf32>
    %240 = vector.multi_reduction <add>, %236, %cst_74 [1] : vector<8x32xf32> to vector<8xf32>
    %241 = vector.shape_cast %240 : vector<8xf32> to vector<8x1xf32>
    %cst_75 = arith.constant 3.200000e+01 : f32
    %242 = vector.broadcast %cst_75 : f32 to vector<8x1xf32>
    %243 = arith.divf %241, %242 : vector<8x1xf32>
    %244 = vector.broadcast %243 : vector<8x1xf32> to vector<8x32xf32>
    %245 = arith.subf %236, %244 : vector<8x32xf32>
    %246 = arith.mulf %245, %245 : vector<8x32xf32>
    %cst_76 = arith.constant dense<0.000000e+00> : vector<8xf32>
    %247 = vector.multi_reduction <add>, %246, %cst_76 [1] : vector<8x32xf32> to vector<8xf32>
    %248 = vector.shape_cast %247 : vector<8xf32> to vector<8x1xf32>
    %cst_77 = arith.constant 3.200000e+01 : f32
    %249 = vector.broadcast %cst_77 : f32 to vector<8x1xf32>
    %250 = arith.divf %248, %249 : vector<8x1xf32>
    %cst_78 = arith.constant 9.99999974E-6 : f32
    %251 = vector.broadcast %cst_78 : f32 to vector<8x1xf32>
    %252 = arith.addf %250, %251 : vector<8x1xf32>
    %253 = math.rsqrt %252 : vector<8x1xf32>
    %254 = vector.broadcast %253 : vector<8x1xf32> to vector<8x32xf32>
    %255 = arith.mulf %245, %254 : vector<8x32xf32>
    %256 = vector.broadcast %238 : vector<1x32xf32> to vector<8x32xf32>
    %257 = arith.mulf %255, %256 : vector<8x32xf32>
    %258 = vector.broadcast %239 : vector<1x32xf32> to vector<8x32xf32>
    %259 = arith.addf %257, %258 : vector<8x32xf32>
    %c0_79 = arith.constant 0 : index
    %c0_80 = arith.constant 0 : index
    %260 = vector.load %arg8[%c0_79, %c0_80] : memref<32x128xf32, #tpu.memory_space<vmem>>, vector<32x128xf32>
    %cst_81 = arith.constant dense<0.000000e+00> : vector<8x128xf32>
    %261 = tpu.matmul %259, %260, %cst_81 {dimension_numbers = #tpu.dot_dimension_numbers<[1], [0], [0], [1], [0, 0, 1, 1], [], []>} : vector<8x32xf32>, vector<32x128xf32>, vector<8x128xf32> -> vector<8x128xf32>
    %c0_82 = arith.constant 0 : index
    %c0_83 = arith.constant 0 : index
    %c0_84 = arith.constant 0 : index
    %262 = vector.load %arg9[%c0_82, %c0_83, %c0_84] : memref<1x8x128xf32, #tpu.memory_space<vmem>>, vector<1x8x128xf32>
    %263 = vector.shape_cast %262 : vector<1x8x128xf32> to vector<8x128xf32>
    %264 = vector.shape_cast %261 : vector<8x128xf32> to vector<1x8x128xf32>
    tpu.vector_store %arg9[%c0_82, %c0_83, %c0_84], %264 {strides = array<i32>} : memref<1x8x128xf32, #tpu.memory_space<vmem>>, vector<1x8x128xf32>,
    return
  }
  func.func @transform_0(%arg0: i32) -> (i32, i32, i32) {
    %c0_i32 = arith.constant 0 : i32
    %c0_i32_0 = arith.constant 0 : i32
    %c0_i32_1 = arith.constant 0 : i32
    return %arg0, %c0_i32, %c0_i32_0 : i32, i32, i32
  }
  func.func @transform_1(%arg0: i32) -> (i32, i32, i32) {
    %c0_i32 = arith.constant 0 : i32
    %c0_i32_0 = arith.constant 0 : i32
    %c0_i32_1 = arith.constant 0 : i32
    %c0_i32_2 = arith.constant 0 : i32
    return %c0_i32, %c0_i32_0, %c0_i32_1 : i32, i32, i32
  }
  func.func @transform_2(%arg0: i32) -> (i32, i32, i32) {
    %c0_i32 = arith.constant 0 : i32
    %c0_i32_0 = arith.constant 0 : i32
    %c0_i32_1 = arith.constant 0 : i32
    %c0_i32_2 = arith.constant 0 : i32
    return %c0_i32, %c0_i32_0, %c0_i32_1 : i32, i32, i32
  }
  func.func @transform_3(%arg0: i32) -> (i32, i32, i32) {
    %c0_i32 = arith.constant 0 : i32
    %c0_i32_0 = arith.constant 0 : i32
    %c0_i32_1 = arith.constant 0 : i32
    %c0_i32_2 = arith.constant 0 : i32
    return %c0_i32, %c0_i32_0, %c0_i32_1 : i32, i32, i32
  }
  func.func @transform_4(%arg0: i32) -> (i32, i32, i32) {
    %c0_i32 = arith.constant 0 : i32
    %c0_i32_0 = arith.constant 0 : i32
    %c0_i32_1 = arith.constant 0 : i32
    %c0_i32_2 = arith.constant 0 : i32
    return %c0_i32, %c0_i32_0, %c0_i32_1 : i32, i32, i32
  }
  func.func @transform_5(%arg0: i32) -> (i32, i32, i32) {
    %c0_i32 = arith.constant 0 : i32
    %c0_i32_0 = arith.constant 0 : i32
    %c0_i32_1 = arith.constant 0 : i32
    %c0_i32_2 = arith.constant 0 : i32
    return %c0_i32, %c0_i32_0, %c0_i32_1 : i32, i32, i32
  }
  func.func @transform_6(%arg0: i32) -> (i32, i32) {
    %c0_i32 = arith.constant 0 : i32
    %c0_i32_0 = arith.constant 0 : i32
    %c0_i32_1 = arith.constant 0 : i32
    return %c0_i32, %c0_i32_0 : i32, i32
  }
  func.func @transform_7(%arg0: i32) -> (i32, i32) {
    %c0_i32 = arith.constant 0 : i32
    %c0_i32_0 = arith.constant 0 : i32
    %c0_i32_1 = arith.constant 0 : i32
    return %c0_i32, %c0_i32_0 : i32, i32
  }
  func.func @transform_8(%arg0: i32) -> (i32, i32, i32) {
    %c0_i32 = arith.constant 0 : i32
    %c0_i32_0 = arith.constant 0 : i32
    %c0_i32_1 = arith.constant 0 : i32
    return %arg0, %c0_i32, %c0_i32_0 : i32, i32, i32
  }
}

</mosaic_0001>

<bundles_post_ra>
// kernel: gpt_forward.1
= control target key start
LH: loop header
LB: loop body
LE: loop exit
PB: predicated region body
PF: predicated region fallthrough
CT: control target
= control target key end

     0   :  { %13 = vsyncpa [#allocation3], 0  ;;  %s9404_s0 = inlined_call_operand.vmem [shape: f32[2,8,32], index: 0, kind: input, shape index: {}]   ;;  %s9405_s1 = inlined_call_operand.vmem [shape: f32[2,8,128], index: 1, kind: input, shape index: {}]   ;;  %s9406_s2 = inlined_call_operand.vmem [shape: f32[2,32,128], index: 2, kind: input, shape index: {}]   ;;  %s9407_s3 = inlined_call_operand.vmem [shape: f32[2,32,32], index: 3, kind: input, shape index: {}]   ;;  %s9408_s4 = inlined_call_operand.vmem [shape: f32[2,32,128], index: 4, kind: input, shape index: {}]   ;;  %s9409_s5 = inlined_call_operand.vmem [shape: f32[2,128,32], index: 5, kind: input, shape index: {}]   ;;  %s9410_s6 = inlined_call_operand.vmem [shape: f32[2,32], index: 6, kind: input, shape index: {}]   ;;  %s9411_s7 = inlined_call_operand.vmem [shape: f32[32,128], index: 7, kind: input, shape index: {}]   ;;  %s9412_s8 = inlined_call_operand.hbm [shape: f32[2,8,128], index: 8, kind: output, shape index: {}]  }
   0x1   :  { %15 = vsyncpa [#allocation3 + $0x1], 0  ;;  %s6181_s27 = smov 0   ;;  %s6183_s28 = smov 0  }
   0x2   :  { %s6185_s29 = smov 0   ;;  %s6187_s30 = smov 0  }
   0x3 LB: > { %s6202_s9 = sadd.s32 4294967295, %s6121_s30   ;;  %s5658_s10 = sadd.s32 4294967294, %s6121_s30   ;;  %s6121_s30 = sphi %s6187_s30, %s10037_s30   ;;  %s6117_s29 = sphi %s6185_s29, %s10036_s29   ;;  %s6113_s28 = sphi %s6183_s28, %s10035_s28   ;;  %s6109_s27 = sphi %s6181_s27, %s10034_s27  }
   0x4   : > { %s6206_s11 = sadd.s32 1, %s6121_s30   ;;  %s201_s12 = sadd.s32 1, %s6117_s29 }
   0x5   : > { %s198_s13 = ssub.s32 %s6121_s30, %s6206_s11  ;;  %p211_p0 = scmp.ne.s32.totalorder %s6117_s29, %s6113_s28 }
   0x6   : > { %p199_p1 = scmp.eq.s32.totalorder %s198_s13, 0  ;;  %p212_p2 = scmp.eq.s32.totalorder %s6202_s9, 1 }
   0x7   : > { %p217_p3 = scmp.ne.s32.totalorder %s6113_s28, %s6109_s27  ;;  %p218_p4 = scmp.eq.s32.totalorder %s5658_s10, 1 }
   0x8   : > { %s6217_s14 = scalar_select %p199_p1, %s6117_s29, %s201_s12  }
   0x9   : > { %p6219_p5 = por %p212_p2, %p211_p0  ;;  %p6223_p6 = por %p218_p4, %p217_p3 }
   0xa   : > { %p5661_p7 = scmp.ge.s32.totalorder %s6121_s30, 1  ;;  %p264_p8 = scmp.lt.s32.totalorder %s6121_s30, 3 }
   0xc   : > { %p265_p9 = pnand %p5661_p7, %p264_p8 }
   0xe   : > { %268 = sbr.rel (%p265_p9) target bundleno = 5334 (0x14d6), region = 52 }
  0x13   : > { %p297_p10 = scmp.lt.s32.totalorder %s6202_s9, 1  ;;  %vm9435_vm0 = vcmask 261120   ;;  %v6123_v2 = vmov 32.0   ;;  %v347_v14 = vld [vmem:[%s9406_s2 + $0x18] sm:$0xff]  ;;  %v346_v15 = vld [vmem:[%s9406_s2 + $0x10] sm:$0xff]  ;;  %v345_v16 = vld [vmem:[%s9406_s2 + $0x8] sm:$0xff]  ;;  %v301_v18 = vlaneseq }
  0x14   : > { %5784 = vrcp.f32 %v6123_v2  ;;  %364 = vmatpush.msra.mxu2 %v347_v14  ;;  %v344_v17 = vld [vmem:[%s9406_s2] sm:$0xff]  ;;  %v6124_v23 = vmov 0.0   ;;  %s6125_s19 = smov 104   ;;  %s6126_s20 = smov 120   ;;  %v6130_v59 = vmov 1983009808  }
  0x15   : > { %s298_s17 = scalar_select %p297_p10, %s6202_s9, 1  ;;  %v302_v19 = vshrl.u32 %v301_v18, 7  ;;  %v6254_v20 = vand.u32 127, %v301_v18  ;;  %v309_v37 = vld [vmem:[%s9405_s1] sm:$0xff]  ;;  %v388_v60 = vunpack.c.l.s4 %v6130_v59  ;;  %vm9455_vm6 = vcmask 1047556  }
  0x16   : > { %365 = vmatpush.msra.mxu2 %v346_v15  ;;  %v340_v39 = vperm.slane %v309_v37, 0  ;;  %v342_v42 = vperm.slane %v309_v37, 1  ;;  %v348_v45 = vperm.slane %v309_v37, 2  ;;  %s9460_s22 = smov 96   ;;  %s6128_s23 = smov 112   ;;  %vm9453_vm7 = vcmask 64512  }
  0x17   : > { %s5663_s18 = sshll.u32 %s298_s17, 3  ;;  %9493 = vst [vmem:[#allocation6_spill] sm:$0xff] %v6254_v20  ;;  %5759 = vset.pattern.permute.xlu2 %v302_v19  ;;  %vm305_vm2 = vcmp.ge.s32.totalorder %v302_v19, %v6254_v20  ;;  %5770 = vset.pattern.permute.xlu0 %v302_v19  ;;  %s9457_s24 = smov 64   ;;  %vm9451_vm8 = vcmask 1041409   ;;  %vm9449_vm9 = vcmask 1043459   ;;  %vm9450_vm10 = vcmask 1042434  }
  0x18   : > { %s6234_s21 = scalar_lea.vmem %s9404_s0, %s5663_s18  ;;  %366 = vmatpush.msra.mxu2 %v345_v16  ;;  %v5664_v24 = vsel %vm305_vm2, 1.0, %v6124_v23  ;;  %vm9443_vm11 = vcmask 1044484   ;;  %vm9439_vm12 = vcmask 1045509   ;;  %vm9438_vm13 = vcmask 1046534   ;;  %s9456_s25 = smov 24  }
  0x19   : > { %v308_v0 = vld [vmem:[%s6234_s21] sm:$0xff]  ;;  %v963_v26 = vperm.slane %v5664_v24, 0  ;;  %v970_v27 = vperm.slane %v5664_v24, 1  ;;  %v977_v29 = vperm.slane %v5664_v24, 2  ;;  %v984_v30 = vperm.slane %v5664_v24, 3  ;;  %s9459_s26 = smov 16  }
  0x1a   : > { %v311_v1 = vsel %vm9435_vm0, %v308_v0, 0.0  ;;  %v5785_v3 = vpop.eup %5784  ;;  %367 = vmatpush.msra.mxu2 %v344_v17  ;;  %v991_v48 = vperm.slane %v5664_v24, 4  ;;  %v998_v49 = vperm.slane %v5664_v24, 5  ;;  %v1005_v51 = vperm.slane %v5664_v24, 6  ;;  %s6135_s10 = smov 8   ;;  %s9675_s17 = smov 96  }
  0x1b   : > { %312 = vadd.xlane.f32.xlu0 %v311_v1  ;;  %v315_v4 = vmul.f32 32.0, %v5785_v3  ;;  %vm319_vm1 = vweird.f32 %v5785_v3  ;;  %v5760_v28 = vpack.i.bf16 %v970_v27, %v963_v26  ;;  %v5765_v33 = vpack.i.bf16 %v984_v30, %v977_v29  ;;  %s9676_s18 = smov 64   ;;  %s294_s13 = sand.u32 1, %s6113_s28  }
  0x1c   : > { %v5771_v50 = vpack.i.bf16 %v998_v49, %v991_v48  ;;  %v1012_v52 = vperm.slane %v5664_v24, 7  ;;  %vm9437_vm14 = vcmask 1047559  }
  0x1d   : > { %v316_v5 = vsub.f32 1.0, %v315_v4 }
  0x1e   : > { %v5776_v54 = vpack.i.bf16 %v1012_v52, %v1005_v51 }
  0x1f   : > { %v317_v6 = vmul.f32 %v5785_v3, %v316_v5  ;;  %5761 = vperm.xlu2 %5759, %v5760_v28  }
  0x21   : > { %v318_v7 = vadd.f32 %v5785_v3, %v317_v6 }
  0x23   : > { %v6238_v8 = vsel %vm319_vm1, %v5785_v3, %v318_v7 }
  0x24   : > { %9492 = vst [vmem:[#allocation5_spill] sm:$0xff] %v6238_v8 }
  0x27   : > { %5766 = vperm.xlu2 %5759, %v5765_v33  }
  0x79   : > { %v6267_v53 = vpop.permute.xlu2 %5761 }
  0x81   : > { %v6269_v55 = vpop.permute.xlu2 %5766 }
  0x8e   : > { %v313_v9 = vpop.xlane.xlu0 %312 }
  0x8f   : > { %v321_v10 = vmul.f32 %v6238_v8, %v313_v9 }
  0x91   : > { %v322_v11 = vsub.f32 %v308_v0, %v321_v10  ;;  %v6278_v0 = vunpack.c.0.s8 %v388_v60  ;;  %v6131_v10 = vmov 1934713408  }
  0x93   : > { %v323_v12 = vmul.f32 %v322_v11, %v322_v11  ;;  %9494 = vst [vmem:[#allocation7_spill] sm:$0xff] %v6278_v0 }
  0x95   : > { %v324_v13 = vsel %vm9435_vm0, %v323_v12, 0.0 }
  0x96   : > { %325 = vadd.xlane.f32.xlu0 %v324_v13 }
  0xaa   : > { %5772 = vperm.xlu0 %5770, %v5771_v50  }
  0xb2   : > { %5777 = vperm.xlu0 %5770, %v5776_v54  }
 0x109   : > { %v326_v21 = vpop.xlane.xlu0 %325 }
 0x10a   : > { %v327_v22 = vmul.f32 %v326_v21, %v6238_v8 }
 0x10c   : > { %v328_v25 = vadd.f32 1e-05, %v327_v22 }
 0x10e   : > { %5786 = vrsqrt.f32 %v328_v25  ;;  %vm335_vm4 = vweird.f32 %v328_v25 }
 0x114   : > { %v5787_v31 = vpop.eup %5786 }
 0x115   : > { %v330_v32 = vmul.f32 %v5787_v31, %v328_v25  ;;  %vm336_vm3 = vweird.f32 %v5787_v31 }
 0x116   : > { %vm337_vm5 = vmor %vm335_vm4, %vm336_vm3 }
 0x117   : > { %v331_v34 = vmul.f32 %v5787_v31, %v330_v32 }
 0x119   : > { %v332_v35 = vmul.f32 0.5, %v331_v34 }
 0x11b   : > { %v333_v36 = vsub.f32 1.5, %v332_v35 }
 0x11c   : > { %v6281_v3 = vpop.permute.xlu0 %5772 }
 0x11d   : > { %v334_v38 = vmul.f32 %v5787_v31, %v333_v36 }
 0x11f   : > { %v338_v40 = vsel %vm337_vm5, %v5787_v31, %v334_v38 }
 0x120   : > { %v339_v41 = vmul.f32 %v338_v40, %v322_v11  ;;  %v412_v11 = vunpack.c.l.s4 %v6131_v10 }
 0x122   : > { %v341_v43 = vmul.f32 %v340_v39, %v339_v41  ;;  %v6289_v16 = vunpack.c.0.s8 %v412_v11 }
 0x124   : > { %v343_v44 = vadd.f32 %v342_v42, %v341_v43  ;;  %9495 = vst [vmem:[#allocation8_spill] sm:$0xff] %v6289_v16  ;;  %v6292_v18 = vpop.permute.xlu0 %5777 }
 0x126   : > { %5665 = vmatmul.msk.f32.vlgmr.msra.gmra.mxu2 %vm9435_vm0, %v343_v44 }
 0x1a9   : > { %v369_v46 = vpop.f32.mrf.mxu2 }
 0x1aa   : > { %v370_v47 = vadd.f32 %v369_v46, %v348_v45 }
 0x1ac   : > { %379 = vrot.lane.b32.xlu2 %v370_v47, %s6125_s19  ;;  %373 = vrot.lane.b32.xlu1 %v370_v47, %s6126_s20  ;;  %v385_v61 = vrot.slane %v370_v47, 4 }
 0x1b4   : > { %493 = vrot.lane.b32.xlu2 %v370_v47, %s9460_s22  ;;  %376 = vrot.lane.b32.xlu1 %v370_v47, %s6128_s23 }
 0x1bc   : > { %615 = vrot.lane.b32.xlu1 %v370_v47, %s9457_s24 }
 0x206   : > { %v380_v56 = vpop.permute.xlu2 %379 }
 0x207   : > { %499 = vrot.lane.b32.xlu2 %v380_v56, %s9460_s22  ;;  %v395_v9 = vrot.slane %v380_v56, 4 }
 0x20e   : > { %v494_v21 = vpop.permute.xlu2 %493 }
 0x20f   : > { %v507_v51 = vrot.slane %v494_v21, 4 }
 0x21e   : > { %v374_v57 = vpop.permute.xlu1 %373 }
 0x21f   : > { %617 = vrot.lane.b32.xlu2 %v374_v57, %s9457_s24  ;;  %495 = vrot.lane.b32.xlu0 %v374_v57, %s9460_s22  ;;  %v397_v1 = vrot.slane %v374_v57, 4  ;;  %v396_v13 = vsel %vm9455_vm6, %v395_v9, %v374_v57 }
 0x220   : > { %v402_v17 = vperm.slane %v396_v13, %v6278_v0 }
 0x221   : > { %v398_v5 = vsel %vm9455_vm6, %v380_v56, %v397_v1 }
 0x222   : > { %v406_v12 = vperm.slane %v398_v5, %v6278_v0  ;;  %v407_v25 = vrot.slane %v402_v17, 4 }
 0x224   : > { %v419_v22 = vrot.slane %v406_v12, 4 }
 0x226   : > { %v377_v58 = vpop.permute.xlu1 %376 }
 0x227   : > { %619 = vrot.lane.b32.xlu0 %v377_v58, %s9457_s24  ;;  %497 = vrot.lane.b32.xlu1 %v377_v58, %s9460_s22  ;;  %v382_v62 = vrot.slane %v377_v58, 4  ;;  %v386_v63 = vsel %vm9455_vm6, %v377_v58, %v385_v61 }
 0x228   : > { %v394_v2 = vperm.slane %v386_v63, %v6278_v0 }
 0x229   : > { %v384_v4 = vsel %vm9455_vm6, %v382_v62, %v370_v47 }
 0x22a   : > { %v390_v6 = vperm.slane %v384_v4, %v6278_v0  ;;  %v421_v7 = vrot.slane %v394_v2, 4  ;;  %v420_v24 = vsel %vm9455_vm6, %v419_v22, %v394_v2 }
 0x22b   : > { %v426_v29 = vperm.slane %v420_v24, %v6289_v16 }
 0x22c   : > { %v409_v14 = vrot.slane %v390_v6, 4  ;;  %v422_v15 = vsel %vm9455_vm6, %v406_v12, %v421_v7  ;;  %v408_v28 = vsel %vm9455_vm6, %v407_v25, %v390_v6 }
 0x22d   : > { %v430_v19 = vperm.slane %v422_v15, %v6289_v16  ;;  %v414_v33 = vperm.slane %v408_v28, %v6289_v16  ;;  %v435_v36 = vrot.slane %v426_v29, 4 }
 0x22e   : > { %v410_v23 = vsel %vm9455_vm6, %v402_v17, %v409_v14  ;;  %v6301_v32 = vpop.permute.xlu1 %615 }
 0x22f   : > { %621 = vrot.lane.b32.xlu1 %v380_v56, %s9457_s24  ;;  %v418_v26 = vperm.slane %v410_v23, %v6289_v16  ;;  %v437_v27 = vrot.slane %v430_v19, 4  ;;  %9496 = vst [vmem:[#allocation9_spill] sm:$0xff] %v6301_v32  ;;  %v431_v43 = vrot.slane %v414_v33, 4  ;;  %v436_v44 = vsel %vm9455_vm6, 0.0, %v435_v36 }
 0x231   : > { %v433_v30 = vrot.slane %v418_v26, 4  ;;  %v438_v31 = vsel %vm9455_vm6, 0.0, %v437_v27  ;;  %v450_v38 = vsel %vm9455_vm6, %v437_v27, %v426_v29  ;;  %v432_v52 = vsel %vm9455_vm6, 0.0, %v431_v43 }
 0x232   : > { %v455_v39 = vrot.slane %v438_v31, 4  ;;  %v454_v46 = vperm.slane %v450_v38, %v6278_v0 }
 0x233   : > { %v434_v40 = vsel %vm9455_vm6, 0.0, %v433_v30  ;;  %v439_v45 = vsel %vm9455_vm6, %v433_v30, %v414_v33 }
 0x234   : > { %v444_v48 = vrot.slane %v434_v40, 4  ;;  %v456_v49 = vsel %vm9455_vm6, %v455_v39, %v436_v44  ;;  %v443_v54 = vperm.slane %v439_v45, %v6278_v0  ;;  %v475_v59 = vrot.slane %v454_v46, 4 }
 0x235   : > { %v460_v58 = vperm.slane %v456_v49, %v6278_v0 }
 0x236   : > { %v445_v62 = vsel %vm9455_vm6, %v444_v48, %v432_v52  ;;  %v463_v10 = vrot.slane %v443_v54, 4 }
 0x237   : > { %v449_v9 = vperm.slane %v445_v62, %v6278_v0  ;;  %v476_v11 = vsel %vm9455_vm6, %v460_v58, %v475_v59  ;;  %v473_v43 = vrot.slane %v460_v58, 4 }
 0x238   : > { %v484_v22 = vperm.slane %v476_v11, %v6289_v16 }
 0x239   : > { %v464_v26 = vsel %vm9455_vm6, %v449_v9, %v463_v10 }
 0x23a   : > { %v489_v38 = vrot.slane %v484_v22, 4 }
 0x261   : > { %v500_v34 = vpop.permute.xlu2 %499 }
 0x262   : > { %v517_v41 = vrot.slane %v500_v34, 4 }
 0x291   : > { %v496_v35 = vpop.permute.xlu0 %495 }
 0x292   : > { %v519_v37 = vrot.slane %v496_v35, 4  ;;  %v518_v47 = vsel %vm9455_vm6, %v517_v41, %v496_v35 }
 0x293   : > { %v524_v56 = vperm.slane %v518_v47, %v6278_v0  ;;  %v461_v47 = vrot.slane %v449_v9, 4 }
 0x294   : > { %v520_v42 = vsel %vm9455_vm6, %v500_v34, %v519_v37  ;;  %v472_v34 = vperm.slane %v464_v26, %v6289_v16 }
 0x295   : > { %v528_v50 = vperm.slane %v520_v42, %v6278_v0  ;;  %v529_v4 = vrot.slane %v524_v56, 4  ;;  %v462_v62 = vsel %vm9455_vm6, %v461_v47, %v443_v54 }
 0x296   : > { %v6349_v52 = vsel %vm9455_vm6, %v489_v38, %v472_v34  ;;  %v491_v58 = vrot.slane %v472_v34, 4 }
 0x297   : > { %v541_v63 = vrot.slane %v528_v50, 4  ;;  %v785_v9 = vperm.slane %v6349_v52, 0  ;;  %v757_v54 = vrot.slane %v6349_v52, 3 }
 0x299   : > { %v498_v57 = vpop.permute.xlu1 %497 }
 0x29a   : > { %v505_v60 = vrot.slane %v498_v57, 4  ;;  %v508_v61 = vsel %vm9455_vm6, %v498_v57, %v507_v51 }
 0x29b   : > { %v516_v1 = vperm.slane %v508_v61, %v6278_v0  ;;  %v755_v61 = vrot.slane %v6349_v52, 1 }
 0x29c   : > { %v506_v2 = vsel %vm9455_vm6, %v505_v60, %v494_v21  ;;  %v756_v60 = vrot.slane %v6349_v52, 2 }
 0x29d   : > { %v512_v5 = vperm.slane %v506_v2, %v6278_v0  ;;  %v542_v6 = vsel %vm9455_vm6, %v541_v63, %v516_v1  ;;  %v543_v7 = vrot.slane %v516_v1, 4 }
 0x29e   : > { %v548_v12 = vperm.slane %v542_v6, %v6289_v16  ;;  %v787_v6 = vperm.slane %v756_v60, 0 }
 0x29f   : > { %v530_v13 = vsel %vm9455_vm6, %v529_v4, %v512_v5  ;;  %v531_v14 = vrot.slane %v512_v5, 4  ;;  %v544_v15 = vsel %vm9455_vm6, %v528_v50, %v543_v7  ;;  %v6360_v4 = vsel %vm9455_vm6, %v484_v22, %v491_v58 }
 0x2a0   : > { %v536_v17 = vperm.slane %v530_v13, %v6289_v16  ;;  %v552_v19 = vperm.slane %v544_v15, %v6289_v16  ;;  %v557_v24 = vrot.slane %v548_v12, 4  ;;  %v786_v7 = vperm.slane %v755_v61, 0 }
 0x2a1   : > { %v532_v21 = vsel %vm9455_vm6, %v524_v56, %v531_v14  ;;  %v474_v56 = vsel %vm9455_vm6, %v473_v43, %v454_v46  ;;  %v468_v46 = vperm.slane %v462_v62, %v6289_v16  ;;  %v763_v15 = vrot.slane %v6360_v4, 2 }
 0x2a2   : > { %v540_v23 = vperm.slane %v532_v21, %v6289_v16  ;;  %v559_v25 = vrot.slane %v552_v19, 4  ;;  %v553_v27 = vrot.slane %v536_v17, 4  ;;  %v558_v36 = vsel %vm9455_vm6, 0.0, %v557_v24 }
 0x2a3   : > { %v480_v1 = vperm.slane %v474_v56, %v6289_v16  ;;  %v760_v19 = vrot.slane %v6349_v52, 6 }
 0x2a4   : > { %v555_v28 = vrot.slane %v540_v23, 4  ;;  %v560_v29 = vsel %vm9455_vm6, 0.0, %v559_v25  ;;  %v572_v30 = vsel %vm9455_vm6, %v559_v25, %v548_v12  ;;  %v554_v44 = vsel %vm9455_vm6, 0.0, %v553_v27 }
 0x2a5   : > { %v576_v31 = vperm.slane %v572_v30, %v6278_v0  ;;  %v577_v33 = vrot.slane %v560_v29, 4  ;;  %v485_v26 = vrot.slane %v480_v1, 4  ;;  %v768_v27 = vrot.slane %v6360_v4, 7 }
 0x2a6   : > { %v556_v35 = vsel %vm9455_vm6, 0.0, %v555_v28  ;;  %v561_v37 = vsel %vm9455_vm6, %v555_v28, %v536_v17  ;;  %v788_v28 = vperm.slane %v757_v54, 0  ;;  %v795_v29 = vperm.slane %v763_v15, 0 }
 0x2a7   : > { %v565_v39 = vperm.slane %v561_v37, %v6278_v0  ;;  %v566_v40 = vrot.slane %v556_v35, 4  ;;  %v578_v41 = vsel %vm9455_vm6, %v577_v33, %v558_v36  ;;  %v597_v42 = vrot.slane %v576_v31, 4 }
 0x2a8   : > { %v582_v45 = vperm.slane %v578_v41, %v6278_v0  ;;  %v791_v34 = vperm.slane %v760_v19, 0  ;;  %v6387_v38 = vsel %vm9455_vm6, %v485_v26, %v468_v46  ;;  %v800_v41 = vperm.slane %v768_v27, 0 }
 0x2a9   : > { %v567_v48 = vsel %vm9455_vm6, %v566_v40, %v554_v44  ;;  %v585_v49 = vrot.slane %v565_v39, 4  ;;  %v761_v44 = vrot.slane %v6349_v52, 7 }
 0x2aa   : > { %v571_v50 = vperm.slane %v567_v48, %v6278_v0  ;;  %v598_v51 = vsel %vm9455_vm6, %v582_v45, %v597_v42  ;;  %v595_v5 = vrot.slane %v582_v45, 4  ;;  %v758_v42 = vrot.slane %v6349_v52, 4 }
 0x2ab   : > { %v606_v57 = vperm.slane %v598_v51, %v6289_v16  ;;  %v747_v51 = vrot.slane %v6387_v38, 7  ;;  %v792_v62 = vperm.slane %v761_v44, 0 }
 0x2ac   : > { %v586_v59 = vsel %vm9455_vm6, %v571_v50, %v585_v49  ;;  %v583_v12 = vrot.slane %v571_v50, 4  ;;  %v596_v21 = vsel %vm9455_vm6, %v595_v5, %v576_v31  ;;  %v487_v31 = vrot.slane %v468_v46, 4 }
 0x2ad   : > { %v594_v63 = vperm.slane %v586_v59, %v6289_v16  ;;  %v611_v2 = vrot.slane %v606_v57, 4  ;;  %v602_v33 = vperm.slane %v596_v21, %v6289_v16  ;;  %v789_v60 = vperm.slane %v758_v42, 0 }
 0x2ae   : > { %v584_v30 = vsel %vm9455_vm6, %v583_v12, %v565_v39  ;;  %v765_v39 = vrot.slane %v6360_v4, 4  ;;  %v6393_v43 = vsel %vm9455_vm6, %v480_v1, %v487_v31  ;;  %v776_v5 = vperm.slane %v747_v51, 0 }
 0x2af   : > { %v6365_v10 = vsel %vm9455_vm6, %v611_v2, %v594_v63  ;;  %v613_v11 = vrot.slane %v594_v63, 4  ;;  %v590_v40 = vperm.slane %v584_v30, %v6289_v16  ;;  %v607_v45 = vrot.slane %v602_v33, 4 }
 0x2b0   : > { %v851_v13 = vmul.f32 %v787_v6, %v6365_v10  ;;  %v850_v14 = vmul.f32 %v786_v7, %v6365_v10  ;;  %v849_v17 = vmul.f32 %v785_v9, %v6365_v10  ;;  %v852_v35 = vmul.f32 %v788_v28, %v6365_v10 }
 0x2b1   : > { %v6378_v25 = vsel %vm9455_vm6, %v606_v57, %v613_v11  ;;  %v855_v37 = vmul.f32 %v791_v34, %v6365_v10  ;;  %v609_v50 = vrot.slane %v590_v40, 4  ;;  %v748_v57 = vrot.slane %v6393_v43, 1 }
 0x2b2   : > { %v920_v22 = vsel %vm9453_vm7, %v851_v13, 0.0  ;;  %v917_v23 = vsel %vm9453_vm7, %v850_v14, 0.0  ;;  %v914_v24 = vsel %vm9453_vm7, %v849_v17, 0.0  ;;  %v859_v36 = vmul.f32 %v795_v29, %v6378_v25 }
 0x2b3   : > { %921 = vadd.xlane.f32.xlu0 %v920_v22  ;;  %918 = vadd.xlane.f32.xlu2 %v917_v23  ;;  %v6397_v47 = vmul.f32 %v800_v41, %v6378_v25  ;;  %v923_v48 = vsel %vm9453_vm7, %v852_v35, 0.0  ;;  %v932_v56 = vsel %vm9453_vm7, %v855_v37, 0.0  ;;  %v749_v58 = vrot.slane %v6393_v43, 2 }
 0x2b4   : > { %915 = vadd.xlane.f32.xlu1 %v914_v24  ;;  %v944_v49 = vsel %vm9453_vm7, %v859_v36, 0.0  ;;  %v754_v59 = vrot.slane %v6393_v43, 7  ;;  %v797_v61 = vperm.slane %v765_v39, 0  ;;  %v6407_v63 = vsel %vm9455_vm6, %v607_v45, %v590_v40 }
 0x2b5   : > { %v853_v1 = vmul.f32 %v789_v60, %v6365_v10  ;;  %v6412_v46 = vsel %vm9455_vm6, %v602_v33, %v609_v50  ;;  %v856_v6 = vmul.f32 %v792_v62, %v6365_v10  ;;  %v778_v7 = vperm.slane %v748_v57, 0 }
 0x2b6   : > { %v861_v2 = vmul.f32 %v797_v61, %v6378_v25  ;;  %v779_v9 = vperm.slane %v749_v58, 0  ;;  %v784_v54 = vperm.slane %v754_v59, 0  ;;  %v759_v11 = vrot.slane %v6349_v52, 5 }
 0x2b7   : > { %v766_v12 = vrot.slane %v6360_v4, 5  ;;  %v6418_v13 = vmul.f32 %v776_v5, %v6407_v63  ;;  %v6421_v14 = vmul.f32 %v778_v7, %v6412_v46  ;;  %v926_v19 = vsel %vm9453_vm7, %v853_v1, 0.0 }
 0x2b8   : > { %v6424_v15 = vmul.f32 %v779_v9, %v6412_v46  ;;  %v6427_v17 = vmul.f32 %v784_v54, %v6412_v46  ;;  %v950_v21 = vsel %vm9453_vm7, %v861_v2, 0.0  ;;  %v935_v52 = vsel %vm9453_vm7, %v856_v6, 0.0 }
 0x2b9   : > { %v790_v22 = vperm.slane %v759_v11, 0  ;;  %v798_v23 = vperm.slane %v766_v12, 0  ;;  %v769_v24 = vperm.slane %v6387_v38, 0  ;;  %v762_v29 = vrot.slane %v6360_v4, 1 }
 0x2ba   : > { %v750_v30 = vrot.slane %v6393_v43, 3  ;;  %v741_v31 = vrot.slane %v6387_v38, 1  ;;  %v767_v39 = vrot.slane %v6360_v4, 6  ;;  %v751_v44 = vrot.slane %v6393_v43, 4 }
 0x2bb   : > { %924 = vadd.xlane.f32.xlu0 %v923_v48  ;;  %945 = vadd.xlane.f32.xlu2 %v944_v49  ;;  %v854_v26 = vmul.f32 %v790_v22, %v6365_v10  ;;  %v862_v27 = vmul.f32 %v798_v23, %v6378_v25  ;;  %v833_v28 = vmul.f32 %v769_v24, %v6407_v63  ;;  %v794_v10 = vperm.slane %v762_v29, 0 }
 0x2bc   : > { %933 = vadd.xlane.f32.xlu1 %v932_v56  ;;  %v780_v36 = vperm.slane %v750_v30, 0  ;;  %v770_v37 = vperm.slane %v741_v31, 0  ;;  %v799_v50 = vperm.slane %v767_v39, 0  ;;  %v781_v51 = vperm.slane %v751_v44, 0 }
 0x2bd   : > { %v929_v33 = vsel %vm9453_vm7, %v854_v26, 0.0  ;;  %v953_v34 = vsel %vm9453_vm7, %v862_v27, 0.0  ;;  %v866_v35 = vsel %vm9453_vm7, %v833_v28, 0.0  ;;  %v858_v40 = vmul.f32 %v794_v10, %v6378_v25 }
 0x2be   : > { %v844_v41 = vmul.f32 %v780_v36, %v6412_v46  ;;  %v834_v42 = vmul.f32 %v770_v37, %v6407_v63  ;;  %v793_v56 = vperm.slane %v6360_v4, 0  ;;  %v863_v57 = vmul.f32 %v799_v50, %v6378_v25 }
 0x2bf   : > { %v941_v45 = vsel %vm9453_vm7, %v858_v40, 0.0  ;;  %v845_v58 = vmul.f32 %v781_v51, %v6412_v46  ;;  %v752_v60 = vrot.slane %v6393_v43, 5  ;;  %v742_v61 = vrot.slane %v6387_v38, 2 }
 0x2c0   : > { %v899_v48 = vsel %vm9453_vm7, %v844_v41, 0.0  ;;  %v869_v49 = vsel %vm9453_vm7, %v834_v42, 0.0  ;;  %v857_v59 = vmul.f32 %v793_v56, %v6378_v25  ;;  %v956_v62 = vsel %vm9453_vm7, %v863_v57, 0.0 }
 0x2c1   : > { %v902_v1 = vsel %vm9453_vm7, %v845_v58, 0.0  ;;  %v782_v5 = vperm.slane %v752_v60, 0  ;;  %v777_v6 = vperm.slane %v6393_v43, 0  ;;  %v771_v7 = vperm.slane %v742_v61, 0 }
 0x2c2   : > { %v938_v2 = vsel %vm9453_vm7, %v857_v59, 0.0  ;;  %v753_v12 = vrot.slane %v6393_v43, 6  ;;  %v764_v28 = vrot.slane %v6360_v4, 3  ;;  %v745_v10 = vrot.slane %v6387_v38, 5 }
 0x2c3   : > { %927 = vadd.xlane.f32.xlu0 %v926_v19  ;;  %951 = vadd.xlane.f32.xlu2 %v950_v21  ;;  %v846_v9 = vmul.f32 %v782_v5, %v6412_v46  ;;  %v841_v54 = vmul.f32 %v777_v6, %v6412_v46  ;;  %v835_v11 = vmul.f32 %v771_v7, %v6407_v63  ;;  %v743_v19 = vrot.slane %v6387_v38, 3  ;;  %v6526_v5 = vpop.permute.xlu2 %617 }
 0x2c4   : > { %936 = vadd.xlane.f32.xlu1 %v935_v52  ;;  %v783_v23 = vperm.slane %v753_v12, 0  ;;  %v796_v30 = vperm.slane %v764_v28, 0  ;;  %v774_v36 = vperm.slane %v745_v10, 0  ;;  %v746_v40 = vrot.slane %v6387_v38, 6  ;;  %9503 = vst [vmem:[#allocation16_spill] sm:$0xff] %v6526_v5 }
 0x2c5   : > { %v905_v21 = vsel %vm9453_vm7, %v846_v9, 0.0  ;;  %v890_v52 = vsel %vm9453_vm7, %v841_v54, 0.0  ;;  %v872_v22 = vsel %vm9453_vm7, %v835_v11, 0.0  ;;  %v772_v24 = vperm.slane %v743_v19, 0 }
 0x2c6   : > { %v847_v26 = vmul.f32 %v783_v23, %v6412_v46  ;;  %v860_v31 = vmul.f32 %v796_v30, %v6378_v25  ;;  %v838_v37 = vmul.f32 %v774_v36, %v6407_v63  ;;  %v775_v41 = vperm.slane %v746_v40, 0 }
 0x2c7   : > { %v836_v27 = vmul.f32 %v772_v24, %v6407_v63  ;;  %v6132_v39 = vmov 0   ;;  %v6495_v50 = vunpack.i.l.bf16 %v6269_v55  ;;  %v6498_v51 = vunpack.i.l.bf16 %v6267_v53 }
 0x2c8   : > { %v908_v43 = vsel %vm9453_vm7, %v847_v26, 0.0  ;;  %v881_v25 = vsel %vm9453_vm7, %v838_v37, 0.0  ;;  %v839_v42 = vmul.f32 %v775_v41, %v6407_v63  ;;  %5781 = vset.pattern.permute.xlu2 %v6132_v39  ;;  %5783 = vset.pattern.permute.xlu0 %v6132_v39  ;;  %v6511_v58 = vunpack.i.l.bf16 %v6292_v18 }
 0x2c9   : > { %v875_v29 = vsel %vm9453_vm7, %v836_v27, 0.0  ;;  %5782 = vset.pattern.permute.xlu1 %v6132_v39  ;;  %9499 = vst [vmem:[#allocation12_spill] sm:$0xff] %v6495_v50  ;;  %v911_v61 = vsel %vm9453_vm7, %v6427_v17, 0.0  ;;  %v6533_v17 = vunpack.i.h.bf16 %v6267_v53  ;;  %v6547_v53 = vunpack.i.h.bf16 %v6269_v55 }
 0x2ca   : > { %v884_v44 = vsel %vm9453_vm7, %v839_v42, 0.0  ;;  %9500 = vst [vmem:[#allocation13_spill] sm:$0xff] %v6498_v51  ;;  %v6558_v24 = vunpack.i.l.bf16 %v6281_v3 }
 0x2cb   : > { %930 = vadd.xlane.f32.xlu0 %v929_v33  ;;  %954 = vadd.xlane.f32.xlu2 %v953_v34  ;;  %v744_v33 = vrot.slane %v6387_v38, 4  ;;  %v947_v34 = vsel %vm9453_vm7, %v860_v31, 0.0  ;;  %v959_v38 = vsel %vm9453_vm7, %v6397_v47, 0.0  ;;  %9501 = vst [vmem:[#allocation14_spill] sm:$0xff] %v6511_v58 }
 0x2cc   : > { %867 = vadd.xlane.f32.xlu1 %v866_v35  ;;  %9504 = vst [vmem:[#allocation17_spill] sm:$0xff] %v6533_v17 }
 0x2cd   : > { %v773_v35 = vperm.slane %v744_v33, 0  ;;  %9505 = vst [vmem:[#allocation18_spill] sm:$0xff] %v6547_v53 }
 0x2ce   : > { %9506 = vst [vmem:[#allocation19_spill] sm:$0xff] %v6558_v24 }
 0x2cf   : > { %v837_v46 = vmul.f32 %v773_v35, %v6407_v63  ;;  %v893_v63 = vsel %vm9453_vm7, %v6421_v14, 0.0  ;;  %v896_v14 = vsel %vm9453_vm7, %v6424_v15, 0.0 }
 0x2d1   : > { %v878_v4 = vsel %vm9453_vm7, %v837_v46, 0.0 }
 0x2d3   : > { %942 = vadd.xlane.f32.xlu0 %v941_v45  ;;  %900 = vadd.xlane.f32.xlu2 %v899_v48  ;;  %v887_v45 = vsel %vm9453_vm7, %v6418_v13, 0.0  ;;  %v6488_v48 = vpop.permute.xlu0 %619 }
 0x2d4   : > { %870 = vadd.xlane.f32.xlu1 %v869_v49  ;;  %9497 = vst [vmem:[#allocation10_spill] sm:$0xff] %v6488_v48  ;;  %v6490_v49 = vpop.permute.xlu1 %621 }
 0x2d5   : > { %9498 = vst [vmem:[#allocation11_spill] sm:$0xff] %v6490_v49 }
 0x2db   : > { %957 = vadd.xlane.f32.xlu0 %v956_v62  ;;  %903 = vadd.xlane.f32.xlu2 %v902_v1  ;;  %v6520_v62 = vunpack.i.h.bf16 %v6292_v18 }
 0x2dc   : > { %939 = vadd.xlane.f32.xlu1 %v938_v2 }
 0x2dd   : > { %9502 = vst [vmem:[#allocation15_spill] sm:$0xff] %v6520_v62 }
 0x2e3   : > { %906 = vadd.xlane.f32.xlu2 %v905_v21  ;;  %891 = vadd.xlane.f32.xlu0 %v890_v52 }
 0x2e4   : > { %873 = vadd.xlane.f32.xlu1 %v872_v22 }
 0x2eb   : > { %909 = vadd.xlane.f32.xlu2 %v908_v43 }
 0x2ec   : > { %876 = vadd.xlane.f32.xlu1 %v875_v29  ;;  %v6569_v29 = vunpack.i.h.bf16 %v6281_v3 }
 0x2ee   : > { %9507 = vst [vmem:[#allocation20_spill] sm:$0xff] %v6569_v29 }
 0x2f4   : > { %948 = vadd.xlane.f32.xlu1 %v947_v34 }
 0x2fc   : > { %879 = vadd.xlane.f32.xlu1 %v878_v4 }
 0x304   : > { %882 = vadd.xlane.f32.xlu1 %v881_v25 }
 0x30c   : > { %885 = vadd.xlane.f32.xlu1 %v884_v44 }
 0x314   : > { %888 = vadd.xlane.f32.xlu1 %v887_v45 }
 0x31c   : > { %960 = vadd.xlane.f32.xlu1 %v959_v38 }
 0x324   : > { %894 = vadd.xlane.f32.xlu1 %v893_v63 }
 0x326   : > { %v922_v13 = vpop.xlane.xlu0 %921  ;;  %v919_v18 = vpop.xlane.xlu2 %918 }
 0x327   : > { %v916_v56 = vpop.xlane.xlu1 %915  ;;  %v6501_v57 = vadd.f32 %v6495_v50, %v922_v13  ;;  %v6540_v11 = vadd.f32 %v6533_v17, %v919_v18 }
 0x328   : > { %v6504_v47 = vadd.f32 %v6498_v51, %v916_v56 }
 0x329   : > { %1146 = vperm.xlu0 %5783, %v6501_v57  }
 0x32a   : > { %1140 = vperm.xlu2 %5781, %v6504_v47  }
 0x32c   : > { %897 = vadd.xlane.f32.xlu1 %v896_v14 }
 0x32e   : > { %v925_v54 = vpop.xlane.xlu0 %924  ;;  %v946_v26 = vpop.xlane.xlu2 %945 }
 0x32f   : > { %v934_v59 = vpop.xlane.xlu1 %933  ;;  %v6551_v21 = vadd.f32 %v6547_v53, %v925_v54  ;;  %v6566_v43 = vadd.f32 %v6495_v50, %v946_v26 }
 0x330   : > { %v6514_v60 = vadd.f32 %v6511_v58, %v934_v59 }
 0x332   : > { %1158 = vperm.xlu0 %5783, %v6514_v60  }
 0x334   : > { %912 = vadd.xlane.f32.xlu1 %v911_v61 }
 0x336   : > { %v928_v52 = vpop.xlane.xlu0 %927  ;;  %v952_v35 = vpop.xlane.xlu2 %951 }
 0x337   : > { %v937_v1 = vpop.xlane.xlu1 %936  ;;  %v6562_v55 = vadd.f32 %v6558_v24, %v928_v52  ;;  %v6593_v40 = vadd.f32 %v6558_v24, %v952_v35 }
 0x338   : > { %v6523_v15 = vadd.f32 %v6520_v62, %v937_v1 }
 0x33a   : > { %1161 = vperm.xlu2 %5781, %v6523_v15  }
 0x33e   : > { %v931_v27 = vpop.xlane.xlu0 %930  ;;  %v955_v36 = vpop.xlane.xlu2 %954 }
 0x33f   : > { %v868_v2 = vpop.xlane.xlu1 %867  ;;  %v6573_v30 = vadd.f32 %v6569_v29, %v931_v27  ;;  %v6605_v44 = vadd.f32 %v6569_v29, %v955_v36 }
 0x340   : > { %v6529_v6 = vadd.f32 %v6498_v51, %v868_v2 }
 0x342   : > { %1092 = vperm.xlu2 %5781, %v6529_v6  }
 0x346   : > { %v943_v33 = vpop.xlane.xlu0 %942  ;;  %v901_v41 = vpop.xlane.xlu2 %900 }
 0x347   : > { %v871_v7 = vpop.xlane.xlu1 %870  ;;  %v6581_v46 = vadd.f32 %v6533_v17, %v943_v33  ;;  %v6625_v18 = vadd.f32 %v6547_v53, %v901_v41 }
 0x348   : > { %v6536_v9 = vadd.f32 %v6533_v17, %v871_v7 }
 0x34a   : > { %1095 = vperm.xlu2 %5781, %v6536_v9  }
 0x34d   : > { %1143 = vperm.xlu1 %5782, %v6540_v11  }
 0x34e   : > { %v958_v45 = vpop.xlane.xlu0 %957  ;;  %v904_v13 = vpop.xlane.xlu2 %903 }
 0x34f   : > { %v940_v12 = vpop.xlane.xlu1 %939  ;;  %v6613_v56 = vadd.f32 %v6511_v58, %v958_v45  ;;  %v6639_v27 = vadd.f32 %v6558_v24, %v904_v13 }
 0x350   : > { %v6544_v19 = vadd.f32 %v6498_v51, %v940_v12 }
 0x352   : > { %1164 = vperm.xlu2 %5781, %v6544_v19  }
 0x355   : > { %1149 = vperm.xlu1 %5782, %v6551_v21  }
 0x356   : > { %v892_v14 = vpop.xlane.xlu0 %891  ;;  %v907_v1 = vpop.xlane.xlu2 %906 }
 0x357   : > { %v874_v22 = vpop.xlane.xlu1 %873  ;;  %v6617_v61 = vadd.f32 %v6498_v51, %v892_v14 }
 0x358   : > { %v6555_v23 = vadd.f32 %v6495_v50, %v874_v22 }
 0x35a   : > { %1098 = vperm.xlu2 %5781, %v6555_v23  }
 0x35d   : > { %1152 = vperm.xlu1 %5782, %v6562_v55  }
 0x35e   : > { %v910_v12 = vpop.xlane.xlu2 %909 }
 0x35f   : > { %v877_v28 = vpop.xlane.xlu1 %876  ;;  %v6633_v22 = vadd.f32 %v6511_v58, %v910_v12 }
 0x360   : > { %v6589_v4 = vadd.f32 %v6547_v53, %v877_v28 }
 0x362   : > { %1170 = vperm.xlu2 %5781, %v6566_v43  }
 0x365   : > { %1155 = vperm.xlu1 %5782, %v6573_v30  }
 0x367   : > { %v949_v31 = vpop.xlane.xlu1 %948 }
 0x368   : > { %v6577_v34 = vadd.f32 %v6547_v53, %v949_v31  ;;  %v6645_v31 = vadd.f32 %v6569_v29, %v907_v1 }
 0x36a   : > { %1173 = vperm.xlu0 %5783, %v6577_v34  }
 0x36d   : > { %1167 = vperm.xlu1 %5782, %v6581_v46  }
 0x36f   : > { %v880_v3 = vpop.xlane.xlu1 %879 }
 0x370   : > { %v6585_v10 = vadd.f32 %v6558_v24, %v880_v3 }
 0x372   : > { %1104 = vperm.xlu2 %5781, %v6585_v10  }
 0x375   : > { %1101 = vperm.xlu1 %5782, %v6589_v4  }
 0x377   : > { %v883_v37 = vpop.xlane.xlu1 %882 }
 0x378   : > { %v6597_v25 = vadd.f32 %v6569_v29, %v883_v37 }
 0x37a   : > { %1176 = vperm.xlu2 %5781, %v6593_v40  }
 0x37d   : > { %1107 = vperm.xlu1 %5782, %v6597_v25  }
 0x37f   : > { %v886_v42 = vpop.xlane.xlu1 %885 }
 0x380   : > { %v6601_v39 = vadd.f32 %v6511_v58, %v886_v42 }
 0x382   : > { %1110 = vperm.xlu0 %5783, %v6601_v39  }
 0x384   : > { %v1141_v28 = vpop.permute.xlu2 %1140 }
 0x385   : > { %1179 = vperm.xlu1 %5782, %v6605_v44  }
 0x387   : > { %v889_v38 = vpop.xlane.xlu1 %888 }
 0x388   : > { %v6609_v63 = vadd.f32 %v6520_v62, %v889_v38 }
 0x38a   : > { %1113 = vperm.xlu0 %5783, %v6609_v63  }
 0x38d   : > { %1182 = vperm.xlu1 %5782, %v6613_v56  }
 0x38f   : > { %v961_v59 = vpop.xlane.xlu1 %960 }
 0x390   : > { %v6621_v2 = vadd.f32 %v6520_v62, %v961_v59  ;;  %v1203_v59 = vperm.slane %v1141_v28, %v6254_v20 }
 0x392   : > { %1116 = vperm.xlu0 %5783, %v6617_v61  }
 0x394   : > { %v1162_v33 = vpop.permute.xlu2 %1161 }
 0x395   : > { %1185 = vperm.xlu1 %5782, %v6621_v2  }
 0x397   : > { %v895_v7 = vpop.xlane.xlu1 %894 }
 0x398   : > { %v6628_v54 = vadd.f32 %v6533_v17, %v895_v7 }
 0x39a   : > { %1125 = vperm.xlu0 %5783, %v6625_v18   ;;  %1119 = vperm.xlu2 %5781, %v6628_v54  }
 0x39b   : > { %v1147_v38 = vpop.permute.xlu0 %1146 }
 0x39c   : > { %v1093_v36 = vpop.permute.xlu2 %1092  ;;  %v1205_v12 = vperm.slane %v1147_v38, %v6254_v20 }
 0x39f   : > { %v898_v52 = vpop.xlane.xlu1 %897 }
 0x3a0   : > { %v6636_v26 = vadd.f32 %v6495_v50, %v898_v52 }
 0x3a2   : > { %1134 = vperm.xlu0 %5783, %v6633_v22   ;;  %1122 = vperm.xlu1 %5782, %v6636_v26  }
 0x3a3   : > { %1128 = vperm.xlu2 %5781, %v6639_v27  }
 0x3a4   : > { %v1096_v41 = vpop.permute.xlu2 %1095  ;;  %v1159_v29 = vpop.permute.xlu0 %1158 }
 0x3a7   : > { %v913_v35 = vpop.xlane.xlu1 %912 }
 0x3a8   : > { %v6649_v3 = vadd.f32 %v6520_v62, %v913_v35 }
 0x3ab   : > { %1131 = vperm.xlu2 %5781, %v6645_v31  }
 0x3ac   : > { %v1165_v45 = vpop.permute.xlu2 %1164 }
 0x3b3   : > { %1137 = vperm.xlu2 %5781, %v6649_v3  }
 0x3b4   : > { %v1099_v52 = vpop.permute.xlu2 %1098 }
 0x3bf   : > { %v1144_v37 = vpop.permute.xlu1 %1143 }
 0x3c0   : > { %v1204_v14 = vperm.slane %v1144_v37, %v6254_v20 }
 0x3c2   : > { %v1240_v1 = vsel %vm9451_vm8, %v1204_v14, %v1203_v59  ;;  %v1210_v14 = vperm.slane %v1162_v33, %v6254_v20  ;;  %v1189_v33 = vperm.slane %v1099_v52, %v6254_v20 }
 0x3c3   : > { %v1241_v58 = vsel %vm9450_vm10, %v1205_v12, %v1240_v1 }
 0x3c7   : > { %v1150_v42 = vpop.permute.xlu1 %1149 }
 0x3c8   : > { %v1206_v7 = vperm.slane %v1150_v42, %v6254_v20  ;;  %v1209_v42 = vperm.slane %v1159_v29, %v6254_v20 }
 0x3ca   : > { %v1242_v28 = vsel %vm9449_vm9, %v1206_v7, %v1241_v58  ;;  %v1171_v58 = vpop.permute.xlu2 %1170 }
 0x3cf   : > { %v1153_v13 = vpop.permute.xlu1 %1152 }
 0x3d0   : > { %v1207_v35 = vperm.slane %v1153_v13, %v6254_v20 }
 0x3d2   : > { %v1243_v38 = vsel %vm9443_vm11, %v1207_v35, %v1242_v28  ;;  %v1188_v35 = vperm.slane %v1096_v41, %v6254_v20 }
 0x3d7   : > { %v1156_v62 = vpop.permute.xlu1 %1155 }
 0x3d8   : > { %v1208_v37 = vperm.slane %v1156_v62, %v6254_v20  ;;  %v1105_v62 = vpop.permute.xlu2 %1104 }
 0x3d9   : > { %v1191_v50 = vperm.slane %v1105_v62, %v6254_v20 }
 0x3da   : > { %v1244_v13 = vsel %vm9439_vm12, %v1208_v37, %v1243_v38  ;;  %v1187_v37 = vperm.slane %v1093_v36, %v6254_v20  ;;  %v1211_v36 = vperm.slane %v1165_v45, %v6254_v20 }
 0x3db   : > { %v1245_v59 = vsel %vm9438_vm13, %v1209_v42, %v1244_v13 }
 0x3dc   : > { %v1246_v1 = vsel %vm9437_vm14, %v1210_v14, %v1245_v59  ;;  %v1174_v24 = vpop.permute.xlu0 %1173  ;;  %v1220_v38 = vsel %vm9451_vm8, %v1188_v35, %v1187_v37 }
 0x3dd   : > { %v1264_v12 = vsel %vm9453_vm7, %v1246_v1, -inf  ;;  %v1222_v13 = vsel %vm9450_vm10, %v1189_v33, %v1220_v38 }
 0x3de   : > { %1265 = vmax.xlane.f32.xlu1 %v1264_v12 }
 0x3df   : > { %v1168_v7 = vpop.permute.xlu1 %1167 }
 0x3e0   : > { %v1177_v17 = vpop.permute.xlu2 %1176  ;;  %v1212_v41 = vperm.slane %v1168_v7, %v6254_v20 }
 0x3e2   : > { %v1247_v37 = vsel %vm9451_vm8, %v1212_v41, %v1211_v36 }
 0x3e7   : > { %v1102_v53 = vpop.permute.xlu1 %1101 }
 0x3e8   : > { %v1190_v42 = vperm.slane %v1102_v53, %v6254_v20 }
 0x3ea   : > { %v1224_v59 = vsel %vm9449_vm9, %v1190_v42, %v1222_v13  ;;  %v1213_v42 = vperm.slane %v1171_v58, %v6254_v20 }
 0x3eb   : > { %v1226_v53 = vsel %vm9443_vm11, %v1191_v50, %v1224_v59  ;;  %v1214_v50 = vperm.slane %v1174_v24, %v6254_v20 }
 0x3ec   : > { %v1248_v45 = vsel %vm9450_vm10, %v1213_v42, %v1247_v37 }
 0x3ed   : > { %v1249_v59 = vsel %vm9449_vm9, %v1214_v50, %v1248_v45 }
 0x3ef   : > { %v1108_v29 = vpop.permute.xlu1 %1107 }
 0x3f0   : > { %v1192_v1 = vperm.slane %v1108_v29, %v6254_v20 }
 0x3f2   : > { %v1228_v33 = vsel %vm9439_vm12, %v1192_v1, %v1226_v53  ;;  %v1215_v1 = vperm.slane %v1177_v17, %v6254_v20 }
 0x3f4   : > { %v1111_v28 = vpop.permute.xlu0 %1110  ;;  %v1120_v12 = vpop.permute.xlu2 %1119 }
 0x3f5   : > { %v1193_v52 = vperm.slane %v1111_v28, %v6254_v20 }
 0x3f7   : > { %v1180_v14 = vpop.permute.xlu1 %1179  ;;  %v1230_v29 = vsel %vm9438_vm13, %v1193_v52, %v1228_v33  ;;  %v1250_v52 = vsel %vm9443_vm11, %v1215_v1, %v1249_v59 }
 0x3fc   : > { %v1114_v51 = vpop.permute.xlu0 %1113 }
 0x3fd   : > { %v1194_v35 = vperm.slane %v1114_v51, %v6254_v20  ;;  %v1129_v38 = vpop.permute.xlu2 %1128  ;;  %v1216_v51 = vperm.slane %v1180_v14, %v6254_v20 }
 0x3fe   : > { %v1199_v50 = vperm.slane %v1129_v38, %v6254_v20 }
 0x3ff   : > { %v1183_v62 = vpop.permute.xlu1 %1182  ;;  %v1232_v7 = vsel %vm9437_vm14, %v1194_v35, %v1230_v29  ;;  %v1251_v53 = vsel %vm9439_vm12, %v1216_v51, %v1250_v52  ;;  %v1196_v29 = vperm.slane %v1120_v12, %v6254_v20 }
 0x400   : > { %v1258_v28 = vsel %vm9453_vm7, %v1232_v7, -inf  ;;  %v1217_v58 = vperm.slane %v1183_v62, %v6254_v20 }
 0x401   : > { %1259 = vmax.xlane.f32.xlu0 %v1258_v28 }
 0x402   : > { %v1252_v35 = vsel %vm9438_vm13, %v1217_v58, %v1251_v53 }
 0x404   : > { %v1117_v13 = vpop.permute.xlu0 %1116 }
 0x405   : > { %v1132_v37 = vpop.permute.xlu2 %1131  ;;  %v1195_v17 = vperm.slane %v1117_v13, %v6254_v20 }
 0x406   : > { %v1200_v1 = vperm.slane %v1132_v37, %v6254_v20 }
 0x407   : > { %v1186_v41 = vpop.permute.xlu1 %1185  ;;  %v1233_v7 = vsel %vm9451_vm8, %v1196_v29, %v1195_v17 }
 0x408   : > { %v1218_v36 = vperm.slane %v1186_v41, %v6254_v20 }
 0x40a   : > { %v1253_v24 = vsel %vm9437_vm14, %v1218_v36, %v1252_v35 }
 0x40b   : > { %v1267_v14 = vsel %vm9453_vm7, %v1253_v24, -inf }
 0x40c   : > { %v1126_v33 = vpop.permute.xlu0 %1125  ;;  %1268 = vmax.xlane.f32.xlu2 %v1267_v14 }
 0x40d   : > { %v1198_v28 = vperm.slane %v1126_v33, %v6254_v20  ;;  %v1138_v51 = vpop.permute.xlu2 %1137 }
 0x40e   : > { %v1202_v41 = vperm.slane %v1138_v51, %v6254_v20 }
 0x414   : > { %v1123_v42 = vpop.permute.xlu1 %1122  ;;  %v1135_v45 = vpop.permute.xlu0 %1134 }
 0x415   : > { %v1197_v62 = vperm.slane %v1123_v42, %v6254_v20  ;;  %v1201_v13 = vperm.slane %v1135_v45, %v6254_v20 }
 0x417   : > { %v1234_v59 = vsel %vm9450_vm10, %v1197_v62, %v1233_v7 }
 0x418   : > { %v1235_v58 = vsel %vm9449_vm9, %v1198_v28, %v1234_v59 }
 0x419   : > { %v1236_v12 = vsel %vm9443_vm11, %v1199_v50, %v1235_v58 }
 0x41a   : > { %v1237_v52 = vsel %vm9439_vm12, %v1200_v1, %v1236_v12 }
 0x41b   : > { %v1238_v36 = vsel %vm9438_vm13, %v1201_v13, %v1237_v52 }
 0x41c   : > { %v1239_v53 = vsel %vm9437_vm14, %v1202_v41, %v1238_v36 }
 0x41d   : > { %v1261_v38 = vsel %vm9453_vm7, %v1239_v53, -inf }
 0x41e   : > { %1262 = vmax.xlane.f32.xlu1 %v1261_v38 }
 0x451   : > { %v1266_v35 = vpop.xlane.xlu1 %1265 }
 0x452   : > { %v1290_v24 = vperm.slane %v1266_v35, 0  ;;  %v1291_v14 = vperm.slane %v1266_v35, 1  ;;  %v1292_v33 = vperm.slane %v1266_v35, 2  ;;  %v1293_v42 = vperm.slane %v1266_v35, 3 }
 0x453   : > { %v1297_v62 = vperm.slane %v1266_v35, 7  ;;  %v1294_v7 = vperm.slane %v1266_v35, 4  ;;  %v1295_v58 = vperm.slane %v1266_v35, 5  ;;  %v1296_v12 = vperm.slane %v1266_v35, 6 }
 0x454   : > { %v1354_v37 = vsub.f32 %v6504_v47, %v1290_v24  ;;  %v1355_v17 = vsub.f32 %v6540_v11, %v1291_v14  ;;  %v1356_v29 = vsub.f32 %v6501_v57, %v1292_v33  ;;  %v1357_v51 = vsub.f32 %v6551_v21, %v1293_v42 }
 0x455   : > { %v1361_v59 = vsub.f32 %v6523_v15, %v1297_v62  ;;  %v1358_v1 = vsub.f32 %v6562_v55, %v1294_v7  ;;  %v1359_v15 = vsub.f32 %v6573_v30, %v1295_v58  ;;  %v1360_v21 = vsub.f32 %v6514_v60, %v1296_v12 }
 0x456   : > { %v1402_v28 = vmul.f32 1.442695, %v1354_v37  ;;  %v1404_v45 = vmul.f32 1.442695, %v1355_v17  ;;  %v1406_v50 = vmul.f32 1.442695, %v1356_v29 }
 0x457   : > { %v1408_v47 = vmul.f32 1.442695, %v1357_v51  ;;  %v1416_v11 = vmul.f32 1.442695, %v1361_v59  ;;  %v1410_v57 = vmul.f32 1.442695, %v1358_v1 }
 0x458   : > { %5788 = vpow2.f32 %v1402_v28  ;;  %v1412_v55 = vmul.f32 1.442695, %v1359_v15  ;;  %v1414_v53 = vmul.f32 1.442695, %v1360_v21 }
 0x459   : > { %5790 = vpow2.f32 %v1404_v45 }
 0x45a   : > { %5792 = vpow2.f32 %v1406_v50 }
 0x45b   : > { %5794 = vpow2.f32 %v1408_v47 }
 0x45c   : > { %5796 = vpow2.f32 %v1416_v11 }
 0x45d   : > { %5798 = vpow2.f32 %v1410_v57 }
 0x45e   : > { %v6722_v13 = vpop.eup %5788  ;;  %5800 = vpow2.f32 %v1412_v55 }
 0x45f   : > { %v6724_v41 = vpop.eup %5790  ;;  %1515 = vperm.xlu0 %5783, %v6722_v13   ;;  %5802 = vpow2.f32 %v1414_v53 }
 0x460   : > { %v6727_v52 = vpop.eup %5792  ;;  %1518 = vperm.xlu2 %5781, %v6724_v41  }
 0x461   : > { %1521 = vperm.xlu1 %5782, %v6727_v52   ;;  %v6733_v36 = vpop.eup %5794 }
 0x462   : > { %v6735_v38 = vpop.eup %5796 }
 0x463   : > { %v6738_v35 = vpop.eup %5798 }
 0x464   : > { %v6742_v30 = vpop.eup %5800 }
 0x465   : > { %v6745_v60 = vpop.eup %5802 }
 0x467   : > { %1524 = vperm.xlu0 %5783, %v6733_v36  }
 0x468   : > { %1536 = vperm.xlu2 %5781, %v6735_v38  }
 0x469   : > { %1527 = vperm.xlu1 %5782, %v6738_v35  }
 0x46f   : > { %1530 = vperm.xlu0 %5783, %v6742_v30  }
 0x471   : > { %1533 = vperm.xlu1 %5782, %v6745_v60  }
 0x474   : > { %v6748_v24 = vpop.xlane.xlu0 %1259 }
 0x475   : > { %v1274_v14 = vperm.slane %v6748_v24, 0  ;;  %v1275_v33 = vperm.slane %v6748_v24, 1  ;;  %v1276_v29 = vperm.slane %v6748_v24, 2  ;;  %v1277_v50 = vperm.slane %v6748_v24, 3 }
 0x477   : > { %v1338_v37 = vsub.f32 %v6529_v6, %v1274_v14  ;;  %v1339_v17 = vsub.f32 %v6536_v9, %v1275_v33  ;;  %v1340_v7 = vsub.f32 %v6555_v23, %v1276_v29  ;;  %v1341_v58 = vsub.f32 %v6589_v4, %v1277_v50 }
 0x478   : > { %v1278_v4 = vperm.slane %v6748_v24, 4 }
 0x479   : > { %v1370_v42 = vmul.f32 1.442695, %v1338_v37  ;;  %v1372_v62 = vmul.f32 1.442695, %v1339_v17  ;;  %v1374_v45 = vmul.f32 1.442695, %v1340_v7 }
 0x47a   : > { %v1376_v21 = vmul.f32 1.442695, %v1341_v58  ;;  %v1280_v37 = vperm.slane %v6748_v24, 6 }
 0x47b   : > { %5804 = vpow2.f32 %v1370_v42 }
 0x47c   : > { %5806 = vpow2.f32 %v1372_v62  ;;  %v1344_v42 = vsub.f32 %v6601_v39, %v1280_v37 }
 0x47d   : > { %5808 = vpow2.f32 %v1374_v45 }
 0x47e   : > { %v1382_v50 = vmul.f32 1.442695, %v1344_v42 }
 0x47f   : > { %v6756_v28 = vpop.xlane.xlu2 %1268 }
 0x480   : > { %v1299_v51 = vperm.slane %v6756_v28, 1  ;;  %v1298_v59 = vperm.slane %v6756_v28, 0  ;;  %v1300_v47 = vperm.slane %v6756_v28, 2  ;;  %v1301_v11 = vperm.slane %v6756_v28, 3 }
 0x481   : > { %v6761_v6 = vpop.eup %5804  ;;  %v1303_v62 = vperm.slane %v6756_v28, 5  ;;  %v1302_v45 = vperm.slane %v6756_v28, 4 }
 0x482   : > { %v6763_v9 = vpop.eup %5806  ;;  %1467 = vperm.xlu0 %5783, %v6761_v6   ;;  %v1363_v1 = vsub.f32 %v6581_v46, %v1299_v51  ;;  %v1362_v23 = vsub.f32 %v6544_v19, %v1298_v59  ;;  %v1364_v15 = vsub.f32 %v6566_v43, %v1300_v47  ;;  %v1365_v46 = vsub.f32 %v6577_v34, %v1301_v11 }
 0x483   : > { %1470 = vperm.xlu2 %5781, %v6763_v9   ;;  %v1279_v19 = vperm.slane %v6748_v24, 5  ;;  %v6775_v55 = vpop.eup %5808  ;;  %v1342_v34 = vsub.f32 %v6585_v10, %v1278_v4  ;;  %v1367_v51 = vsub.f32 %v6605_v44, %v1303_v62  ;;  %v1281_v59 = vperm.slane %v6748_v24, 7 }
 0x484   : > { %v1420_v57 = vmul.f32 1.442695, %v1363_v1  ;;  %v1418_v12 = vmul.f32 1.442695, %v1362_v23  ;;  %v1422_v53 = vmul.f32 1.442695, %v1364_v15  ;;  %v1366_v39 = vsub.f32 %v6593_v40, %v1302_v45 }
 0x485   : > { %v1424_v14 = vmul.f32 1.442695, %v1365_v46  ;;  %v1343_v33 = vsub.f32 %v6597_v25, %v1279_v19  ;;  %v1378_v7 = vmul.f32 1.442695, %v1342_v34  ;;  %v1428_v47 = vmul.f32 1.442695, %v1367_v51 }
 0x486   : > { %5810 = vpow2.f32 %v1420_v57  ;;  %v1345_v58 = vsub.f32 %v6609_v63, %v1281_v59  ;;  %v1304_v44 = vperm.slane %v6756_v28, 6  ;;  %v1426_v11 = vmul.f32 1.442695, %v1366_v39 }
 0x487   : > { %5812 = vpow2.f32 %v1418_v12  ;;  %v1380_v29 = vmul.f32 1.442695, %v1343_v33  ;;  %v1305_v4 = vperm.slane %v6756_v28, 7 }
 0x488   : > { %5814 = vpow2.f32 %v1376_v21  ;;  %v1384_v12 = vmul.f32 1.442695, %v1345_v58  ;;  %v1368_v15 = vsub.f32 %v6613_v56, %v1304_v44 }
 0x489   : > { %5816 = vpow2.f32 %v1422_v53  ;;  %v1369_v34 = vsub.f32 %v6621_v2, %v1305_v4 }
 0x48a   : > { %1473 = vperm.xlu0 %5783, %v6775_v55   ;;  %5818 = vpow2.f32 %v1424_v14  ;;  %v1430_v19 = vmul.f32 1.442695, %v1368_v15 }
 0x48b   : > { %5820 = vpow2.f32 %v1380_v29  ;;  %v1432_v28 = vmul.f32 1.442695, %v1369_v34 }
 0x48c   : > { %v6781_v43 = vpop.eup %5810  ;;  %5822 = vpow2.f32 %v1378_v7 }
 0x48d   : > { %v6783_v17 = vpop.eup %5812  ;;  %1542 = vperm.xlu2 %5781, %v6781_v43   ;;  %5824 = vpow2.f32 %v1382_v50 }
 0x48e   : > { %1539 = vperm.xlu1 %5782, %v6783_v17   ;;  %v6790_v25 = vpop.eup %5814  ;;  %5826 = vpow2.f32 %v1428_v47 }
 0x48f   : > { %v6796_v10 = vpop.eup %5816  ;;  %5828 = vpow2.f32 %v1426_v11 }
 0x490   : > { %v6798_v1 = vpop.eup %5818  ;;  %5830 = vpow2.f32 %v1384_v12 }
 0x491   : > { %v6803_v23 = vpop.xlane.xlu1 %1262  ;;  %v6807_v24 = vpop.eup %5820  ;;  %5832 = vpow2.f32 %v1430_v19 }
 0x492   : > { %1476 = vperm.xlu0 %5783, %v6790_v25   ;;  %v1283_v57 = vperm.slane %v6803_v23, 1  ;;  %v1282_v40 = vperm.slane %v6803_v23, 0  ;;  %v6813_v21 = vpop.eup %5822  ;;  %v1286_v33 = vperm.slane %v6803_v23, 4  ;;  %v1285_v29 = vperm.slane %v6803_v23, 3 }
 0x493   : > { %v6815_v46 = vpop.eup %5824  ;;  %v1284_v7 = vperm.slane %v6803_v23, 2  ;;  %v1287_v50 = vperm.slane %v6803_v23, 5  ;;  %v1288_v39 = vperm.slane %v6803_v23, 6 }
 0x494   : > { %v1347_v63 = vsub.f32 %v6628_v54, %v1283_v57  ;;  %v1346_v53 = vsub.f32 %v6617_v61, %v1282_v40  ;;  %v6822_v56 = vpop.eup %5826  ;;  %v1350_v61 = vsub.f32 %v6639_v27, %v1286_v33  ;;  %v1349_v62 = vsub.f32 %v6625_v18, %v1285_v29 }
 0x495   : > { %1545 = vperm.xlu2 %5781, %v6796_v10   ;;  %v6828_v54 = vpop.eup %5828  ;;  %v1348_v59 = vsub.f32 %v6636_v26, %v1284_v7  ;;  %v1351_v18 = vsub.f32 %v6645_v31, %v1287_v50  ;;  %v1352_v44 = vsub.f32 %v6633_v22, %v1288_v39  ;;  %v1289_v57 = vperm.slane %v6803_v23, 7 }
 0x496   : > { %1548 = vperm.xlu1 %5782, %v6798_v1   ;;  %v1388_v14 = vmul.f32 1.442695, %v1347_v63  ;;  %v1386_v37 = vmul.f32 1.442695, %v1346_v53  ;;  %v6830_v42 = vpop.eup %5830  ;;  %v1394_v45 = vmul.f32 1.442695, %v1350_v61 }
 0x497   : > { %v6837_v2 = vpop.eup %5832  ;;  %v1392_v51 = vmul.f32 1.442695, %v1349_v62  ;;  %v1390_v58 = vmul.f32 1.442695, %v1348_v59  ;;  %v1396_v26 = vmul.f32 1.442695, %v1351_v18  ;;  %v1353_v22 = vsub.f32 %v6649_v3, %v1289_v57 }
 0x498   : > { %5834 = vpow2.f32 %v1388_v14  ;;  %v1398_v12 = vmul.f32 1.442695, %v1352_v44 }
 0x499   : > { %5836 = vpow2.f32 %v1386_v37  ;;  %v1400_v63 = vmul.f32 1.442695, %v1353_v22 }
 0x49a   : > { %1482 = vperm.xlu0 %5783, %v6807_v24   ;;  %5838 = vpow2.f32 %v1432_v28 }
 0x49b   : > { %5840 = vpow2.f32 %v1394_v45 }
 0x49c   : > { %5842 = vpow2.f32 %v1392_v51 }
 0x49d   : > { %1479 = vperm.xlu2 %5781, %v6813_v21   ;;  %5844 = vpow2.f32 %v1390_v58 }
 0x49e   : > { %1485 = vperm.xlu1 %5782, %v6815_v46   ;;  %v6843_v27 = vpop.eup %5834  ;;  %5846 = vpow2.f32 %v1396_v26 }
 0x49f   : > { %v6845_v47 = vpop.eup %5836  ;;  %5848 = vpow2.f32 %v1398_v12 }
 0x4a0   : > { %v6851_v11 = vpop.eup %5838  ;;  %5850 = vpow2.f32 %v1400_v63 }
 0x4a1   : > { %v6855_v15 = vpop.eup %5840 }
 0x4a2   : > { %1554 = vperm.xlu0 %5783, %v6822_v56   ;;  %9508 = vst [vmem:[#allocation21_spill] sm:$0xff] %v6855_v15  ;;  %v6857_v40 = vpop.eup %5842 }
 0x4a3   : > { %9509 = vst [vmem:[#allocation22_spill] sm:$0xff] %v6857_v40  ;;  %v6862_v31 = vpop.eup %5844 }
 0x4a4   : > { %v6865_v23 = vpop.eup %5846 }
 0x4a5   : > { %1551 = vperm.xlu2 %5781, %v6828_v54   ;;  %9510 = vst [vmem:[#allocation23_spill] sm:$0xff] %v6865_v23  ;;  %v6867_v19 = vpop.eup %5848 }
 0x4a6   : > { %1488 = vperm.xlu1 %5782, %v6830_v42   ;;  %9511 = vst [vmem:[#allocation24_spill] sm:$0xff] %v6867_v19  ;;  %v6871_v53 = vpop.eup %5850 }
 0x4a7   : > { %9512 = vst [vmem:[#allocation25_spill] sm:$0xff] %v6871_v53 }
 0x4aa   : > { %1557 = vperm.xlu0 %5783, %v6837_v2  }
 0x4ad   : > { %1494 = vperm.xlu2 %5781, %v6843_v27  }
 0x4ae   : > { %1491 = vperm.xlu1 %5782, %v6845_v47  }
 0x4b2   : > { %1560 = vperm.xlu0 %5783, %v6851_v11  }
 0x4b5   : > { %1503 = vperm.xlu2 %5781, %v6855_v15  }
 0x4b6   : > { %1500 = vperm.xlu1 %5782, %v6857_v40  }
 0x4ba   : > { %1497 = vperm.xlu0 %5783, %v6862_v31   ;;  %v1519_v3 = vpop.permute.xlu2 %1518 }
 0x4bb   : > { %v1579_v29 = vperm.slane %v1519_v3, %v6254_v20 }
 0x4bd   : > { %1506 = vperm.xlu2 %5781, %v6865_v23  }
 0x4be   : > { %1509 = vperm.xlu1 %5782, %v6867_v19  }
 0x4c2   : > { %v1537_v37 = vpop.permute.xlu2 %1536 }
 0x4c3   : > { %v1585_v12 = vperm.slane %v1537_v37, %v6254_v20 }
 0x4c5   : > { %1512 = vperm.xlu2 %5781, %v6871_v53  }
 0x4d1   : > { %v1516_v4 = vpop.permute.xlu0 %1515 }
 0x4d2   : > { %v1578_v33 = vperm.slane %v1516_v4, %v6254_v20 }
 0x4d3   : > { %v1522_v14 = vpop.permute.xlu1 %1521 }
 0x4d4   : > { %v1580_v61 = vperm.slane %v1522_v14, %v6254_v20  ;;  %v1608_v62 = vsel %vm9451_vm8, %v1579_v29, %v1578_v33 }
 0x4d6   : > { %v1609_v45 = vsel %vm9450_vm10, %v1580_v61, %v1608_v62 }
 0x4d9   : > { %v1525_v34 = vpop.permute.xlu0 %1524 }
 0x4da   : > { %v1581_v7 = vperm.slane %v1525_v34, %v6254_v20 }
 0x4db   : > { %v1528_v28 = vpop.permute.xlu1 %1527 }
 0x4dc   : > { %v1582_v50 = vperm.slane %v1528_v28, %v6254_v20  ;;  %v1610_v51 = vsel %vm9449_vm9, %v1581_v7, %v1609_v45 }
 0x4dd   : > { %v1471_v59 = vpop.permute.xlu2 %1470 }
 0x4de   : > { %v1611_v58 = vsel %vm9443_vm11, %v1582_v50, %v1610_v51 }
 0x4e1   : > { %v1531_v39 = vpop.permute.xlu0 %1530 }
 0x4e2   : > { %v1583_v18 = vperm.slane %v1531_v39, %v6254_v20  ;;  %v1563_v39 = vperm.slane %v1471_v59, %v6254_v20 }
 0x4e3   : > { %v1534_v44 = vpop.permute.xlu1 %1533 }
 0x4e4   : > { %v1584_v26 = vperm.slane %v1534_v44, %v6254_v20  ;;  %v1612_v57 = vsel %vm9439_vm12, %v1583_v18, %v1611_v58 }
 0x4e6   : > { %v1613_v22 = vsel %vm9438_vm13, %v1584_v26, %v1612_v57 }
 0x4e7   : > { %v1614_v63 = vsel %vm9437_vm14, %v1585_v12, %v1613_v22  ;;  %v1543_v4 = vpop.permute.xlu2 %1542 }
 0x4e8   : > { %v1632_v3 = vsel %vm9453_vm7, %v1614_v63, 0.0 }
 0x4e9   : > { %1633 = vadd.xlane.f32.xlu0 %v1632_v3 }
 0x4ef   : > { %v1546_v14 = vpop.permute.xlu2 %1545 }
 0x4f4   : > { %v1468_v33 = vpop.permute.xlu0 %1467 }
 0x4f5   : > { %v1562_v50 = vperm.slane %v1468_v33, %v6254_v20 }
 0x4f7   : > { %v1480_v29 = vpop.permute.xlu2 %1479  ;;  %v1594_v44 = vsel %vm9451_vm8, %v1563_v39, %v1562_v50  ;;  %v1587_v39 = vperm.slane %v1543_v4, %v6254_v20 }
 0x4f8   : > { %v1566_v63 = vperm.slane %v1480_v29, %v6254_v20 }
 0x4fc   : > { %v1474_v34 = vpop.permute.xlu0 %1473 }
 0x4fd   : > { %v1564_v37 = vperm.slane %v1474_v34, %v6254_v20 }
 0x4ff   : > { %v1552_v62 = vpop.permute.xlu2 %1551  ;;  %v1595_v26 = vsel %vm9450_vm10, %v1564_v37, %v1594_v44 }
 0x500   : > { %v1540_v61 = vpop.permute.xlu1 %1539 }
 0x501   : > { %v1586_v59 = vperm.slane %v1540_v61, %v6254_v20  ;;  %v1588_v61 = vperm.slane %v1546_v14, %v6254_v20 }
 0x504   : > { %v1477_v28 = vpop.permute.xlu0 %1476 }
 0x505   : > { %v1565_v18 = vperm.slane %v1477_v28, %v6254_v20 }
 0x507   : > { %v1495_v58 = vpop.permute.xlu2 %1494  ;;  %v1596_v12 = vsel %vm9449_vm9, %v1565_v18, %v1595_v26 }
 0x508   : > { %v1549_v7 = vpop.permute.xlu1 %1548  ;;  %v1597_v34 = vsel %vm9443_vm11, %v1566_v63, %v1596_v12 }
 0x509   : > { %v1589_v26 = vperm.slane %v1549_v7, %v6254_v20 }
 0x50c   : > { %v1483_v45 = vpop.permute.xlu0 %1482 }
 0x50d   : > { %v1567_v22 = vperm.slane %v1483_v45, %v6254_v20 }
 0x50f   : > { %v1598_v50 = vsel %vm9439_vm12, %v1567_v22, %v1597_v34  ;;  %v1504_v18 = vpop.permute.xlu2 %1503 }
 0x510   : > { %v1486_v51 = vpop.permute.xlu1 %1485 }
 0x511   : > { %v1568_v3 = vperm.slane %v1486_v51, %v6254_v20  ;;  %v1615_v51 = vsel %vm9451_vm8, %v1587_v39, %v1586_v59 }
 0x512   : > { %v1616_v12 = vsel %vm9450_vm10, %v1588_v61, %v1615_v51  ;;  %v1574_v61 = vperm.slane %v1504_v18, %v6254_v20 }
 0x513   : > { %v1599_v37 = vsel %vm9438_vm13, %v1568_v3, %v1598_v50  ;;  %v1617_v63 = vsel %vm9449_vm9, %v1589_v26, %v1616_v12  ;;  %v1590_v3 = vperm.slane %v1552_v62, %v6254_v20 }
 0x514   : > { %v1555_v57 = vpop.permute.xlu0 %1554 }
 0x515   : > { %v1591_v4 = vperm.slane %v1555_v57, %v6254_v20  ;;  %v1571_v57 = vperm.slane %v1495_v58, %v6254_v20 }
 0x517   : > { %v1507_v59 = vpop.permute.xlu2 %1506 }
 0x518   : > { %v1489_v33 = vpop.permute.xlu1 %1488 }
 0x519   : > { %v1569_v28 = vperm.slane %v1489_v33, %v6254_v20 }
 0x51b   : > { %v1600_v45 = vsel %vm9437_vm14, %v1569_v28, %v1599_v37  ;;  %v1618_v28 = vsel %vm9443_vm11, %v1590_v3, %v1617_v63 }
 0x51c   : > { %v1558_v44 = vpop.permute.xlu0 %1557  ;;  %v1626_v29 = vsel %vm9453_vm7, %v1600_v45, 0.0  ;;  %v1619_v50 = vsel %vm9439_vm12, %v1591_v4, %v1618_v28  ;;  %v1575_v4 = vperm.slane %v1507_v59, %v6254_v20 }
 0x51d   : > { %1627 = vadd.xlane.f32.xlu1 %v1626_v29  ;;  %v1592_v33 = vperm.slane %v1558_v44, %v6254_v20 }
 0x51f   : > { %v1620_v14 = vsel %vm9438_vm13, %v1592_v33, %v1619_v50  ;;  %v1513_v12 = vpop.permute.xlu2 %1512 }
 0x520   : > { %v1492_v22 = vpop.permute.xlu1 %1491 }
 0x521   : > { %v1570_v62 = vperm.slane %v1492_v22, %v6254_v20 }
 0x523   : > { %v1601_v51 = vsel %vm9451_vm8, %v1571_v57, %v1570_v62 }
 0x524   : > { %v1561_v34 = vpop.permute.xlu0 %1560 }
 0x525   : > { %v1593_v7 = vperm.slane %v1561_v34, %v6254_v20  ;;  %v1577_v34 = vperm.slane %v1513_v12, %v6254_v20 }
 0x527   : > { %v1621_v37 = vsel %vm9437_vm14, %v1593_v7, %v1620_v14 }
 0x528   : > { %v1501_v39 = vpop.permute.xlu1 %1500  ;;  %v1635_v45 = vsel %vm9453_vm7, %v1621_v37, 0.0 }
 0x529   : > { %1636 = vadd.xlane.f32.xlu2 %v1635_v45  ;;  %v1573_v26 = vperm.slane %v1501_v39, %v6254_v20 }
 0x52c   : > { %v1498_v44 = vpop.permute.xlu0 %1497 }
 0x52d   : > { %v1572_v29 = vperm.slane %v1498_v44, %v6254_v20 }
 0x52f   : > { %v1602_v63 = vsel %vm9450_vm10, %v1572_v29, %v1601_v51 }
 0x530   : > { %v1603_v3 = vsel %vm9449_vm9, %v1573_v26, %v1602_v63  ;;  %v1510_v33 = vpop.permute.xlu1 %1509 }
 0x531   : > { %v1576_v22 = vperm.slane %v1510_v33, %v6254_v20  ;;  %v1604_v58 = vsel %vm9443_vm11, %v1574_v61, %v1603_v3 }
 0x532   : > { %v1605_v28 = vsel %vm9439_vm12, %v1575_v4, %v1604_v58 }
 0x533   : > { %v1606_v7 = vsel %vm9438_vm13, %v1576_v22, %v1605_v28 }
 0x534   : > { %v1607_v18 = vsel %vm9437_vm14, %v1577_v34, %v1606_v7 }
 0x535   : > { %v1629_v50 = vsel %vm9453_vm7, %v1607_v18, 0.0 }
 0x536   : > { %1630 = vadd.xlane.f32.xlu0 %v1629_v50 }
 0x55c   : > { %v1634_v14 = vpop.xlane.xlu0 %1633 }
 0x55d   : > { %v1660_v59 = vperm.slane %v1634_v14, 2  ;;  %v6938_v37 = vperm.slane %v1634_v14, 1  ;;  %v6940_v39 = vperm.slane %v1634_v14, 0  ;;  %v6942_v45 = vperm.slane %v1634_v14, 3 }
 0x55e   : > { %v6945_v62 = vperm.slane %v1634_v14, 7  ;;  %v6948_v29 = vperm.slane %v1634_v14, 4  ;;  %v6957_v4 = vperm.slane %v1634_v14, 5  ;;  %v6959_v3 = vperm.slane %v1634_v14, 6 }
 0x55f   : > { %5852 = vrcp.f32 %v1660_v59  ;;  %v1985_v57 = vand.u32 2147483647, %v1660_v59  ;;  %v1987_v44 = vand.u32 2147483648, %v1660_v59  ;;  %v1970_v51 = vand.u32 2147483647, %v6938_v37 }
 0x560   : > { %5854 = vrcp.f32 %v6938_v37  ;;  %v1972_v26 = vand.u32 2147483648, %v6938_v37  ;;  %v1955_v61 = vand.u32 2147483647, %v6940_v39  ;;  %v1957_v12 = vand.u32 2147483648, %v6940_v39 }
 0x561   : > { %5856 = vrcp.f32 %v6940_v39  ;;  %vm1981_vm15 = vweird.f32 %v1660_v59  ;;  %vm1966_vm1 = vweird.f32 %v6938_v37  ;;  %vm6961_vm2 = vcmp.eq.f32.partialorder %v1985_v57, 8.507059e+37 }
 0x562   : > { %5858 = vrcp.f32 %v6942_v45  ;;  %v1988_v34 = vor.u32 1.1754944e-38, %v1987_v44  ;;  %vm1951_vm3 = vweird.f32 %v6940_v39  ;;  %vm6968_vm4 = vcmp.eq.f32.partialorder %v1970_v51, 8.507059e+37 }
 0x563   : > { %5860 = vrcp.f32 %v6945_v62  ;;  %v1973_v50 = vor.u32 1.1754944e-38, %v1972_v26  ;;  %v2002_v57 = vand.u32 2147483648, %v6942_v45  ;;  %vm6975_vm5 = vcmp.eq.f32.partialorder %v1955_v61, 8.507059e+37 }
 0x564   : > { %5862 = vrcp.f32 %v6948_v29  ;;  %v1958_v16 = vor.u32 1.1754944e-38, %v1957_v12  ;;  %vm1996_vm0 = vweird.f32 %v6942_v45  ;;  %v2060_v51 = vand.u32 2147483647, %v6945_v62 }
 0x565   : > { %v5853_v63 = vpop.eup %5852  ;;  %vm2056_vm13 = vweird.f32 %v6945_v62  ;;  %v2062_v14 = vand.u32 2147483648, %v6945_v62  ;;  %5864 = vrcp.f32 %v6957_v4  ;;  %v2017_v48 = vand.u32 2147483648, %v6948_v29 }
 0x566   : > { %v5855_v33 = vpop.eup %5854  ;;  %v1977_v22 = vmul.f32 %v5853_v63, %v1660_v59  ;;  %vm1982_vm14 = vweird.f32 %v5853_v63  ;;  %5866 = vrcp.f32 %v6959_v3 }
 0x567   : > { %v5857_v28 = vpop.eup %5856  ;;  %v1962_v7 = vmul.f32 %v5855_v33, %v6938_v37  ;;  %vm1967_vm12 = vweird.f32 %v5855_v33  ;;  %vm1983_vm10 = vmor %vm1981_vm15, %vm1982_vm14  ;;  %vm2026_vm15 = vweird.f32 %v6957_v4 }
 0x568   : > { %v1978_v20 = vsub.f32 1.0, %v1977_v22  ;;  %v1947_v8 = vmul.f32 %v5857_v28, %v6940_v39  ;;  %v6981_v53 = vpop.eup %5858  ;;  %vm1952_vm11 = vweird.f32 %v5857_v28  ;;  %vm1968_vm7 = vmor %vm1966_vm1, %vm1967_vm12 }
 0x569   : > { %v1963_v26 = vsub.f32 1.0, %v1962_v7  ;;  %v5861_v22 = vpop.eup %5860  ;;  %v1992_v12 = vmul.f32 %v6981_v53, %v6942_v45  ;;  %vm1997_vm9 = vweird.f32 %v6981_v53  ;;  %vm1953_vm14 = vmor %vm1951_vm3, %vm1952_vm11  ;;  %vm2041_vm3 = vweird.f32 %v6959_v3 }
 0x56a   : > { %v1979_v61 = vmul.f32 %v5853_v63, %v1978_v20  ;;  %v1948_v0 = vsub.f32 1.0, %v1947_v8  ;;  %v2052_v49 = vmul.f32 %v5861_v22, %v6945_v62  ;;  %v5863_v7 = vpop.eup %5862  ;;  %vm2057_vm8 = vweird.f32 %v5861_v22 }
 0x56b   : > { %v1964_v19 = vmul.f32 %v5855_v33, %v1963_v26  ;;  %v1993_v32 = vsub.f32 1.0, %v1992_v12  ;;  %v2007_v40 = vmul.f32 %v5863_v7, %v6948_v29  ;;  %vm2012_vm6 = vweird.f32 %v5863_v7 }
 0x56c   : > { %v1980_v5 = vadd.f32 %v5853_v63, %v1979_v61  ;;  %v1949_v23 = vmul.f32 %v5857_v28, %v1948_v0  ;;  %v2053_v8 = vsub.f32 1.0, %v2052_v49  ;;  %v5865_v0 = vpop.eup %5864  ;;  %v2063_v62 = vor.u32 1.1754944e-38, %v2062_v14 }
 0x56d   : > { %v1965_v20 = vadd.f32 %v5855_v33, %v1964_v19  ;;  %v1994_v61 = vmul.f32 %v6981_v53, %v1993_v32  ;;  %v2008_v19 = vsub.f32 1.0, %v2007_v40  ;;  %v2030_v14 = vand.u32 2147483647, %v6957_v4 }
 0x56e   : > { %v1984_v26 = vsel %vm1983_vm10, %v5853_v63, %v1980_v5  ;;  %v1950_v15 = vadd.f32 %v5857_v28, %v1949_v23  ;;  %v2054_v49 = vmul.f32 %v5861_v22, %v2053_v8  ;;  %vm7025_vm10 = vmor %vm2056_vm13, %vm2057_vm8  ;;  %vm2061_vm8 = vcmp.eq.f32.partialorder %v2060_v51, 8.507059e+37 }
 0x56f   : > { %v1989_v12 = vsel %vm6961_vm2, %v1988_v34, %v1984_v26  ;;  %v1969_v59 = vsel %vm1968_vm7, %v5855_v33, %v1965_v20  ;;  %v1995_v32 = vadd.f32 %v6981_v53, %v1994_v61  ;;  %vm7014_vm7 = vmor %vm1996_vm0, %vm1997_vm9  ;;  %v2009_v40 = vmul.f32 %v5863_v7, %v2008_v19 }
 0x570   : > { %v1990_v5 = vmul.f32 %v6727_v52, %v1989_v12  ;;  %v1974_v37 = vsel %vm6968_vm4, %v1973_v50, %v1969_v59  ;;  %v1954_v23 = vsel %vm1953_vm14, %v5857_v28, %v1950_v15  ;;  %v2055_v52 = vadd.f32 %v5861_v22, %v2054_v49  ;;  %v5867_v12 = vpop.eup %5866 }
 0x571   : > { %v1975_v63 = vmul.f32 %v6724_v41, %v1974_v37  ;;  %v1959_v58 = vsel %vm6975_vm5, %v1958_v16, %v1954_v23  ;;  %v1999_v41 = vsel %vm7014_vm7, %v6981_v53, %v1995_v32  ;;  %v2015_v33 = vand.u32 2147483647, %v6948_v29 }
 0x572   : > { %2278 = vperm.xlu1 %5782, %v1990_v5   ;;  %v1960_v15 = vmul.f32 %v6722_v13, %v1959_v58  ;;  %v2022_v34 = vmul.f32 %v5865_v0, %v6957_v4  ;;  %v2003_v28 = vor.u32 1.1754944e-38, %v2002_v57  ;;  %v2059_v13 = vsel %vm7025_vm10, %v5861_v22, %v2055_v52 }
 0x573   : > { %2273 = vperm.xlu2 %5781, %v1975_v63   ;;  %v2010_v18 = vadd.f32 %v5863_v7, %v2009_v40  ;;  %vm2011_vm0 = vweird.f32 %v6948_v29  ;;  %v9523_v53 = vand.u32 2147483647, %v6942_v45  ;;  %v2018_v8 = vor.u32 1.1754944e-38, %v2017_v48 }
 0x574   : > { %2268 = vperm.xlu0 %5783, %v1960_v15   ;;  %vm2013_vm11 = vmor %vm2011_vm0, %vm2012_vm6  ;;  %v2023_v50 = vsub.f32 1.0, %v2022_v34  ;;  %v2064_v57 = vsel %vm2061_vm8, %v2063_v62, %v2059_v13  ;;  %vm2016_vm12 = vcmp.eq.f32.partialorder %v2015_v33, 8.507059e+37  ;;  %vm2027_vm13 = vweird.f32 %v5865_v0 }
 0x575   : > { %vm2001_vm9 = vcmp.eq.f32.partialorder %v9523_v53, 8.507059e+37  ;;  %v2014_v20 = vsel %vm2013_vm11, %v5863_v7, %v2010_v18  ;;  %v2032_v29 = vand.u32 2147483648, %v6957_v4  ;;  %v2065_v51 = vmul.f32 %v6735_v38, %v2064_v57  ;;  %vm2028_vm6 = vmor %vm2026_vm15, %vm2027_vm13 }
 0x576   : > { %v2004_v44 = vsel %vm2001_vm9, %v2003_v28, %v1999_v41  ;;  %v2024_v22 = vmul.f32 %v5865_v0, %v2023_v50  ;;  %v2019_v26 = vsel %vm2016_vm12, %v2018_v8, %v2014_v20  ;;  %vm2031_vm1 = vcmp.eq.f32.partialorder %v2030_v14, 8.507059e+37 }
 0x577   : > { %v2005_v45 = vmul.f32 %v6733_v36, %v2004_v44  ;;  %v2020_v48 = vmul.f32 %v6738_v35, %v2019_v26  ;;  %v2033_v59 = vor.u32 1.1754944e-38, %v2032_v29  ;;  %v2037_v49 = vmul.f32 %v5867_v12, %v6959_v3 }
 0x578   : > { %v2025_v61 = vadd.f32 %v5865_v0, %v2024_v22  ;;  %v2047_v5 = vand.u32 2147483648, %v6959_v3  ;;  %vm2042_vm2 = vweird.f32 %v5867_v12  ;;  %v2045_v38 = vand.u32 2147483647, %v6959_v3 }
 0x579   : > { %v2038_v19 = vsub.f32 1.0, %v2037_v49  ;;  %vm2043_vm4 = vmor %vm2041_vm3, %vm2042_vm2 }
 0x57a   : > { %2283 = vperm.xlu1 %5782, %v2005_v45   ;;  %v2029_v7 = vsel %vm2028_vm6, %v5865_v0, %v2025_v61  ;;  %v2048_v0 = vor.u32 1.1754944e-38, %v2047_v5  ;;  %vm2046_vm5 = vcmp.eq.f32.partialorder %v2045_v38, 8.507059e+37 }
 0x57b   : > { %2303 = vperm.xlu2 %5781, %v2065_v51   ;;  %v2034_v36 = vsel %vm2031_vm1, %v2033_v59, %v2029_v7  ;;  %v2039_v37 = vmul.f32 %v5867_v12, %v2038_v19 }
 0x57c   : > { %2288 = vperm.xlu0 %5783, %v2020_v48   ;;  %v2035_v4 = vmul.f32 %v6742_v30, %v2034_v36 }
 0x57d   : > { %v2040_v35 = vadd.f32 %v5867_v12, %v2039_v37 }
 0x57f   : > { %v2044_v23 = vsel %vm2043_vm4, %v5867_v12, %v2040_v35 }
 0x580   : > { %v2049_v32 = vsel %vm2046_vm5, %v2048_v0, %v2044_v23 }
 0x581   : > { %v2050_v63 = vmul.f32 %v6745_v60, %v2049_v32 }
 0x582   : > { %2293 = vperm.xlu1 %5782, %v2035_v4  }
 0x584   : > { %2298 = vperm.xlu0 %5783, %v2050_v63  }
 0x590   : > { %v7050_v58 = vpop.xlane.xlu1 %1627 }
 0x591   : > { %v1644_v30 = vperm.slane %v7050_v58, 2  ;;  %v1643_v39 = vperm.slane %v7050_v58, 1  ;;  %v7055_v52 = vperm.slane %v7050_v58, 0  ;;  %v7058_v3 = vperm.slane %v7050_v58, 3 }
 0x592   : > { %v7065_v34 = vperm.slane %v7050_v58, 5  ;;  %v7068_v13 = vperm.slane %v7050_v58, 4 }
 0x593   : > { %5868 = vrcp.f32 %v1644_v30  ;;  %v1745_v40 = vand.u32 2147483647, %v1644_v30  ;;  %v1747_v15 = vand.u32 2147483648, %v1644_v30  ;;  %v1730_v60 = vand.u32 2147483647, %v1643_v39 }
 0x594   : > { %5870 = vrcp.f32 %v1643_v39  ;;  %v1732_v41 = vand.u32 2147483648, %v1643_v39  ;;  %v1715_v16 = vand.u32 2147483647, %v7055_v52  ;;  %v1717_v33 = vand.u32 2147483648, %v7055_v52 }
 0x595   : > { %5872 = vrcp.f32 %v7055_v52  ;;  %vm1741_vm14 = vweird.f32 %v1644_v30  ;;  %vm1726_vm7 = vweird.f32 %v1643_v39  ;;  %vm7070_vm10 = vcmp.eq.f32.partialorder %v1745_v40, 8.507059e+37 }
 0x596   : > { %5874 = vrcp.f32 %v7058_v3  ;;  %v1748_v50 = vor.u32 1.1754944e-38, %v1747_v15  ;;  %vm1711_vm0 = vweird.f32 %v7055_v52  ;;  %vm7075_vm9 = vcmp.eq.f32.partialorder %v1730_v60, 8.507059e+37 }
 0x597   : > { %v1733_v57 = vor.u32 1.1754944e-38, %v1732_v41  ;;  %v1760_v22 = vand.u32 2147483647, %v7058_v3  ;;  %v1762_v26 = vand.u32 2147483648, %v7058_v3  ;;  %vm7084_vm8 = vcmp.eq.f32.partialorder %v1715_v16, 8.507059e+37 }
 0x598   : > { %v1718_v51 = vor.u32 1.1754944e-38, %v1717_v33  ;;  %vm1756_vm11 = vweird.f32 %v7058_v3  ;;  %5876 = vrcp.f32 %v7065_v34  ;;  %v1790_v32 = vand.u32 2147483647, %v7065_v34 }
 0x599   : > { %v5869_v28 = vpop.eup %5868  ;;  %5878 = vrcp.f32 %v7068_v13  ;;  %vm7098_vm15 = vcmp.eq.f32.partialorder %v1760_v22, 8.507059e+37  ;;  %v1763_v37 = vor.u32 1.1754944e-38, %v1762_v26  ;;  %v1792_v63 = vand.u32 2147483648, %v7065_v34 }
 0x59a   : > { %v5871_v18 = vpop.eup %5870  ;;  %v1737_v53 = vmul.f32 %v5869_v28, %v1644_v30  ;;  %vm1742_vm12 = vweird.f32 %v5869_v28 }
 0x59b   : > { %v5873_v44 = vpop.eup %5872  ;;  %v1722_v20 = vmul.f32 %v5871_v18, %v1643_v39  ;;  %vm1727_vm13 = vweird.f32 %v5871_v18  ;;  %vm1743_vm1 = vmor %vm1741_vm14, %vm1742_vm12  ;;  %vm1786_vm14 = vweird.f32 %v7065_v34 }
 0x59c   : > { %v7081_v29 = vpop.xlane.xlu2 %1636  ;;  %v1738_v45 = vsub.f32 1.0, %v1737_v53  ;;  %v1707_v61 = vmul.f32 %v5873_v44, %v7055_v52  ;;  %v5875_v48 = vpop.eup %5874  ;;  %vm1712_vm6 = vweird.f32 %v5873_v44  ;;  %vm1728_vm2 = vmor %vm1726_vm7, %vm1727_vm13 }
 0x59d   : > { %v1723_v7 = vsub.f32 1.0, %v1722_v20  ;;  %v7091_v12 = vperm.slane %v7081_v29, 1  ;;  %v7094_v59 = vperm.slane %v7081_v29, 0  ;;  %v1752_v19 = vmul.f32 %v5875_v48, %v7058_v3  ;;  %vm1713_vm4 = vmor %vm1711_vm0, %vm1712_vm6 }
 0x59e   : > { %v1739_v49 = vmul.f32 %v5869_v28, %v1738_v45  ;;  %v1708_v36 = vsub.f32 1.0, %v1707_v61  ;;  %v7108_v40 = vpop.eup %5876  ;;  %vm1757_vm3 = vweird.f32 %v5875_v48  ;;  %v7119_v53 = vperm.slane %v7081_v29, 2 }
 0x59f   : > { %v1724_v5 = vmul.f32 %v5871_v18, %v1723_v7  ;;  %5880 = vrcp.f32 %v7091_v12  ;;  %v1753_v0 = vsub.f32 1.0, %v1752_v19  ;;  %v2090_v33 = vand.u32 2147483647, %v7091_v12  ;;  %vm7131_vm5 = vmor %vm1756_vm11, %vm1757_vm3 }
 0x5a0   : > { %v1740_v38 = vadd.f32 %v5869_v28, %v1739_v49  ;;  %v1709_v35 = vmul.f32 %v5873_v44, %v1708_v36  ;;  %5882 = vrcp.f32 %v7094_v59  ;;  %v2092_v45 = vand.u32 2147483648, %v7091_v12 }
 0x5a1   : > { %v1725_v23 = vadd.f32 %v5871_v18, %v1724_v5  ;;  %v1754_v41 = vmul.f32 %v5875_v48, %v1753_v0  ;;  %vm2086_vm7 = vweird.f32 %v7091_v12  ;;  %v1782_v14 = vmul.f32 %v7108_v40, %v7065_v34 }
 0x5a2   : > { %v1744_v15 = vsel %vm1743_vm1, %v5869_v28, %v1740_v38  ;;  %v1710_v60 = vadd.f32 %v5873_v44, %v1709_v35  ;;  %v7121_v28 = vpop.eup %5878  ;;  %vm7149_vm0 = vcmp.eq.f32.partialorder %v1790_v32, 8.507059e+37  ;;  %5884 = vrcp.f32 %v7119_v53 }
 0x5a3   : > { %v1749_v30 = vsel %vm7070_vm10, %v1748_v50, %v1744_v15  ;;  %v1729_v16 = vsel %vm1728_vm2, %v5871_v18, %v1725_v23  ;;  %v1755_v62 = vadd.f32 %v5875_v48, %v1754_v41  ;;  %vm7143_vm10 = vcmp.eq.f32.partialorder %v2090_v33, 8.507059e+37 }
 0x5a4   : > { %v1750_v39 = vmul.f32 %v6775_v55, %v1749_v30  ;;  %v1734_v20 = vsel %vm7075_vm9, %v1733_v57, %v1729_v16  ;;  %v1714_v22 = vsel %vm1713_vm4, %v5873_v44, %v1710_v60  ;;  %v1793_v55 = vor.u32 1.1754944e-38, %v1792_v63 }
 0x5a5   : > { %v5881_v50 = vpop.eup %5880  ;;  %v1735_v18 = vmul.f32 %v6763_v9, %v1734_v20  ;;  %v1719_v52 = vsel %vm7084_vm8, %v1718_v51, %v1714_v22  ;;  %v1759_v9 = vsel %vm7131_vm5, %v5875_v48, %v1755_v62  ;;  %v1775_v57 = vand.u32 2147483647, %v7068_v13 }
 0x5a6   : > { %2198 = vperm.xlu1 %5782, %v1750_v39   ;;  %v1720_v44 = vmul.f32 %v6761_v6, %v1719_v52  ;;  %v2082_v8 = vmul.f32 %v5881_v50, %v7091_v12  ;;  %v5883_v3 = vpop.eup %5882  ;;  %v1764_v51 = vsel %vm7098_vm15, %v1763_v37, %v1759_v9  ;;  %vm2071_vm9 = vweird.f32 %v7094_v59 }
 0x5a7   : > { %2193 = vperm.xlu2 %5781, %v1735_v18   ;;  %v2067_v7 = vmul.f32 %v5883_v3, %v7094_v59  ;;  %vm2087_vm8 = vweird.f32 %v5881_v50  ;;  %v2093_v49 = vor.u32 1.1754944e-38, %v2092_v45  ;;  %v2075_v36 = vand.u32 2147483647, %v7094_v59 }
 0x5a8   : > { %2188 = vperm.xlu0 %5783, %v1720_v44   ;;  %v2083_v48 = vsub.f32 1.0, %v2082_v8  ;;  %v1783_v19 = vsub.f32 1.0, %v1782_v14  ;;  %v7160_v35 = vperm.slane %v7081_v29, 3  ;;  %v7163_v0 = vperm.slane %v7081_v29, 5  ;;  %v5885_v15 = vpop.eup %5884  ;;  %vm2088_vm13 = vmor %vm2086_vm7, %vm2087_vm8 }
 0x5a9   : > { %v2068_v38 = vsub.f32 1.0, %v2067_v7  ;;  %v1765_v4 = vmul.f32 %v6790_v25, %v1764_v51  ;;  %v2077_v37 = vand.u32 2147483648, %v7094_v59  ;;  %vm1787_vm11 = vweird.f32 %v7108_v40 }
 0x5aa   : > { %v2084_v5 = vmul.f32 %v5881_v50, %v2083_v48  ;;  %v1784_v23 = vmul.f32 %v7108_v40, %v1783_v19  ;;  %vm2072_vm12 = vweird.f32 %v5883_v3  ;;  %5886 = vrcp.f32 %v7160_v35  ;;  %vm1788_vm15 = vmor %vm1786_vm14, %vm1787_vm11 }
 0x5ab   : > { %v2069_v63 = vmul.f32 %v5883_v3, %v2068_v38  ;;  %v2105_v25 = vand.u32 2147483647, %v7119_v53  ;;  %v2107_v41 = vand.u32 2147483648, %v7119_v53  ;;  %5888 = vrcp.f32 %v7163_v0  ;;  %vm2073_vm6 = vmor %vm2071_vm9, %vm2072_vm12 }
 0x5ac   : > { %v2085_v32 = vadd.f32 %v5881_v50, %v2084_v5  ;;  %v1785_v60 = vadd.f32 %v7108_v40, %v1784_v23  ;;  %v2097_v33 = vmul.f32 %v5885_v15, %v7119_v53  ;;  %v1767_v12 = vmul.f32 %v7121_v28, %v7068_v13 }
 0x5ad   : > { %v2070_v16 = vadd.f32 %v5883_v3, %v2069_v63  ;;  %vm2076_vm1 = vcmp.eq.f32.partialorder %v2075_v36, 8.507059e+37  ;;  %v2078_v20 = vor.u32 1.1754944e-38, %v2077_v37  ;;  %vm1771_vm2 = vweird.f32 %v7068_v13 }
 0x5ae   : > { %2203 = vperm.xlu1 %5782, %v1765_v4   ;;  %v2089_v30 = vsel %vm2088_vm13, %v5881_v50, %v2085_v32  ;;  %v1789_v22 = vsel %vm1788_vm15, %v7108_v40, %v1785_v60  ;;  %v2098_v18 = vsub.f32 1.0, %v2097_v33  ;;  %vm2101_vm3 = vweird.f32 %v7119_v53 }
 0x5af   : > { %v2094_v39 = vsel %vm7143_vm10, %v2093_v49, %v2089_v30  ;;  %v2074_v62 = vsel %vm2073_vm6, %v5883_v3, %v2070_v16  ;;  %v1794_v50 = vsel %vm7149_vm0, %v1793_v55, %v1789_v22  ;;  %vm7193_vm4 = vcmp.eq.f32.partialorder %v2105_v25, 8.507059e+37 }
 0x5b0   : > { %v2095_v34 = vmul.f32 %v6781_v43, %v2094_v39  ;;  %v2079_v52 = vsel %vm2076_vm1, %v2078_v20, %v2074_v62  ;;  %v2108_v59 = vor.u32 1.1754944e-38, %v2107_v41  ;;  %v5887_v45 = vpop.eup %5886  ;;  %v2099_v44 = vmul.f32 %v5885_v15, %v2098_v18  ;;  %v7233_v41 = vpop.xlane.xlu0 %1630 }
 0x5b1   : > { %v2080_v40 = vmul.f32 %v6783_v17, %v2079_v52  ;;  %vm2102_vm5 = vweird.f32 %v5885_v15  ;;  %v1768_v43 = vsub.f32 1.0, %v1767_v12  ;;  %v5889_v9 = vpop.eup %5888  ;;  %v1795_v8 = vmul.f32 %v6807_v24, %v1794_v50 }
 0x5b2   : > { %2313 = vperm.xlu2 %5781, %v2095_v34   ;;  %v2112_v55 = vmul.f32 %v5887_v45, %v7160_v35  ;;  %v2120_v3 = vand.u32 2147483647, %v7160_v35  ;;  %v2122_v61 = vand.u32 2147483648, %v7160_v35  ;;  %v2100_v14 = vadd.f32 %v5885_v15, %v2099_v44  ;;  %vm2103_vm14 = vmor %vm2101_vm3, %vm2102_vm5 }
 0x5b3   : > { %2308 = vperm.xlu0 %5783, %v2080_v40   ;;  %v2142_v6 = vmul.f32 %v5889_v9, %v7163_v0  ;;  %v2150_v51 = vand.u32 2147483647, %v7163_v0  ;;  %v2152_v17 = vand.u32 2147483648, %v7163_v0  ;;  %v1769_v24 = vmul.f32 %v7121_v28, %v1768_v43 }
 0x5b4   : > { %v2113_v48 = vsub.f32 1.0, %v2112_v55  ;;  %vm1772_vm7 = vweird.f32 %v7121_v28  ;;  %v1777_v7 = vand.u32 2147483648, %v7068_v13  ;;  %v2104_v49 = vsel %vm2103_vm14, %v5885_v15, %v2100_v14 }
 0x5b5   : > { %v2143_v36 = vsub.f32 1.0, %v2142_v6  ;;  %v7211_v19 = vperm.slane %v7050_v58, 6  ;;  %v7214_v5 = vperm.slane %v7081_v29, 6  ;;  %v2109_v53 = vsel %vm7193_vm4, %v2108_v59, %v2104_v49  ;;  %vm7222_vm9 = vmor %vm1771_vm2, %vm1772_vm7 }
 0x5b6   : > { %2213 = vperm.xlu1 %5782, %v1795_v8   ;;  %v2114_v38 = vmul.f32 %v5887_v45, %v2113_v48  ;;  %vm2117_vm10 = vweird.f32 %v5887_v45  ;;  %v1770_v4 = vadd.f32 %v7121_v28, %v1769_v24  ;;  %v2110_v37 = vmul.f32 %v6796_v10, %v2109_v53 }
 0x5b7   : > { %v2144_v23 = vmul.f32 %v5889_v9, %v2143_v36  ;;  %vm2147_vm0 = vweird.f32 %v5889_v9  ;;  %5890 = vrcp.f32 %v7211_v19  ;;  %vm2116_vm8 = vweird.f32 %v7160_v35 }
 0x5b8   : > { %v2115_v63 = vadd.f32 %v5887_v45, %v2114_v38  ;;  %v2123_v15 = vor.u32 1.1754944e-38, %v2122_v61  ;;  %v1774_v60 = vsel %vm7222_vm9, %v7121_v28, %v1770_v4  ;;  %vm2118_vm11 = vmor %vm2116_vm8, %vm2117_vm10  ;;  %vm2146_vm12 = vweird.f32 %v7163_v0 }
 0x5b9   : > { %v2145_v10 = vadd.f32 %v5889_v9, %v2144_v23  ;;  %v1778_v25 = vor.u32 1.1754944e-38, %v1777_v7  ;;  %5892 = vrcp.f32 %v7214_v5  ;;  %vm2121_vm13 = vcmp.eq.f32.partialorder %v2120_v3, 8.507059e+37  ;;  %vm2148_vm15 = vmor %vm2146_vm12, %vm2147_vm0 }
 0x5ba   : > { %2318 = vperm.xlu2 %5781, %v2110_v37   ;;  %v2119_v30 = vsel %vm2118_vm11, %v5887_v45, %v2115_v63  ;;  %v2153_v35 = vor.u32 1.1754944e-38, %v2152_v17  ;;  %vm1776_vm6 = vcmp.eq.f32.partialorder %v1775_v57, 8.507059e+37  ;;  %vm2151_vm1 = vcmp.eq.f32.partialorder %v2150_v51, 8.507059e+37 }
 0x5bb   : > { %v2124_v16 = vsel %vm2121_vm13, %v2123_v15, %v2119_v30  ;;  %v2149_v28 = vsel %vm2148_vm15, %v5889_v9, %v2145_v10  ;;  %v1779_v33 = vsel %vm1776_vm6, %v1778_v25, %v1774_v60  ;;  %v7240_v39 = vperm.slane %v7081_v29, 4 }
 0x5bc   : > { %v2125_v12 = vmul.f32 %v6798_v1, %v2124_v16  ;;  %v2154_v0 = vsel %vm2151_vm1, %v2153_v35, %v2149_v28  ;;  %v7243_v20 = vperm.slane %v7050_v58, 7  ;;  %v1805_v62 = vand.u32 2147483647, %v7211_v19 }
 0x5bd   : > { %v5891_v22 = vpop.eup %5890  ;;  %v2155_v34 = vmul.f32 %v6822_v56, %v2154_v0  ;;  %v7248_v13 = vperm.slane %v7233_v41, 2  ;;  %v1807_v1 = vand.u32 2147483648, %v7211_v19  ;;  %5894 = vrcp.f32 %v7240_v39 }
 0x5be   : > { %2323 = vperm.xlu0 %5783, %v2125_v12   ;;  %v1797_v57 = vmul.f32 %v5891_v22, %v7211_v19  ;;  %v1780_v58 = vmul.f32 %v6813_v21, %v1779_v33  ;;  %v2165_v18 = vand.u32 2147483647, %v7214_v5  ;;  %v2167_v56 = vand.u32 2147483648, %v7214_v5 }
 0x5bf   : > { %v5893_v50 = vpop.eup %5892  ;;  %2333 = vperm.xlu1 %5782, %v2155_v34   ;;  %5896 = vrcp.f32 %v7243_v20  ;;  %vm1801_vm2 = vweird.f32 %v7211_v19  ;;  %vm2161_vm3 = vweird.f32 %v7214_v5  ;;  %vm7260_vm4 = vcmp.eq.f32.partialorder %v1805_v62, 8.507059e+37 }
 0x5c0   : > { %v1798_v52 = vsub.f32 1.0, %v1797_v57  ;;  %v2157_v26 = vmul.f32 %v5893_v50, %v7214_v5  ;;  %v2135_v21 = vand.u32 2147483647, %v7240_v39  ;;  %v2137_v45 = vand.u32 2147483648, %v7240_v39 }
 0x5c1   : > { %5898 = vrcp.f32 %v7248_v13  ;;  %vm1802_vm5 = vweird.f32 %v5891_v22  ;;  %v1808_v44 = vor.u32 1.1754944e-38, %v1807_v1  ;;  %vm7267_vm14 = vcmp.eq.f32.partialorder %v2165_v18, 8.507059e+37 }
 0x5c2   : > { %2208 = vperm.xlu2 %5781, %v1780_v58   ;;  %v1799_v40 = vmul.f32 %v5891_v22, %v1798_v52  ;;  %v2158_v43 = vsub.f32 1.0, %v2157_v26  ;;  %v2168_v8 = vor.u32 1.1754944e-38, %v2167_v56  ;;  %vm2131_vm7 = vweird.f32 %v7240_v39  ;;  %vm1803_vm9 = vmor %vm1801_vm2, %vm1802_vm5 }
 0x5c3   : > { %v7273_v55 = vperm.slane %v7233_v41, 1  ;;  %v5895_v3 = vpop.eup %5894  ;;  %vm2162_vm10 = vweird.f32 %v5893_v50  ;;  %vm1816_vm0 = vweird.f32 %v7243_v20  ;;  %vm7279_vm8 = vcmp.eq.f32.partialorder %v2135_v21, 8.507059e+37 }
 0x5c4   : > { %v1800_v61 = vadd.f32 %v5891_v22, %v1799_v40  ;;  %v2159_v14 = vmul.f32 %v5893_v50, %v2158_v43  ;;  %v2127_v51 = vmul.f32 %v5895_v3, %v7240_v39  ;;  %v2138_v48 = vor.u32 1.1754944e-38, %v2137_v45  ;;  %vm2163_vm11 = vmor %vm2161_vm3, %vm2162_vm10 }
 0x5c5   : > { %v5897_v6 = vpop.eup %5896  ;;  %v1820_v24 = vand.u32 2147483647, %v7243_v20  ;;  %v1822_v53 = vand.u32 2147483648, %v7243_v20  ;;  %5900 = vrcp.f32 %v7273_v55  ;;  %v7292_v37 = vperm.slane %v7233_v41, 0 }
 0x5c6   : > { %v1804_v7 = vsel %vm1803_vm9, %v5891_v22, %v1800_v61  ;;  %v2160_v49 = vadd.f32 %v5893_v50, %v2159_v14  ;;  %v1812_v36 = vmul.f32 %v5897_v6, %v7243_v20  ;;  %v2128_v4 = vsub.f32 1.0, %v2127_v51 }
 0x5c7   : > { %v5899_v38 = vpop.eup %5898  ;;  %v1809_v19 = vsel %vm7260_vm4, %v1808_v44, %v1804_v7  ;;  %vm2132_vm12 = vweird.f32 %v5895_v3  ;;  %v7299_v5 = vperm.slane %v7081_v29, 7  ;;  %vm1817_vm13 = vweird.f32 %v5897_v6 }
 0x5c8   : > { %v1810_v23 = vmul.f32 %v6815_v46, %v1809_v19  ;;  %v2164_v32 = vsel %vm2163_vm11, %v5893_v50, %v2160_v49  ;;  %v1813_v63 = vsub.f32 1.0, %v1812_v36  ;;  %v1857_v15 = vmul.f32 %v5899_v38, %v7248_v13  ;;  %vm2133_vm6 = vmor %vm2131_vm7, %vm2132_vm12 }
 0x5c9   : > { %v2169_v60 = vsel %vm7267_vm14, %v2168_v8, %v2164_v32  ;;  %v2129_v10 = vmul.f32 %v5895_v3, %v2128_v4  ;;  %vm7302_vm15 = vcmp.eq.f32.partialorder %v1820_v24, 8.507059e+37  ;;  %v1867_v28 = vand.u32 2147483648, %v7248_v13  ;;  %vm1818_vm2 = vmor %vm1816_vm0, %vm1817_vm13 }
 0x5ca   : > { %2218 = vperm.xlu0 %5783, %v1810_v23   ;;  %v2170_v25 = vmul.f32 %v6837_v2, %v2169_v60  ;;  %v1814_v30 = vmul.f32 %v5897_v6, %v1813_v63  ;;  %v1858_v35 = vsub.f32 1.0, %v1857_v15  ;;  %5902 = vrcp.f32 %v7292_v37 }
 0x5cb   : > { %v2130_v16 = vadd.f32 %v5895_v3, %v2129_v10  ;;  %vm1862_vm1 = vweird.f32 %v5899_v38  ;;  %v1865_v2 = vand.u32 2147483647, %v7248_v13  ;;  %v5901_v12 = vpop.eup %5900  ;;  %v1823_v22 = vor.u32 1.1754944e-38, %v1822_v53 }
 0x5cc   : > { %2338 = vperm.xlu1 %5782, %v2170_v25   ;;  %v1815_v29 = vadd.f32 %v5897_v6, %v1814_v30  ;;  %v1859_v33 = vmul.f32 %v5899_v38, %v1858_v35  ;;  %vm1861_vm3 = vweird.f32 %v7248_v13  ;;  %5904 = vrcp.f32 %v7299_v5 }
 0x5cd   : > { %v2134_v0 = vsel %vm2133_vm6, %v5895_v3, %v2130_v16  ;;  %v1842_v57 = vmul.f32 %v5901_v12, %v7273_v55  ;;  %vm1863_vm4 = vmor %vm1861_vm3, %vm1862_vm1  ;;  %v1868_v20 = vor.u32 1.1754944e-38, %v1867_v28  ;;  %vm1866_vm5 = vcmp.eq.f32.partialorder %v1865_v2, 8.507059e+37 }
 0x5ce   : > { %v2139_v34 = vsel %vm7279_vm8, %v2138_v48, %v2134_v0  ;;  %v1819_v39 = vsel %vm1818_vm2, %v5897_v6, %v1815_v29  ;;  %v1860_v62 = vadd.f32 %v5899_v38, %v1859_v33  ;;  %v1850_v26 = vand.u32 2147483647, %v7273_v55 }
 0x5cf   : > { %v2140_v1 = vmul.f32 %v6828_v54, %v2139_v34  ;;  %v1824_v50 = vsel %vm7302_vm15, %v1823_v22, %v1819_v39  ;;  %v1843_v13 = vsub.f32 1.0, %v1842_v57  ;;  %v1852_v59 = vand.u32 2147483648, %v7273_v55  ;;  %v9550_v57 = vld [vmem:[#allocation21_spill] sm:$0xff] }
 0x5d0   : > { %v1825_v58 = vmul.f32 %v6830_v42, %v1824_v50  ;;  %v1864_v18 = vsel %vm1863_vm4, %v5899_v38, %v1860_v62  ;;  %v5903_v56 = vpop.eup %5902  ;;  %vm1847_vm14 = vweird.f32 %v5901_v12  ;;  %vm1846_vm7 = vweird.f32 %v7273_v55 }
 0x5d1   : > { %2328 = vperm.xlu2 %5781, %v2140_v1   ;;  %v1869_v52 = vsel %vm1866_vm5, %v1868_v20, %v1864_v18  ;;  %v1844_v21 = vmul.f32 %v5901_v12, %v1843_v13  ;;  %v1827_v45 = vmul.f32 %v5903_v56, %v7292_v37  ;;  %v1654_v42 = vperm.slane %v7233_v41, 4  ;;  %vm1848_vm10 = vmor %vm1846_vm7, %vm1847_vm14 }
 0x5d2   : > { %2223 = vperm.xlu0 %5783, %v1825_v58   ;;  %v1870_v54 = vmul.f32 %v6862_v31, %v1869_v52  ;;  %v5905_v40 = vpop.eup %5904  ;;  %v1837_v9 = vand.u32 2147483648, %v7292_v37  ;;  %vm1851_vm0 = vcmp.eq.f32.partialorder %v1850_v26, 8.507059e+37  ;;  %v1853_v3 = vor.u32 1.1754944e-38, %v1852_v59 }
 0x5d3   : > { %v1845_v44 = vadd.f32 %v5901_v12, %v1844_v21  ;;  %v1828_v43 = vsub.f32 1.0, %v1827_v45  ;;  %v2172_v8 = vmul.f32 %v5905_v40, %v7299_v5  ;;  %v1835_v31 = vand.u32 2147483647, %v7292_v37 }
 0x5d4   : > { %2238 = vperm.xlu1 %5782, %v1870_v54   ;;  %vm1832_vm9 = vweird.f32 %v5903_v56  ;;  %vm1831_vm8 = vweird.f32 %v7292_v37  ;;  %5906 = vrcp.f32 %v1654_v42  ;;  %v1838_v48 = vor.u32 1.1754944e-38, %v1837_v9 }
 0x5d5   : > { %v1849_v61 = vsel %vm1848_vm10, %v5901_v12, %v1845_v44  ;;  %v1829_v14 = vmul.f32 %v5903_v56, %v1828_v43  ;;  %v2173_v6 = vsub.f32 1.0, %v2172_v8  ;;  %v2182_v24 = vand.u32 2147483648, %v7299_v5  ;;  %vm1833_vm11 = vmor %vm1831_vm8, %vm1832_vm9 }
 0x5d6   : > { %v1854_v51 = vsel %vm1851_vm0, %v1853_v3, %v1849_v61  ;;  %vm2177_vm12 = vweird.f32 %v5905_v40  ;;  %v2180_v49 = vand.u32 2147483647, %v7299_v5  ;;  %v7336_v36 = vperm.slane %v7233_v41, 3  ;;  %v9552_v61 = vld [vmem:[#allocation9_spill] sm:$0xff] }
 0x5d7   : > { %v1855_v55 = vmul.f32 %v6843_v27, %v1854_v51  ;;  %v1830_v17 = vadd.f32 %v5903_v56, %v1829_v14  ;;  %v2174_v7 = vmul.f32 %v5905_v40, %v2173_v6  ;;  %vm1836_vm13 = vcmp.eq.f32.partialorder %v1835_v31, 8.507059e+37  ;;  %v9553_v51 = vld [vmem:[#allocation23_spill] sm:$0xff] }
 0x5d8   : > { %v7339_v38 = vperm.slane %v7233_v41, 5  ;;  %vm2176_vm15 = vweird.f32 %v7299_v5  ;;  %v2183_v37 = vor.u32 1.1754944e-38, %v2182_v24  ;;  %5908 = vrcp.f32 %v7336_v36 }
 0x5d9   : > { %2233 = vperm.xlu2 %5781, %v1855_v55   ;;  %v1834_v53 = vsel %vm1833_vm11, %v5903_v56, %v1830_v17  ;;  %v2175_v27 = vadd.f32 %v5905_v40, %v2174_v7  ;;  %vm2178_vm6 = vmor %vm2176_vm15, %vm2177_vm12  ;;  %vm2181_vm1 = vcmp.eq.f32.partialorder %v2180_v49, 8.507059e+37  ;;  %v1895_v25 = vand.u32 2147483647, %v1654_v42 }
 0x5da   : > { %v1839_v19 = vsel %vm1836_vm13, %v1838_v48, %v1834_v53  ;;  %v5907_v23 = vpop.eup %5906  ;;  %5910 = vrcp.f32 %v7339_v38  ;;  %v1897_v5 = vand.u32 2147483648, %v1654_v42  ;;  %v7350_v30 = vperm.slane %v7233_v41, 7 }
 0x5db   : > { %v1840_v4 = vmul.f32 %v6845_v47, %v1839_v19  ;;  %v2179_v32 = vsel %vm2178_vm6, %v5905_v40, %v2175_v27  ;;  %v1887_v15 = vmul.f32 %v5907_v23, %v1654_v42  ;;  %v7347_v47 = vperm.slane %v7233_v41, 6 }
 0x5dc   : > { %v2184_v63 = vsel %vm2181_vm1, %v2183_v37, %v2179_v32  ;;  %vm1892_vm2 = vweird.f32 %v5907_v23  ;;  %vm1891_vm3 = vweird.f32 %v1654_v42  ;;  %vm1896_vm5 = vcmp.eq.f32.partialorder %v1895_v25, 8.507059e+37  ;;  %v9551_v42 = vld [vmem:[#allocation22_spill] sm:$0xff]  ;;  %v9557_v32 = vld [vmem:[#allocation11_spill] sm:$0xff] }
 0x5dd   : > { %2228 = vperm.xlu0 %5783, %v1840_v4   ;;  %v2185_v60 = vmul.f32 %v6851_v11, %v2184_v63  ;;  %v1888_v10 = vsub.f32 1.0, %v1887_v15  ;;  %5912 = vrcp.f32 %v7347_v47  ;;  %vm1893_vm4 = vmor %vm1891_vm3, %vm1892_vm2  ;;  %v1898_v33 = vor.u32 1.1754944e-38, %v1897_v5 }
 0x5de   : > { %v5909_v35 = vpop.eup %5908  ;;  %5914 = vrcp.f32 %v7350_v30  ;;  %v1880_v12 = vand.u32 2147483647, %v7336_v36  ;;  %v1882_v0 = vand.u32 2147483648, %v7336_v36  ;;  %v1912_v62 = vand.u32 2147483648, %v7339_v38 }
 0x5df   : > { %2343 = vperm.xlu1 %5782, %v2185_v60   ;;  %v1889_v16 = vmul.f32 %v5907_v23, %v1888_v10  ;;  %v1872_v28 = vmul.f32 %v5909_v35, %v7336_v36  ;;  %vm1877_vm14 = vweird.f32 %v5909_v35  ;;  %v1910_v20 = vand.u32 2147483647, %v7339_v38  ;;  %v9559_v10 = vld [vmem:[#allocation24_spill] sm:$0xff] }
 0x5e0   : > { %v5911_v46 = vpop.eup %5910  ;;  %vm1876_vm10 = vweird.f32 %v7336_v36  ;;  %v1883_v13 = vor.u32 1.1754944e-38, %v1882_v0  ;;  %vm1906_vm9 = vweird.f32 %v7339_v38  ;;  %vm1881_vm8 = vcmp.eq.f32.partialorder %v1880_v12, 8.507059e+37  ;;  %v9554_v36 = vld [vmem:[#allocation16_spill] sm:$0xff] }
 0x5e1   : > { %v1890_v29 = vadd.f32 %v5907_v23, %v1889_v16  ;;  %v1902_v11 = vmul.f32 %v5911_v46, %v7339_v38  ;;  %v1873_v2 = vsub.f32 1.0, %v1872_v28  ;;  %vm1907_vm7 = vweird.f32 %v5911_v46  ;;  %vm1878_vm0 = vmor %vm1876_vm10, %vm1877_vm14  ;;  %v9555_v38 = vld [vmem:[#allocation10_spill] sm:$0xff]  ;;  %v9562_v28 = vld [vmem:[#allocation25_spill] sm:$0xff] }
 0x5e2   : > { %vm1908_vm11 = vmor %vm1906_vm9, %vm1907_vm7  ;;  %v1913_v54 = vor.u32 1.1754944e-38, %v1912_v62  ;;  %vm1911_vm12 = vcmp.eq.f32.partialorder %v1910_v20, 8.507059e+37  ;;  %v1927_v9 = vand.u32 2147483648, %v7347_v47  ;;  %v1925_v31 = vand.u32 2147483647, %v7347_v47  ;;  %v9565_v62 = vld [vmem:[#allocation8_spill] sm:$0xff] }
 0x5e3   : > { %v1894_v41 = vsel %vm1893_vm4, %v5907_v23, %v1890_v29  ;;  %v1903_v22 = vsub.f32 1.0, %v1902_v11  ;;  %v1874_v39 = vmul.f32 %v5909_v35, %v1873_v2  ;;  %v5913_v58 = vpop.eup %5912  ;;  %v629_v14 = vrot.slane %v9552_v61, 4 }
 0x5e4   : > { %v1899_v34 = vsel %vm1896_vm5, %v1898_v33, %v1894_v41  ;;  %v1917_v52 = vmul.f32 %v5913_v58, %v7347_v47  ;;  %v5915_v26 = vpop.eup %5914  ;;  %vm1922_vm13 = vweird.f32 %v5913_v58  ;;  %vm1921_vm15 = vweird.f32 %v7347_v47  ;;  %v9560_v47 = vld [vmem:[#allocation7_spill] sm:$0xff]  ;;  %v2274_v41 = vpop.permute.xlu2 %2273 }
 0x5e5   : > { %v1900_v1 = vmul.f32 %v9550_v57, %v1899_v34  ;;  %v1904_v50 = vmul.f32 %v5911_v46, %v1903_v22  ;;  %v1875_v18 = vadd.f32 %v5909_v35, %v1874_v39  ;;  %v1932_v8 = vmul.f32 %v5915_v26, %v7350_v30  ;;  %vm1923_vm6 = vmor %vm1921_vm15, %vm1922_vm13  ;;  %v2279_v34 = vpop.permute.xlu1 %2278 }
 0x5e6   : > { %v1918_v40 = vsub.f32 1.0, %v1917_v52  ;;  %v1942_v48 = vand.u32 2147483648, %v7350_v30  ;;  %v1928_v24 = vor.u32 1.1754944e-38, %v1927_v9  ;;  %vm1937_vm1 = vweird.f32 %v5915_v26 }
 0x5e7   : > { %2248 = vperm.xlu2 %5781, %v1900_v1   ;;  %v1905_v56 = vadd.f32 %v5911_v46, %v1904_v50  ;;  %v1879_v59 = vsel %vm1878_vm0, %v5909_v35, %v1875_v18  ;;  %v1933_v6 = vsub.f32 1.0, %v1932_v8  ;;  %v1940_v49 = vand.u32 2147483647, %v7350_v30 }
 0x5e8   : > { %v1884_v21 = vsel %vm1881_vm8, %v1883_v13, %v1879_v59  ;;  %v1919_v3 = vmul.f32 %v5913_v58, %v1918_v40  ;;  %v641_v53 = vrot.slane %v9554_v36, 4  ;;  %v627_v19 = vrot.slane %v9555_v38, 4 }
 0x5e9   : > { %v1909_v45 = vsel %vm1908_vm11, %v5911_v46, %v1905_v56  ;;  %v1885_v44 = vmul.f32 %v9551_v42, %v1884_v21  ;;  %v1934_v7 = vmul.f32 %v5915_v26, %v1933_v6  ;;  %vm1926_vm2 = vcmp.eq.f32.partialorder %v1925_v31, 8.507059e+37 }
 0x5ea   : > { %v1914_v43 = vsel %vm1911_vm12, %v1913_v54, %v1909_v45  ;;  %v1920_v17 = vadd.f32 %v5913_v58, %v1919_v3  ;;  %vm9556_vm3 = vcmask 1047556   ;;  %vm1936_vm4 = vweird.f32 %v7350_v30 }
 0x5eb   : > { %2243 = vperm.xlu0 %5783, %v1885_v44   ;;  %v1915_v55 = vmul.f32 %v9553_v51, %v1914_v43  ;;  %v630_v4 = vsel %vm9556_vm3, %v9555_v38, %v629_v14  ;;  %v1935_v23 = vadd.f32 %v5915_v26, %v1934_v7  ;;  %v639_v63 = vrot.slane %v9557_v32, 4  ;;  %vm1938_vm5 = vmor %vm1936_vm4, %vm1937_vm1 }
 0x5ec   : > { %v1924_v27 = vsel %vm1923_vm6, %v5913_v58, %v1920_v17  ;;  %v1943_v15 = vor.u32 1.1754944e-38, %v1942_v48  ;;  %vm9558_vm14 = vmmov %vm9556_vm3  ;;  %vm1941_vm7 = vcmp.eq.f32.partialorder %v1940_v49, 8.507059e+37  ;;  %v638_v35 = vperm.slane %v630_v4, %v9560_v47  ;;  %v7398_v52 = vpop.permute.xlu2 %2303 }
 0x5ed   : > { %v1929_v37 = vsel %vm1926_vm2, %v1928_v24, %v1924_v27  ;;  %v642_v60 = vsel %vm9558_vm14, %v9557_v32, %v641_v53  ;;  %v1939_v5 = vsel %vm1938_vm5, %v5915_v26, %v1935_v23  ;;  %vm9561_vm10 = vmmov %vm9556_vm3  ;;  %v2269_v26 = vpop.permute.xlu0 %2268  ;;  %v2284_v59 = vpop.permute.xlu1 %2283 }
 0x5ee   : > { %v1930_v25 = vmul.f32 %v9559_v10, %v1929_v37  ;;  %v1944_v16 = vsel %vm1941_vm7, %v1943_v15, %v1939_v5  ;;  %v628_v46 = vsel %vm9561_vm10, %v627_v19, %v9552_v61  ;;  %v650_v30 = vperm.slane %v642_v60, %v9560_v47  ;;  %vm9563_vm0 = vmmov %vm9556_vm3 }
 0x5ef   : > { %2253 = vperm.xlu2 %5781, %v1915_v55   ;;  %v1945_v29 = vmul.f32 %v9562_v28, %v1944_v16  ;;  %v640_v11 = vsel %vm9563_vm0, %v639_v63, %v9554_v36  ;;  %v634_v33 = vperm.slane %v628_v46, %v9560_v47  ;;  %v665_v2 = vrot.slane %v638_v35, 4  ;;  %vm9564_vm9 = vmmov %vm9563_vm0 }
 0x5f0   : > { %v646_v12 = vperm.slane %v640_v11, %v9560_v47  ;;  %v663_v0 = vrot.slane %v650_v30, 4  ;;  %vm9566_vm8 = vmmov %vm9563_vm0 }
 0x5f1   : > { %v666_v22 = vsel %vm9564_vm9, %v650_v30, %v665_v2  ;;  %v653_v39 = vrot.slane %v634_v33, 4  ;;  %vm9567_vm11 = vmmov %vm9563_vm0 }
 0x5f2   : > { %v674_v57 = vperm.slane %v666_v22, %v9565_v62  ;;  %v651_v1 = vrot.slane %v646_v12, 4  ;;  %v664_v20 = vsel %vm9567_vm11, %v663_v0, %v638_v35  ;;  %vm9568_vm12 = vmmov %vm9563_vm0 }
 0x5f3   : > { %2258 = vperm.xlu0 %5783, %v1930_v25   ;;  %v654_v50 = vsel %vm9566_vm8, %v646_v12, %v653_v39  ;;  %v670_v18 = vperm.slane %v664_v20, %v9565_v62  ;;  %vm9569_vm13 = vmmov %vm9563_vm0 }
 0x5f4   : > { %v662_v58 = vperm.slane %v654_v50, %v9565_v62  ;;  %v681_v13 = vrot.slane %v674_v57, 4  ;;  %v652_v56 = vsel %vm9568_vm12, %v651_v1, %v634_v33  ;;  %vm9570_vm15 = vmmov %vm9563_vm0 }
 0x5f5   : > { %v658_v54 = vperm.slane %v652_v56, %v9565_v62  ;;  %v679_v45 = vrot.slane %v670_v18, 4  ;;  %vm9571_vm6 = vmmov %vm9563_vm0  ;;  %v2289_v51 = vpop.permute.xlu0 %2288  ;;  %v2294_v17 = vpop.permute.xlu1 %2293 }
 0x5f6   : > { %v677_v21 = vrot.slane %v662_v58, 4  ;;  %v682_v40 = vsel %vm9569_vm13, 0.0, %v681_v13  ;;  %v694_v42 = vsel %vm9570_vm15, %v681_v13, %v670_v18  ;;  %vm9572_vm1 = vmmov %vm9563_vm0 }
 0x5f7   : > { %2263 = vperm.xlu2 %5781, %v1945_v29   ;;  %v699_v44 = vrot.slane %v682_v40, 4  ;;  %v675_v43 = vrot.slane %v658_v54, 4  ;;  %v680_v8 = vsel %vm9572_vm1, 0.0, %v679_v45  ;;  %v698_v31 = vperm.slane %v694_v42, %v9560_v47  ;;  %vm9573_vm2 = vmmov %vm9563_vm0 }
 0x5f8   : > { %v678_v9 = vsel %vm9571_vm6, 0.0, %v677_v21  ;;  %v683_v61 = vsel %vm9573_vm2, %v677_v21, %v658_v54  ;;  %vm9574_vm3 = vmmov %vm9563_vm0 }
 0x5f9   : > { %v688_v14 = vrot.slane %v678_v9, 4  ;;  %v700_v6 = vsel %vm9574_vm3, %v699_v44, %v680_v8  ;;  %vm9575_vm4 = vmmov %vm9563_vm0  ;;  %v687_v48 = vperm.slane %v683_v61, %v9560_v47  ;;  %v719_v7 = vrot.slane %v698_v31, 4 }
 0x5fa   : > { %v676_v55 = vsel %vm9575_vm4, 0.0, %v675_v43  ;;  %v704_v24 = vperm.slane %v700_v6, %v9560_v47  ;;  %vm9576_vm5 = vmmov %vm9563_vm0 }
 0x5fb   : > { %v689_v49 = vsel %vm9576_vm5, %v688_v14, %v676_v55  ;;  %v707_v38 = vrot.slane %v687_v48, 4  ;;  %vm9577_vm14 = vmmov %vm9563_vm0 }
 0x5fc   : > { %v693_v53 = vperm.slane %v689_v49, %v9560_v47  ;;  %v720_v19 = vsel %vm9577_vm14, %v704_v24, %v719_v7  ;;  %vm9578_vm7 = vmmov %vm9563_vm0  ;;  %v717_v35 = vrot.slane %v704_v24, 4 }
 0x5fd   : > { %v728_v27 = vperm.slane %v720_v19, %v9565_v62  ;;  %v2299_v4 = vpop.permute.xlu0 %2298  ;;  %vm9579_vm10 = vmmov %vm9563_vm0  ;;  %vm9580_vm0 = vcmask 64512  }
 0x5fe   : > { %v708_v23 = vsel %vm9578_vm7, %v693_v53, %v707_v38  ;;  %v705_v28 = vrot.slane %v693_v53, 4  ;;  %vm9581_vm9 = vmmov %vm9572_vm1 }
 0x5ff   : > { %v716_v32 = vperm.slane %v708_v23, %v9565_v62  ;;  %v733_v63 = vrot.slane %v728_v27, 4  ;;  %v718_v29 = vsel %vm9581_vm9, %v717_v35, %v698_v31  ;;  %vm9582_vm8 = vmmov %vm9580_vm0 }
 0x600   : > { %vm9583_vm11 = vmmov %vm9580_vm0  ;;  %v7433_v39 = vperm.slane %v718_v29, %v9565_v62 }
 0x601   : > { %v7405_v3 = vpop.permute.xlu2 %2193  ;;  %v734_v60 = vsel %vm9579_vm10, %v733_v63, %v716_v32  ;;  %vm9584_vm12 = vmmov %vm9572_vm1  ;;  %v735_v43 = vrot.slane %v716_v32, 4 }
 0x602   : > { %v2362_v25 = vmul.f32 %v2269_v26, %v734_v60  ;;  %v2363_v16 = vmul.f32 %v2274_v41, %v734_v60  ;;  %v2364_v46 = vmul.f32 %v2279_v34, %v734_v60  ;;  %v2365_v11 = vmul.f32 %v2284_v59, %v734_v60  ;;  %vm9585_vm13 = vmmov %vm9580_vm0 }
 0x603   : > { %v2366_v41 = vmul.f32 %v2289_v51, %v734_v60  ;;  %v706_v34 = vsel %vm9584_vm12, %v705_v28, %v687_v48  ;;  %v2367_v20 = vmul.f32 %v2294_v17, %v734_v60  ;;  %vm9586_vm15 = vmmov %vm9580_vm0  ;;  %v729_v59 = vrot.slane %v7433_v39, 4 }
 0x604   : > { %v2490_v30 = vsel %vm9580_vm0, %v2362_v25, 0.0  ;;  %v2497_v33 = vsel %vm9582_vm8, %v2363_v16, 0.0  ;;  %v2504_v2 = vsel %vm9583_vm11, %v2364_v46, 0.0  ;;  %v2511_v50 = vsel %vm9585_vm13, %v2365_v11, 0.0  ;;  %vm9587_vm6 = vmmov %vm9580_vm0 }
 0x605   : > { %v2491_v12 = vrot.slane %v2490_v30, 4  ;;  %v2498_v57 = vrot.slane %v2497_v33, 4  ;;  %v2505_v1 = vrot.slane %v2504_v2, 4  ;;  %v2512_v13 = vrot.slane %v2511_v50, 4  ;;  %vm9588_vm1 = vmmov %vm9580_vm0 }
 0x606   : > { %v2518_v56 = vsel %vm9586_vm15, %v2366_v41, 0.0  ;;  %v7441_v26 = vperm.slane %v706_v34, %v9565_v62  ;;  %v2525_v45 = vsel %vm9587_vm6, %v2367_v20, 0.0  ;;  %v2368_v40 = vmul.f32 %v2299_v4, %v734_v60  ;;  %vm9589_vm3 = vmmov %vm9580_vm0 }
 0x607   : > { %v2492_v58 = vadd.f32 %v2491_v12, %v2490_v30  ;;  %v2499_v54 = vadd.f32 %v2498_v57, %v2497_v33  ;;  %v2506_v21 = vadd.f32 %v2505_v1, %v2504_v2  ;;  %v2369_v42 = vmul.f32 %v7398_v52, %v734_v60  ;;  %vm9590_vm4 = vmmov %vm9573_vm2 }
 0x608   : > { %v2519_v9 = vrot.slane %v2518_v56, 4  ;;  %v2513_v8 = vadd.f32 %v2512_v13, %v2511_v50  ;;  %v2526_v31 = vrot.slane %v2525_v45, 4  ;;  %v2532_v55 = vsel %vm9588_vm1, %v2368_v40, 0.0  ;;  %vm9591_vm5 = vmmov %vm9580_vm0 }
 0x609   : > { %v2493_v44 = vrot.slane %v2492_v58, 2  ;;  %v2500_v6 = vrot.slane %v2499_v54, 2  ;;  %v2507_v51 = vrot.slane %v2506_v21, 2  ;;  %v7453_v17 = vsel %vm9573_vm2, %v729_v59, %v7441_v26  ;;  %vm9592_vm14 = vmmov %vm9580_vm0 }
 0x60a   : > { %v2539_v48 = vsel %vm9589_vm3, %v2369_v42, 0.0  ;;  %v2347_v24 = vmul.f32 %v7405_v3, %v7453_v17  ;;  %v7459_v7 = vsel %vm9590_vm4, %v728_v27, %v735_v43  ;;  %v2520_v49 = vadd.f32 %v2519_v9, %v2518_v56  ;;  %vm9593_vm7 = vmmov %vm9580_vm0 }
 0x60b   : > { %v2494_v52 = vadd.f32 %v2493_v44, %v2492_v58  ;;  %v2514_v19 = vrot.slane %v2513_v8, 2  ;;  %v2527_v4 = vadd.f32 %v2526_v31, %v2525_v45  ;;  %v2533_v23 = vrot.slane %v2532_v55, 4  ;;  %vm9594_vm10 = vmmov %vm9580_vm0 }
 0x60c   : > { %v2314_v36 = vpop.permute.xlu2 %2313  ;;  %v2501_v60 = vadd.f32 %v2500_v6, %v2499_v54  ;;  %v2540_v25 = vrot.slane %v2539_v48, 4  ;;  %v2508_v35 = vadd.f32 %v2507_v51, %v2506_v21  ;;  %v2385_v3 = vsel %vm9591_vm5, %v2347_v24, 0.0  ;;  %vm9595_vm9 = vmmov %vm9580_vm0 }
 0x60d   : > { %v2371_v53 = vmul.f32 %v2314_v36, %v7459_v7  ;;  %v2495_v16 = vrot.slane %v2494_v52, 1  ;;  %v2521_v46 = vrot.slane %v2520_v49, 2  ;;  %v2528_v28 = vrot.slane %v2527_v4, 2  ;;  %vm9596_vm8 = vmmov %vm9580_vm0 }
 0x60e   : > { %v2534_v29 = vadd.f32 %v2533_v23, %v2532_v55  ;;  %v2502_v33 = vrot.slane %v2501_v60, 1  ;;  %v2541_v2 = vadd.f32 %v2540_v25, %v2539_v48  ;;  %v2509_v12 = vrot.slane %v2508_v35, 1  ;;  %vm9597_vm11 = vmmov %vm9580_vm0 }
 0x60f   : > { %v2553_v36 = vsel %vm9592_vm14, %v2371_v53, 0.0  ;;  %v2386_v41 = vrot.slane %v2385_v3, 4  ;;  %v2496_v59 = vadd.f32 %v2495_v16, %v2494_v52  ;;  %v2529_v21 = vadd.f32 %v2528_v28, %v2527_v4  ;;  %vm9601_vm6 = vmmov %vm9580_vm0 }
 0x610   : > { %v2554_v34 = vrot.slane %v2553_v36, 4  ;;  %v2535_v45 = vrot.slane %v2534_v29, 2  ;;  %v2503_v40 = vadd.f32 %v2502_v33, %v2501_v60  ;;  %v2542_v42 = vrot.slane %v2541_v2, 2  ;;  %vm9604_vm3 = vmmov %vm9590_vm4 }
 0x611   : > { %v2387_v44 = vadd.f32 %v2386_v41, %v2385_v3  ;;  %v2510_v51 = vadd.f32 %v2509_v12, %v2508_v35  ;;  %vm9598_vm12 = vcmask 1041409   ;;  %vm9599_vm13 = vcmask 1042434   ;;  %vm9606_vm5 = vmmov %vm9580_vm0 }
 0x612   : > { %v2648_v52 = vsel %vm9598_vm12, %v2503_v40, %v2496_v59  ;;  %v2536_v53 = vadd.f32 %v2535_v45, %v2534_v29  ;;  %v2543_v35 = vadd.f32 %v2542_v42, %v2541_v2  ;;  %vm9600_vm15 = vcmask 1043459   ;;  %vm9607_vm14 = vmmov %vm9580_vm0 }
 0x613   : > { %v2649_v3 = vsel %vm9599_vm13, %v2510_v51, %v2648_v52  ;;  %vm9602_vm1 = vcmask 1044484   ;;  %vm9603_vm2 = vcmask 1045509   ;;  %vm9605_vm4 = vcmask 1046534  }
 0x614   : > { %v2319_v15 = vpop.permute.xlu2 %2318 }
 0x615   : > { %v2372_v32 = vmul.f32 %v2319_v15, %v7459_v7  ;;  %v2515_v15 = vadd.f32 %v2514_v19, %v2513_v8 }
 0x617   : > { %v2560_v11 = vsel %vm9594_vm10, %v2372_v32, 0.0  ;;  %v2516_v54 = vrot.slane %v2515_v15, 1  ;;  %vm9609_vm10 = vmmov %vm9580_vm0 }
 0x618   : > { %v7417_v37 = vpop.permute.xlu1 %2198  ;;  %v2561_v58 = vrot.slane %v2560_v11, 4 }
 0x619   : > { %v2348_v27 = vmul.f32 %v7417_v37, %v7453_v17  ;;  %v2517_v24 = vadd.f32 %v2516_v54, %v2515_v15 }
 0x61a   : > { %v2189_v10 = vpop.permute.xlu0 %2188 }
 0x61b   : > { %v2346_v38 = vmul.f32 %v2189_v10, %v7453_v17  ;;  %v2392_v37 = vsel %vm9580_vm0, %v2348_v27, 0.0 }
 0x61c   : > { %v7428_v0 = vpop.permute.xlu2 %2208  ;;  %v2393_v43 = vrot.slane %v2392_v37, 4 }
 0x61d   : > { %v2378_v10 = vsel %vm9593_vm7, %v2346_v38, 0.0  ;;  %v2350_v13 = vmul.f32 %v7428_v0, %v7453_v17  ;;  %v2562_v0 = vadd.f32 %v2561_v58, %v2560_v11  ;;  %v2388_v38 = vrot.slane %v2387_v44, 2  ;;  %vm9608_vm7 = vmmov %vm9580_vm0 }
 0x61e   : > { %v2379_v57 = vrot.slane %v2378_v10, 4  ;;  %v2394_v19 = vadd.f32 %v2393_v43, %v2392_v37  ;;  %v2544_v37 = vrot.slane %v2543_v35, 1  ;;  %vm9610_vm0 = vmmov %vm9598_vm12 }
 0x61f   : > { %v2406_v48 = vsel %vm9597_vm11, %v2350_v13, 0.0  ;;  %v2389_v29 = vadd.f32 %v2388_v38, %v2387_v44  ;;  %vm9613_vm11 = vmmov %vm9599_vm13 }
 0x620   : > { %v7422_v5 = vpop.permute.xlu1 %2203  ;;  %v2380_v9 = vadd.f32 %v2379_v57, %v2378_v10  ;;  %v2407_v25 = vrot.slane %v2406_v48, 4  ;;  %v2395_v11 = vrot.slane %v2394_v19, 2  ;;  %vm9614_vm12 = vmmov %vm9606_vm5 }
 0x621   : > { %v2349_v30 = vmul.f32 %v7422_v5, %v7453_v17  ;;  %v2522_v5 = vadd.f32 %v2521_v46, %v2520_v49  ;;  %v2530_v49 = vrot.slane %v2529_v21, 1  ;;  %v2563_v46 = vrot.slane %v2562_v0, 2  ;;  %vm9615_vm13 = vmmov %vm9606_vm5 }
 0x622   : > { %v2381_v60 = vrot.slane %v2380_v9, 2  ;;  %v2390_v54 = vrot.slane %v2389_v29, 1 }
 0x623   : > { %v2399_v56 = vsel %vm9595_vm9, %v2349_v30, 0.0  ;;  %v2523_v55 = vrot.slane %v2522_v5, 1  ;;  %v2531_v10 = vadd.f32 %v2530_v49, %v2529_v21  ;;  %v2537_v30 = vrot.slane %v2536_v53, 1  ;;  %vm9611_vm9 = vmmov %vm9606_vm5 }
 0x624   : > { %v2400_v8 = vrot.slane %v2399_v56, 4  ;;  %v2382_v41 = vadd.f32 %v2381_v60, %v2380_v9  ;;  %v2396_v21 = vadd.f32 %v2395_v11, %v2394_v19  ;;  %v7501_v9 = vadd.f32 %v2544_v37, %v2543_v35 }
 0x625   : > { %v7430_v22 = vpop.permute.xlu0 %2308  ;;  %v2524_v27 = vadd.f32 %v2523_v55, %v2522_v5  ;;  %v731_v5 = vrot.slane %v7441_v26, 4  ;;  %v2538_v13 = vadd.f32 %v2537_v30, %v2536_v53 }
 0x626   : > { %v2370_v1 = vmul.f32 %v7430_v22, %v7459_v7  ;;  %v2555_v22 = vadd.f32 %v2554_v34, %v2553_v36  ;;  %v2401_v16 = vadd.f32 %v2400_v8, %v2399_v56  ;;  %v2650_v36 = vsel %vm9600_vm15, %v2517_v24, %v2649_v3 }
 0x627   : > { %v2408_v34 = vadd.f32 %v2407_v25, %v2406_v48  ;;  %v2651_v57 = vsel %vm9602_vm1, %v2524_v27, %v2650_v36  ;;  %v2383_v44 = vrot.slane %v2382_v41, 1  ;;  %v7505_v26 = vsel %vm9604_vm3, %v7433_v39, %v731_v5  ;;  %vm9617_vm1 = vmmov %vm9606_vm5 }
 0x628   : > { %v7437_v18 = vpop.permute.xlu1 %2213  ;;  %v2546_v31 = vsel %vm9596_vm8, %v2370_v1, 0.0  ;;  %v2556_v32 = vrot.slane %v2555_v22, 2  ;;  %v2402_v2 = vrot.slane %v2401_v16, 2  ;;  %v2564_v1 = vadd.f32 %v2563_v46, %v2562_v0  ;;  %vm9612_vm8 = vmmov %vm9606_vm5 }
 0x629   : > { %v2547_v4 = vrot.slane %v2546_v31, 4  ;;  %v2351_v23 = vmul.f32 %v7437_v18, %v7453_v17  ;;  %v2652_v58 = vsel %vm9603_vm2, %v2531_v10, %v2651_v57  ;;  %v2409_v43 = vrot.slane %v2408_v34, 2  ;;  %vm9618_vm2 = vmmov %vm9610_vm0 }
 0x62a   : > { %v2557_v12 = vadd.f32 %v2556_v32, %v2555_v22  ;;  %v2403_v22 = vadd.f32 %v2402_v2, %v2401_v16  ;;  %v2565_v8 = vrot.slane %v2564_v1, 1  ;;  %v2391_v0 = vadd.f32 %v2390_v54, %v2389_v29  ;;  %vm9619_vm3 = vmmov %vm9617_vm1 }
 0x62b   : > { %v7446_v61 = vpop.permute.xlu2 %2328  ;;  %v2548_v33 = vadd.f32 %v2547_v4, %v2546_v31  ;;  %v2413_v18 = vsel %vm9601_vm6, %v2351_v23, 0.0  ;;  %v7508_v31 = vsel %vm9605_vm4, %v2538_v13, %v2652_v58  ;;  %v2397_v48 = vrot.slane %v2396_v21, 1  ;;  %vm9616_vm6 = vmmov %vm9606_vm5 }
 0x62c   : > { %v2414_v56 = vrot.slane %v2413_v18, 4  ;;  %v2374_v40 = vmul.f32 %v7446_v61, %v7459_v7  ;;  %v2558_v42 = vrot.slane %v2557_v12, 1  ;;  %v2384_v53 = vadd.f32 %v2383_v44, %v2382_v41 }
 0x62d   : > { %v2549_v45 = vrot.slane %v2548_v33, 2  ;;  %v2410_v38 = vadd.f32 %v2409_v43, %v2408_v34  ;;  %v2404_v39 = vrot.slane %v2403_v22, 1  ;;  %v7515_v23 = vadd.f32 %v2565_v8, %v2564_v1 }
 0x62e   : > { %v2415_v51 = vadd.f32 %v2414_v56, %v2413_v18  ;;  %v2574_v24 = vsel %vm9606_vm5, %v2374_v40, 0.0  ;;  %v2559_v49 = vadd.f32 %v2558_v42, %v2557_v12  ;;  %v2398_v3 = vadd.f32 %v2397_v48, %v2396_v21  ;;  %vm9621_vm5 = vmmov %vm9617_vm1 }
 0x62f   : > { %v2550_v52 = vadd.f32 %v2549_v45, %v2548_v33  ;;  %v2575_v60 = vrot.slane %v2574_v24, 4  ;;  %v2634_v10 = vsel %vm9610_vm0, %v2391_v0, %v2384_v53  ;;  %v2405_v30 = vadd.f32 %v2404_v39, %v2403_v22 }
 0x630   : > { %v7448_v14 = vpop.permute.xlu0 %2323  ;;  %v2416_v25 = vrot.slane %v2415_v51, 2  ;;  %v2635_v2 = vsel %vm9613_vm11, %v2398_v3, %v2634_v10  ;;  %vm9620_vm4 = vcmask 1044484   ;;  %vm9625_vm0 = vcmask 1045509  }
 0x631   : > { %v7464_v63 = vpop.permute.xlu1 %2333  ;;  %v2373_v55 = vmul.f32 %v7448_v14, %v7459_v7  ;;  %v2551_v27 = vrot.slane %v2550_v52, 1  ;;  %v2576_v12 = vadd.f32 %v2575_v60, %v2574_v24  ;;  %v2636_v54 = vsel %vm9600_vm15, %v2405_v30, %v2635_v2 }
 0x632   : > { %v2375_v46 = vmul.f32 %v7464_v63, %v7459_v7  ;;  %v2417_v41 = vadd.f32 %v2416_v25, %v2415_v51 }
 0x633   : > { %v7477_v50 = vpop.permute.xlu2 %2233  ;;  %v2567_v16 = vsel %vm9607_vm14, %v2373_v55, 0.0  ;;  %v2552_v37 = vadd.f32 %v2551_v27, %v2550_v52  ;;  %v2577_v45 = vrot.slane %v2576_v12, 2  ;;  %vm9622_vm14 = vmmov %vm9613_vm11  ;;  %vm9628_vm11 = vcmask 1046534  }
 0x634   : > { %v2355_v32 = vmul.f32 %v7477_v50, %v7505_v26  ;;  %v2411_v50 = vrot.slane %v2410_v38, 1  ;;  %v2568_v29 = vrot.slane %v2567_v16, 4  ;;  %v2581_v57 = vsel %vm9614_vm12, %v2375_v46, 0.0  ;;  %vm9629_vm12 = vmmov %vm9618_vm2 }
 0x635   : > { %v2418_v40 = vrot.slane %v2417_v41, 1  ;;  %v2582_v22 = vrot.slane %v2581_v57, 4  ;;  %v2655_v51 = vsel %vm9618_vm2, %v2559_v49, %v2552_v37 }
 0x636   : > { %v2441_v11 = vsel %vm9611_vm9, %v2355_v32, 0.0  ;;  %v2569_v21 = vadd.f32 %v2568_v29, %v2567_v16  ;;  %v2656_v25 = vsel %vm9622_vm14, %v7515_v23, %v2655_v51  ;;  %vm9626_vm9 = vmmov %vm9617_vm1 }
 0x637   : > { %v2442_v5 = vrot.slane %v2441_v11, 4  ;;  %v2419_v49 = vadd.f32 %v2418_v40, %v2417_v41 }
 0x638   : > { %v2570_v48 = vrot.slane %v2569_v21, 2 }
 0x639   : > { %v2443_v55 = vadd.f32 %v2442_v5, %v2441_v11 }
 0x63a   : > { %v2571_v3 = vadd.f32 %v2570_v48, %v2569_v21 }
 0x63b   : > { %v2444_v16 = vrot.slane %v2443_v55, 2 }
 0x63c   : > { %v7479_v20 = vpop.permute.xlu0 %2218 }
 0x63d   : > { %v2352_v61 = vmul.f32 %v7479_v20, %v7453_v17 }
 0x63e   : > { %v7485_v6 = vpop.permute.xlu1 %2338 }
 0x63f   : > { %v2420_v35 = vsel %vm9608_vm7, %v2352_v61, 0.0  ;;  %v2376_v63 = vmul.f32 %v7485_v6, %v7459_v7  ;;  %vm9623_vm7 = vmmov %vm9617_vm1 }
 0x640   : > { %v2421_v33 = vrot.slane %v2420_v35, 4 }
 0x641   : > { %v7493_v15 = vpop.permute.xlu2 %2248  ;;  %v2588_v42 = vsel %vm9616_vm6, %v2376_v63, 0.0  ;;  %vm9632_vm6 = vmmov %vm9620_vm4 }
 0x642   : > { %v2358_v58 = vmul.f32 %v7493_v15, %v7505_v26  ;;  %v2422_v6 = vadd.f32 %v2421_v33, %v2420_v35  ;;  %v2589_v24 = vrot.slane %v2588_v42, 4 }
 0x644   : > { %v2224_v28 = vpop.permute.xlu0 %2223  ;;  %v2462_v61 = vsel %vm9619_vm3, %v2358_v58, 0.0  ;;  %v2423_v52 = vrot.slane %v2422_v6, 2  ;;  %v2590_v46 = vadd.f32 %v2589_v24, %v2588_v42  ;;  %vm9635_vm3 = vmmov %vm9625_vm0 }
 0x645   : > { %v2353_v14 = vmul.f32 %v2224_v28, %v7453_v17 }
 0x646   : > { %v2239_v59 = vpop.permute.xlu1 %2238  ;;  %v2424_v27 = vadd.f32 %v2423_v52, %v2422_v6  ;;  %v2591_v37 = vrot.slane %v2590_v46, 2 }
 0x647   : > { %v2356_v17 = vmul.f32 %v2239_v59, %v7505_v26  ;;  %v2427_v18 = vsel %vm9612_vm8, %v2353_v14, 0.0  ;;  %v2412_v59 = vadd.f32 %v2411_v50, %v2410_v38  ;;  %v2578_v38 = vadd.f32 %v2577_v45, %v2576_v12  ;;  %vm9627_vm8 = vmmov %vm9600_vm15 }
 0x648   : > { %v2428_v13 = vrot.slane %v2427_v18, 4  ;;  %v2463_v14 = vrot.slane %v2462_v61, 4  ;;  %v2445_v12 = vadd.f32 %v2444_v16, %v2443_v55  ;;  %v2425_v2 = vrot.slane %v2424_v27, 1  ;;  %vm9634_vm2 = vmmov %vm9627_vm8 }
 0x649   : > { %v2254_v19 = vpop.permute.xlu2 %2253  ;;  %v2448_v56 = vsel %vm9615_vm13, %v2356_v17, 0.0  ;;  %v2637_v39 = vsel %vm9620_vm4, %v2412_v59, %v2636_v54  ;;  %v2579_v29 = vrot.slane %v2578_v38, 1  ;;  %vm9630_vm13 = vcmask 1047559   ;;  %vm9636_vm4 = vmmov %vm9628_vm11 }
 0x64a   : > { %v2449_v8 = vrot.slane %v2448_v56, 4  ;;  %v2429_v0 = vadd.f32 %v2428_v13, %v2427_v18  ;;  %v2464_v33 = vadd.f32 %v2463_v14, %v2462_v61  ;;  %v2446_v45 = vrot.slane %v2445_v12, 1  ;;  %vm9631_vm15 = vmmov %vm9630_vm13 }
 0x64b   : > { %v2580_v6 = vadd.f32 %v2579_v29, %v2578_v38 }
 0x64c   : > { %v2450_v60 = vadd.f32 %v2449_v8, %v2448_v56  ;;  %v2430_v35 = vrot.slane %v2429_v0, 2  ;;  %v2465_v59 = vrot.slane %v2464_v33, 2 }
 0x64e   : > { %v2451_v18 = vrot.slane %v2450_v60, 2  ;;  %v2431_v41 = vadd.f32 %v2430_v35, %v2429_v0  ;;  %v2466_v48 = vadd.f32 %v2465_v59, %v2464_v33 }
 0x64f   : > { %v2229_v4 = vpop.permute.xlu0 %2228 }
 0x650   : > { %v2354_v20 = vmul.f32 %v2229_v4, %v7505_v26  ;;  %v2452_v54 = vadd.f32 %v2451_v18, %v2450_v60  ;;  %v2432_v40 = vrot.slane %v2431_v41, 1  ;;  %v2467_v35 = vrot.slane %v2466_v48, 1 }
 0x651   : > { %v2344_v28 = vpop.permute.xlu1 %2343  ;;  %v2264_v43 = vpop.permute.xlu2 %2263 }
 0x652   : > { %v2434_v36 = vsel %vm9609_vm10, %v2354_v20, 0.0  ;;  %v2377_v1 = vmul.f32 %v2344_v28, %v7459_v7  ;;  %v2359_v7 = vmul.f32 %v2254_v19, %v7505_v26  ;;  %v2361_v53 = vmul.f32 %v2264_v43, %v7505_v26  ;;  %vm9624_vm10 = vmmov %vm9617_vm1 }
 0x653   : > { %v2435_v34 = vrot.slane %v2434_v36, 4  ;;  %v2583_v19 = vadd.f32 %v2582_v22, %v2581_v57  ;;  %v2426_v43 = vadd.f32 %v2425_v2, %v2424_v27  ;;  %v2592_v22 = vadd.f32 %v2591_v37, %v2590_v46 }
 0x654   : > { %v2595_v15 = vsel %vm9617_vm1, %v2377_v1, 0.0  ;;  %v2469_v20 = vsel %vm9621_vm5, %v2359_v7, 0.0  ;;  %v2638_v1 = vsel %vm9625_vm0, %v2419_v49, %v2637_v39  ;;  %v2453_v52 = vrot.slane %v2452_v54, 1  ;;  %vm9633_vm1 = vmmov %vm9622_vm14 }
 0x655   : > { %v2436_v44 = vadd.f32 %v2435_v34, %v2434_v36  ;;  %v2596_v32 = vrot.slane %v2595_v15, 4  ;;  %v2483_v36 = vsel %vm9623_vm7, %v2361_v53, 0.0  ;;  %v2470_v50 = vrot.slane %v2469_v20, 4  ;;  %vm9638_vm14 = vmmov %vm9632_vm6 }
 0x656   : > { %v2584_v11 = vrot.slane %v2583_v19, 2  ;;  %v2484_v23 = vrot.slane %v2483_v36, 4  ;;  %v2572_v34 = vrot.slane %v2571_v3, 1  ;;  %v2447_v53 = vadd.f32 %v2446_v45, %v2445_v12  ;;  %vm9639_vm7 = vmmov %vm9630_vm13 }
 0x657   : > { %v2437_v4 = vrot.slane %v2436_v44, 2  ;;  %v2597_v17 = vadd.f32 %v2596_v32, %v2595_v15  ;;  %v2471_v5 = vadd.f32 %v2470_v50, %v2469_v20  ;;  %v2433_v39 = vadd.f32 %v2432_v40, %v2431_v41 }
 0x658   : > { %v2585_v56 = vadd.f32 %v2584_v11, %v2583_v19  ;;  %v2485_v42 = vadd.f32 %v2484_v23, %v2483_v36  ;;  %v2593_v19 = vrot.slane %v2592_v22, 1  ;;  %v2639_v60 = vsel %vm9628_vm11, %v2426_v43, %v2638_v1 }
 0x659   : > { %v2438_v30 = vadd.f32 %v2437_v4, %v2436_v44  ;;  %v2598_v13 = vrot.slane %v2597_v17, 2  ;;  %v2573_v44 = vadd.f32 %v2572_v34, %v2571_v3  ;;  %v2472_v15 = vrot.slane %v2471_v5, 2 }
 0x65a   : > { %v2586_v0 = vrot.slane %v2585_v56, 1  ;;  %v2486_v38 = vrot.slane %v2485_v42, 2  ;;  %v2454_v3 = vadd.f32 %v2453_v52, %v2452_v54  ;;  %v2654_v36 = vsel %vm9630_vm13, %v7501_v9, %v7508_v31 }
 0x65b   : > { %v2439_v58 = vrot.slane %v2438_v30, 1  ;;  %v2599_v55 = vadd.f32 %v2598_v13, %v2597_v17  ;;  %v2657_v32 = vsel %vm9627_vm8, %v2573_v44, %v2656_v25  ;;  %v2473_v49 = vadd.f32 %v2472_v15, %v2471_v5  ;;  %vm9642_vm8 = vmmov %vm9639_vm7 }
 0x65c   : > { %v2640_v25 = vsel %vm9631_vm15, %v2433_v39, %v2639_v60  ;;  %v2487_v50 = vadd.f32 %v2486_v38, %v2485_v42  ;;  %v2594_v17 = vadd.f32 %v2593_v19, %v2592_v22  ;;  %v2666_v12 = vrot.slane %v2654_v36, 4 }
 0x65d   : > { %v2244_v10 = vpop.permute.xlu0 %2243  ;;  %v2440_v51 = vadd.f32 %v2439_v58, %v2438_v30  ;;  %v2658_v30 = vsel %vm9632_vm6, %v2580_v6, %v2657_v32  ;;  %v2474_v11 = vrot.slane %v2473_v49, 1  ;;  %v2468_v41 = vadd.f32 %v2467_v35, %v2466_v48 }
 0x65e   : > { %v2357_v28 = vmul.f32 %v2244_v10, %v7505_v26  ;;  %v2587_v10 = vadd.f32 %v2586_v0, %v2585_v56  ;;  %v2668_v23 = vrot.slane %v2640_v25, 4  ;;  %v2488_v31 = vrot.slane %v2487_v50, 1 }
 0x65f   : > { %v2641_v16 = vsel %vm9629_vm12, %v2447_v53, %v2440_v51  ;;  %vm9637_vm5 = vcmask 1047556   ;;  %v2475_v1 = vadd.f32 %v2474_v11, %v2473_v49 }
 0x660   : > { %v2455_v63 = vsel %vm9624_vm10, %v2357_v28, 0.0  ;;  %v2642_v28 = vsel %vm9633_vm1, %v2454_v3, %v2641_v16  ;;  %v2659_v9 = vsel %vm9635_vm3, %v2587_v10, %v2658_v30  ;;  %v2667_v2 = vsel %vm9637_vm5, %v2666_v12, %v2640_v25  ;;  %vm9640_vm10 = vmmov %vm9637_vm5 }
 0x661   : > { %v2456_v57 = vrot.slane %v2455_v63, 4  ;;  %v2660_v34 = vsel %vm9636_vm4, %v2594_v17, %v2659_v9  ;;  %v2669_v58 = vsel %vm9640_vm10, %v2654_v36, %v2668_v23  ;;  %v2673_v56 = vperm.slane %v2667_v2, %v9560_v47  ;;  %vm9643_vm11 = vmmov %vm9637_vm5 }
 0x662   : > { %v2489_v59 = vadd.f32 %v2488_v31, %v2487_v50  ;;  %v2677_v45 = vperm.slane %v2669_v58, %v9560_v47  ;;  %vm9644_vm12 = vmmov %vm9637_vm5 }
 0x663   : > { %v2457_v21 = vadd.f32 %v2456_v57, %v2455_v63  ;;  %v2692_v43 = vrot.slane %v2673_v56, 4  ;;  %vm9645_vm13 = vmmov %vm9637_vm5 }
 0x664   : > { %vm9646_vm15 = vmmov %vm9637_vm5 }
 0x665   : > { %v2458_v7 = vrot.slane %v2457_v21, 2  ;;  %v2259_v8 = vpop.permute.xlu0 %2258  ;;  %vm9647_vm6 = vmmov %vm9637_vm5 }
 0x666   : > { %v2360_v61 = vmul.f32 %v2259_v8, %v7505_v26  ;;  %v2600_v26 = vrot.slane %v2599_v55, 1  ;;  %v2704_v8 = vrot.slane %v2677_v45, 4  ;;  %vm9648_vm1 = vmmov %vm9637_vm5 }
 0x667   : > { %v2459_v24 = vadd.f32 %v2458_v7, %v2457_v21  ;;  %vm9650_vm3 = vmmov %vm9648_vm1 }
 0x668   : > { %v2476_v4 = vsel %vm9626_vm9, %v2360_v61, 0.0  ;;  %v2601_v33 = vadd.f32 %v2600_v26, %v2599_v55  ;;  %vm9641_vm9 = vmmov %vm9636_vm4 }
 0x669   : > { %v2460_v14 = vrot.slane %v2459_v24, 1  ;;  %v2477_v20 = vrot.slane %v2476_v4, 4  ;;  %vm9651_vm4 = vmmov %vm9648_vm1 }
 0x66a   : > { %v2661_v5 = vsel %vm9639_vm7, %v2601_v33, %v2660_v34  ;;  %vm9652_vm5 = vmmov %vm9648_vm1 }
 0x66b   : > { %v2461_v27 = vadd.f32 %v2460_v14, %v2459_v24  ;;  %v2478_v46 = vadd.f32 %v2477_v20, %v2476_v4  ;;  %v2678_v21 = vrot.slane %v2661_v5, 4  ;;  %vm9654_vm7 = vmmov %vm9648_vm1 }
 0x66c   : > { %vm9655_vm10 = vmmov %vm9648_vm1 }
 0x66d   : > { %v2479_v29 = vrot.slane %v2478_v46, 2  ;;  %v2643_v18 = vsel %vm9634_vm2, %v2461_v27, %v2642_v28  ;;  %vm9649_vm2 = vmmov %vm9648_vm1 }
 0x66e   : > { %v2644_v37 = vsel %vm9638_vm14, %v2468_v41, %v2643_v18  ;;  %vm9653_vm14 = vmmov %vm9648_vm1 }
 0x66f   : > { %v2480_v63 = vadd.f32 %v2479_v29, %v2478_v46  ;;  %v2645_v54 = vsel %vm9625_vm0, %v2475_v1, %v2644_v37  ;;  %vm9656_vm0 = vmmov %vm9648_vm1 }
 0x671   : > { %v2481_v57 = vrot.slane %v2480_v63, 1 }
 0x673   : > { %v2482_v13 = vadd.f32 %v2481_v57, %v2480_v63 }
 0x675   : > { %v2646_v6 = vsel %vm9641_vm9, %v2482_v13, %v2645_v54  ;;  %vm9657_vm9 = vmmov %vm9656_vm0  ;;  %v2794_v54 = vld [vmem:[%s9407_s3 + $0x8] sm:$0xff] }
 0x676   : > { %v2647_v40 = vsel %vm9642_vm8, %v2489_v59, %v2646_v6  ;;  %vm9658_vm8 = vmmov %vm9656_vm0  ;;  %v2795_v59 = vld [vmem:[%s9407_s3 + $0x10] sm:$0xff] }
 0x677   : > { %v2679_v42 = vsel %vm9643_vm11, %v2678_v21, %v2647_v40  ;;  %v2680_v44 = vrot.slane %v2647_v40, 4  ;;  %vm9659_vm11 = vmmov %vm9656_vm0  ;;  %v2793_v21 = vld [vmem:[%s9407_s3] sm:$0xff] }
 0x678   : > { %v2685_v22 = vperm.slane %v2679_v42, %v9560_v47 }
 0x679   : > { %v2681_v7 = vsel %vm9644_vm12, %v2661_v5, %v2680_v44  ;;  %vm9660_vm12 = vmmov %vm9656_vm0 }
 0x67a   : > { %v2689_v15 = vperm.slane %v2681_v7, %v9560_v47  ;;  %v2690_v51 = vrot.slane %v2685_v22, 4  ;;  %v2693_v55 = vsel %vm9645_vm13, %v2685_v22, %v2692_v43  ;;  %vm9661_vm13 = vmmov %vm9656_vm0  ;;  %v7634_v22 = vld [vmem:[%s9405_s1] sm:$0xff] }
 0x67b   : > { %v2701_v61 = vperm.slane %v2693_v55, %v9565_v62  ;;  %v2797_v7 = vperm.slane %v7634_v22, 3 }
 0x67c   : > { %v2702_v0 = vrot.slane %v2689_v15, 4  ;;  %v2691_v48 = vsel %vm9646_vm15, %v2690_v51, %v2673_v56  ;;  %v2705_v52 = vsel %vm9647_vm6, %v2689_v15, %v2704_v8  ;;  %vm9662_vm15 = vmmov %vm9656_vm0  ;;  %v2796_v56 = vld [vmem:[%s9407_s3 + $0x18] sm:$0xff]  ;;  %v6057_v51 = vld [vmem:[%s6234_s21] sm:$0xff] }
 0x67d   : > { %v2697_v24 = vperm.slane %v2691_v48, %v9565_v62  ;;  %v2713_v53 = vperm.slane %v2705_v52, %v9565_v62  ;;  %v2716_v39 = vrot.slane %v2701_v61, 4  ;;  %vm9663_vm6 = vmmov %vm9656_vm0  ;;  %2813 = vmatpush.msra.mxu1 %v2796_v56  ;;  %v9668_v48 = vld [vmem:[#allocation5_spill] sm:$0xff] }
 0x67e   : > { %v2703_v38 = vsel %vm9648_vm1, %v2702_v0, %v2677_v45  ;;  %vm9664_vm1 = vmmov %vm9656_vm0  ;;  %v2926_v56 = vld [vmem:[%s9409_s5 + $0x30] sm:$0xff] }
 0x67f   : > { %v2709_v4 = vperm.slane %v2703_v38, %v9565_v62  ;;  %v2714_v32 = vrot.slane %v2697_v24, 4  ;;  %v2717_v19 = vsel %vm9649_vm2, 0.0, %v2716_v39  ;;  %v2720_v14 = vrot.slane %v2713_v53, 4  ;;  %2814 = vmatpush.msra.mxu1 %v2795_v59  ;;  %v2851_v38 = vld [vmem:[%s9408_s4 + $0x18] sm:$0xff] }
 0x680   : > { %v2722_v20 = vsel %vm9650_vm3, %v2716_v39, %v2697_v24  ;;  %v2727_v60 = vrot.slane %v2717_v19, 4  ;;  %vm9489_vm2 = vcmask 130048   ;;  %vm9478_vm3 = vcmask 195584   ;;  %2868 = vmatpush.msrb.mxu2 %v2851_v38  ;;  %v2848_v19 = vld [vmem:[%s9408_s4] sm:$0xff] }
 0x681   : > { %v2715_v49 = vsel %vm9651_vm4, 0.0, %v2714_v32  ;;  %v2718_v16 = vrot.slane %v2709_v4, 4  ;;  %v2721_v26 = vsel %vm9652_vm5, 0.0, %v2720_v14  ;;  %v2726_v35 = vperm.slane %v2722_v20, %v9560_v47  ;;  %2815 = vmatpush.msra.mxu1 %v2794_v54  ;;  %v2849_v32 = vld [vmem:[%s9408_s4 + $0x8] sm:$0xff] }
 0x682   : > { %v2728_v3 = vsel %vm9653_vm14, %v2727_v60, %v2715_v49  ;;  %v2733_v27 = vsel %vm9654_vm7, %v2720_v14, %v2709_v4  ;;  %v2738_v46 = vrot.slane %v2721_v26, 4  ;;  %vm9665_vm4 = vcmask 64512   ;;  %v2850_v4 = vld [vmem:[%s9408_s4 + $0x10] sm:$0xff]  ;;  %v2925_v54 = vld [vmem:[%s9409_s5 + $0x28] sm:$0xff] }
 0x683   : > { %v2719_v36 = vsel %vm9655_vm10, 0.0, %v2718_v16  ;;  %v2732_v10 = vperm.slane %v2728_v3, %v9560_v47  ;;  %v2737_v25 = vperm.slane %v2733_v27, %v9560_v47  ;;  %v2746_v50 = vrot.slane %v2726_v35, 4  ;;  %2816 = vmatpush.msra.mxu1 %v2793_v21  ;;  %2869 = vmatpush.msrb.mxu2 %v2850_v4 }
 0x684   : > { %v2739_v30 = vsel %vm9656_vm0, %v2738_v46, %v2719_v36  ;;  %vm9666_vm5 = vcmask 261120   ;;  %v2844_v46 = vperm.slane %v7634_v22, 4 }
 0x685   : > { %v2743_v17 = vperm.slane %v2739_v30, %v9560_v47  ;;  %v2747_v28 = vsel %vm9657_vm9, %v2732_v10, %v2746_v50  ;;  %v2758_v29 = vrot.slane %v2737_v25, 4  ;;  %v2744_v11 = vrot.slane %v2732_v10, 4  ;;  %vm9667_vm14 = vmmov %vm9666_vm5  ;;  %2870 = vmatpush.msrb.mxu2 %v2849_v32 }
 0x686   : > { %v2755_v33 = vperm.slane %v2747_v28, %v9565_v62  ;;  %vm9669_vm7 = vmmov %vm9666_vm5  ;;  %v2935_v28 = vld [vmem:[%s9409_s5 + $0x78] sm:$0xff] }
 0x687   : > { %v2759_v18 = vsel %vm9658_vm8, %v2743_v17, %v2758_v29  ;;  %v2745_v12 = vsel %vm9659_vm11, %v2744_v11, %v2726_v35  ;;  %v2756_v41 = vrot.slane %v2743_v17, 4  ;;  %2871 = vmatpush.msrb.mxu2 %v2848_v19  ;;  %vm9670_vm8 = vmmov %vm9666_vm5  ;;  %v2852_v17 = vperm.slane %v7634_v22, 6  ;;  %v2934_v29 = vld [vmem:[%s9409_s5 + $0x70] sm:$0xff]  ;;  %2937 = vmatpush.msra.mxu3 %v2935_v28  ;;  %v2933_v11 = vld [vmem:[%s9409_s5 + $0x68] sm:$0xff] }
 0x688   : > { %v2767_v23 = vperm.slane %v2759_v18, %v9565_v62  ;;  %v2774_v63 = vrot.slane %v2755_v33, 4  ;;  %v2751_v9 = vperm.slane %v2745_v12, %v9565_v62  ;;  %v2932_v12 = vld [vmem:[%s9409_s5 + $0x60] sm:$0xff] }
 0x689   : > { %v2757_v31 = vsel %vm9660_vm12, %v2756_v41, %v2737_v25  ;;  %v2846_v25 = vperm.slane %v7634_v22, 5  ;;  %2938 = vmatpush.msra.mxu3 %v2934_v29 }
 0x68a   : > { %v2775_v34 = vsel %vm9661_vm13, %v2767_v23, %v2774_v63  ;;  %v2772_v2 = vrot.slane %v2767_v23, 4  ;;  %v2763_v37 = vperm.slane %v2757_v31, %v9565_v62  ;;  %v2770_v57 = vrot.slane %v2751_v9, 4  ;;  %v2931_v23 = vld [vmem:[%s9409_s5 + $0x58] sm:$0xff] }
 0x68b   : > { %2785 = vrot.lane.b32.xlu2 %v2775_v34, %s9456_s25  ;;  %2939 = vmatpush.msra.mxu3 %v2933_v11  ;;  %v2929_v34 = vld [vmem:[%s9409_s5 + $0x48] sm:$0xff] }
 0x68c   : > { %v2773_v1 = vsel %vm9662_vm15, %v2772_v2, %v2755_v33  ;;  %v2771_v5 = vsel %vm9663_vm6, %v2763_v37, %v2770_v57  ;;  %v2768_v58 = vrot.slane %v2763_v37, 4  ;;  %v2928_v37 = vld [vmem:[%s9409_s5 + $0x40] sm:$0xff]  ;;  %vm9672_vm6 = vmmov %vm9666_vm5 }
 0x68d   : > { %2781 = vrot.lane.b32.xlu0 %v2773_v1, %s9459_s26  ;;  %2777 = vrot.lane.b32.xlu1 %v2771_v5, %s6135_s10  ;;  %v2927_v5 = vld [vmem:[%s9409_s5 + $0x38] sm:$0xff]  ;;  %s5584_s26 = scalar_lea.sflag [#allocation3], %s294_s13 }
 0x68e   : > { %v2769_v13 = vsel %vm9664_vm1, %v2768_v58, %v2751_v9  ;;  %2940 = vmatpush.msra.mxu3 %v2932_v12  ;;  %v2930_v9 = vld [vmem:[%s9409_s5 + $0x50] sm:$0xff]  ;;  %vm9673_vm1 = vmmov %vm9666_vm5 }
 0x690   : > { %2941 = vmatpush.msra.mxu3 %v2931_v23 }
 0x692   : > { %2942 = vmatpush.msra.mxu3 %v2930_v9  ;;  %v5670_v9 = vld [vmem:[%s9406_s2 + $0x20] sm:$0xff] }
 0x694   : > { %2943 = vmatpush.msra.mxu3 %v2929_v34 }
 0x696   : > { %2944 = vmatpush.msra.mxu3 %v2928_v37 }
 0x698   : > { %2945 = vmatpush.msra.mxu3 %v2927_v5 }
 0x69a   : > { %2946 = vmatpush.msra.mxu3 %v2926_v56 }
 0x69c   : > { %2947 = vmatpush.msra.mxu3 %v2925_v54 }
 0x6e5   : > { %v2786_v42 = vpop.permute.xlu2 %2785 }
 0x6ff   : > { %v2782_v6 = vpop.permute.xlu0 %2781  ;;  %v2778_v45 = vpop.permute.xlu1 %2777 }
 0x700   : > { %v2788_v40 = vsel %vm9665_vm4, %v2769_v13, %v2778_v45  ;;  %v2924_v45 = vld [vmem:[%s9409_s5 + $0x20] sm:$0xff] }
 0x701   : > { %v2790_v44 = vsel %vm9489_vm2, %v2788_v40, %v2782_v6  ;;  %2948 = vmatpush.msra.mxu3 %v2924_v45 }
 0x702   : > { %v2792_v43 = vsel %vm9478_vm3, %v2790_v44, %v2786_v42  ;;  %v2923_v42 = vld [vmem:[%s9409_s5 + $0x18] sm:$0xff] }
 0x703   : > { %5666 = vmatmul.msk.f32.vlgmr.msra.gmra.mxu1 %vm9666_vm5, %v2792_v43  ;;  %2949 = vmatpush.msra.mxu3 %v2923_v42 }
 0x780   : > { %v2818_v8 = vpop.f32.mrf.mxu1 }
 0x781   : > { %v2819_v15 = vadd.f32 %v2818_v8, %v2797_v7  ;;  %v2922_v7 = vld [vmem:[%s9409_s5 + $0x10] sm:$0xff] }
 0x782   : > { %2950 = vmatpush.msra.mxu3 %v2922_v7 }
 0x783   : > { %v7638_v55 = vadd.f32 %v6057_v51, %v2819_v15  ;;  %v2921_v15 = vld [vmem:[%s9409_s5 + $0x8] sm:$0xff] }
 0x784   : > { %2951 = vmatpush.msra.mxu3 %v2921_v15 }
 0x785   : > { %v2822_v61 = vsel %vm9667_vm14, %v7638_v55, 0.0 }
 0x786   : > { %2823 = vadd.xlane.f32.xlu1 %v2822_v61 }
 0x7f9   : > { %v2824_v0 = vpop.xlane.xlu1 %2823 }
 0x7fa   : > { %v2825_v52 = vmul.f32 %v2824_v0, %v9668_v48  ;;  %v2920_v0 = vld [vmem:[%s9409_s5] sm:$0xff] }
 0x7fb   : > { %2952 = vmatpush.msra.mxu3 %v2920_v0 }
 0x7fc   : > { %v2826_v24 = vsub.f32 %v7638_v55, %v2825_v52 }
 0x7fe   : > { %v2827_v53 = vmul.f32 %v2826_v24, %v2826_v24 }
 0x800   : > { %v2828_v39 = vsel %vm9669_vm7, %v2827_v53, 0.0  ;;  %vm9674_vm7 = vmmov %vm9673_vm1 }
 0x801   : > { %2829 = vadd.xlane.f32.xlu0 %v2828_v39 }
 0x874   : > { %v2830_v14 = vpop.xlane.xlu0 %2829 }
 0x875   : > { %v2831_v20 = vmul.f32 %v2830_v14, %v9668_v48 }
 0x877   : > { %v2832_v60 = vadd.f32 1e-05, %v2831_v20 }
 0x879   : > { %5916 = vrsqrt.f32 %v2832_v60  ;;  %vm2839_vm0 = vweird.f32 %v2832_v60 }
 0x87f   : > { %v5917_v49 = vpop.eup %5916 }
 0x880   : > { %v2834_v16 = vmul.f32 %v5917_v49, %v2832_v60  ;;  %vm2840_vm10 = vweird.f32 %v5917_v49 }
 0x881   : > { %vm2841_vm9 = vmor %vm2839_vm0, %vm2840_vm10  ;;  %vm9677_vm10 = vcmask 1047556  }
 0x882   : > { %v2835_v26 = vmul.f32 %v5917_v49, %v2834_v16  ;;  %vm9678_vm0 = vmmov %vm9677_vm10 }
 0x884   : > { %v2836_v35 = vmul.f32 0.5, %v2835_v26 }
 0x886   : > { %v2837_v3 = vsub.f32 1.5, %v2836_v35 }
 0x888   : > { %v2838_v27 = vmul.f32 %v5917_v49, %v2837_v3 }
 0x88a   : > { %v2842_v36 = vsel %vm2841_vm9, %v5917_v49, %v2838_v27  ;;  %vm9679_vm9 = vmmov %vm9678_vm0 }
 0x88b   : > { %v2843_v10 = vmul.f32 %v2842_v36, %v2826_v24 }
 0x88d   : > { %v2845_v50 = vmul.f32 %v2844_v46, %v2843_v10 }
 0x88f   : > { %v2847_v30 = vadd.f32 %v2846_v25, %v2845_v50 }
 0x891   : > { %5667 = vmatmul.msk.f32.vlgmr.msrb.gmra.mxu2 %vm9670_vm8, %v2847_v30  ;;  %v2936_v30 = vperm.slane %v7634_v22, 7  ;;  %v5673_v22 = vld [vmem:[%s9406_s2 + $0x38] sm:$0xff]  ;;  %vm9680_vm8 = vmmov %vm9678_vm0 }
 0x892   : > { %3007 = vmatpush.msrb.mxu1 %v5673_v22 }
 0x914   : > { %v2873_v33 = vpop.f32.mrf.mxu2 }
 0x915   : > { %v7671_v18 = vadd.f32 %v2873_v33, %v2852_v17 }
 0x917   : > { %v2877_v41 = vmul.f32 0.70710677, %v7671_v18  ;;  %v2876_v10 = vmul.f32 0.5, %v7671_v18 }
 0x919   : > { %v2878_v63 = vmul.f32 %v2877_v41, %v2877_v41 }
 0x91b   : > { %v2879_v31 = vmin.f32 %v2878_v63, 16.0  ;;  %v5671_v63 = vld [vmem:[%s9406_s2 + $0x28] sm:$0xff] }
 0x91d   : > { %v2880_v2 = vmul.f32 2.1237322e-06, %v2879_v31  ;;  %v2891_v57 = vmul.f32 3.8918573e-05, %v2879_v31 }
 0x91f   : > { %v2881_v1 = vadd.f32 0.00028619796, %v2880_v2  ;;  %v2892_v58 = vadd.f32 0.001143296, %v2891_v57 }
 0x921   : > { %v2882_v13 = vmul.f32 %v2881_v1, %v2879_v31  ;;  %v2893_v59 = vmul.f32 %v2892_v58, %v2879_v31 }
 0x923   : > { %v2894_v21 = vadd.f32 0.014752088, %v2893_v59  ;;  %v2883_v6 = vadd.f32 0.0036580483, %v2882_v13  ;;  %v5669_v13 = vld [vmem:[%s9405_s1 + $0x8] sm:$0xff] }
 0x924   : > { %v2982_v59 = vperm.slane %v5669_v13, 0  ;;  %v2991_v42 = vperm.slane %v5669_v13, 2 }
 0x925   : > { %v2895_v40 = vmul.f32 %v2894_v21, %v2879_v31  ;;  %v2884_v43 = vmul.f32 %v2883_v6, %v2879_v31  ;;  %v2984_v6 = vperm.slane %v5669_v13, 1 }
 0x927   : > { %v2896_v44 = vadd.f32 0.112945676, %v2895_v40  ;;  %v2885_v61 = vadd.f32 0.05243302, %v2884_v43 }
 0x929   : > { %v2897_v8 = vmul.f32 %v2896_v44, %v2879_v31  ;;  %v2886_v53 = vmul.f32 %v2885_v61, %v2879_v31 }
 0x92b   : > { %v2898_v51 = vadd.f32 0.4994258, %v2897_v8  ;;  %v2887_v39 = vadd.f32 0.18741608, %v2886_v53 }
 0x92d   : > { %v2899_v52 = vmul.f32 %v2898_v51, %v2879_v31  ;;  %v2888_v4 = vmul.f32 %v2887_v39, %v2879_v31 }
 0x92f   : > { %v2900_v24 = vadd.f32 1.0, %v2899_v52  ;;  %v2889_v20 = vadd.f32 1.1283791, %v2888_v4 }
 0x931   : > { %5918 = vrcp.f32 %v2900_v24  ;;  %v2912_v14 = vand.u32 2147483648, %v2900_v24  ;;  %v2910_v49 = vand.u32 2147483647, %v2900_v24  ;;  %vm2906_vm12 = vweird.f32 %v2900_v24 }
 0x932   : > { %v2890_v35 = vmul.f32 %v2889_v20, %v2877_v41 }
 0x933   : > { %v2913_v26 = vor.u32 1.1754944e-38, %v2912_v14  ;;  %vm2911_vm15 = vcmp.eq.f32.partialorder %v2910_v49, 8.507059e+37 }
 0x937   : > { %v5919_v38 = vpop.eup %5918 }
 0x938   : > { %v2902_v32 = vmul.f32 %v5919_v38, %v2900_v24  ;;  %vm2907_vm11 = vweird.f32 %v5919_v38 }
 0x939   : > { %vm2908_vm13 = vmor %vm2906_vm12, %vm2907_vm11 }
 0x93a   : > { %v2903_v19 = vsub.f32 1.0, %v2902_v32  ;;  %vm9681_vm11 = vmmov %vm9678_vm0 }
 0x93b   : > { %vm9682_vm12 = vmmov %vm9678_vm0 }
 0x93c   : > { %v2904_v60 = vmul.f32 %v5919_v38, %v2903_v19 }
 0x93e   : > { %v2905_v16 = vadd.f32 %v5919_v38, %v2904_v60 }
 0x940   : > { %v2909_v3 = vsel %vm2908_vm13, %v5919_v38, %v2905_v16  ;;  %vm9683_vm13 = vmmov %vm9678_vm0 }
 0x941   : > { %v2914_v27 = vsel %vm2911_vm15, %v2913_v26, %v2909_v3  ;;  %vm9684_vm15 = vmmov %vm9678_vm0 }
 0x942   : > { %v2915_v46 = vmul.f32 %v2914_v27, %v2890_v35 }
 0x944   : > { %v5668_v36 = vclamps-f32 %v2915_v46, 1.0 }
 0x946   : > { %v2918_v25 = vadd.f32 1.0, %v5668_v36 }
 0x948   : > { %v2919_v50 = vmul.f32 %v2918_v25, %v2876_v10 }
 0x94a   : > { %2953 = vmatmul.f32.vlgmr.msra.gmra.mxu3 %v2919_v50 }
 0x9cd   : > { %v2954_v17 = vpop.f32.mrf.mxu3 }
 0x9ce   : > { %v2955_v28 = vadd.f32 %v2954_v17, %v2936_v30 }
 0x9d0   : > { %v7716_v29 = vadd.f32 %v2955_v28, %v7638_v55  ;;  %v5672_v55 = vld [vmem:[%s9406_s2 + $0x30] sm:$0xff] }
 0x9d1   : > { %3008 = vmatpush.msrb.mxu1 %v5672_v55 }
 0x9d2   : > { %9671 = vst [vmem:[#allocation21_spill] sm:$0xff] %v7716_v29  ;;  %v2960_v11 = vsel %vm9672_vm6, %v7716_v29, 0.0  ;;  %vm9685_vm6 = vmmov %vm9678_vm0 }
 0x9d3   : > { %2961 = vadd.xlane.f32.xlu2 %v2960_v11  ;;  %3009 = vmatpush.msrb.mxu1 %v5671_v63 }
 0x9d5   : > { %3010 = vmatpush.msrb.mxu1 %v5670_v9 }
 0xa46   : > { %v2962_v33 = vpop.xlane.xlu2 %2961 }
 0xa47   : > { %v2963_v12 = vmul.f32 %v2962_v33, %v9668_v48 }
 0xa49   : > { %v2964_v41 = vsub.f32 %v7716_v29, %v2963_v12 }
 0xa4b   : > { %v2965_v18 = vmul.f32 %v2964_v41, %v2964_v41 }
 0xa4d   : > { %v2966_v23 = vsel %vm9673_vm1, %v2965_v18, 0.0  ;;  %vm9686_vm1 = vmmov %vm9678_vm0 }
 0xa4e   : > { %2967 = vadd.xlane.f32.xlu1 %v2966_v23 }
 0xac1   : > { %v2968_v31 = vpop.xlane.xlu1 %2967 }
 0xac2   : > { %v2969_v34 = vmul.f32 %v2968_v31, %v9668_v48 }
 0xac4   : > { %v2970_v2 = vadd.f32 1e-05, %v2969_v34 }
 0xac6   : > { %5920 = vrsqrt.f32 %v2970_v2  ;;  %vm2977_vm5 = vweird.f32 %v2970_v2 }
 0xacc   : > { %v5921_v37 = vpop.eup %5920 }
 0xacd   : > { %v2972_v57 = vmul.f32 %v5921_v37, %v2970_v2  ;;  %vm2978_vm4 = vweird.f32 %v5921_v37 }
 0xace   : > { %vm2979_vm14 = vmor %vm2977_vm5, %vm2978_vm4 }
 0xacf   : > { %v2973_v1 = vmul.f32 %v5921_v37, %v2972_v57  ;;  %vm9687_vm4 = vmmov %vm9678_vm0 }
 0xad0   : > { %vm9688_vm5 = vmmov %vm9678_vm0 }
 0xad1   : > { %v2974_v5 = vmul.f32 0.5, %v2973_v1 }
 0xad3   : > { %v2975_v58 = vsub.f32 1.5, %v2974_v5 }
 0xad5   : > { %v2976_v56 = vmul.f32 %v5921_v37, %v2975_v58 }
 0xad7   : > { %v2980_v54 = vsel %vm2979_vm14, %v5921_v37, %v2976_v56  ;;  %vm9689_vm14 = vmmov %vm9678_vm0 }
 0xad8   : > { %v2981_v21 = vmul.f32 %v2980_v54, %v2964_v41 }
 0xada   : > { %v2983_v45 = vmul.f32 %v2982_v59, %v2981_v21 }
 0xadc   : > { %v2985_v40 = vadd.f32 %v2984_v6, %v2983_v45 }
 0xade   : > { %5674 = vmatmul.msk.f32.vlgmr.msrb.gmra.mxu1 %vm9674_vm7, %v2985_v40  ;;  %vm9690_vm7 = vmmov %vm9678_vm0 }
 0xb5b   : > { %v3012_v44 = vpop.f32.mrf.mxu1 }
 0xb5c   : > { %v3013_v43 = vadd.f32 %v3012_v44, %v2991_v42 }
 0xb5e   : > { %3022 = vrot.lane.b32.xlu1 %v3013_v43, %s6125_s19  ;;  %3019 = vrot.lane.b32.xlu0 %v3013_v43, %s6128_s23  ;;  %v3027_v51 = vrot.slane %v3013_v43, 4  ;;  %s10018_s19 = smov 24  }
 0xb5f   : > { %3016 = vrot.lane.b32.xlu2 %v3013_v43, %s6126_s20  ;;  %s10021_s20 = smov 16  }
 0xb66   : > { %3135 = vrot.lane.b32.xlu0 %v3013_v43, %s9675_s17 }
 0xb6e   : > { %3257 = vrot.lane.b32.xlu0 %v3013_v43, %s9676_s18 }
 0xbb9   : > { %v3017_v7 = vpop.permute.xlu2 %3016 }
 0xbba   : > { %3137 = vrot.lane.b32.xlu2 %v3017_v7, %s9675_s17  ;;  %v3039_v24 = vrot.slane %v3017_v7, 4 }
 0xbc2   : > { %3259 = vrot.lane.b32.xlu2 %v3017_v7, %s9676_s18 }
 0xbd0   : > { %v3023_v8 = vpop.permute.xlu1 %3022  ;;  %v3020_v15 = vpop.permute.xlu0 %3019 }
 0xbd1   : > { %3141 = vrot.lane.b32.xlu1 %v3023_v8, %s9675_s17  ;;  %3139 = vrot.lane.b32.xlu0 %v3020_v15, %s9675_s17  ;;  %v3025_v61 = vrot.slane %v3020_v15, 4  ;;  %v3028_v0 = vsel %vm9677_vm10, %v3020_v15, %v3027_v51  ;;  %v3037_v39 = vrot.slane %v3023_v8, 4  ;;  %v3040_v38 = vsel %vm9679_vm9, %v3023_v8, %v3039_v24  ;;  %vm9691_vm10 = vmmov %vm9678_vm0  ;;  %s5662_s17 = sshll.u32 %s294_s13, 3 }
 0xbd2   : > { %v3036_v52 = vperm.slane %v3028_v0, %v9560_v47  ;;  %v3048_v19 = vperm.slane %v3040_v38, %v9560_v47  ;;  %vm9692_vm9 = vmmov %vm9678_vm0  ;;  %s296_s24 = scalar_lea.vmem [#allocation2], %s5662_s17 }
 0xbd3   : > { %v3026_v53 = vsel %vm9678_vm0, %v3025_v61, %v3013_v43  ;;  %v3038_v14 = vsel %vm9680_vm8, %v3037_v39, %v3017_v7  ;;  %vm9693_vm8 = vmmov %vm9678_vm0  ;;  %s5596_s25 = sshll.u32 %s296_s24, 4  ;;  %s5597_s25 = int_to_ptr.vmem [resolvable:$true] %s5596_s25 }
 0xbd4   : > { %v3032_v4 = vperm.slane %v3026_v53, %v9560_v47  ;;  %v3063_v32 = vrot.slane %v3036_v52, 4  ;;  %v3044_v16 = vperm.slane %v3038_v14, %v9560_v47  ;;  %v3061_v26 = vrot.slane %v3048_v19, 4 }
 0xbd6   : > { %v3051_v20 = vrot.slane %v3032_v4, 4  ;;  %v3064_v60 = vsel %vm9681_vm11, %v3048_v19, %v3063_v32  ;;  %v3049_v27 = vrot.slane %v3044_v16, 4  ;;  %v3062_v46 = vsel %vm9683_vm13, %v3061_v26, %v3036_v52  ;;  %vm9694_vm11 = vmmov %vm9678_vm0 }
 0xbd7   : > { %v3072_v35 = vperm.slane %v3064_v60, %v9565_v62  ;;  %v3068_v25 = vperm.slane %v3062_v46, %v9565_v62  ;;  %vm9696_vm13 = vmmov %vm9678_vm0 }
 0xbd8   : > { %v3136_v49 = vpop.permute.xlu0 %3135  ;;  %v3052_v3 = vsel %vm9682_vm12, %v3044_v16, %v3051_v20  ;;  %v3050_v50 = vsel %vm9684_vm15, %v3049_v27, %v3032_v4  ;;  %vm9695_vm12 = vmmov %vm9678_vm0 }
 0xbd9   : > { %3261 = vrot.lane.b32.xlu1 %v3020_v15, %s9676_s18  ;;  %3263 = vrot.lane.b32.xlu0 %v3023_v8, %s9676_s18  ;;  %v3060_v36 = vperm.slane %v3052_v3, %v9565_v62  ;;  %v3079_v10 = vrot.slane %v3072_v35, 4  ;;  %v3056_v11 = vperm.slane %v3050_v50, %v9565_v62  ;;  %v3077_v33 = vrot.slane %v3068_v25, 4  ;;  %vm9697_vm15 = vmmov %vm9678_vm0  ;;  %s5704_s18 = sshll.u32 %s6202_s9, 3 }
 0xbda   : > { %v3149_v9 = vrot.slane %v3136_v49, 4  ;;  %s5594_s23 = scalar_lea.hbm %s9412_s8, %s5704_s18 }
 0xbdb   : > { %v3075_v30 = vrot.slane %v3060_v36, 4  ;;  %v3080_v17 = vsel %vm9685_vm6, 0.0, %v3079_v10  ;;  %v3092_v18 = vsel %vm9687_vm4, %v3079_v10, %v3068_v25  ;;  %v3073_v55 = vrot.slane %v3056_v11, 4  ;;  %vm9698_vm6 = vmmov %vm9678_vm0  ;;  %s5598_s22 = sshll.u32 %s5594_s23, 4  ;;  %s5599_s22 = int_to_ptr.hbm [resolvable:$true] %s5598_s22 }
 0xbdc   : > { %v3097_v12 = vrot.slane %v3080_v17, 4  ;;  %v3078_v63 = vsel %vm9689_vm14, 0.0, %v3077_v33  ;;  %v7775_v34 = vperm.slane %v3092_v18, %v9560_v47  ;;  %vm9700_vm4 = vmmov %vm9678_vm0  ;;  %s6073_s21 = sshra.s32 %s5599_s22, 4  ;;  %s6074_s21 = int_to_ptr.hbm [resolvable:$true] %s6073_s21 }
 0xbdd   : > { %v3076_v41 = vsel %vm9686_vm1, 0.0, %v3075_v30  ;;  %v3081_v22 = vsel %vm9688_vm5, %v3075_v30, %v3056_v11  ;;  %v3074_v54 = vsel %vm9692_vm9, 0.0, %v3073_v55  ;;  %vm9699_vm1 = vmmov %vm9678_vm0  ;;  %s6075_s12 = scalar_lea.hbm %s6074_s21, 8  ;;  %p6080_p0 = scmp.lt.s32.totalorder %s6074_s21, %s9412_s8 }
 0xbde   : > { %v3086_v31 = vrot.slane %v3076_v41, 4  ;;  %v3098_v2 = vsel %vm9690_vm7, %v3097_v12, %v3078_v63  ;;  %v7779_v57 = vperm.slane %v3081_v22, %v9560_v47  ;;  %v3117_v42 = vrot.slane %v7775_v34, 4  ;;  %vm9701_vm5 = vmmov %vm9678_vm0  ;;  %p6076_p11 = scmp.ne.s32.totalorder %s6074_s21, %s6075_s12 }
 0xbdf   : > { %v3102_v21 = vperm.slane %v3098_v2, %v9560_v47  ;;  %vm9702_vm14 = vmmov %vm9678_vm0 }
 0xbe0   : > { %v7767_v28 = vpop.permute.xlu0 %3257  ;;  %v3087_v40 = vsel %vm9693_vm8, %v3086_v31, %v3074_v54  ;;  %v3105_v61 = vrot.slane %v7779_v57, 4  ;;  %vm9703_vm7 = vmmov %vm9678_vm0  ;;  %p6077_p12 = pnand %p6076_p11, %p6219_p5 }
 0xbe1   : > { %v3091_v39 = vperm.slane %v3087_v40, %v9560_v47  ;;  %v3118_v38 = vsel %vm9698_vm6, %v3102_v21, %v3117_v42  ;;  %vm9705_vm9 = vmmov %vm9678_vm0 }
 0xbe2   : > { %v7805_v26 = vperm.slane %v3118_v38, %v9565_v62  ;;  %vm9706_vm8 = vmmov %vm9678_vm0  ;;  %p6078_p13 = pneg %p6077_p12 }
 0xbe3   : > { %v3106_v46 = vsel %vm9702_vm14, %v3091_v39, %v3105_v61  ;;  %vm9711_vm6 = vmmov %vm9678_vm0 }
 0xbe4   : > { %v7817_v41 = vperm.slane %v3106_v46, %v9565_v62  ;;  %v3131_v55 = vrot.slane %v7805_v26, 4  ;;  %vm9715_vm14 = vmmov %vm9678_vm0 }
 0xc14   : > { %v3138_v23 = vpop.permute.xlu2 %3137 }
 0xc15   : > { %v3161_v37 = vrot.slane %v3138_v23, 4 }
 0xc43   : > { %v3142_v1 = vpop.permute.xlu1 %3141  ;;  %v3140_v5 = vpop.permute.xlu0 %3139 }
 0xc44   : > { %v3159_v58 = vrot.slane %v3142_v1, 4  ;;  %v3162_v13 = vsel %vm9691_vm10, %v3142_v1, %v3161_v37  ;;  %v3147_v56 = vrot.slane %v3140_v5, 4  ;;  %v3150_v59 = vsel %vm9678_vm0, %v3140_v5, %v3149_v9  ;;  %vm9704_vm10 = vmmov %vm9678_vm0 }
 0xc45   : > { %v3170_v6 = vperm.slane %v3162_v13, %v9560_v47  ;;  %v3158_v45 = vperm.slane %v3150_v59, %v9560_v47  ;;  %v3115_v37 = vrot.slane %v3102_v21, 4  ;;  %v3103_v13 = vrot.slane %v3091_v39, 4 }
 0xc46   : > { %v3160_v44 = vsel %vm9694_vm11, %v3159_v58, %v3138_v23  ;;  %v3148_v43 = vsel %vm9695_vm12, %v3147_v56, %v3136_v49  ;;  %vm9707_vm11 = vmmov %vm9678_vm0 }
 0xc47   : > { %v3166_v7 = vperm.slane %v3160_v44, %v9560_v47  ;;  %v3183_v8 = vrot.slane %v3170_v6, 4  ;;  %v3154_v15 = vperm.slane %v3148_v43, %v9560_v47  ;;  %v3185_v51 = vrot.slane %v3158_v45, 4  ;;  %vm9708_vm12 = vmmov %vm9678_vm0 }
 0xc49   : > { %v3171_v0 = vrot.slane %v3166_v7, 4  ;;  %v3173_v52 = vrot.slane %v3154_v15, 4  ;;  %v3184_v24 = vsel %vm9696_vm13, %v3183_v8, %v3158_v45  ;;  %v3186_v53 = vsel %vm9697_vm15, %v3170_v6, %v3185_v51  ;;  %vm9709_vm13 = vmmov %vm9678_vm0 }
 0xc4a   : > { %v3190_v4 = vperm.slane %v3184_v24, %v9565_v62  ;;  %v3194_v32 = vperm.slane %v3186_v53, %v9565_v62  ;;  %vm9710_vm15 = vmmov %vm9678_vm0 }
 0xc4b   : > { %v3172_v19 = vsel %vm9699_vm1, %v3171_v0, %v3154_v15  ;;  %v3174_v14 = vsel %vm9700_vm4, %v3166_v7, %v3173_v52  ;;  %v3132_v5 = vsel %vm9710_vm15, %v3131_v55, %v7817_v41  ;;  %vm9712_vm1 = vmmov %vm9678_vm0 }
 0xc4c   : > { %v3178_v20 = vperm.slane %v3172_v19, %v9565_v62  ;;  %v3182_v60 = vperm.slane %v3174_v14, %v9565_v62  ;;  %v3199_v49 = vrot.slane %v3190_v4, 4  ;;  %v3201_v16 = vrot.slane %v3194_v32, 4  ;;  %vm9713_vm4 = vmmov %vm9678_vm0 }
 0xc4d   : > { %v3116_v56 = vsel %vm9712_vm1, %v3115_v37, %v7775_v34  ;;  %v3398_v54 = vrot.slane %v3132_v5, 2  ;;  %v3397_v6 = vrot.slane %v3132_v5, 1  ;;  %v3427_v42 = vperm.slane %v3132_v5, 0  ;;  %vm9724_vm15 = vmmov %vm9712_vm1 }
 0xc4e   : > { %v3195_v35 = vrot.slane %v3178_v20, 4  ;;  %v3197_v3 = vrot.slane %v3182_v60, 4  ;;  %v3202_v27 = vsel %vm9701_vm5, 0.0, %v3201_v16  ;;  %v3214_v36 = vsel %vm9703_vm7, %v3201_v16, %v3190_v4  ;;  %vm9714_vm5 = vmmov %vm9678_vm0 }
 0xc4f   : > { %v3219_v10 = vrot.slane %v3202_v27, 4  ;;  %v3200_v50 = vsel %vm9678_vm0, 0.0, %v3199_v49  ;;  %v3218_v17 = vperm.slane %v3214_v36, %v9560_v47  ;;  %v7838_v40 = vperm.slane %v3116_v56, %v9565_v62 }
 0xc50   : > { %v3198_v25 = vsel %vm9704_vm10, 0.0, %v3197_v3  ;;  %v3203_v30 = vsel %vm9705_vm9, %v3197_v3, %v3178_v20  ;;  %v3196_v18 = vsel %vm9707_vm11, 0.0, %v3195_v35  ;;  %v3429_v43 = vperm.slane %v3398_v54, 0  ;;  %vm9719_vm9 = vmmov %vm9712_vm1 }
 0xc51   : > { %v3207_v11 = vperm.slane %v3203_v30, %v9560_v47  ;;  %v3208_v33 = vrot.slane %v3198_v25, 4  ;;  %v3220_v12 = vsel %vm9706_vm8, %v3219_v10, %v3200_v50  ;;  %v3239_v22 = vrot.slane %v3218_v17, 4  ;;  %vm9720_vm8 = vmmov %vm9712_vm1 }
 0xc52   : > { %v3224_v23 = vperm.slane %v3220_v12, %v9560_v47  ;;  %v3428_v7 = vperm.slane %v3397_v6, 0  ;;  %v3104_v34 = vsel %vm9714_vm5, %v3103_v13, %v7779_v57  ;;  %v3400_v15 = vrot.slane %v3132_v5, 4 }
 0xc53   : > { %v3209_v63 = vsel %vm9708_vm12, %v3208_v33, %v3196_v18  ;;  %v3227_v9 = vrot.slane %v3207_v11, 4  ;;  %v3399_v51 = vrot.slane %v3132_v5, 3  ;;  %v3403_v61 = vrot.slane %v3132_v5, 7 }
 0xc54   : > { %v3213_v31 = vperm.slane %v3209_v63, %v9560_v47  ;;  %v3240_v2 = vsel %vm9709_vm13, %v3224_v23, %v3239_v22  ;;  %v3237_v21 = vrot.slane %v3224_v23, 4  ;;  %vm9716_vm7 = vcmask 64512  }
 0xc55   : > { %v7826_v1 = vperm.slane %v3240_v2, %v9565_v62  ;;  %v7847_v38 = vperm.slane %v3104_v34, %v9565_v62  ;;  %v3127_v4 = vrot.slane %v7838_v40, 4  ;;  %vm9717_vm10 = vmmov %vm9716_vm7  ;;  %v3431_v14 = vperm.slane %v3400_v15, 0 }
 0xc56   : > { %v3228_v58 = vsel %vm9711_vm6, %v3213_v31, %v3227_v9  ;;  %v3225_v0 = vrot.slane %v3213_v31, 4  ;;  %v3238_v52 = vsel %vm9715_vm14, %v3237_v21, %v3218_v17  ;;  %vm9718_vm0 = vmmov %vm9716_vm7  ;;  %v3430_v60 = vperm.slane %v3399_v51, 0 }
 0xc57   : > { %v7834_v59 = vperm.slane %v3228_v58, %v9565_v62  ;;  %v3253_v45 = vrot.slane %v7826_v1, 4  ;;  %v7853_v19 = vperm.slane %v3238_v52, %v9565_v62  ;;  %v3434_v49 = vperm.slane %v3403_v61, 0  ;;  %vm9721_vm11 = vmmov %vm9718_vm0 }
 0xc58   : > { %v3226_v20 = vsel %vm9719_vm9, %v3225_v0, %v3207_v11  ;;  %v7858_v35 = vsel %vm9720_vm8, %v3127_v4, %v7847_v38  ;;  %v3402_v36 = vrot.slane %v3132_v5, 6  ;;  %v3401_v25 = vrot.slane %v3132_v5, 5  ;;  %vm9722_vm12 = vmmov %vm9718_vm0 }
 0xc59   : > { %v3254_v44 = vsel %vm9713_vm4, %v3253_v45, %v7834_v59  ;;  %v3249_v46 = vrot.slane %v7853_v19, 4  ;;  %v7862_v10 = vperm.slane %v3226_v20, %v9565_v62  ;;  %v3383_v50 = vrot.slane %v7858_v35, 1  ;;  %vm9723_vm13 = vmmov %vm9718_vm0 }
 0xc5a   : > { %v3491_v8 = vmul.f32 %v3427_v42, %v3254_v44  ;;  %v3493_v24 = vmul.f32 %v3429_v43, %v3254_v44  ;;  %v3492_v53 = vmul.f32 %v3428_v7, %v3254_v44  ;;  %v3495_v16 = vmul.f32 %v3431_v14, %v3254_v44  ;;  %vm9725_vm6 = vmmov %vm9712_vm1 }
 0xc5b   : > { %v3494_v3 = vmul.f32 %v3430_v60, %v3254_v44  ;;  %v3498_v27 = vmul.f32 %v3434_v49, %v3254_v44  ;;  %v3133_v17 = vrot.slane %v7817_v41, 4  ;;  %v3433_v12 = vperm.slane %v3402_v36, 0  ;;  %vm9726_vm1 = vmmov %vm9718_vm0 }
 0xc5c   : > { %v3555_v39 = vsel %vm9716_vm7, %v3491_v8, 0.0  ;;  %v3561_v32 = vsel %vm9717_vm10, %v3493_v24, 0.0  ;;  %v3558_v57 = vsel %vm9718_vm0, %v3492_v53, 0.0  ;;  %v3567_v30 = vsel %vm9721_vm11, %v3495_v16, 0.0  ;;  %vm9727_vm4 = vmmov %vm9718_vm0 }
 0xc5d   : > { %3556 = vadd.xlane.f32.xlu2 %v3555_v39  ;;  %3562 = vadd.xlane.f32.xlu1 %v3561_v32  ;;  %v3564_v11 = vsel %vm9722_vm12, %v3494_v3, 0.0  ;;  %v3576_v33 = vsel %vm9723_vm13, %v3498_v27, 0.0  ;;  %v7871_v18 = vsel %vm9724_vm15, %v3249_v46, %v7862_v10  ;;  %v3432_v23 = vperm.slane %v3401_v25, 0  ;;  %vm9728_vm5 = vmmov %vm9718_vm0 }
 0xc5e   : > { %3559 = vadd.xlane.f32.xlu0 %v3558_v57  ;;  %v3412_v22 = vperm.slane %v3383_v50, 0  ;;  %v3497_v55 = vmul.f32 %v3433_v12, %v3254_v44  ;;  %v7875_v63 = vsel %vm9725_vm6, %v7805_v26, %v3133_v17  ;;  %v3255_v31 = vrot.slane %v7834_v59, 4  ;;  %vm9729_vm14 = vmmov %vm9725_vm6 }
 0xc5f   : > { %v3496_v41 = vmul.f32 %v3432_v23, %v3254_v44  ;;  %v3384_v2 = vrot.slane %v7858_v35, 2  ;;  %v3404_v37 = vrot.slane %v7875_v63, 1  ;;  %v3411_v26 = vperm.slane %v7858_v35, 0  ;;  %vm9730_vm7 = vmmov %vm9718_vm0 }
 0xc60   : > { %v3476_v9 = vmul.f32 %v3412_v22, %v7871_v18  ;;  %v3573_v5 = vsel %vm9726_vm1, %v3497_v55, 0.0  ;;  %v7887_v56 = vsel %vm9729_vm14, %v7826_v1, %v3255_v31  ;;  %v3385_v42 = vrot.slane %v7858_v35, 3  ;;  %vm9731_vm10 = vmmov %vm9718_vm0 }
 0xc61   : > { %v3570_v58 = vsel %vm9727_vm4, %v3496_v41, 0.0  ;;  %v3413_v59 = vperm.slane %v3384_v2, 0  ;;  %v3436_v54 = vperm.slane %v3404_v37, 0  ;;  %v3475_v6 = vmul.f32 %v3411_v26, %v7871_v18  ;;  %vm9732_vm9 = vmmov %vm9718_vm0 }
 0xc62   : > { %v3510_v13 = vsel %vm9728_vm5, %v3476_v9, 0.0  ;;  %v3405_v44 = vrot.slane %v7875_v63, 2  ;;  %v3435_v34 = vperm.slane %v7875_v63, 0  ;;  %v3414_v8 = vperm.slane %v3385_v42, 0  ;;  %vm9733_vm8 = vmmov %vm9718_vm0 }
 0xc63   : > { %v3477_v45 = vmul.f32 %v3413_v59, %v7871_v18  ;;  %v3500_v21 = vmul.f32 %v3436_v54, %v7887_v56  ;;  %v3507_v43 = vsel %vm9730_vm7, %v3475_v6, 0.0  ;;  %v3406_v52 = vrot.slane %v7875_v63, 3  ;;  %vm9734_vm11 = vmmov %vm9718_vm0 }
 0xc64   : > { %v3437_v15 = vperm.slane %v3405_v44, 0  ;;  %v3499_v51 = vmul.f32 %v3435_v34, %v7887_v56  ;;  %v3478_v61 = vmul.f32 %v3414_v8, %v7871_v18  ;;  %v3387_v24 = vrot.slane %v7858_v35, 5  ;;  %vm9735_vm12 = vmmov %vm9718_vm0 }
 0xc65   : > { %3568 = vadd.xlane.f32.xlu2 %v3567_v30  ;;  %3565 = vadd.xlane.f32.xlu1 %v3564_v11  ;;  %v3513_v7 = vsel %vm9731_vm10, %v3477_v45, 0.0  ;;  %v3582_v1 = vsel %vm9718_vm0, %v3500_v21, 0.0  ;;  %v3386_v53 = vrot.slane %v7858_v35, 4  ;;  %v3438_v57 = vperm.slane %v3406_v52, 0  ;;  %vm9736_vm13 = vmmov %vm9718_vm0 }
 0xc66   : > { %3577 = vadd.xlane.f32.xlu0 %v3576_v33  ;;  %v3501_v0 = vmul.f32 %v3437_v15, %v7887_v56  ;;  %v3579_v39 = vsel %vm9732_vm9, %v3499_v51, 0.0  ;;  %v3516_v4 = vsel %vm9733_vm8, %v3478_v61, 0.0  ;;  %v3416_v14 = vperm.slane %v3387_v24, 0  ;;  %vm9737_vm15 = vmmov %vm9718_vm0 }
 0xc67   : > { %v3415_v20 = vperm.slane %v3386_v53, 0  ;;  %v3502_v60 = vmul.f32 %v3438_v57, %v7887_v56  ;;  %v3388_v3 = vrot.slane %v7858_v35, 6  ;;  %v3408_v27 = vrot.slane %v7875_v63, 5  ;;  %vm9738_vm1 = vmmov %vm9718_vm0 }
 0xc68   : > { %v3585_v32 = vsel %vm9734_vm11, %v3501_v0, 0.0  ;;  %v3480_v49 = vmul.f32 %v3416_v14, %v7871_v18  ;;  %v3407_v46 = vrot.slane %v7875_v63, 4  ;;  %v3129_v25 = vrot.slane %v7847_v38, 4  ;;  %vm9739_vm4 = vmmov %vm9718_vm0 }
 0xc69   : > { %v3479_v16 = vmul.f32 %v3415_v20, %v7871_v18  ;;  %v3588_v36 = vsel %vm9735_vm12, %v3502_v60, 0.0  ;;  %v3417_v17 = vperm.slane %v3388_v3, 0  ;;  %v3440_v11 = vperm.slane %v3408_v27, 0  ;;  %vm9740_vm5 = vmmov %vm9718_vm0 }
 0xc6a   : > { %v3522_v50 = vsel %vm9736_vm13, %v3480_v49, 0.0  ;;  %v3439_v33 = vperm.slane %v3407_v46, 0  ;;  %v3130_v23 = vsel %vm9725_vm6, %v7838_v40, %v3129_v25  ;;  %v3389_v38 = vrot.slane %v7858_v35, 7  ;;  %vm9741_vm14 = vmmov %vm9725_vm6  ;;  %v7947_v25 = vpop.permute.xlu1 %3261 }
 0xc6b   : > { %v3519_v30 = vsel %vm9737_vm15, %v3479_v16, 0.0  ;;  %v3481_v12 = vmul.f32 %v3417_v17, %v7871_v18  ;;  %v3504_v22 = vmul.f32 %v3440_v11, %v7887_v56  ;;  %v3251_v41 = vrot.slane %v7862_v10, 4  ;;  %vm9742_vm7 = vmmov %vm9718_vm0  ;;  %v9752_v17 = vld [vmem:[#allocation13_spill] sm:$0xff] }
 0xc6c   : > { %v3503_v55 = vmul.f32 %v3439_v33, %v7887_v56  ;;  %v3409_v9 = vrot.slane %v7875_v63, 6  ;;  %v3390_v31 = vrot.slane %v3130_v23, 1  ;;  %v3418_v40 = vperm.slane %v3389_v38, 0  ;;  %vm9743_vm10 = vmmov %vm9718_vm0 }
 0xc6d   : > { %3574 = vadd.xlane.f32.xlu2 %v3573_v5  ;;  %3571 = vadd.xlane.f32.xlu1 %v3570_v58  ;;  %v3525_v2 = vsel %vm9738_vm1, %v3481_v12, 0.0  ;;  %v3594_v37 = vsel %vm9739_vm4, %v3504_v22, 0.0  ;;  %v3252_v58 = vsel %vm9741_vm14, %v7853_v19, %v3251_v41  ;;  %v3410_v54 = vrot.slane %v7875_v63, 7  ;;  %vm9744_vm9 = vmmov %vm9718_vm0 }
 0xc6e   : > { %3511 = vadd.xlane.f32.xlu0 %v3510_v13  ;;  %v3591_v5 = vsel %vm9740_vm5, %v3503_v55, 0.0  ;;  %v3441_v13 = vperm.slane %v3409_v9, 0  ;;  %v3420_v35 = vperm.slane %v3390_v31, 0  ;;  %v3482_v10 = vmul.f32 %v3418_v40, %v7871_v18  ;;  %vm9745_vm8 = vmmov %vm9718_vm0  ;;  %v9754_v55 = vld [vmem:[#allocation17_spill] sm:$0xff]  ;;  %v9755_v9 = vld [vmem:[#allocation19_spill] sm:$0xff] }
 0xc6f   : > { %v3393_v6 = vrot.slane %v3130_v23, 4  ;;  %v3419_v19 = vperm.slane %v3130_v23, 0  ;;  %v3442_v44 = vperm.slane %v3410_v54, 0  ;;  %v3392_v34 = vrot.slane %v3130_v23, 3  ;;  %vm9746_vm11 = vmmov %vm9718_vm0 }
 0xc70   : > { %v3505_v26 = vmul.f32 %v3441_v13, %v7887_v56  ;;  %v3484_v59 = vmul.f32 %v3420_v35, %v3252_v58  ;;  %v3528_v45 = vsel %vm9742_vm7, %v3482_v10, 0.0  ;;  %v3391_v8 = vrot.slane %v3130_v23, 2  ;;  %vm9747_vm12 = vmmov %vm9718_vm0  ;;  %v9758_v10 = vld [vmem:[#allocation14_spill] sm:$0xff] }
 0xc71   : > { %v3506_v18 = vmul.f32 %v3442_v44, %v7887_v56  ;;  %v3394_v63 = vrot.slane %v3130_v23, 5  ;;  %v3422_v0 = vperm.slane %v3392_v34, 0  ;;  %v3395_v56 = vrot.slane %v3130_v23, 6  ;;  %vm9748_vm13 = vmmov %vm9718_vm0 }
 0xc72   : > { %v3597_v21 = vsel %vm9743_vm10, %v3505_v26, 0.0  ;;  %v3534_v42 = vsel %vm9718_vm0, %v3484_v59, 0.0  ;;  %v3421_v52 = vperm.slane %v3391_v8, 0  ;;  %vm9749_vm15 = vmmov %vm9718_vm0  ;;  %vm9761_vm4 = vcmask 1041409  }
 0xc73   : > { %v3600_v51 = vsel %vm9745_vm8, %v3506_v18, 0.0  ;;  %v3424_v24 = vperm.slane %v3394_v63, 0  ;;  %v3486_v53 = vmul.f32 %v3422_v0, %v3252_v58  ;;  %v3425_v60 = vperm.slane %v3395_v56, 0  ;;  %vm9750_vm6 = vmmov %vm9718_vm0 }
 0xc74   : > { %vm9751_vm1 = vmmov %vm9718_vm0  ;;  %vm9762_vm5 = vcmask 1042434   ;;  %vm9763_vm14 = vcmask 1043459   ;;  %vm9764_vm7 = vcmask 1044484   ;;  %vm9765_vm10 = vcmask 1045509  }
 0xc75   : > { %3508 = vadd.xlane.f32.xlu2 %v3507_v43  ;;  %3514 = vadd.xlane.f32.xlu1 %v3513_v7  ;;  %v3423_v43 = vperm.slane %v3393_v6, 0  ;;  %v3483_v7 = vmul.f32 %v3419_v19, %v3252_v58  ;;  %v3540_v57 = vsel %vm9747_vm12, %v3486_v53, 0.0  ;;  %v3489_v16 = vmul.f32 %v3425_v60, %v3252_v58  ;;  %v9759_v6 = vld [vmem:[#allocation20_spill] sm:$0xff]  ;;  %vm9768_vm8 = vmmov %vm9751_vm1 }
 0xc76   : > { %3583 = vadd.xlane.f32.xlu0 %v3582_v1  ;;  %vm9766_vm0 = vcmask 1046534   ;;  %vm9770_vm12 = vmmov %vm9762_vm5 }
 0xc77   : > { %v3487_v1 = vmul.f32 %v3423_v43, %v3252_v58  ;;  %v3531_v15 = vsel %vm9744_vm9, %v3483_v7, 0.0  ;;  %v3549_v27 = vsel %vm9750_vm6, %v3489_v16, 0.0  ;;  %vm9767_vm9 = vcmask 1047559   ;;  %vm9773_vm6 = vmmov %vm9765_vm10 }
 0xc79   : > { %v3543_v61 = vsel %vm9746_vm11, %v3487_v1, 0.0  ;;  %vm9769_vm11 = vmmov %vm9761_vm4 }
 0xc7d   : > { %3580 = vadd.xlane.f32.xlu2 %v3579_v39  ;;  %3517 = vadd.xlane.f32.xlu1 %v3516_v4  ;;  %v3485_v39 = vmul.f32 %v3421_v52, %v3252_v58  ;;  %v3488_v4 = vmul.f32 %v3424_v24, %v3252_v58 }
 0xc7e   : > { %3586 = vadd.xlane.f32.xlu0 %v3585_v32  ;;  %v3396_v32 = vrot.slane %v3130_v23, 7  ;;  %v9753_v23 = vld [vmem:[#allocation12_spill] sm:$0xff] }
 0xc7f   : > { %v3537_v14 = vsel %vm9748_vm13, %v3485_v39, 0.0  ;;  %v3546_v20 = vsel %vm9749_vm15, %v3488_v4, 0.0  ;;  %vm9771_vm13 = vmmov %vm9763_vm14 }
 0xc80   : > { %v3426_v49 = vperm.slane %v3396_v32, 0  ;;  %vm9772_vm15 = vmmov %vm9764_vm7 }
 0xc82   : > { %v3490_v3 = vmul.f32 %v3426_v49, %v3252_v58  ;;  %v9757_v58 = vld [vmem:[#allocation15_spill] sm:$0xff] }
 0xc84   : > { %v3552_v46 = vsel %vm9751_vm1, %v3490_v3, 0.0  ;;  %vm9774_vm1 = vmmov %vm9766_vm0 }
 0xc85   : > { %3589 = vadd.xlane.f32.xlu2 %v3588_v36  ;;  %3523 = vadd.xlane.f32.xlu1 %v3522_v50  ;;  %v7945_v36 = vpop.permute.xlu2 %3259  ;;  %v7949_v50 = vpop.permute.xlu0 %3263 }
 0xc86   : > { %3520 = vadd.xlane.f32.xlu0 %v3519_v30 }
 0xc8d   : > { %3526 = vadd.xlane.f32.xlu2 %v3525_v2  ;;  %3595 = vadd.xlane.f32.xlu1 %v3594_v37 }
 0xc8e   : > { %3592 = vadd.xlane.f32.xlu0 %v3591_v5  ;;  %v9756_v5 = vld [vmem:[#allocation18_spill] sm:$0xff] }
 0xc95   : > { %3529 = vadd.xlane.f32.xlu2 %v3528_v45  ;;  %3598 = vadd.xlane.f32.xlu1 %v3597_v21 }
 0xc96   : > { %3535 = vadd.xlane.f32.xlu0 %v3534_v42 }
 0xc9d   : > { %3532 = vadd.xlane.f32.xlu2 %v3531_v15  ;;  %3601 = vadd.xlane.f32.xlu1 %v3600_v51 }
 0xc9e   : > { %3544 = vadd.xlane.f32.xlu0 %v3543_v61 }
 0xca5   : > { %3541 = vadd.xlane.f32.xlu2 %v3540_v57  ;;  %3538 = vadd.xlane.f32.xlu1 %v3537_v14 }
 0xca6   : > { %3547 = vadd.xlane.f32.xlu0 %v3546_v20 }
 0xcad   : > { %3550 = vadd.xlane.f32.xlu2 %v3549_v27 }
 0xcae   : > { %3553 = vadd.xlane.f32.xlu0 %v3552_v46 }
 0xcd0   : > { %v3557_v30 = vpop.xlane.xlu2 %3556  ;;  %v3563_v33 = vpop.xlane.xlu1 %3562 }
 0xcd1   : > { %v7952_v11 = vadd.f32 %v9752_v17, %v3557_v30  ;;  %v3560_v12 = vpop.xlane.xlu0 %3559  ;;  %v7955_v22 = vadd.f32 %v9753_v23, %v3563_v33 }
 0xcd2   : > { %v7958_v38 = vadd.f32 %v9754_v55, %v3560_v12 }
 0xcd3   : > { %3716 = vperm.xlu1 %5782, %v7952_v11   ;;  %3722 = vperm.xlu0 %5783, %v7955_v22  }
 0xcd4   : > { %3719 = vperm.xlu2 %5781, %v7958_v38  }
 0xcd8   : > { %v3569_v41 = vpop.xlane.xlu2 %3568  ;;  %v3566_v2 = vpop.xlane.xlu1 %3565 }
 0xcd9   : > { %v7964_v31 = vadd.f32 %v9755_v9, %v3569_v41  ;;  %v3578_v37 = vpop.xlane.xlu0 %3577  ;;  %v7967_v40 = vadd.f32 %v9756_v5, %v3566_v2 }
 0xcda   : > { %v7970_v13 = vadd.f32 %v9757_v58, %v3578_v37 }
 0xcdb   : > { %3725 = vperm.xlu0 %5783, %v7967_v40  }
 0xcdc   : > { %3728 = vperm.xlu2 %5781, %v7964_v31   ;;  %3737 = vperm.xlu1 %5782, %v7970_v13  }
 0xce0   : > { %v3575_v35 = vpop.xlane.xlu2 %3574  ;;  %v3572_v59 = vpop.xlane.xlu1 %3571 }
 0xce1   : > { %v7976_v26 = vadd.f32 %v9758_v10, %v3575_v35  ;;  %v3512_v54 = vpop.xlane.xlu0 %3511  ;;  %v7979_v45 = vadd.f32 %v9759_v6, %v3572_v59 }
 0xce2   : > { %v7982_v21 = vadd.f32 %v9754_v55, %v3512_v54 }
 0xce3   : > { %3731 = vperm.xlu0 %5783, %v7979_v45  }
 0xce4   : > { %3734 = vperm.xlu2 %5781, %v7976_v26   ;;  %3671 = vperm.xlu1 %5782, %v7982_v21  }
 0xce8   : > { %v3509_v42 = vpop.xlane.xlu2 %3508  ;;  %v3515_v44 = vpop.xlane.xlu1 %3514 }
 0xce9   : > { %v7988_v19 = vadd.f32 %v9752_v17, %v3509_v42  ;;  %v3584_v43 = vpop.xlane.xlu0 %3583  ;;  %v7991_v7 = vadd.f32 %v9753_v23, %v3515_v44 }
 0xcea   : > { %v7994_v18 = vadd.f32 %v9754_v55, %v3584_v43 }
 0xceb   : > { %3674 = vperm.xlu0 %5783, %v7991_v7  }
 0xcec   : > { %3668 = vperm.xlu2 %5781, %v7988_v19   ;;  %3743 = vperm.xlu1 %5782, %v7994_v18  }
 0xcf0   : > { %v3581_v1 = vpop.xlane.xlu2 %3580  ;;  %v3518_v8 = vpop.xlane.xlu1 %3517 }
 0xcf1   : > { %v8000_v34 = vadd.f32 %v9752_v17, %v3581_v1  ;;  %v3587_v63 = vpop.xlane.xlu0 %3586  ;;  %v8003_v15 = vadd.f32 %v9756_v5, %v3518_v8 }
 0xcf2   : > { %v8006_v51 = vadd.f32 %v9753_v23, %v3587_v63 }
 0xcf3   : > { %3677 = vperm.xlu0 %5783, %v8003_v15  }
 0xcf4   : > { %3740 = vperm.xlu2 %5781, %v8000_v34   ;;  %3746 = vperm.xlu1 %5782, %v8006_v51  }
 0xcf8   : > { %v3590_v61 = vpop.xlane.xlu2 %3589  ;;  %v3524_v52 = vpop.xlane.xlu1 %3523 }
 0xcf9   : > { %v8012_v0 = vadd.f32 %v9756_v5, %v3590_v61  ;;  %v3521_v24 = vpop.xlane.xlu0 %3520  ;;  %v8015_v53 = vadd.f32 %v9759_v6, %v3524_v52  ;;  %v9760_v52 = vld [vmem:[#allocation6_spill] sm:$0xff] }
 0xcfa   : > { %v8018_v39 = vadd.f32 %v9755_v9, %v3521_v24 }
 0xcfb   : > { %3683 = vperm.xlu0 %5783, %v8015_v53  }
 0xcfc   : > { %3749 = vperm.xlu2 %5781, %v8012_v0   ;;  %3680 = vperm.xlu1 %5782, %v8018_v39  }
 0xd00   : > { %v3527_v4 = vpop.xlane.xlu2 %3526  ;;  %v3596_v32 = vpop.xlane.xlu1 %3595 }
 0xd01   : > { %v8024_v56 = vadd.f32 %v9758_v10, %v3527_v4  ;;  %v3593_v57 = vpop.xlane.xlu0 %3592  ;;  %v8027_v14 = vadd.f32 %v9759_v6, %v3596_v32 }
 0xd02   : > { %v8030_v20 = vadd.f32 %v9755_v9, %v3593_v57 }
 0xd03   : > { %3755 = vperm.xlu0 %5783, %v8027_v14  }
 0xd04   : > { %3686 = vperm.xlu2 %5781, %v8024_v56   ;;  %3752 = vperm.xlu1 %5782, %v8030_v20  }
 0xd08   : > { %v3530_v60 = vpop.xlane.xlu2 %3529  ;;  %v3599_v16 = vpop.xlane.xlu1 %3598 }
 0xd09   : > { %v8036_v49 = vadd.f32 %v9757_v58, %v3530_v60  ;;  %v3536_v3 = vpop.xlane.xlu0 %3535  ;;  %v8039_v27 = vadd.f32 %v9758_v10, %v3599_v16 }
 0xd0a   : > { %v8042_v46 = vadd.f32 %v9754_v55, %v3536_v3 }
 0xd0b   : > { %3758 = vperm.xlu0 %5783, %v8039_v27  }
 0xd0c   : > { %3689 = vperm.xlu2 %5781, %v8036_v49   ;;  %3695 = vperm.xlu1 %5782, %v8042_v46  }
 0xd10   : > { %v3533_v30 = vpop.xlane.xlu2 %3532  ;;  %v3602_v12 = vpop.xlane.xlu1 %3601 }
 0xd11   : > { %v8048_v33 = vadd.f32 %v9752_v17, %v3533_v30  ;;  %v3545_v41 = vpop.xlane.xlu0 %3544  ;;  %v8051_v2 = vadd.f32 %v9757_v58, %v3602_v12 }
 0xd12   : > { %v8054_v37 = vadd.f32 %v9755_v9, %v3545_v41 }
 0xd13   : > { %3761 = vperm.xlu0 %5783, %v8051_v2  }
 0xd14   : > { %3692 = vperm.xlu2 %5781, %v8048_v33   ;;  %3704 = vperm.xlu1 %5782, %v8054_v37  }
 0xd18   : > { %v3542_v55 = vpop.xlane.xlu2 %3541  ;;  %v3539_v17 = vpop.xlane.xlu1 %3538 }
 0xd19   : > { %v8060_v35 = vadd.f32 %v9756_v5, %v3542_v55  ;;  %v3548_v59 = vpop.xlane.xlu0 %3547  ;;  %v8063_v54 = vadd.f32 %v9753_v23, %v3539_v17 }
 0xd1a   : > { %v8066_v42 = vadd.f32 %v9759_v6, %v3548_v59 }
 0xd1b   : > { %3698 = vperm.xlu0 %5783, %v8063_v54  }
 0xd1c   : > { %3701 = vperm.xlu2 %5781, %v8060_v35   ;;  %3707 = vperm.xlu1 %5782, %v8066_v42  }
 0xd20   : > { %v3551_v9 = vpop.xlane.xlu2 %3550 }
 0xd21   : > { %v8072_v44 = vadd.f32 %v9758_v10, %v3551_v9  ;;  %v3554_v5 = vpop.xlane.xlu0 %3553 }
 0xd22   : > { %v8075_v43 = vadd.f32 %v9757_v58, %v3554_v5 }
 0xd24   : > { %3710 = vperm.xlu2 %5781, %v8072_v44   ;;  %3713 = vperm.xlu1 %5782, %v8075_v43  }
 0xd2e   : > { %v3720_v23 = vpop.permute.xlu2 %3719 }
 0xd2f   : > { %v3780_v10 = vperm.slane %v3720_v23, %v9760_v52 }
 0xd36   : > { %v3729_v6 = vpop.permute.xlu2 %3728 }
 0xd37   : > { %v3783_v41 = vperm.slane %v3729_v6, %v9760_v52 }
 0xd3e   : > { %v3735_v1 = vpop.permute.xlu2 %3734 }
 0xd3f   : > { %v3785_v59 = vperm.slane %v3735_v1, %v9760_v52 }
 0xd45   : > { %v3717_v8 = vpop.permute.xlu1 %3716  ;;  %v3723_v63 = vpop.permute.xlu0 %3722 }
 0xd46   : > { %v3669_v61 = vpop.permute.xlu2 %3668  ;;  %v3779_v24 = vperm.slane %v3717_v8, %v9760_v52  ;;  %v3781_v57 = vperm.slane %v3723_v63, %v9760_v52 }
 0xd48   : > { %v3809_v60 = vsel %vm9761_vm4, %v3780_v10, %v3779_v24  ;;  %vm9775_vm4 = vmmov %vm9767_vm9 }
 0xd49   : > { %v3810_v3 = vsel %vm9762_vm5, %v3781_v57, %v3809_v60  ;;  %vm9776_vm5 = vmmov %vm9768_vm8 }
 0xd4d   : > { %v3726_v32 = vpop.permute.xlu0 %3725 }
 0xd4e   : > { %v3738_v4 = vpop.permute.xlu1 %3737  ;;  %v3741_v58 = vpop.permute.xlu2 %3740  ;;  %v3782_v16 = vperm.slane %v3726_v32, %v9760_v52 }
 0xd4f   : > { %v3786_v5 = vperm.slane %v3738_v4, %v9760_v52  ;;  %v3763_v4 = vperm.slane %v3669_v61, %v9760_v52 }
 0xd50   : > { %v3811_v30 = vsel %vm9763_vm14, %v3782_v16, %v3810_v3  ;;  %vm9777_vm14 = vmmov %vm9769_vm11 }
 0xd51   : > { %v3812_v9 = vsel %vm9764_vm7, %v3783_v41, %v3811_v30  ;;  %vm9778_vm7 = vmmov %vm9770_vm12 }
 0xd55   : > { %v3732_v55 = vpop.permute.xlu0 %3731 }
 0xd56   : > { %v3672_v12 = vpop.permute.xlu1 %3671  ;;  %v3784_v17 = vperm.slane %v3732_v55, %v9760_v52  ;;  %v3750_v8 = vpop.permute.xlu2 %3749 }
 0xd57   : > { %v3764_v1 = vperm.slane %v3672_v12, %v9760_v52 }
 0xd58   : > { %v3813_v23 = vsel %vm9765_vm10, %v3784_v17, %v3812_v9  ;;  %vm9779_vm10 = vmmov %vm9771_vm13 }
 0xd59   : > { %v3814_v63 = vsel %vm9766_vm0, %v3785_v59, %v3813_v23  ;;  %v3795_v41 = vsel %vm9769_vm11, %v3764_v1, %v3763_v4  ;;  %vm9780_vm0 = vmmov %vm9772_vm15 }
 0xd5a   : > { %v3815_v24 = vsel %vm9767_vm9, %v3786_v5, %v3814_v63  ;;  %vm9781_vm9 = vmmov %vm9773_vm6 }
 0xd5b   : > { %v3833_v32 = vsel %vm9768_vm8, %v3815_v24, -inf  ;;  %vm9782_vm8 = vmmov %vm9774_vm1 }
 0xd5c   : > { %3834 = vmax.xlane.f32.xlu0 %v3833_v32  ;;  %vm9783_vm11 = vmmov %vm9775_vm4 }
 0xd5d   : > { %v3675_v10 = vpop.permute.xlu0 %3674 }
 0xd5e   : > { %v3744_v6 = vpop.permute.xlu1 %3743  ;;  %v3687_v57 = vpop.permute.xlu2 %3686  ;;  %v3765_v3 = vperm.slane %v3675_v10, %v9760_v52 }
 0xd5f   : > { %v3769_v12 = vperm.slane %v3687_v57, %v9760_v52  ;;  %v3787_v57 = vperm.slane %v3741_v58, %v9760_v52 }
 0xd60   : > { %v3796_v17 = vsel %vm9770_vm12, %v3765_v3, %v3795_v41  ;;  %vm9784_vm12 = vmmov %vm9776_vm5 }
 0xd65   : > { %v3678_v16 = vpop.permute.xlu0 %3677 }
 0xd66   : > { %v3747_v60 = vpop.permute.xlu1 %3746  ;;  %v3766_v30 = vperm.slane %v3678_v16, %v9760_v52  ;;  %v3690_v59 = vpop.permute.xlu2 %3689 }
 0xd67   : > { %v3770_v61 = vperm.slane %v3690_v59, %v9760_v52  ;;  %v3789_v41 = vperm.slane %v3747_v60, %v9760_v52 }
 0xd68   : > { %v3797_v23 = vsel %vm9771_vm13, %v3766_v30, %v3796_v17  ;;  %v3788_v30 = vperm.slane %v3744_v6, %v9760_v52  ;;  %vm9785_vm13 = vmmov %vm9777_vm14 }
 0xd6d   : > { %v3684_v5 = vpop.permute.xlu0 %3683 }
 0xd6e   : > { %v3681_v55 = vpop.permute.xlu1 %3680  ;;  %v3768_v63 = vperm.slane %v3684_v5, %v9760_v52  ;;  %v3693_v17 = vpop.permute.xlu2 %3692 }
 0xd6f   : > { %v3767_v9 = vperm.slane %v3681_v55, %v9760_v52 }
 0xd71   : > { %v3798_v24 = vsel %vm9772_vm15, %v3767_v9, %v3797_v23  ;;  %v3816_v9 = vsel %vm9777_vm14, %v3788_v30, %v3787_v57  ;;  %vm9786_vm15 = vmmov %vm9778_vm7 }
 0xd72   : > { %v3799_v32 = vsel %vm9773_vm6, %v3768_v63, %v3798_v24  ;;  %v3817_v5 = vsel %vm9778_vm7, %v3789_v41, %v3816_v9  ;;  %v3790_v63 = vperm.slane %v3750_v8, %v9760_v52  ;;  %v3771_v41 = vperm.slane %v3693_v17, %v9760_v52  ;;  %vm9787_vm6 = vmmov %vm9779_vm10 }
 0xd73   : > { %v3800_v10 = vsel %vm9774_vm1, %v3769_v12, %v3799_v32  ;;  %vm9788_vm1 = vmmov %vm9780_vm0 }
 0xd74   : > { %v3801_v16 = vsel %vm9775_vm4, %v3770_v61, %v3800_v10  ;;  %v3818_v12 = vsel %vm9779_vm10, %v3790_v63, %v3817_v5  ;;  %vm9789_vm4 = vmmov %vm9781_vm9 }
 0xd75   : > { %v3827_v1 = vsel %vm9776_vm5, %v3801_v16, -inf  ;;  %v3756_v4 = vpop.permute.xlu0 %3755  ;;  %vm9790_vm5 = vmmov %vm9782_vm8 }
 0xd76   : > { %v3753_v3 = vpop.permute.xlu1 %3752  ;;  %3828 = vmax.xlane.f32.xlu2 %v3827_v1  ;;  %v3792_v24 = vperm.slane %v3756_v4, %v9760_v52  ;;  %v3702_v16 = vpop.permute.xlu2 %3701  ;;  %vm9791_vm14 = vmmov %vm9783_vm11 }
 0xd77   : > { %v3791_v23 = vperm.slane %v3753_v3, %v9760_v52  ;;  %v3774_v9 = vperm.slane %v3702_v16, %v9760_v52  ;;  %vm9792_vm7 = vmmov %vm9784_vm12 }
 0xd78   : > { %vm9808_vm10 = vmmov %vm9785_vm13 }
 0xd79   : > { %v3819_v6 = vsel %vm9780_vm0, %v3791_v23, %v3818_v12  ;;  %vm9809_vm0 = vmmov %vm9786_vm15 }
 0xd7a   : > { %v3820_v32 = vsel %vm9781_vm9, %v3792_v24, %v3819_v6  ;;  %vm9810_vm9 = vmmov %vm9787_vm6 }
 0xd7d   : > { %v3759_v59 = vpop.permute.xlu0 %3758 }
 0xd7e   : > { %v3696_v55 = vpop.permute.xlu1 %3695  ;;  %v3793_v60 = vperm.slane %v3759_v59, %v9760_v52  ;;  %v3711_v12 = vpop.permute.xlu2 %3710 }
 0xd7f   : > { %v3772_v4 = vperm.slane %v3696_v55, %v9760_v52 }
 0xd80   : > { %v3821_v1 = vsel %vm9782_vm8, %v3793_v60, %v3820_v32  ;;  %v3777_v60 = vperm.slane %v3711_v12, %v9760_v52  ;;  %vm9811_vm8 = vmmov %vm9788_vm1 }
 0xd81   : > { %v3802_v5 = vsel %vm9785_vm13, %v3772_v4, %v3771_v41  ;;  %vm9814_vm13 = vmmov %vm9791_vm14 }
 0xd85   : > { %v3762_v61 = vpop.permute.xlu0 %3761 }
 0xd86   : > { %v3705_v58 = vpop.permute.xlu1 %3704  ;;  %v3794_v10 = vperm.slane %v3762_v61, %v9760_v52 }
 0xd87   : > { %v3775_v23 = vperm.slane %v3705_v58, %v9760_v52 }
 0xd88   : > { %v3822_v3 = vsel %vm9783_vm11, %v3794_v10, %v3821_v1  ;;  %vm9812_vm11 = vmmov %vm9789_vm4 }
 0xd89   : > { %v3836_v8 = vsel %vm9784_vm12, %v3822_v3, -inf  ;;  %vm9813_vm12 = vmmov %vm9790_vm5 }
 0xd8a   : > { %3837 = vmax.xlane.f32.xlu1 %v3836_v8 }
 0xd8d   : > { %v3699_v57 = vpop.permute.xlu0 %3698 }
 0xd8e   : > { %v3708_v30 = vpop.permute.xlu1 %3707  ;;  %v3773_v59 = vperm.slane %v3699_v57, %v9760_v52 }
 0xd8f   : > { %v3776_v24 = vperm.slane %v3708_v30, %v9760_v52 }
 0xd90   : > { %v3803_v63 = vsel %vm9786_vm15, %v3773_v59, %v3802_v5  ;;  %vm9815_vm15 = vmmov %vm9792_vm7 }
 0xd91   : > { %v3804_v6 = vsel %vm9787_vm6, %v3774_v9, %v3803_v63  ;;  %vm9816_vm6 = vmmov %vm9808_vm10 }
 0xd92   : > { %v3805_v55 = vsel %vm9788_vm1, %v3775_v23, %v3804_v6  ;;  %vm9817_vm1 = vmmov %vm9809_vm0 }
 0xd93   : > { %v3806_v17 = vsel %vm9789_vm4, %v3776_v24, %v3805_v55  ;;  %vm9818_vm4 = vmmov %vm9810_vm9 }
 0xd94   : > { %v3807_v10 = vsel %vm9790_vm5, %v3777_v60, %v3806_v17  ;;  %vm9819_vm5 = vmmov %vm9811_vm8 }
 0xd96   : > { %v3714_v61 = vpop.permute.xlu1 %3713 }
 0xd97   : > { %v3778_v32 = vperm.slane %v3714_v61, %v9760_v52 }
 0xd99   : > { %v3808_v58 = vsel %vm9791_vm14, %v3778_v32, %v3807_v10  ;;  %vm9820_vm14 = vmmov %vm9816_vm6 }
 0xd9a   : > { %v3830_v16 = vsel %vm9792_vm7, %v3808_v58, -inf  ;;  %vm9821_vm7 = vmmov %vm9812_vm11 }
 0xd9b   : > { %3831 = vmax.xlane.f32.xlu0 %v3830_v16 }
 0xdcf   : > { %v3835_v1 = vpop.xlane.xlu0 %3834 }
 0xdd0   : > { %v3859_v3 = vperm.slane %v3835_v1, 0  ;;  %v3860_v8 = vperm.slane %v3835_v1, 1  ;;  %v3861_v4 = vperm.slane %v3835_v1, 2  ;;  %v3866_v30 = vperm.slane %v3835_v1, 7 }
 0xdd1   : > { %v3862_v9 = vperm.slane %v3835_v1, 3  ;;  %v3863_v5 = vperm.slane %v3835_v1, 4 }
 0xdd2   : > { %v3923_v41 = vsub.f32 %v7952_v11, %v3859_v3  ;;  %v3924_v57 = vsub.f32 %v7958_v38, %v3860_v8  ;;  %v3925_v59 = vsub.f32 %v7955_v22, %v3861_v4  ;;  %v3930_v24 = vsub.f32 %v7970_v13, %v3866_v30 }
 0xdd3   : > { %v3926_v6 = vsub.f32 %v7967_v40, %v3862_v9  ;;  %v3927_v55 = vsub.f32 %v7964_v31, %v3863_v5  ;;  %v3864_v11 = vperm.slane %v3835_v1, 5  ;;  %v3865_v22 = vperm.slane %v3835_v1, 6 }
 0xdd4   : > { %v3971_v23 = vmul.f32 1.442695, %v3923_v41  ;;  %v3973_v63 = vmul.f32 1.442695, %v3924_v57  ;;  %v3975_v12 = vmul.f32 1.442695, %v3925_v59 }
 0xdd5   : > { %v3985_v17 = vmul.f32 1.442695, %v3930_v24  ;;  %v3977_v60 = vmul.f32 1.442695, %v3926_v6  ;;  %v3979_v61 = vmul.f32 1.442695, %v3927_v55  ;;  %v3928_v40 = vsub.f32 %v7979_v45, %v3864_v11 }
 0xdd6   : > { %5922 = vpow2.f32 %v3971_v23  ;;  %v3929_v31 = vsub.f32 %v7976_v26, %v3865_v22 }
 0xdd7   : > { %5924 = vpow2.f32 %v3973_v63  ;;  %v3981_v13 = vmul.f32 1.442695, %v3928_v40 }
 0xdd8   : > { %5926 = vpow2.f32 %v3975_v12  ;;  %v3983_v16 = vmul.f32 1.442695, %v3929_v31 }
 0xdd9   : > { %5928 = vpow2.f32 %v3985_v17 }
 0xdda   : > { %5930 = vpow2.f32 %v3977_v60 }
 0xddb   : > { %5932 = vpow2.f32 %v3979_v61 }
 0xddc   : > { %v8149_v38 = vpop.eup %5922  ;;  %5934 = vpow2.f32 %v3981_v13 }
 0xddd   : > { %v8151_v32 = vpop.eup %5924  ;;  %4084 = vperm.xlu2 %5781, %v8149_v38   ;;  %5936 = vpow2.f32 %v3983_v16 }
 0xdde   : > { %v8154_v10 = vpop.eup %5926  ;;  %4087 = vperm.xlu1 %5782, %v8151_v32  }
 0xddf   : > { %4090 = vperm.xlu0 %5783, %v8154_v10   ;;  %v8160_v58 = vpop.eup %5928 }
 0xde0   : > { %v8162_v1 = vpop.eup %5930 }
 0xde1   : > { %v8165_v3 = vpop.eup %5932 }
 0xde2   : > { %v8178_v63 = vpop.eup %5934 }
 0xde3   : > { %v8180_v12 = vpop.eup %5936 }
 0xde5   : > { %4105 = vperm.xlu2 %5781, %v8160_v58  }
 0xde6   : > { %4093 = vperm.xlu1 %5782, %v8162_v1  }
 0xde7   : > { %4096 = vperm.xlu0 %5783, %v8165_v3  }
 0xde9   : > { %v8169_v45 = vpop.xlane.xlu2 %3828 }
 0xdea   : > { %v3843_v26 = vperm.slane %v8169_v45, 0  ;;  %v3844_v8 = vperm.slane %v8169_v45, 1  ;;  %v3845_v4 = vperm.slane %v8169_v45, 2  ;;  %v3846_v59 = vperm.slane %v8169_v45, 3 }
 0xdec   : > { %v3907_v30 = vsub.f32 %v7988_v19, %v3843_v26  ;;  %v3908_v41 = vsub.f32 %v7982_v21, %v3844_v8  ;;  %v3909_v57 = vsub.f32 %v7991_v7, %v3845_v4  ;;  %v3910_v19 = vsub.f32 %v8003_v15, %v3846_v59 }
 0xded   : > { %v3848_v7 = vperm.slane %v8169_v45, 5 }
 0xdee   : > { %v3939_v9 = vmul.f32 1.442695, %v3907_v30  ;;  %v3941_v5 = vmul.f32 1.442695, %v3908_v41  ;;  %v3943_v23 = vmul.f32 1.442695, %v3909_v57  ;;  %4099 = vperm.xlu1 %5782, %v8178_v63  }
 0xdef   : > { %4102 = vperm.xlu0 %5783, %v8180_v12   ;;  %v3945_v24 = vmul.f32 1.442695, %v3910_v19  ;;  %v3912_v17 = vsub.f32 %v8015_v53, %v3848_v7 }
 0xdf0   : > { %5938 = vpow2.f32 %v3939_v9 }
 0xdf1   : > { %5940 = vpow2.f32 %v3941_v5  ;;  %v3949_v15 = vmul.f32 1.442695, %v3912_v17  ;;  %v3847_v5 = vperm.slane %v8169_v45, 4 }
 0xdf2   : > { %5942 = vpow2.f32 %v3943_v23 }
 0xdf3   : > { %5944 = vpow2.f32 %v3945_v24  ;;  %v3911_v7 = vsub.f32 %v8018_v39, %v3847_v5 }
 0xdf4   : > { %5946 = vpow2.f32 %v3949_v15 }
 0xdf6   : > { %v8185_v21 = vpop.eup %5938 }
 0xdf7   : > { %v8188_v6 = vpop.eup %5940  ;;  %4036 = vperm.xlu0 %5783, %v8185_v21  }
 0xdf8   : > { %v8190_v55 = vpop.eup %5942  ;;  %4039 = vperm.xlu2 %5781, %v8188_v6  }
 0xdf9   : > { %4042 = vperm.xlu1 %5782, %v8190_v55   ;;  %v8196_v60 = vpop.eup %5944 }
 0xdfa   : > { %v8204_v9 = vpop.eup %5946 }
 0xdfd   : > { %v3838_v11 = vpop.xlane.xlu1 %3837 }
 0xdfe   : > { %v3867_v22 = vperm.slane %v3838_v11, 0  ;;  %v3868_v61 = vperm.slane %v3838_v11, 1  ;;  %v3872_v40 = vperm.slane %v3838_v11, 5  ;;  %v3870_v31 = vperm.slane %v3838_v11, 3 }
 0xdff   : > { %v3869_v26 = vperm.slane %v3838_v11, 2  ;;  %v3873_v41 = vperm.slane %v3838_v11, 6  ;;  %v3874_v24 = vperm.slane %v3838_v11, 7 }
 0xe00   : > { %v3931_v13 = vsub.f32 %v8000_v34, %v3867_v22  ;;  %v3932_v16 = vsub.f32 %v7994_v18, %v3868_v61  ;;  %v3936_v8 = vsub.f32 %v8027_v14, %v3872_v40  ;;  %v3934_v30 = vsub.f32 %v8012_v0, %v3870_v31 }
 0xe01   : > { %4045 = vperm.xlu1 %5782, %v8196_v60   ;;  %v3933_v57 = vsub.f32 %v8006_v51, %v3869_v26  ;;  %v3849_v34 = vperm.slane %v8169_v45, 6  ;;  %v3937_v14 = vsub.f32 %v8039_v27, %v3873_v41  ;;  %v3850_v27 = vperm.slane %v8169_v45, 7 }
 0xe02   : > { %v3987_v53 = vmul.f32 1.442695, %v3931_v13  ;;  %v3989_v4 = vmul.f32 1.442695, %v3932_v16  ;;  %v3997_v59 = vmul.f32 1.442695, %v3936_v8  ;;  %v3938_v31 = vsub.f32 %v8051_v2, %v3874_v24 }
 0xe03   : > { %v3993_v18 = vmul.f32 1.442695, %v3934_v30  ;;  %v3991_v23 = vmul.f32 1.442695, %v3933_v57  ;;  %v3913_v51 = vsub.f32 %v8024_v56, %v3849_v34  ;;  %v3999_v17 = vmul.f32 1.442695, %v3937_v14 }
 0xe04   : > { %5948 = vpow2.f32 %v3987_v53  ;;  %v3947_v61 = vmul.f32 1.442695, %v3911_v7  ;;  %v3871_v40 = vperm.slane %v3838_v11, 4  ;;  %v3914_v16 = vsub.f32 %v8036_v49, %v3850_v27 }
 0xe05   : > { %5950 = vpow2.f32 %v3989_v4  ;;  %v3951_v22 = vmul.f32 1.442695, %v3913_v51  ;;  %v4001_v11 = vmul.f32 1.442695, %v3938_v31 }
 0xe06   : > { %5952 = vpow2.f32 %v3997_v59  ;;  %v3935_v45 = vsub.f32 %v8030_v20, %v3871_v40  ;;  %v3953_v8 = vmul.f32 1.442695, %v3914_v16 }
 0xe07   : > { %5954 = vpow2.f32 %v3993_v18 }
 0xe08   : > { %5956 = vpow2.f32 %v3991_v23  ;;  %v3995_v4 = vmul.f32 1.442695, %v3935_v45 }
 0xe09   : > { %4051 = vperm.xlu1 %5782, %v8204_v9   ;;  %5958 = vpow2.f32 %v3999_v17 }
 0xe0a   : > { %v8210_v0 = vpop.eup %5948  ;;  %5960 = vpow2.f32 %v3951_v22 }
 0xe0b   : > { %v8212_v19 = vpop.eup %5950  ;;  %4108 = vperm.xlu0 %5783, %v8210_v0   ;;  %5962 = vpow2.f32 %v3947_v61 }
 0xe0c   : > { %4111 = vperm.xlu2 %5781, %v8212_v19   ;;  %v8218_v15 = vpop.eup %5952  ;;  %5964 = vpow2.f32 %v4001_v11 }
 0xe0d   : > { %9793 = vst [vmem:[#allocation22_spill] sm:$0xff] %v8218_v15  ;;  %v8223_v56 = vpop.eup %5954  ;;  %5966 = vpow2.f32 %v3953_v8 }
 0xe0e   : > { %v8225_v13 = vpop.xlane.xlu0 %3831  ;;  %v8227_v39 = vpop.eup %5956  ;;  %5968 = vpow2.f32 %v3995_v4 }
 0xe0f   : > { %v3853_v2 = vperm.slane %v8225_v13, 2  ;;  %v8234_v26 = vpop.eup %5958  ;;  %v3851_v53 = vperm.slane %v8225_v13, 0  ;;  %v3852_v49 = vperm.slane %v8225_v13, 1  ;;  %v3854_v5 = vperm.slane %v8225_v13, 3 }
 0xe10   : > { %9794 = vst [vmem:[#allocation9_spill] sm:$0xff] %v8234_v26  ;;  %v8240_v41 = vpop.eup %5960  ;;  %v3855_v14 = vperm.slane %v8225_v13, 4  ;;  %v3857_v17 = vperm.slane %v8225_v13, 6  ;;  %v3856_v22 = vperm.slane %v8225_v13, 5  ;;  %v3858_v45 = vperm.slane %v8225_v13, 7 }
 0xe11   : > { %4123 = vperm.xlu1 %5782, %v8218_v15   ;;  %v3917_v30 = vsub.f32 %v8063_v54, %v3853_v2  ;;  %9795 = vst [vmem:[#allocation23_spill] sm:$0xff] %v8240_v41  ;;  %v8242_v57 = vpop.eup %5962  ;;  %v3915_v20 = vsub.f32 %v8048_v33, %v3851_v53  ;;  %v3916_v59 = vsub.f32 %v8042_v46, %v3852_v49 }
 0xe12   : > { %9796 = vst [vmem:[#allocation16_spill] sm:$0xff] %v8242_v57  ;;  %v8248_v18 = vpop.eup %5964  ;;  %v3918_v46 = vsub.f32 %v8060_v35, %v3854_v5  ;;  %v3919_v7 = vsub.f32 %v8054_v37, %v3855_v14  ;;  %v3921_v35 = vsub.f32 %v8072_v44, %v3857_v17  ;;  %v3920_v37 = vsub.f32 %v8066_v42, %v3856_v22 }
 0xe13   : > { %4117 = vperm.xlu0 %5783, %v8223_v56   ;;  %v3959_v34 = vmul.f32 1.442695, %v3917_v30  ;;  %9797 = vst [vmem:[#allocation10_spill] sm:$0xff] %v8248_v18  ;;  %v3955_v54 = vmul.f32 1.442695, %v3915_v20  ;;  %v8253_v51 = vpop.eup %5966  ;;  %v3922_v44 = vsub.f32 %v8075_v43, %v3858_v45 }
 0xe14   : > { %4114 = vperm.xlu2 %5781, %v8227_v39   ;;  %v3957_v23 = vmul.f32 1.442695, %v3916_v59  ;;  %9798 = vst [vmem:[#allocation11_spill] sm:$0xff] %v8253_v51  ;;  %v8255_v33 = vpop.eup %5968  ;;  %v3961_v27 = vmul.f32 1.442695, %v3918_v46 }
 0xe15   : > { %5970 = vpow2.f32 %v3959_v34  ;;  %9799 = vst [vmem:[#allocation24_spill] sm:$0xff] %v8255_v33  ;;  %v3963_v61 = vmul.f32 1.442695, %v3919_v7  ;;  %v3967_v16 = vmul.f32 1.442695, %v3921_v35 }
 0xe16   : > { %5972 = vpow2.f32 %v3955_v54  ;;  %v3965_v11 = vmul.f32 1.442695, %v3920_v37  ;;  %v3969_v53 = vmul.f32 1.442695, %v3922_v44 }
 0xe17   : > { %5974 = vpow2.f32 %v3957_v23 }
 0xe18   : > { %5976 = vpow2.f32 %v3961_v27 }
 0xe19   : > { %4126 = vperm.xlu1 %5782, %v8234_v26   ;;  %5978 = vpow2.f32 %v3963_v61 }
 0xe1a   : > { %5980 = vpow2.f32 %v3967_v16 }
 0xe1b   : > { %4054 = vperm.xlu0 %5783, %v8240_v41   ;;  %v8261_v24 = vpop.eup %5970  ;;  %5982 = vpow2.f32 %v3965_v11 }
 0xe1c   : > { %4048 = vperm.xlu2 %5781, %v8242_v57   ;;  %9800 = vst [vmem:[#allocation25_spill] sm:$0xff] %v8261_v24  ;;  %v8266_v40 = vpop.eup %5972  ;;  %5984 = vpow2.f32 %v3969_v53 }
 0xe1d   : > { %9801 = vst [vmem:[#allocation13_spill] sm:$0xff] %v8266_v40  ;;  %v8268_v31 = vpop.eup %5974 }
 0xe1e   : > { %9802 = vst [vmem:[#allocation12_spill] sm:$0xff] %v8268_v31  ;;  %v8275_v2 = vpop.eup %5976 }
 0xe1f   : > { %9803 = vst [vmem:[#allocation17_spill] sm:$0xff] %v8275_v2  ;;  %v8277_v8 = vpop.eup %5978 }
 0xe20   : > { %9804 = vst [vmem:[#allocation19_spill] sm:$0xff] %v8277_v8  ;;  %v8282_v4 = vpop.eup %5980 }
 0xe21   : > { %4129 = vperm.xlu1 %5782, %v8248_v18   ;;  %9805 = vst [vmem:[#allocation18_spill] sm:$0xff] %v8282_v4  ;;  %v8284_v42 = vpop.eup %5982 }
 0xe22   : > { %9806 = vst [vmem:[#allocation15_spill] sm:$0xff] %v8284_v42  ;;  %v8288_v13 = vpop.eup %5984 }
 0xe23   : > { %4057 = vperm.xlu0 %5783, %v8253_v51   ;;  %9807 = vst [vmem:[#allocation14_spill] sm:$0xff] %v8288_v13 }
 0xe24   : > { %4120 = vperm.xlu2 %5781, %v8255_v33  }
 0xe29   : > { %4066 = vperm.xlu1 %5782, %v8261_v24  }
 0xe2b   : > { %4060 = vperm.xlu0 %5783, %v8266_v40  }
 0xe2c   : > { %4063 = vperm.xlu2 %5781, %v8268_v31  }
 0xe33   : > { %4069 = vperm.xlu0 %5783, %v8275_v2  }
 0xe34   : > { %4072 = vperm.xlu2 %5781, %v8277_v8  }
 0xe37   : > { %v4085_v49 = vpop.permute.xlu2 %4084 }
 0xe38   : > { %v4147_v5 = vperm.slane %v4085_v49, %v9760_v52 }
 0xe3b   : > { %4078 = vperm.xlu0 %5783, %v8282_v4  }
 0xe3c   : > { %4075 = vperm.xlu2 %5781, %v8284_v42  }
 0xe3f   : > { %v4106_v59 = vpop.permute.xlu2 %4105 }
 0xe40   : > { %v4154_v11 = vperm.slane %v4106_v59, %v9760_v52 }
 0xe44   : > { %4081 = vperm.xlu2 %5781, %v8288_v13  }
 0xe50   : > { %v4088_v30 = vpop.permute.xlu1 %4087 }
 0xe51   : > { %v4091_v20 = vpop.permute.xlu0 %4090  ;;  %v4148_v43 = vperm.slane %v4088_v30, %v9760_v52 }
 0xe52   : > { %v4149_v14 = vperm.slane %v4091_v20, %v9760_v52  ;;  %v4040_v17 = vpop.permute.xlu2 %4039 }
 0xe53   : > { %v4177_v23 = vsel %vm9808_vm10, %v4148_v43, %v4147_v5  ;;  %vm9822_vm10 = vmmov %vm9809_vm0 }
 0xe54   : > { %v4178_v7 = vsel %vm9809_vm0, %v4149_v14, %v4177_v23  ;;  %vm9823_vm0 = vmmov %vm9818_vm4 }
 0xe58   : > { %v4094_v34 = vpop.permute.xlu1 %4093 }
 0xe59   : > { %v4097_v54 = vpop.permute.xlu0 %4096  ;;  %v4150_v46 = vperm.slane %v4094_v34, %v9760_v52 }
 0xe5a   : > { %v4151_v27 = vperm.slane %v4097_v54, %v9760_v52 }
 0xe5b   : > { %v4179_v22 = vsel %vm9810_vm9, %v4150_v46, %v4178_v7  ;;  %vm9824_vm9 = vmmov %vm9813_vm12 }
 0xe5c   : > { %v4180_v16 = vsel %vm9811_vm8, %v4151_v27, %v4179_v22  ;;  %vm9825_vm8 = vmmov %vm9819_vm5 }
 0xe60   : > { %v4100_v61 = vpop.permute.xlu1 %4099 }
 0xe61   : > { %v4152_v35 = vperm.slane %v4100_v61, %v9760_v52  ;;  %v4103_v37 = vpop.permute.xlu0 %4102 }
 0xe62   : > { %v4153_v45 = vperm.slane %v4103_v37, %v9760_v52 }
 0xe63   : > { %v4181_v44 = vsel %vm9812_vm11, %v4152_v35, %v4180_v16  ;;  %vm9826_vm11 = vmmov %vm9814_vm13 }
 0xe64   : > { %v4182_v53 = vsel %vm9813_vm12, %v4153_v45, %v4181_v44  ;;  %vm9827_vm12 = vmmov %vm9821_vm7 }
 0xe65   : > { %v4183_v49 = vsel %vm9814_vm13, %v4154_v11, %v4182_v53  ;;  %vm9828_vm13 = vmmov %vm9815_vm15 }
 0xe66   : > { %v4112_v30 = vpop.permute.xlu2 %4111  ;;  %v4201_v20 = vsel %vm9815_vm15, %v4183_v49, 0.0  ;;  %vm9829_vm15 = vmmov %vm9824_vm9 }
 0xe67   : > { %4202 = vadd.xlane.f32.xlu1 %v4201_v20  ;;  %v4156_v22 = vperm.slane %v4112_v30, %v9760_v52 }
 0xe69   : > { %v4037_v54 = vpop.permute.xlu0 %4036 }
 0xe6a   : > { %v4131_v53 = vperm.slane %v4037_v54, %v9760_v52 }
 0xe6b   : > { %v4043_v43 = vpop.permute.xlu1 %4042 }
 0xe6e   : > { %v4115_v34 = vpop.permute.xlu2 %4114 }
 0xe6f   : > { %v4157_v16 = vperm.slane %v4115_v34, %v9760_v52 }
 0xe73   : > { %v4046_v5 = vpop.permute.xlu1 %4045 }
 0xe76   : > { %v4049_v23 = vpop.permute.xlu2 %4048 }
 0xe77   : > { %v4135_v54 = vperm.slane %v4049_v23, %v9760_v52 }
 0xe7b   : > { %v4052_v14 = vpop.permute.xlu1 %4051 }
 0xe7d   : > { %v4109_v46 = vpop.permute.xlu0 %4108 }
 0xe7e   : > { %v4155_v59 = vperm.slane %v4109_v46, %v9760_v52  ;;  %v4121_v27 = vpop.permute.xlu2 %4120  ;;  %v4132_v46 = vperm.slane %v4040_v17, %v9760_v52 }
 0xe7f   : > { %v4159_v49 = vperm.slane %v4121_v27, %v9760_v52 }
 0xe80   : > { %v4184_v35 = vsel %vm9816_vm6, %v4156_v22, %v4155_v59  ;;  %v4133_v59 = vperm.slane %v4043_v43, %v9760_v52  ;;  %v4163_v34 = vsel %vm9820_vm14, %v4132_v46, %v4131_v53  ;;  %vm9830_vm6 = vmmov %vm9826_vm11 }
 0xe81   : > { %v4185_v45 = vsel %vm9817_vm1, %v4157_v16, %v4184_v35  ;;  %vm9831_vm1 = vmmov %vm9828_vm13 }
 0xe82   : > { %v4164_v16 = vsel %vm9822_vm10, %v4133_v59, %v4163_v34 }
 0xe83   : > { %v4124_v7 = vpop.permute.xlu1 %4123 }
 0xe84   : > { %v4160_v22 = vperm.slane %v4124_v7, %v9760_v52 }
 0xe85   : > { %v4118_v61 = vpop.permute.xlu0 %4117 }
 0xe86   : > { %v4158_v37 = vperm.slane %v4118_v61, %v9760_v52  ;;  %v4064_v30 = vpop.permute.xlu2 %4063  ;;  %v4134_v61 = vperm.slane %v4046_v5, %v9760_v52 }
 0xe88   : > { %v4186_v44 = vsel %vm9818_vm4, %v4158_v37, %v4185_v45  ;;  %v4136_v37 = vperm.slane %v4052_v14, %v9760_v52  ;;  %v4165_v7 = vsel %vm9823_vm0, %v4134_v61, %v4164_v16  ;;  %vm9832_vm4 = vmmov %vm9820_vm14 }
 0xe89   : > { %v4187_v48 = vsel %vm9819_vm5, %v4159_v49, %v4186_v44  ;;  %v4166_v5 = vsel %vm9825_vm8, %v4135_v54, %v4165_v7  ;;  %vm9833_vm5 = vmmov %vm9822_vm10 }
 0xe8a   : > { %v4188_v27 = vsel %vm9821_vm7, %v4160_v22, %v4187_v48  ;;  %v4167_v48 = vsel %vm9827_vm12, %v4136_v37, %v4166_v5  ;;  %vm9834_vm14 = vmmov %vm9823_vm0 }
 0xe8b   : > { %v4127_v11 = vpop.permute.xlu1 %4126  ;;  %vm9835_vm7 = vmmov %vm9825_vm8 }
 0xe8c   : > { %v4161_v35 = vperm.slane %v4127_v11, %v9760_v52  ;;  %vm9836_vm10 = vmmov %vm9827_vm12 }
 0xe8d   : > { %v4055_v20 = vpop.permute.xlu0 %4054  ;;  %vm9837_vm0 = vmmov %vm9824_vm9 }
 0xe8e   : > { %v4137_v45 = vperm.slane %v4055_v20, %v9760_v52  ;;  %v4189_v44 = vsel %vm9824_vm9, %v4161_v35, %v4188_v27  ;;  %v4073_v20 = vpop.permute.xlu2 %4072  ;;  %v4140_v35 = vperm.slane %v4064_v30, %v9760_v52  ;;  %vm9838_vm9 = vmmov %vm9830_vm6 }
 0xe8f   : > { %v4143_v7 = vperm.slane %v4073_v20, %v9760_v52  ;;  %vm9839_vm8 = vmmov %vm9831_vm1  ;;  %v3269_v20 = vrot.slane %v7947_v25, 4 }
 0xe90   : > { %v4168_v49 = vsel %vm9829_vm15, %v4137_v45, %v4167_v48 }
 0xe93   : > { %v4130_v17 = vpop.permute.xlu1 %4129 }
 0xe94   : > { %v4162_v43 = vperm.slane %v4130_v17, %v9760_v52 }
 0xe95   : > { %v4058_v23 = vpop.permute.xlu0 %4057 }
 0xe96   : > { %v4190_v11 = vsel %vm9826_vm11, %v4162_v43, %v4189_v44  ;;  %v4138_v53 = vperm.slane %v4058_v23, %v9760_v52  ;;  %v4076_v61 = vpop.permute.xlu2 %4075  ;;  %vm9840_vm11 = vcmask 1047556  }
 0xe97   : > { %v4204_v14 = vsel %vm9828_vm13, %v4190_v11, 0.0  ;;  %v4144_v11 = vperm.slane %v4076_v61, %v9760_v52  ;;  %vm9841_vm12 = vmmov %vm9840_vm11 }
 0xe98   : > { %4205 = vadd.xlane.f32.xlu2 %v4204_v14  ;;  %v4169_v46 = vsel %vm9830_vm6, %v4138_v53, %v4168_v49  ;;  %vm9842_vm13 = vmmov %vm9840_vm11 }
 0xe99   : > { %v4195_v59 = vsel %vm9831_vm1, %v4169_v46, 0.0  ;;  %vm9843_vm15 = vmmov %vm9840_vm11 }
 0xe9a   : > { %4196 = vadd.xlane.f32.xlu0 %v4195_v59  ;;  %v3271_v59 = vrot.slane %v7767_v28, 4  ;;  %vm9844_vm6 = vmmov %vm9840_vm11 }
 0xe9b   : > { %v4067_v54 = vpop.permute.xlu1 %4066  ;;  %vm9845_vm1 = vmmov %vm9844_vm6 }
 0xe9c   : > { %v4141_v17 = vperm.slane %v4067_v54, %v9760_v52 }
 0xe9d   : > { %v4061_v22 = vpop.permute.xlu0 %4060 }
 0xe9e   : > { %v4139_v34 = vperm.slane %v4061_v22, %v9760_v52  ;;  %v4082_v44 = vpop.permute.xlu2 %4081  ;;  %v3270_v22 = vsel %vm9840_vm11, %v3269_v20, %v7767_v28 }
 0xe9f   : > { %v4146_v48 = vperm.slane %v4082_v44, %v9760_v52  ;;  %v8363_v61 = vperm.slane %v3270_v22, %v9560_v47 }
 0xea0   : > { %v4170_v27 = vsel %vm9832_vm4, %v4140_v35, %v4139_v34  ;;  %v3281_v34 = vrot.slane %v7949_v50, 4 }
 0xea1   : > { %v4171_v45 = vsel %vm9833_vm5, %v4141_v17, %v4170_v27  ;;  %v3283_v27 = vrot.slane %v7945_v36, 4 }
 0xea2   : > { %v3282_v54 = vsel %vm9842_vm13, %v3281_v34, %v7945_v36 }
 0xea3   : > { %v3284_v28 = vsel %vm9843_vm15, %v7949_v50, %v3283_v27  ;;  %v8375_v17 = vperm.slane %v3282_v54, %v9560_v47 }
 0xea4   : > { %v8387_v36 = vperm.slane %v3284_v28, %v9560_v47 }
 0xea5   : > { %v4070_v37 = vpop.permute.xlu0 %4069 }
 0xea6   : > { %v4142_v16 = vperm.slane %v4070_v37, %v9760_v52  ;;  %v3295_v37 = vrot.slane %v8363_v61, 4 }
 0xea8   : > { %v4172_v43 = vsel %vm9834_vm14, %v4142_v16, %v4171_v45 }
 0xea9   : > { %v4173_v5 = vsel %vm9835_vm7, %v4143_v7, %v4172_v43 }
 0xeaa   : > { %v4174_v14 = vsel %vm9836_vm10, %v4144_v11, %v4173_v5  ;;  %v8395_v11 = vsel %vm9844_vm6, %v8375_v17, %v3295_v37 }
 0xead   : > { %v4079_v30 = vpop.permute.xlu0 %4078 }
 0xeae   : > { %v4145_v23 = vperm.slane %v4079_v30, %v9760_v52  ;;  %v3272_v52 = vsel %vm9841_vm12, %v7947_v25, %v3271_v59 }
 0xeaf   : > { %v8366_v35 = vperm.slane %v3272_v52, %v9560_v47 }
 0xeb0   : > { %v4175_v53 = vsel %vm9837_vm0, %v4145_v23, %v4174_v14 }
 0xeb1   : > { %v4176_v49 = vsel %vm9838_vm9, %v4146_v48, %v4175_v53  ;;  %v3307_v16 = vrot.slane %v8366_v35, 4 }
 0xeb2   : > { %v4198_v46 = vsel %vm9839_vm8, %v4176_v49, 0.0 }
 0xeb3   : > { %4199 = vadd.xlane.f32.xlu1 %v4198_v46  ;;  %v8400_v30 = vsel %vm9845_vm1, %v8387_v36, %v3307_v16 }
 0xeda   : > { %v4203_v25 = vpop.xlane.xlu1 %4202 }
 0xedb   : > { %v8378_v45 = vperm.slane %v4203_v25, 0  ;;  %v8380_v43 = vperm.slane %v4203_v25, 1  ;;  %v8382_v7 = vperm.slane %v4203_v25, 2  ;;  %v8384_v44 = vperm.slane %v4203_v25, 3 }
 0xedc   : > { %v8389_v5 = vperm.slane %v4203_v25, 4  ;;  %v8402_v23 = vperm.slane %v4203_v25, 6  ;;  %v8406_v14 = vperm.slane %v4203_v25, 7  ;;  %v8411_v46 = vperm.slane %v4203_v25, 5 }
 0xedd   : > { %5986 = vrcp.f32 %v8378_v45  ;;  %v4526_v48 = vand.u32 2147483648, %v8378_v45  ;;  %v4524_v53 = vand.u32 2147483647, %v8378_v45  ;;  %v4541_v49 = vand.u32 2147483648, %v8380_v43 }
 0xede   : > { %5988 = vrcp.f32 %v8380_v43  ;;  %v4539_v20 = vand.u32 2147483647, %v8380_v43  ;;  %v4556_v59 = vand.u32 2147483648, %v8382_v7  ;;  %v4554_v54 = vand.u32 2147483647, %v8382_v7 }
 0xedf   : > { %5990 = vrcp.f32 %v8382_v7  ;;  %vm4520_vm4 = vweird.f32 %v8378_v45  ;;  %v4527_v37 = vor.u32 1.1754944e-38, %v4526_v48  ;;  %vm4535_vm5 = vweird.f32 %v8380_v43 }
 0xee0   : > { %5992 = vrcp.f32 %v8384_v44  ;;  %vm8427_vm14 = vcmp.eq.f32.partialorder %v4524_v53, 8.507059e+37  ;;  %v4542_v22 = vor.u32 1.1754944e-38, %v4541_v49  ;;  %vm4550_vm7 = vweird.f32 %v8382_v7 }
 0xee1   : > { %5994 = vrcp.f32 %v8389_v5  ;;  %vm8435_vm10 = vcmp.eq.f32.partialorder %v4539_v20, 8.507059e+37  ;;  %v4557_v29 = vor.u32 1.1754944e-38, %v4556_v59  ;;  %v4586_v53 = vand.u32 2147483648, %v8389_v5 }
 0xee2   : > { %5996 = vrcp.f32 %v8402_v23  ;;  %vm8443_vm9 = vcmp.eq.f32.partialorder %v4554_v54, 8.507059e+37  ;;  %vm4580_vm8 = vweird.f32 %v8389_v5  ;;  %v4629_v20 = vand.u32 2147483647, %v8406_v14 }
 0xee3   : > { %v5987_v27 = vpop.eup %5986  ;;  %5998 = vrcp.f32 %v8406_v14  ;;  %v4631_v59 = vand.u32 2147483648, %v8406_v14  ;;  %vm4565_vm13 = vweird.f32 %v8384_v44  ;;  %v4571_v41 = vand.u32 2147483648, %v8384_v44 }
 0xee4   : > { %v5989_v28 = vpop.eup %5988  ;;  %v4516_v25 = vmul.f32 %v5987_v27, %v8378_v45  ;;  %6000 = vrcp.f32 %v8411_v46  ;;  %vm4521_vm0 = vweird.f32 %v5987_v27  ;;  %v4569_v50 = vand.u32 2147483647, %v8384_v44 }
 0xee5   : > { %v5991_v52 = vpop.eup %5990  ;;  %v4531_v48 = vmul.f32 %v5989_v28, %v8380_v43  ;;  %vm4536_vm11 = vweird.f32 %v5989_v28  ;;  %vm4522_vm1 = vmor %vm4520_vm4, %vm4521_vm0  ;;  %v9854_v34 = vand.u32 2147483647, %v8389_v5  ;;  %v4572_v16 = vor.u32 1.1754944e-38, %v4571_v41 }
 0xee6   : > { %v8440_v13 = vpop.eup %5992  ;;  %v4517_v4 = vsub.f32 1.0, %v4516_v25  ;;  %v4546_v49 = vmul.f32 %v5991_v52, %v8382_v7  ;;  %vm4551_vm12 = vweird.f32 %v5991_v52  ;;  %vm4537_vm3 = vmor %vm4535_vm5, %vm4536_vm11  ;;  %v9859_v41 = vperm.slane %v8400_v30, %v9565_v62 }
 0xee7   : > { %v8449_v42 = vpop.eup %5994  ;;  %v4532_v2 = vsub.f32 1.0, %v4531_v48  ;;  %v4561_v25 = vmul.f32 %v8440_v13, %v8384_v44  ;;  %vm4566_vm15 = vweird.f32 %v8440_v13  ;;  %vm4552_vm4 = vmor %vm4550_vm7, %vm4551_vm12  ;;  %vm4625_vm7 = vweird.f32 %v8406_v14 }
 0xee8   : > { %v4518_v8 = vmul.f32 %v5987_v27, %v4517_v4  ;;  %v4547_v18 = vsub.f32 1.0, %v4546_v49  ;;  %v4576_v54 = vmul.f32 %v8449_v42, %v8389_v5  ;;  %v8456_v40 = vpop.eup %5996  ;;  %vm4581_vm6 = vweird.f32 %v8449_v42 }
 0xee9   : > { %v4533_v31 = vmul.f32 %v5989_v28, %v4532_v2  ;;  %v4562_v24 = vsub.f32 1.0, %v4561_v25  ;;  %v5999_v48 = vpop.eup %5998  ;;  %vm4611_vm11 = vweird.f32 %v8456_v40  ;;  %vm9858_vm12 = vcmask 1047556  }
 0xeea   : > { %v4519_v51 = vadd.f32 %v5987_v27, %v4518_v8  ;;  %v4548_v33 = vmul.f32 %v5991_v52, %v4547_v18  ;;  %v4577_v26 = vsub.f32 1.0, %v4576_v54  ;;  %v8461_v4 = vpop.eup %6000  ;;  %v4621_v2 = vmul.f32 %v5999_v48, %v8406_v14 }
 0xeeb   : > { %v4534_v49 = vadd.f32 %v5989_v28, %v4533_v31  ;;  %v4563_v25 = vmul.f32 %v8440_v13, %v4562_v24  ;;  %v4606_v54 = vmul.f32 %v8456_v40, %v8402_v23  ;;  %vm4626_vm5 = vweird.f32 %v5999_v48 }
 0xeec   : > { %v4523_v57 = vsel %vm4522_vm1, %v5987_v27, %v4519_v51  ;;  %v4549_v18 = vadd.f32 %v5991_v52, %v4548_v33  ;;  %v4578_v8 = vmul.f32 %v8449_v42, %v4577_v26  ;;  %v4622_v24 = vsub.f32 1.0, %v4621_v2  ;;  %vm4627_vm0 = vmor %vm4625_vm7, %vm4626_vm5 }
 0xeed   : > { %v4528_v31 = vsel %vm8427_vm14, %v4527_v37, %v4523_v57  ;;  %v4538_v45 = vsel %vm4537_vm3, %v5989_v28, %v4534_v49  ;;  %v4564_v51 = vadd.f32 %v8440_v13, %v4563_v25  ;;  %vm8492_vm3 = vmor %vm4580_vm8, %vm4581_vm6  ;;  %vm4585_vm14 = vcmp.eq.f32.partialorder %v9854_v34, 8.507059e+37 }
 0xeee   : > { %v4529_v43 = vmul.f32 %v8149_v38, %v4528_v31  ;;  %v4543_v33 = vsel %vm8435_vm10, %v4542_v22, %v4538_v45  ;;  %v4553_v26 = vsel %vm4552_vm4, %v5991_v52, %v4549_v18  ;;  %v4579_v27 = vadd.f32 %v8449_v42, %v4578_v8  ;;  %vm8508_vm10 = vmor %vm4565_vm13, %vm4566_vm15 }
 0xeef   : > { %v4544_v15 = vmul.f32 %v8151_v32, %v4543_v33  ;;  %v4558_v57 = vsel %vm8443_vm9, %v4557_v29, %v4553_v26  ;;  %v4623_v38 = vmul.f32 %v5999_v48, %v4622_v24  ;;  %v4607_v29 = vsub.f32 1.0, %v4606_v54  ;;  %vm9863_vm4 = vmmov %vm9858_vm12 }
 0xef0   : > { %4837 = vperm.xlu2 %5781, %v4529_v43   ;;  %v4559_v22 = vmul.f32 %v8154_v10, %v4558_v57  ;;  %v4583_v32 = vsel %vm8492_vm3, %v8449_v42, %v4579_v27  ;;  %v4587_v52 = vor.u32 1.1754944e-38, %v4586_v53  ;;  %vm4630_vm9 = vcmp.eq.f32.partialorder %v4629_v20, 8.507059e+37 }
 0xef1   : > { %4842 = vperm.xlu0 %5783, %v4544_v15   ;;  %v4624_v37 = vadd.f32 %v5999_v48, %v4623_v38  ;;  %v4632_v42 = vor.u32 1.1754944e-38, %v4631_v59  ;;  %v4568_v15 = vsel %vm8508_vm10, %v8440_v13, %v4564_v51  ;;  %v4608_v5 = vmul.f32 %v8456_v40, %v4607_v29  ;;  %vm9866_vm10 = vmmov %vm9863_vm4 }
 0xef2   : > { %4847 = vperm.xlu1 %5782, %v4559_v22   ;;  %v4588_v28 = vsel %vm4585_vm14, %v4587_v52, %v4583_v32  ;;  %v4591_v44 = vmul.f32 %v8461_v4, %v8411_v46  ;;  %vm4570_vm8 = vcmp.eq.f32.partialorder %v4569_v50, 8.507059e+37  ;;  %v9857_v20 = vrot.slane %v8387_v36, 4  ;;  %vm9865_vm14 = vmmov %vm9863_vm4 }
 0xef3   : > { %v4628_v14 = vsel %vm4627_vm0, %v5999_v48, %v4624_v37  ;;  %v4609_v49 = vadd.f32 %v8456_v40, %v4608_v5  ;;  %v4573_v13 = vsel %vm4570_vm8, %v4572_v16, %v4568_v15  ;;  %v4616_v2 = vand.u32 2147483648, %v8402_v23  ;;  %vm9867_vm0 = vmmov %vm9863_vm4 }
 0xef4   : > { %v4633_v53 = vsel %vm4630_vm9, %v4632_v42, %v4628_v14  ;;  %v3306_v59 = vsel %vm9858_vm12, %v9857_v20, %v8366_v35  ;;  %v4592_v25 = vsub.f32 1.0, %v4591_v44  ;;  %v3323_v48 = vrot.slane %v9859_v41, 4  ;;  %vm9868_vm9 = vmmov %vm9867_vm0 }
 0xef5   : > { %v4589_v18 = vmul.f32 %v8165_v3, %v4588_v28  ;;  %vm4610_vm13 = vweird.f32 %v8402_v23  ;;  %v4614_v8 = vand.u32 2147483647, %v8402_v23  ;;  %v4634_v54 = vmul.f32 %v8160_v58, %v4633_v53  ;;  %vm9870_vm8 = vmmov %vm9867_vm0 }
 0xef6   : > { %vm8532_vm15 = vmor %vm4610_vm13, %vm4611_vm11  ;;  %v4593_v35 = vmul.f32 %v8461_v4, %v4592_v25  ;;  %vm4596_vm6 = vweird.f32 %v8461_v4  ;;  %v4601_v31 = vand.u32 2147483648, %v8411_v46  ;;  %v4574_v30 = vmul.f32 %v8162_v1, %v4573_v13 }
 0xef7   : > { %v4613_v3 = vsel %vm8532_vm15, %v8456_v40, %v4609_v49  ;;  %v4599_v23 = vand.u32 2147483647, %v8411_v46  ;;  %v3312_v58 = vperm.slane %v3306_v59, %v9565_v62  ;;  %v4617_v45 = vor.u32 1.1754944e-38, %v4616_v2  ;;  %vm9871_vm11 = vmmov %vm9867_vm0 }
 0xef8   : > { %4857 = vperm.xlu2 %5781, %v4589_v18   ;;  %v4594_v24 = vadd.f32 %v8461_v4, %v4593_v35  ;;  %vm4595_vm1 = vweird.f32 %v8411_v46  ;;  %v9862_v51 = vrot.slane %v8375_v17, 4  ;;  %v9864_v1 = vperm.slane %v8395_v11, %v9565_v62  ;;  %vm9872_vm12 = vmmov %vm9867_vm0 }
 0xef9   : > { %4872 = vperm.xlu0 %5783, %v4634_v54   ;;  %vm4615_vm3 = vcmp.eq.f32.partialorder %v4614_v8, 8.507059e+37  ;;  %vm4597_vm5 = vmor %vm4595_vm1, %vm4596_vm6  ;;  %v3324_v40 = vsel %vm9865_vm14, 0.0, %v3323_v48  ;;  %v4602_v46 = vor.u32 1.1754944e-38, %v4601_v31  ;;  %vm4600_vm7 = vcmp.eq.f32.partialorder %v4599_v23, 8.507059e+37 }
 0xefa   : > { %v3294_v43 = vsel %vm9863_vm4, %v9862_v51, %v8363_v61  ;;  %v3319_v33 = vrot.slane %v9864_v1, 4  ;;  %4852 = vperm.xlu1 %5782, %v4574_v30   ;;  %v4618_v26 = vsel %vm4615_vm3, %v4617_v45, %v4613_v3  ;;  %v4598_v27 = vsel %vm4597_vm5, %v8461_v4, %v4594_v24  ;;  %vm9875_vm13 = vmmov %vm9867_vm0 }
 0xefb   : > { %v3300_v17 = vperm.slane %v3294_v43, %v9565_v62  ;;  %v3321_v57 = vrot.slane %v3312_v58, 4  ;;  %v4603_v61 = vsel %vm4600_vm7, %v4602_v46, %v4598_v27  ;;  %v3336_v7 = vsel %vm9866_vm10, %v3323_v48, %v3312_v58  ;;  %vm9877_vm15 = vmmov %vm9867_vm0 }
 0xefc   : > { %v3341_v11 = vrot.slane %v3324_v40, 4  ;;  %v4619_v38 = vmul.f32 %v8180_v12, %v4618_v26  ;;  %v3320_v22 = vsel %vm9867_vm0, 0.0, %v3319_v33  ;;  %v4604_v32 = vmul.f32 %v8178_v63, %v4603_v61  ;;  %vm9879_vm6 = vmmov %vm9867_vm0 }
 0xefd   : > { %v3317_v50 = vrot.slane %v3300_v17, 4  ;;  %v3322_v29 = vsel %vm9868_vm9, 0.0, %v3321_v57  ;;  %v8565_v4 = vperm.slane %v3336_v7, %v9560_v47  ;;  %v3325_v34 = vsel %vm9870_vm8, %v3319_v33, %v3300_v17  ;;  %vm9881_vm1 = vmmov %vm9867_vm0 }
 0xefe   : > { %v3330_v52 = vrot.slane %v3320_v22, 4  ;;  %v3342_v37 = vsel %vm9871_vm11, %v3341_v11, %v3322_v29  ;;  %v8571_v12 = vperm.slane %v3325_v34, %v9560_v47 }
 0xeff   : > { %9869 = vst [vmem:[#allocation20_spill] sm:$0xff] %v8565_v4  ;;  %v3318_v10 = vsel %vm9872_vm12, 0.0, %v3317_v50  ;;  %v8574_v42 = vperm.slane %v3342_v37, %v9560_v47  ;;  %v3361_v63 = vrot.slane %v8565_v4, 4 }
 0xf00   : > { %4867 = vperm.xlu2 %5781, %v4619_v38   ;;  %9873 = vst [vmem:[#allocation6_spill] sm:$0xff] %v8571_v12  ;;  %v3331_v15 = vsel %vm9875_vm13, %v3330_v52, %v3318_v10  ;;  %v3349_v28 = vrot.slane %v8571_v12, 4 }
 0xf01   : > { %9874 = vst [vmem:[#allocation26_spill] sm:$0xff] %v8574_v42  ;;  %v8579_v5 = vperm.slane %v3331_v15, %v9560_v47  ;;  %v3362_v14 = vsel %vm9877_vm15, %v8574_v42, %v3361_v63 }
 0xf02   : > { %4862 = vperm.xlu1 %5782, %v4604_v32   ;;  %v8589_v49 = vperm.slane %v3362_v14, %v9565_v62 }
 0xf03   : > { %9876 = vst [vmem:[#allocation27_spill] sm:$0xff] %v8579_v5  ;;  %v3350_v13 = vsel %vm9879_vm6, %v8579_v5, %v3349_v28 }
 0xf04   : > { %9878 = vst [vmem:[#allocation28_spill] sm:$0xff] %v8589_v49  ;;  %v8607_v18 = vperm.slane %v3350_v13, %v9565_v62  ;;  %v3375_v8 = vrot.slane %v8589_v49, 4 }
 0xf06   : > { %9880 = vst [vmem:[#allocation29_spill] sm:$0xff] %v8607_v18  ;;  %v8628_v23 = vsel %vm9881_vm1, %v3375_v8, %v8607_v18 }
 0xf0b   : > { %v4206_v16 = vpop.xlane.xlu2 %4205 }
 0xf0c   : > { %v8584_v44 = vperm.slane %v4206_v16, 0  ;;  %v8586_v53 = vperm.slane %v4206_v16, 1  ;;  %v8591_v20 = vperm.slane %v4206_v16, 2  ;;  %v8593_v59 = vperm.slane %v4206_v16, 3 }
 0xf0d   : > { %v8597_v2 = vperm.slane %v4206_v16, 4  ;;  %v4197_v25 = vpop.xlane.xlu0 %4196  ;;  %v8600_v41 = vperm.slane %v4206_v16, 5  ;;  %v8603_v48 = vperm.slane %v4206_v16, 6  ;;  %v8621_v30 = vperm.slane %v4206_v16, 7 }
 0xf0e   : > { %6002 = vrcp.f32 %v8586_v53  ;;  %v8611_v54 = vperm.slane %v4197_v25, 0  ;;  %v8613_v36 = vperm.slane %v4197_v25, 2  ;;  %v8616_v35 = vperm.slane %v4197_v25, 1 }
 0xf0f   : > { %6004 = vrcp.f32 %v8584_v44  ;;  %v8624_v3 = vperm.slane %v4197_v25, 3  ;;  %v8632_v45 = vperm.slane %v4197_v25, 4  ;;  %v8634_v24 = vperm.slane %v4197_v25, 5 }
 0xf10   : > { %6006 = vrcp.f32 %v8591_v20  ;;  %v4316_v51 = vand.u32 2147483648, %v8613_v36  ;;  %v8640_v1 = vperm.slane %v4197_v25, 6  ;;  %v4301_v33 = vand.u32 2147483648, %v8616_v35 }
 0xf11   : > { %6008 = vrcp.f32 %v8593_v59  ;;  %v8648_v27 = vperm.slane %v4197_v25, 7  ;;  %v4314_v46 = vand.u32 2147483647, %v8613_v36  ;;  %v4286_v17 = vand.u32 2147483648, %v8611_v54 }
 0xf12   : > { %6010 = vrcp.f32 %v8597_v2  ;;  %v4284_v61 = vand.u32 2147483647, %v8611_v54  ;;  %v4331_v7 = vand.u32 2147483648, %v8624_v3  ;;  %v8661_v22 = vor.u32 1.1754944e-38, %v4316_v51 }
 0xf13   : > { %6012 = vrcp.f32 %v8600_v41  ;;  %v4299_v32 = vand.u32 2147483647, %v8616_v35  ;;  %v8669_v34 = vor.u32 1.1754944e-38, %v4301_v33  ;;  %vm4280_vm4 = vweird.f32 %v8611_v54 }
 0xf14   : > { %v8619_v31 = vpop.eup %6002  ;;  %6014 = vrcp.f32 %v8603_v48  ;;  %v4659_v37 = vand.u32 2147483647, %v8586_v53  ;;  %vm4295_vm3 = vweird.f32 %v8616_v35  ;;  %v4287_v63 = vor.u32 1.1754944e-38, %v4286_v17 }
 0xf15   : > { %v8630_v58 = vpop.eup %6004  ;;  %6016 = vrcp.f32 %v8611_v54  ;;  %v4651_v40 = vmul.f32 %v8619_v31, %v8586_v53  ;;  %v4329_v15 = vand.u32 2147483647, %v8624_v3  ;;  %vm4655_vm5 = vweird.f32 %v8586_v53 }
 0xf16   : > { %v8638_v43 = vpop.eup %6006  ;;  %6018 = vrcp.f32 %v8616_v35  ;;  %v4636_v50 = vmul.f32 %v8630_v58, %v8584_v44  ;;  %vm4310_vm14 = vweird.f32 %v8613_v36  ;;  %vm8679_vm7 = vcmp.eq.f32.partialorder %v4284_v61, 8.507059e+37 }
 0xf17   : > { %v8646_v26 = vpop.eup %6008  ;;  %6020 = vrcp.f32 %v8613_v36  ;;  %v4652_v11 = vsub.f32 1.0, %v4651_v40  ;;  %v8683_v25 = vor.u32 1.1754944e-38, %v4331_v7  ;;  %vm4656_vm10 = vweird.f32 %v8619_v31 }
 0xf18   : > { %v8653_v57 = vpop.eup %6010  ;;  %6022 = vrcp.f32 %v8624_v3  ;;  %v4637_v28 = vsub.f32 1.0, %v4636_v50  ;;  %vm8688_vm0 = vcmp.eq.f32.partialorder %v4299_v32, 8.507059e+37  ;;  %v4661_v17 = vand.u32 2147483648, %v8586_v53  ;;  %vm8715_vm6 = vmor %vm4655_vm5, %vm4656_vm10 }
 0xf19   : > { %v8658_v38 = vpop.eup %6012  ;;  %6024 = vrcp.f32 %v8621_v30  ;;  %v4653_v52 = vmul.f32 %v8619_v31, %v4652_v11  ;;  %vm4640_vm9 = vweird.f32 %v8584_v44  ;;  %vm8698_vm8 = vcmp.eq.f32.partialorder %v4314_v46, 8.507059e+37 }
 0xf1a   : > { %v8666_v29 = vpop.eup %6014  ;;  %6026 = vrcp.f32 %v8634_v24  ;;  %v4638_v61 = vmul.f32 %v8630_v58, %v4637_v28  ;;  %vm8702_vm11 = vcmp.eq.f32.partialorder %v4659_v37, 8.507059e+37  ;;  %vm4641_vm12 = vweird.f32 %v8630_v58 }
 0xf1b   : > { %v6017_v10 = vpop.eup %6016  ;;  %v4654_v8 = vadd.f32 %v8619_v31, %v4653_v52  ;;  %v4646_v53 = vand.u32 2147483648, %v8584_v44  ;;  %vm8733_vm10 = vmor %vm4640_vm9, %vm4641_vm12  ;;  %vm8746_vm9 = vcmp.eq.f32.partialorder %v4329_v15, 8.507059e+37  ;;  %6028 = vrcp.f32 %v8632_v45 }
 0xf1c   : > { %v6019_v14 = vpop.eup %6018  ;;  %v4276_v16 = vmul.f32 %v6017_v10, %v8611_v54  ;;  %vm4281_vm15 = vweird.f32 %v6017_v10  ;;  %v4639_v12 = vadd.f32 %v8630_v58, %v4638_v61  ;;  %6030 = vrcp.f32 %v8640_v1 }
 0xf1d   : > { %v6021_v51 = vpop.eup %6020  ;;  %v4291_v33 = vmul.f32 %v6019_v14, %v8616_v35  ;;  %vm4296_vm13 = vweird.f32 %v6019_v14  ;;  %6032 = vrcp.f32 %v8648_v27  ;;  %v4666_v40 = vmul.f32 %v8638_v43, %v8591_v20 }
 0xf1e   : > { %v8695_v11 = vpop.eup %6022  ;;  %v4306_v7 = vmul.f32 %v6021_v51, %v8613_v36  ;;  %v4277_v52 = vsub.f32 1.0, %v4276_v16  ;;  %vm4311_vm5 = vweird.f32 %v6021_v51  ;;  %vm4297_vm1 = vmor %vm4295_vm3, %vm4296_vm13  ;;  %vm4670_vm13 = vweird.f32 %v8591_v20 }
 0xf1f   : > { %v8707_v47 = vpop.eup %6024  ;;  %v4292_v28 = vsub.f32 1.0, %v4291_v33  ;;  %v4321_v49 = vmul.f32 %v8695_v11, %v8624_v3  ;;  %v4658_v33 = vsel %vm8715_vm6, %v8619_v31, %v4654_v8  ;;  %vm4282_vm6 = vmor %vm4280_vm4, %vm4281_vm15  ;;  %vm4326_vm2 = vweird.f32 %v8695_v11 }
 0xf20   : > { %9890 = vst [vmem:[#allocation30_spill] sm:$0xff] %v8707_v47  ;;  %v8719_v37 = vpop.eup %6026  ;;  %v4307_v16 = vsub.f32 1.0, %v4306_v7  ;;  %v4278_v18 = vmul.f32 %v6017_v10, %v4277_v52  ;;  %v4662_v7 = vor.u32 1.1754944e-38, %v4661_v17  ;;  %vm4312_vm4 = vmor %vm4310_vm14, %vm4311_vm5  ;;  %vm9897_vm14 = vweird.f32 %v8624_v3 }
 0xf21   : > { %v4293_v62 = vmul.f32 %v6019_v14, %v4292_v28  ;;  %v4322_v4 = vsub.f32 1.0, %v4321_v49  ;;  %v4351_v5 = vmul.f32 %v8719_v37, %v8634_v24  ;;  %v8812_v46 = vpop.eup %6028  ;;  %vm4686_vm5 = vweird.f32 %v8646_v26 }
 0xf22   : > { %v4308_v42 = vmul.f32 %v6021_v51, %v4307_v16  ;;  %v4279_v47 = vadd.f32 %v6017_v10, %v4278_v18  ;;  %v4644_v18 = vand.u32 2147483647, %v8584_v44 }
 0xf23   : > { %v4294_v31 = vadd.f32 %v6019_v14, %v4293_v62  ;;  %v4323_v49 = vmul.f32 %v8695_v11, %v4322_v4  ;;  %v4663_v62 = vsel %vm8702_vm11, %v4662_v7, %v4658_v33  ;;  %v4643_v4 = vsel %vm8733_vm10, %v8630_v58, %v4639_v12  ;;  %v8827_v7 = vpop.eup %6030 }
 0xf24   : > { %v4309_v8 = vadd.f32 %v6021_v51, %v4308_v42  ;;  %v4283_v17 = vsel %vm4282_vm6, %v6017_v10, %v4279_v47  ;;  %v4647_v47 = vor.u32 1.1754944e-38, %v4646_v53  ;;  %v4352_v54 = vsub.f32 1.0, %v4351_v5 }
 0xf25   : > { %v4298_v42 = vsel %vm4297_vm1, %v6019_v14, %v4294_v31  ;;  %v4288_v44 = vsel %vm8679_vm7, %v4287_v63, %v4283_v17  ;;  %v4324_v12 = vadd.f32 %v8695_v11, %v4323_v49  ;;  %vm4645_vm3 = vcmp.eq.f32.partialorder %v4644_v18, 8.507059e+37  ;;  %vm8785_vm7 = vmor %vm9897_vm14, %vm4326_vm2 }
 0xf26   : > { %v4313_v35 = vsel %vm4312_vm4, %v6021_v51, %v4309_v8  ;;  %v4303_v10 = vsel %vm8688_vm0, %v8669_v34, %v4298_v42  ;;  %v4289_v15 = vmul.f32 %v8185_v21, %v4288_v44  ;;  %v8764_v32 = vpop.xlane.xlu1 %4199  ;;  %v4648_v34 = vsel %vm4645_vm3, %v4647_v47, %v4643_v4 }
 0xf27   : > { %v4318_v36 = vsel %vm8698_vm8, %v8661_v22, %v4313_v35  ;;  %v4304_v58 = vmul.f32 %v8188_v6, %v4303_v10  ;;  %v8775_v21 = vperm.slane %v8764_v32, 0  ;;  %v8779_v63 = vperm.slane %v8764_v32, 1 }
 0xf28   : > { %v4319_v5 = vmul.f32 %v8190_v55, %v4318_v36  ;;  %4757 = vperm.xlu2 %5781, %v4289_v15   ;;  %v4664_v55 = vmul.f32 %v8212_v19, %v4663_v62  ;;  %vm4355_vm0 = vweird.f32 %v8634_v24  ;;  %v8792_v22 = vperm.slane %v8764_v32, 2 }
 0xf29   : > { %4762 = vperm.xlu0 %5783, %v4304_v58   ;;  %v4328_v14 = vsel %vm8785_vm7, %v8695_v11, %v4324_v12  ;;  %v4353_v13 = vmul.f32 %v8719_v37, %v4352_v54  ;;  %vm4356_vm8 = vweird.f32 %v8719_v37  ;;  %v4649_v3 = vmul.f32 %v8210_v0, %v4648_v34 }
 0xf2a   : > { %4767 = vperm.xlu1 %5782, %v4319_v5   ;;  %v4359_v51 = vand.u32 2147483647, %v8634_v24  ;;  %v4361_v19 = vand.u32 2147483648, %v8634_v24  ;;  %v8805_v50 = vperm.slane %v8764_v32, 3  ;;  %v8808_v28 = vperm.slane %v8764_v32, 4  ;;  %vm8823_vm2 = vmor %vm4355_vm0, %vm4356_vm8 }
 0xf2b   : > { %6034 = vrcp.f32 %v8775_v21  ;;  %v4354_v11 = vadd.f32 %v8719_v37, %v4353_v13  ;;  %v8815_v0 = vperm.slane %v8764_v32, 5  ;;  %v4333_v16 = vsel %vm8746_vm9, %v8683_v25, %v4328_v14  ;;  %v8835_v25 = vpop.eup %6032 }
 0xf2c   : > { %6036 = vrcp.f32 %v8779_v63  ;;  %v4667_v53 = vsub.f32 1.0, %v4666_v40  ;;  %v4674_v31 = vand.u32 2147483647, %v8591_v20  ;;  %v4676_v49 = vand.u32 2147483648, %v8591_v20 }
 0xf2d   : > { %6038 = vrcp.f32 %v8792_v22  ;;  %v4358_v52 = vsel %vm8823_vm2, %v8719_v37, %v4354_v11  ;;  %v4362_v24 = vor.u32 1.1754944e-38, %v4361_v19  ;;  %vm4671_vm11 = vweird.f32 %v8638_v43 }
 0xf2e   : > { %v4668_v18 = vmul.f32 %v8638_v43, %v4667_v53  ;;  %v4681_v8 = vmul.f32 %v8646_v26, %v8593_v59  ;;  %6040 = vrcp.f32 %v8805_v50  ;;  %v4334_v17 = vmul.f32 %v8196_v60, %v4333_v16  ;;  %vm4672_vm1 = vmor %vm4670_vm13, %vm4671_vm11 }
 0xf2f   : > { %vm4360_vm12 = vcmp.eq.f32.partialorder %v4359_v51, 8.507059e+37  ;;  %vm8845_vm15 = vcmp.eq.f32.partialorder %v4674_v31, 8.507059e+37  ;;  %v4677_v44 = vor.u32 1.1754944e-38, %v4676_v49  ;;  %v4689_v60 = vand.u32 2147483647, %v8593_v59 }
 0xf30   : > { %4877 = vperm.xlu2 %5781, %v4649_v3   ;;  %v4363_v37 = vsel %vm4360_vm12, %v4362_v24, %v4358_v52  ;;  %v4669_v61 = vadd.f32 %v8638_v43, %v4668_v18  ;;  %v4682_v4 = vsub.f32 1.0, %v4681_v8  ;;  %v4691_v47 = vand.u32 2147483648, %v8593_v59 }
 0xf31   : > { %4882 = vperm.xlu0 %5783, %v4664_v55   ;;  %v8849_v42 = vpop.eup %6034  ;;  %v4711_v20 = vmul.f32 %v8658_v38, %v8600_v41  ;;  %v4719_v15 = vand.u32 2147483647, %v8600_v41  ;;  %v4364_v36 = vmul.f32 %v8204_v9, %v4363_v37  ;;  %vm4685_vm10 = vweird.f32 %v8593_v59 }
 0xf32   : > { %4772 = vperm.xlu1 %5782, %v4334_v17   ;;  %v8855_v54 = vpop.eup %6036  ;;  %v4673_v35 = vsel %vm4672_vm1, %v8638_v43, %v4669_v61  ;;  %v4683_v10 = vmul.f32 %v8646_v26, %v4682_v4  ;;  %vm4715_vm6 = vweird.f32 %v8600_v41  ;;  %vm4716_vm9 = vweird.f32 %v8658_v38  ;;  %vm4687_vm4 = vmor %vm4685_vm10, %vm4686_vm5  ;;  %v9908_v17 = vld [vmem:[#allocation22_spill] sm:$0xff] }
 0xf33   : > { %v8861_v12 = vpop.eup %6038  ;;  %v4678_v58 = vsel %vm8845_vm15, %v4677_v44, %v4673_v35  ;;  %v4712_v5 = vsub.f32 1.0, %v4711_v20  ;;  %v4721_v43 = vand.u32 2147483648, %v8600_v41  ;;  %vm4690_vm3 = vcmp.eq.f32.partialorder %v4689_v60, 8.507059e+37  ;;  %vm4717_vm7 = vmor %vm4715_vm6, %vm4716_vm9 }
 0xf34   : > { %v4684_v34 = vadd.f32 %v8646_v26, %v4683_v10  ;;  %v8871_v6 = vpop.eup %6040  ;;  %v4692_v55 = vor.u32 1.1754944e-38, %v4691_v47  ;;  %v4336_v14 = vmul.f32 %v8812_v46, %v8632_v45  ;;  %v4679_v59 = vmul.f32 %v8227_v39, %v4678_v58 }
 0xf35   : > { %v4713_v9 = vmul.f32 %v8658_v38, %v4712_v5  ;;  %vm8878_vm14 = vcmp.eq.f32.partialorder %v4719_v15, 8.507059e+37  ;;  %v4344_v51 = vand.u32 2147483647, %v8632_v45  ;;  %v4366_v16 = vmul.f32 %v8827_v7, %v8640_v1 }
 0xf36   : > { %v4688_v13 = vsel %vm4687_vm4, %v8646_v26, %v4684_v34  ;;  %v4337_v11 = vsub.f32 1.0, %v4336_v14  ;;  %v4722_v39 = vor.u32 1.1754944e-38, %v4721_v43  ;;  %vm4340_vm0 = vweird.f32 %v8632_v45  ;;  %v9910_v34 = vld [vmem:[#allocation23_spill] sm:$0xff] }
 0xf37   : > { %v4693_v19 = vsel %vm4690_vm3, %v4692_v55, %v4688_v13  ;;  %v4714_v40 = vadd.f32 %v8658_v38, %v4713_v9  ;;  %v4346_v26 = vand.u32 2147483648, %v8632_v45  ;;  %vm4341_vm8 = vweird.f32 %v8812_v46 }
 0xf38   : > { %v4694_v33 = vmul.f32 %v8223_v56, %v4693_v19  ;;  %v4338_v52 = vmul.f32 %v8812_v46, %v4337_v11  ;;  %v4367_v31 = vsub.f32 1.0, %v4366_v16  ;;  %vm8898_vm2 = vcmp.eq.f32.partialorder %v4344_v51, 8.507059e+37  ;;  %vm4342_vm12 = vmor %vm4340_vm0, %vm4341_vm8 }
 0xf39   : > { %4887 = vperm.xlu0 %5783, %v4679_v59   ;;  %v4718_v53 = vsel %vm4717_vm7, %v8658_v38, %v4714_v40  ;;  %v4376_v49 = vand.u32 2147483648, %v8640_v1  ;;  %v4726_v24 = vmul.f32 %v8666_v29, %v8603_v48  ;;  %vm4371_vm11 = vweird.f32 %v8827_v7 }
 0xf3a   : > { %4782 = vperm.xlu1 %5782, %v4364_v36   ;;  %4892 = vperm.xlu2 %5781, %v4694_v33   ;;  %v4723_v56 = vsel %vm8878_vm14, %v4722_v39, %v4718_v53  ;;  %v4339_v38 = vadd.f32 %v8812_v46, %v4338_v52  ;;  %v4368_v18 = vmul.f32 %v8827_v7, %v4367_v31  ;;  %v4374_v8 = vand.u32 2147483647, %v8640_v1  ;;  %v9911_v39 = vld [vmem:[#allocation9_spill] sm:$0xff] }
 0xf3b   : > { %v4724_v37 = vmul.f32 %v9908_v17, %v4723_v56  ;;  %v4347_v61 = vor.u32 1.1754944e-38, %v4346_v26  ;;  %vm4370_vm13 = vweird.f32 %v8640_v1  ;;  %v4727_v62 = vsub.f32 1.0, %v4726_v24  ;;  %v9909_v1 = vld [vmem:[#allocation16_spill] sm:$0xff] }
 0xf3c   : > { %v4343_v4 = vsel %vm4342_vm12, %v8812_v46, %v4339_v38  ;;  %v4369_v44 = vadd.f32 %v8827_v7, %v4368_v18  ;;  %v4377_v60 = vor.u32 1.1754944e-38, %v4376_v49  ;;  %v4736_v47 = vand.u32 2147483648, %v8603_v48  ;;  %vm4372_vm15 = vmor %vm4370_vm13, %vm4371_vm11  ;;  %v9912_v56 = vld [vmem:[#allocation24_spill] sm:$0xff] }
 0xf3d   : > { %v4348_v20 = vsel %vm8898_vm2, %v4347_v61, %v4343_v4  ;;  %v4728_v35 = vmul.f32 %v8666_v29, %v4727_v62  ;;  %vm4731_vm1 = vweird.f32 %v8666_v29  ;;  %v4696_v45 = vmul.f32 %v8653_v57, %v8597_v2  ;;  %v9915_v62 = vld [vmem:[#allocation11_spill] sm:$0xff] }
 0xf3e   : > { %v4349_v10 = vmul.f32 %v9909_v1, %v4348_v20  ;;  %v4373_v46 = vsel %vm4372_vm15, %v8827_v7, %v4369_v44  ;;  %vm4375_vm5 = vcmp.eq.f32.partialorder %v4374_v8, 8.507059e+37  ;;  %v4734_v15 = vand.u32 2147483647, %v8603_v48 }
 0xf3f   : > { %v4378_v36 = vsel %vm4375_vm5, %v4377_v60, %v4373_v46  ;;  %v4729_v58 = vadd.f32 %v8666_v29, %v4728_v35  ;;  %vm4730_vm10 = vweird.f32 %v8603_v48  ;;  %v4697_v5 = vsub.f32 1.0, %v4696_v45 }
 0xf40   : > { %v4379_v43 = vmul.f32 %v9910_v34, %v4378_v36  ;;  %vm4732_vm6 = vmor %vm4730_vm10, %vm4731_vm1  ;;  %v4737_v55 = vor.u32 1.1754944e-38, %v4736_v47  ;;  %v4706_v9 = vand.u32 2147483648, %v8597_v2  ;;  %v4381_v7 = vmul.f32 %v8835_v25, %v8648_v27  ;;  %v9916_v36 = vld [vmem:[#allocation25_spill] sm:$0xff] }
 0xf41   : > { %4777 = vperm.xlu0 %5783, %v4349_v10   ;;  %v4733_v14 = vsel %vm4732_vm6, %v8666_v29, %v4729_v58  ;;  %v4698_v59 = vmul.f32 %v8653_v57, %v4697_v5  ;;  %vm4701_vm9 = vweird.f32 %v8653_v57  ;;  %v4704_v48 = vand.u32 2147483647, %v8597_v2 }
 0xf42   : > { %4902 = vperm.xlu1 %5782, %v4724_v37   ;;  %6042 = vrcp.f32 %v8808_v28  ;;  %4787 = vperm.xlu2 %5781, %v4379_v43   ;;  %vm4735_vm4 = vcmp.eq.f32.partialorder %v4734_v15, 8.507059e+37  ;;  %vm4700_vm3 = vweird.f32 %v8597_v2  ;;  %v4382_v13 = vsub.f32 1.0, %v4381_v7 }
 0xf43   : > { %v4738_v3 = vsel %vm4735_vm4, %v4737_v55, %v4733_v14  ;;  %v4699_v51 = vadd.f32 %v8653_v57, %v4698_v59  ;;  %vm4386_vm14 = vweird.f32 %v8835_v25  ;;  %v4391_v29 = vand.u32 2147483648, %v8648_v27  ;;  %vm4702_vm7 = vmor %vm4700_vm3, %vm4701_vm9  ;;  %v9917_v55 = vld [vmem:[#allocation30_spill] sm:$0xff] }
 0xf44   : > { %v4707_v19 = vor.u32 1.1754944e-38, %v4706_v9  ;;  %v4383_v40 = vmul.f32 %v8835_v25, %v4382_v13  ;;  %v4389_v11 = vand.u32 2147483647, %v8648_v27  ;;  %v4426_v16 = vmul.f32 %v8861_v12, %v8792_v22 }
 0xf45   : > { %v4703_v33 = vsel %vm4702_vm7, %v8653_v57, %v4699_v51  ;;  %vm4705_vm0 = vcmp.eq.f32.partialorder %v4704_v48, 8.507059e+37  ;;  %vm4385_vm8 = vweird.f32 %v8648_v27  ;;  %v4434_v2 = vand.u32 2147483647, %v8792_v22  ;;  %v9919_v48 = vld [vmem:[#allocation12_spill] sm:$0xff] }
 0xf46   : > { %v4739_v26 = vmul.f32 %v9911_v39, %v4738_v3  ;;  %v4708_v53 = vsel %vm4705_vm0, %v4707_v19, %v4703_v33  ;;  %v4384_v52 = vadd.f32 %v8835_v25, %v4383_v40  ;;  %v4427_v31 = vsub.f32 1.0, %v4426_v16  ;;  %vm4387_vm2 = vmor %vm4385_vm8, %vm4386_vm14 }
 0xf47   : > { %v4709_v41 = vmul.f32 %v9912_v56, %v4708_v53  ;;  %v4392_v49 = vor.u32 1.1754944e-38, %v4391_v29  ;;  %v4436_v24 = vand.u32 2147483648, %v8792_v22  ;;  %v4411_v57 = vmul.f32 %v8855_v54, %v8779_v63 }
 0xf48   : > { %v8955_v27 = vpop.eup %6042  ;;  %v4388_v38 = vsel %vm4387_vm2, %v8835_v25, %v4384_v52  ;;  %vm4390_vm11 = vcmp.eq.f32.partialorder %v4389_v11, 8.507059e+37  ;;  %v4428_v8 = vmul.f32 %v8861_v12, %v4427_v31  ;;  %vm4431_vm12 = vweird.f32 %v8861_v12 }
 0xf49   : > { %4897 = vperm.xlu0 %5783, %v4709_v41   ;;  %v4393_v17 = vsel %vm4390_vm11, %v4392_v49, %v4388_v38  ;;  %vm4430_vm13 = vweird.f32 %v8792_v22  ;;  %vm8961_vm15 = vcmp.eq.f32.partialorder %v4434_v2, 8.507059e+37  ;;  %v4412_v61 = vsub.f32 1.0, %v4411_v57  ;;  %v9920_v2 = vld [vmem:[#allocation13_spill] sm:$0xff] }
 0xf4a   : > { %4907 = vperm.xlu1 %5782, %v4739_v26   ;;  %v4838_v18 = vpop.permute.xlu2 %4837  ;;  %v4394_v4 = vmul.f32 %v9915_v62, %v4393_v17  ;;  %v4429_v44 = vadd.f32 %v8861_v12, %v4428_v8  ;;  %v4421_v25 = vand.u32 2147483648, %v8779_v63  ;;  %v4396_v60 = vmul.f32 %v8849_v42, %v8775_v21  ;;  %vm4432_vm1 = vmor %vm4430_vm13, %vm4431_vm12  ;;  %v9922_v17 = vld [vmem:[#allocation10_spill] sm:$0xff] }
 0xf4b   : > { %v4437_v47 = vor.u32 1.1754944e-38, %v4436_v24  ;;  %v4413_v20 = vmul.f32 %v8855_v54, %v4412_v61  ;;  %vm4416_vm5 = vweird.f32 %v8855_v54  ;;  %v4419_v22 = vand.u32 2147483647, %v8779_v63 }
 0xf4c   : > { %4792 = vperm.xlu2 %5781, %v4394_v4   ;;  %v4931_v35 = vmul.f32 %v4838_v18, %v8628_v23  ;;  %v4433_v45 = vsel %vm4432_vm1, %v8861_v12, %v4429_v44  ;;  %vm4415_vm10 = vweird.f32 %v8779_v63  ;;  %v4397_v1 = vsub.f32 1.0, %v4396_v60 }
 0xf4d   : > { %v4438_v10 = vsel %vm8961_vm15, %v4437_v47, %v4433_v45  ;;  %v4414_v46 = vadd.f32 %v8855_v54, %v4413_v20  ;;  %v4422_v15 = vor.u32 1.1754944e-38, %v4421_v25  ;;  %vm4401_vm6 = vweird.f32 %v8849_v42  ;;  %vm4417_vm9 = vmor %vm4415_vm10, %vm4416_vm5 }
 0xf4e   : > { %v4439_v58 = vmul.f32 %v9916_v36, %v4438_v10  ;;  %v4398_v5 = vmul.f32 %v8849_v42, %v4397_v1  ;;  %v4404_v34 = vand.u32 2147483647, %v8775_v21  ;;  %v4406_v12 = vand.u32 2147483648, %v8775_v21 }
 0xf4f   : > { %v8985_v63 = vperm.slane %v8764_v32, 6  ;;  %v4418_v43 = vsel %vm4417_vm9, %v8855_v54, %v4414_v46  ;;  %vm4420_vm4 = vcmp.eq.f32.partialorder %v4419_v22, 8.507059e+37  ;;  %v4741_v9 = vmul.f32 %v9917_v55, %v8621_v30 }
 0xf50   : > { %6044 = vrcp.f32 %v8815_v0  ;;  %v4423_v7 = vsel %vm4420_vm4, %v4422_v15, %v4418_v43  ;;  %v4399_v14 = vadd.f32 %v8849_v42, %v4398_v5  ;;  %vm4400_vm3 = vweird.f32 %v8775_v21  ;;  %v9924_v43 = vld [vmem:[#allocation17_spill] sm:$0xff] }
 0xf51   : > { %vm9918_vm14 = vcmask 64512   ;;  %v4424_v13 = vmul.f32 %v9919_v48, %v4423_v7  ;;  %vm4402_vm7 = vmor %vm4400_vm3, %vm4401_vm6  ;;  %v4407_v54 = vor.u32 1.1754944e-38, %v4406_v12  ;;  %v4742_v51 = vsub.f32 1.0, %v4741_v9 }
 0xf52   : > { %4807 = vperm.xlu1 %5782, %v4439_v58   ;;  %v5059_v59 = vsel %vm9918_vm14, %v4931_v35, 0.0  ;;  %v4858_v3 = vpop.permute.xlu2 %4857  ;;  %v4403_v29 = vsel %vm4402_vm7, %v8849_v42, %v4399_v14  ;;  %vm4405_vm0 = vcmp.eq.f32.partialorder %v4404_v34, 8.507059e+37  ;;  %v4749_v19 = vand.u32 2147483647, %v8621_v30  ;;  %vm9921_vm15 = vmmov %vm9918_vm14  ;;  %v9923_v35 = vld [vmem:[#allocation19_spill] sm:$0xff] }
 0xf53   : > { %v4751_v40 = vand.u32 2147483648, %v8621_v30  ;;  %4802 = vperm.xlu0 %5783, %v4424_v13   ;;  %v4408_v11 = vsel %vm4405_vm0, %v4407_v54, %v4403_v29  ;;  %v4743_v21 = vmul.f32 %v9917_v55, %v4742_v51  ;;  %vm4746_vm8 = vweird.f32 %v9917_v55 }
 0xf54   : > { %v4456_v16 = vmul.f32 %v8955_v27, %v8808_v28  ;;  %v5060_v33 = vrot.slane %v5059_v59, 4  ;;  %v4409_v39 = vmul.f32 %v9920_v2, %v4408_v11  ;;  %v4935_v26 = vmul.f32 %v4858_v3, %v8628_v23 }
 0xf55   : > { %6046 = vrcp.f32 %v8985_v63  ;;  %v4744_v42 = vadd.f32 %v9917_v55, %v4743_v21  ;;  %vm4745_vm2 = vweird.f32 %v8621_v30  ;;  %vm4750_vm12 = vcmp.eq.f32.partialorder %v4749_v19, 8.507059e+37 }
 0xf56   : > { %v4457_v53 = vsub.f32 1.0, %v4456_v16  ;;  %v9009_v52 = vpop.eup %6044  ;;  %4797 = vperm.xlu2 %5781, %v4409_v39   ;;  %vm4747_vm11 = vmor %vm4745_vm2, %vm4746_vm8  ;;  %v4752_v31 = vor.u32 1.1754944e-38, %v4751_v40  ;;  %vm4461_vm13 = vweird.f32 %v8955_v27  ;;  %v4464_v56 = vand.u32 2147483647, %v8808_v28  ;;  %v9925_v16 = vld [vmem:[#allocation15_spill] sm:$0xff] }
 0xf57   : > { %v4748_v41 = vsel %vm4747_vm11, %v9917_v55, %v4744_v42  ;;  %v4466_v24 = vand.u32 2147483648, %v8808_v28  ;;  %v4441_v30 = vmul.f32 %v8871_v6, %v8805_v50  ;;  %v9019_v57 = vperm.slane %v8764_v32, 7  ;;  %vm9926_vm11 = vmmov %vm9921_vm15 }
 0xf58   : > { %v4458_v49 = vmul.f32 %v8955_v27, %v4457_v53  ;;  %v5061_v38 = vadd.f32 %v5060_v33, %v5059_v59  ;;  %v5087_v18 = vsel %vm9921_vm15, %v4935_v26, 0.0  ;;  %v4753_v8 = vsel %vm4750_vm12, %v4752_v31, %v4748_v41  ;;  %vm9927_vm12 = vmmov %vm9926_vm11 }
 0xf59   : > { %v4754_v37 = vmul.f32 %v9922_v17, %v4753_v8  ;;  %vm4460_vm1 = vweird.f32 %v8808_v28  ;;  %v4442_v62 = vsub.f32 1.0, %v4441_v30  ;;  %vm4465_vm10 = vcmp.eq.f32.partialorder %v4464_v56, 8.507059e+37 }
 0xf5a   : > { %v4459_v61 = vadd.f32 %v8955_v27, %v4458_v49  ;;  %vm4462_vm5 = vmor %vm4460_vm1, %vm4461_vm13  ;;  %v4467_v4 = vor.u32 1.1754944e-38, %v4466_v24  ;;  %v4449_v44 = vand.u32 2147483647, %v8805_v50  ;;  %v4451_v25 = vand.u32 2147483648, %v8805_v50  ;;  %v4868_v59 = vpop.permute.xlu2 %4867 }
 0xf5b   : > { %v9027_v32 = vpop.eup %6046  ;;  %4912 = vperm.xlu1 %5782, %v4754_v37   ;;  %v4443_v47 = vmul.f32 %v8871_v6, %v4442_v62  ;;  %vm4446_vm6 = vweird.f32 %v8871_v6  ;;  %v4471_v28 = vmul.f32 %v9009_v52, %v8815_v0  ;;  %6048 = vrcp.f32 %v9019_v57  ;;  %v9929_v37 = vld [vmem:[#allocation18_spill] sm:$0xff] }
 0xf5c   : > { %v4463_v60 = vsel %vm4462_vm5, %v8955_v27, %v4459_v61  ;;  %v5062_v20 = vrot.slane %v5061_v38, 2  ;;  %vm4445_vm9 = vweird.f32 %v8805_v50  ;;  %v5088_v46 = vrot.slane %v5087_v18, 4  ;;  %vm9928_vm5 = vmmov %vm9926_vm11 }
 0xf5d   : > { %v4468_v22 = vsel %vm4465_vm10, %v4467_v4, %v4463_v60  ;;  %v4444_v1 = vadd.f32 %v8871_v6, %v4443_v47  ;;  %v4472_v10 = vsub.f32 1.0, %v4471_v28  ;;  %vm4447_vm4 = vmor %vm4445_vm9, %vm4446_vm6  ;;  %vm4450_vm3 = vcmp.eq.f32.partialorder %v4449_v44, 8.507059e+37 }
 0xf5e   : > { %v4469_v45 = vmul.f32 %v9923_v35, %v4468_v22  ;;  %v4452_v27 = vor.u32 1.1754944e-38, %v4451_v25  ;;  %vm4476_vm14 = vweird.f32 %v9009_v52  ;;  %v4479_v58 = vand.u32 2147483647, %v8815_v0  ;;  %vm9930_vm6 = vmmov %vm9928_vm5 }
 0xf5f   : > { %v4448_v15 = vsel %vm4447_vm4, %v8871_v6, %v4444_v1  ;;  %v4473_v36 = vmul.f32 %v9009_v52, %v4472_v10  ;;  %v4481_v5 = vand.u32 2147483648, %v8815_v0  ;;  %v4486_v50 = vmul.f32 %v9027_v32, %v8985_v63  ;;  %vm9931_vm4 = vmmov %vm9928_vm5 }
 0xf60   : > { %4817 = vperm.xlu0 %5783, %v4469_v45   ;;  %v4453_v34 = vsel %vm4450_vm3, %v4452_v27, %v4448_v15  ;;  %v9045_v12 = vadd.f32 %v5062_v20, %v5061_v38  ;;  %vm4475_vm7 = vweird.f32 %v8815_v0  ;;  %v9052_v14 = vadd.f32 %v5088_v46, %v5087_v18 }
 0xf61   : > { %v4454_v55 = vmul.f32 %v9924_v43, %v4453_v34  ;;  %v4474_v9 = vadd.f32 %v9009_v52, %v4473_v36  ;;  %v9050_v6 = vpop.eup %6048  ;;  %vm4477_vm0 = vmor %vm4475_vm7, %vm4476_vm14  ;;  %vm4480_vm8 = vcmp.eq.f32.partialorder %v4479_v58, 8.507059e+37  ;;  %v4482_v48 = vor.u32 1.1754944e-38, %v4481_v5 }
 0xf62   : > { %v4487_v13 = vsub.f32 1.0, %v4486_v50  ;;  %v4496_v51 = vand.u32 2147483648, %v8985_v63  ;;  %vm4491_vm2 = vweird.f32 %v9027_v32  ;;  %v4494_v11 = vand.u32 2147483647, %v8985_v63 }
 0xf63   : > { %v4843_v7 = vpop.permute.xlu0 %4842  ;;  %4812 = vperm.xlu2 %5781, %v4454_v55   ;;  %v4478_v3 = vsel %vm4477_vm0, %v9009_v52, %v4474_v9  ;;  %v4937_v21 = vmul.f32 %v4868_v59, %v8628_v23  ;;  %vm4490_vm13 = vweird.f32 %v8985_v63  ;;  %v5064_v52 = vrot.slane %v9045_v12, 1 }
 0xf64   : > { %v4848_v54 = vpop.permute.xlu1 %4847  ;;  %v4932_v29 = vmul.f32 %v4843_v7, %v8628_v23  ;;  %v4483_v19 = vsel %vm4480_vm8, %v4482_v48, %v4478_v3  ;;  %v4488_v40 = vmul.f32 %v9027_v32, %v4487_v13  ;;  %v5090_v31 = vrot.slane %v9052_v14, 2  ;;  %vm4492_vm15 = vmor %vm4490_vm13, %vm4491_vm2  ;;  %v9932_v7 = vld [vmem:[#allocation14_spill] sm:$0xff] }
 0xf65   : > { %v4933_v0 = vmul.f32 %v4848_v54, %v8628_v23  ;;  %v4484_v33 = vmul.f32 %v9925_v16, %v4483_v19  ;;  %v4497_v56 = vor.u32 1.1754944e-38, %v4496_v51  ;;  %v4501_v41 = vmul.f32 %v9050_v6, %v9019_v57  ;;  %vm9935_vm8 = vmmov %vm9931_vm4 }
 0xf66   : > { %v5066_v39 = vsel %vm9927_vm12, %v4932_v29, 0.0  ;;  %v4489_v26 = vadd.f32 %v9027_v32, %v4488_v40  ;;  %vm4495_vm1 = vcmp.eq.f32.partialorder %v4494_v11, 8.507059e+37  ;;  %v5101_v38 = vsel %vm9928_vm5, %v4937_v21, 0.0 }
 0xf67   : > { %v5073_v2 = vsel %vm9926_vm11, %v4933_v0, 0.0  ;;  %v5067_v53 = vrot.slane %v5066_v39, 4  ;;  %v4502_v18 = vsub.f32 1.0, %v4501_v41  ;;  %v4511_v8 = vand.u32 2147483648, %v9019_v57 }
 0xf68   : > { %v5074_v42 = vrot.slane %v5073_v2, 4  ;;  %4822 = vperm.xlu0 %5783, %v4484_v33   ;;  %v4493_v49 = vsel %vm4492_vm15, %v9027_v32, %v4489_v26  ;;  %vm4506_vm10 = vweird.f32 %v9050_v6  ;;  %v4509_v32 = vand.u32 2147483647, %v9019_v57 }
 0xf69   : > { %v5068_v30 = vadd.f32 %v5067_v53, %v5066_v39  ;;  %v4498_v63 = vsel %vm4495_vm1, %v4497_v56, %v4493_v49  ;;  %v4503_v60 = vmul.f32 %v9050_v6, %v4502_v18  ;;  %v5102_v28 = vrot.slane %v5101_v38, 4 }
 0xf6a   : > { %v5075_v24 = vadd.f32 %v5074_v42, %v5073_v2  ;;  %v4499_v61 = vmul.f32 %v9929_v37, %v4498_v63  ;;  %vm4505_vm9 = vweird.f32 %v9019_v57  ;;  %v4512_v1 = vor.u32 1.1754944e-38, %v4511_v8 }
 0xf6b   : > { %v4873_v17 = vpop.permute.xlu0 %4872  ;;  %v5069_v4 = vrot.slane %v5068_v30, 2  ;;  %v4504_v45 = vadd.f32 %v9050_v6, %v4503_v60  ;;  %vm4507_vm3 = vmor %vm4505_vm9, %vm4506_vm10  ;;  %v5065_v58 = vadd.f32 %v5064_v52, %v9045_v12  ;;  %vm4510_vm14 = vcmp.eq.f32.partialorder %v4509_v32, 8.507059e+37  ;;  %v9942_v60 = vld [vmem:[#allocation27_spill] sm:$0xff] }
 0xf6c   : > { %v5076_v62 = vrot.slane %v5075_v24, 2  ;;  %v4853_v44 = vpop.permute.xlu1 %4852  ;;  %v4938_v25 = vmul.f32 %v4873_v17, %v8628_v23  ;;  %4827 = vperm.xlu2 %5781, %v4499_v61   ;;  %v5091_v9 = vadd.f32 %v5090_v31, %v9052_v14  ;;  %v5103_v57 = vadd.f32 %v5102_v28, %v5101_v38  ;;  %v9941_v61 = vld [vmem:[#allocation26_spill] sm:$0xff]  ;;  %vm9952_vm9 = vmmov %vm9931_vm4 }
 0xf6d   : > { %v4934_v47 = vmul.f32 %v4853_v44, %v8628_v23  ;;  %v5070_v22 = vadd.f32 %v5069_v4, %v5068_v30  ;;  %v4508_v5 = vsel %vm4507_vm3, %v9050_v6, %v4504_v45  ;;  %vm9933_vm7 = vcmask 1041409   ;;  %vm9953_vm3 = vmmov %vm9931_vm4 }
 0xf6e   : > { %v5077_v20 = vadd.f32 %v5076_v62, %v5075_v24  ;;  %v5108_v35 = vsel %vm9930_vm6, %v4938_v25, 0.0  ;;  %v4513_v43 = vsel %vm4510_vm14, %v4512_v1, %v4508_v5  ;;  %vm9934_vm0 = vcmask 1042434   ;;  %vm9954_vm14 = vmmov %vm9953_vm3 }
 0xf6f   : > { %v5080_v10 = vsel %vm9931_vm4, %v4934_v47, 0.0  ;;  %v5071_v27 = vrot.slane %v5070_v22, 1  ;;  %v5109_v36 = vrot.slane %v5108_v35, 4  ;;  %v4514_v59 = vmul.f32 %v9932_v7, %v4513_v43  ;;  %v9943_v47 = vld [vmem:[#allocation20_spill] sm:$0xff] }
 0xf70   : > { %v5078_v46 = vrot.slane %v5077_v20, 1  ;;  %v5081_v15 = vrot.slane %v5080_v10, 4  ;;  %v5092_v0 = vrot.slane %v5091_v9, 1  ;;  %v5104_v29 = vrot.slane %v5103_v57, 2  ;;  %v9950_v43 = vld [vmem:[#allocation28_spill] sm:$0xff] }
 0xf71   : > { %v5072_v50 = vadd.f32 %v5071_v27, %v5070_v22  ;;  %v5110_v54 = vadd.f32 %v5109_v36, %v5108_v35  ;;  %4832 = vperm.xlu0 %5783, %v4514_v59   ;;  %vm9936_vm2 = vcmask 1043459   ;;  %vm9937_vm11 = vcmask 1044484   ;;  %v9946_v35 = vld [vmem:[#allocation6_spill] sm:$0xff]  ;;  %v9948_v36 = vld [vmem:[#allocation29_spill] sm:$0xff] }
 0xf72   : > { %v5079_v34 = vadd.f32 %v5078_v46, %v5077_v20  ;;  %v5082_v55 = vadd.f32 %v5081_v15, %v5080_v10  ;;  %v5093_v33 = vadd.f32 %v5092_v0, %v5091_v9  ;;  %v5105_v2 = vadd.f32 %v5104_v29, %v5103_v57  ;;  %v9945_v20 = vld [vmem:[#allocation8_spill] sm:$0xff] }
 0xf73   : > { %v5217_v48 = vsel %vm9933_vm7, %v5072_v50, %v5065_v58  ;;  %v5111_v14 = vrot.slane %v5110_v54, 2  ;;  %vm9938_vm12 = vcmask 1045509   ;;  %vm9939_vm13 = vcmask 1046534   ;;  %vm9955_vm7 = vmmov %vm9953_vm3 }
 0xf74   : > { %v5083_v13 = vrot.slane %v5082_v55, 2  ;;  %v4863_v3 = vpop.permute.xlu1 %4862  ;;  %v5218_v12 = vsel %vm9934_vm0, %v5079_v34, %v5217_v48  ;;  %vm9940_vm15 = vcmask 1047559   ;;  %v3359_v62 = vrot.slane %v9941_v61, 4  ;;  %vm9956_vm0 = vmmov %vm9953_vm3 }
 0xf75   : > { %v4936_v6 = vmul.f32 %v4863_v3, %v8628_v23  ;;  %v5112_v26 = vadd.f32 %v5111_v14, %v5110_v54  ;;  %v5106_v23 = vrot.slane %v5105_v2, 1  ;;  %v3347_v32 = vrot.slane %v9942_v60, 4 }
 0xf76   : > { %v5084_v51 = vadd.f32 %v5083_v13, %v5082_v55  ;;  %vm9944_vm1 = vcmask 1047556   ;;  %v3377_v58 = vrot.slane %v9948_v36, 4 }
 0xf77   : > { %v5094_v19 = vsel %vm9935_vm8, %v4936_v6, 0.0  ;;  %v5113_v31 = vrot.slane %v5112_v26, 1  ;;  %v5107_v49 = vadd.f32 %v5106_v23, %v5105_v2  ;;  %v3360_v28 = vsel %vm9944_vm1, %v3359_v62, %v9943_v47  ;;  %vm9947_vm5 = vmmov %vm9944_vm1 }
 0xf78   : > { %v5085_v40 = vrot.slane %v5084_v51, 1  ;;  %v5095_v11 = vrot.slane %v5094_v19, 4  ;;  %v9106_v22 = vperm.slane %v3360_v28, %v9945_v20  ;;  %v3348_v45 = vsel %vm9947_vm5, %v3347_v32, %v9946_v35  ;;  %vm9949_vm10 = vmmov %vm9944_vm1 }
 0xf79   : > { %v5114_v24 = vadd.f32 %v5113_v31, %v5112_v26  ;;  %v9111_v46 = vperm.slane %v3348_v45, %v9945_v20  ;;  %vm9951_vm6 = vmmov %vm9944_vm1 }
 0xf7a   : > { %v5086_v21 = vadd.f32 %v5085_v40, %v5084_v51  ;;  %v5096_v16 = vadd.f32 %v5095_v11, %v5094_v19  ;;  %v3371_v27 = vrot.slane %v9106_v22, 4  ;;  %v9119_v55 = vsel %vm9951_vm6, %v9950_v43, %v3377_v58  ;;  %vm9957_vm8 = vmmov %vm9956_vm0 }
 0xf7b   : > { %v3373_v28 = vrot.slane %v9111_v46, 4  ;;  %vm9964_vm5 = vmmov %vm9956_vm0 }
 0xf7c   : > { %v5219_v39 = vsel %vm9936_vm2, %v5086_v21, %v5218_v12  ;;  %v5097_v42 = vrot.slane %v5096_v16, 2  ;;  %v3372_v5 = vsel %vm9949_vm10, %v3371_v27, %v9111_v46  ;;  %vm9958_vm2 = vmmov %vm9956_vm0  ;;  %vm9965_vm10 = vcmask 1041409  }
 0xf7d   : > { %v5220_v53 = vsel %vm9937_vm11, %v5093_v33, %v5219_v39  ;;  %vm9959_vm11 = vmmov %vm9956_vm0 }
 0xf7e   : > { %v5098_v52 = vadd.f32 %v5097_v42, %v5096_v16  ;;  %vm9966_vm6 = vmmov %vm9956_vm0 }
 0xf80   : > { %v5099_v56 = vrot.slane %v5098_v52, 1 }
 0xf82   : > { %v5100_v41 = vadd.f32 %v5099_v56, %v5098_v52  ;;  %v4758_v18 = vpop.permute.xlu2 %4757 }
 0xf83   : > { %v4915_v50 = vmul.f32 %v4758_v18, %v3372_v5 }
 0xf84   : > { %v5221_v30 = vsel %vm9938_vm12, %v5100_v41, %v5220_v53  ;;  %vm9960_vm12 = vmmov %vm9956_vm0 }
 0xf85   : > { %v5222_v38 = vsel %vm9939_vm13, %v5107_v49, %v5221_v30  ;;  %v4947_v54 = vsel %vm9931_vm4, %v4915_v50, 0.0  ;;  %vm9961_vm13 = vmmov %vm9956_vm0 }
 0xf86   : > { %v9099_v63 = vsel %vm9940_vm15, %v5114_v24, %v5222_v38  ;;  %v4948_v19 = vrot.slane %v4947_v54, 4  ;;  %vm9962_vm15 = vmmov %vm9944_vm1 }
 0xf87   : > { %v9143_v46 = vsel %vm9962_vm15, %v9106_v22, %v3373_v28  ;;  %vm9963_vm1 = vmmov %vm9956_vm0 }
 0xf88   : > { %v4949_v26 = vadd.f32 %v4948_v19, %v4947_v54  ;;  %vm9968_vm4 = vmmov %vm9956_vm0 }
 0xf89   : > { %vm9977_vm15 = vmmov %vm9956_vm0 }
 0xf8a   : > { %v4878_v8 = vpop.permute.xlu2 %4877  ;;  %v4950_v38 = vrot.slane %v4949_v26, 2 }
 0xf8b   : > { %v4939_v9 = vmul.f32 %v4878_v8, %v9119_v55 }
 0xf8c   : > { %v4951_v47 = vadd.f32 %v4950_v38, %v4949_v26 }
 0xf8d   : > { %v5115_v3 = vsel %vm9953_vm3, %v4939_v9, 0.0  ;;  %vm9969_vm3 = vcmask 1042434  }
 0xf8e   : > { %v5116_v11 = vrot.slane %v5115_v3, 4 }
 0xf90   : > { %v5117_v52 = vadd.f32 %v5116_v11, %v5115_v3 }
 0xf92   : > { %v5118_v8 = vrot.slane %v5117_v52, 2 }
 0xf94   : > { %v4893_v44 = vpop.permute.xlu2 %4892  ;;  %v5119_v35 = vadd.f32 %v5118_v8, %v5117_v52 }
 0xf95   : > { %v4942_v57 = vmul.f32 %v4893_v44, %v9119_v55 }
 0xf96   : > { %v5120_v54 = vrot.slane %v5119_v35, 1 }
 0xf97   : > { %v5136_v12 = vsel %vm9954_vm14, %v4942_v57, 0.0  ;;  %vm9970_vm14 = vmmov %vm9956_vm0 }
 0xf98   : > { %v5137_v21 = vrot.slane %v5136_v12, 4 }
 0xf9a   : > { %v5138_v23 = vadd.f32 %v5137_v21, %v5136_v12 }
 0xf9b   : > { %v4763_v17 = vpop.permute.xlu0 %4762 }
 0xf9c   : > { %v4768_v37 = vpop.permute.xlu1 %4767  ;;  %v4788_v15 = vpop.permute.xlu2 %4787  ;;  %v4916_v34 = vmul.f32 %v4763_v17, %v3372_v5  ;;  %v5139_v17 = vrot.slane %v5138_v23, 2 }
 0xf9d   : > { %v4917_v59 = vmul.f32 %v4768_v37, %v3372_v5  ;;  %v4921_v0 = vmul.f32 %v4788_v15, %v3372_v5 }
 0xf9e   : > { %v4954_v13 = vsel %vm9952_vm9, %v4916_v34, 0.0  ;;  %v5140_v45 = vadd.f32 %v5139_v17, %v5138_v23  ;;  %vm9967_vm9 = vmmov %vm9956_vm0 }
 0xf9f   : > { %v4961_v51 = vsel %vm9955_vm7, %v4917_v59, 0.0  ;;  %v4955_v29 = vrot.slane %v4954_v13, 4  ;;  %v4989_v33 = vsel %vm9956_vm0, %v4921_v0, 0.0  ;;  %vm9971_vm7 = vmmov %vm9956_vm0 }
 0xfa0   : > { %v4962_v16 = vrot.slane %v4961_v51, 4  ;;  %v4990_v41 = vrot.slane %v4989_v33, 4  ;;  %v5141_v3 = vrot.slane %v5140_v45, 1 }
 0xfa1   : > { %v4956_v2 = vadd.f32 %v4955_v29, %v4954_v13 }
 0xfa2   : > { %v4963_v56 = vadd.f32 %v4962_v16, %v4961_v51  ;;  %v4991_v62 = vadd.f32 %v4990_v41, %v4989_v33  ;;  %v9151_v26 = vadd.f32 %v5141_v3, %v5140_v45 }
 0xfa3   : > { %v4883_v4 = vpop.permute.xlu0 %4882  ;;  %v4957_v49 = vrot.slane %v4956_v2, 2 }
 0xfa4   : > { %v4773_v25 = vpop.permute.xlu1 %4772  ;;  %v4940_v14 = vmul.f32 %v4883_v4, %v9119_v55  ;;  %v4964_v61 = vrot.slane %v4963_v56, 2  ;;  %v4992_v34 = vrot.slane %v4991_v62, 2 }
 0xfa5   : > { %v4918_v40 = vmul.f32 %v4773_v25, %v3372_v5  ;;  %v4958_v44 = vadd.f32 %v4957_v49, %v4956_v2  ;;  %v5121_v2 = vadd.f32 %v5120_v54, %v5119_v35 }
 0xfa6   : > { %v4793_v6 = vpop.permute.xlu2 %4792  ;;  %v5122_v53 = vsel %vm9958_vm2, %v4940_v14, 0.0  ;;  %v4965_v58 = vadd.f32 %v4964_v61, %v4963_v56  ;;  %vm9973_vm2 = vmmov %vm9956_vm0 }
 0xfa7   : > { %v4968_v42 = vsel %vm9957_vm8, %v4918_v40, 0.0  ;;  %v5123_v30 = vrot.slane %v5122_v53, 4  ;;  %v4922_v37 = vmul.f32 %v4793_v6, %v3372_v5  ;;  %v4959_v43 = vrot.slane %v4958_v44, 1  ;;  %vm9972_vm8 = vmmov %vm9956_vm0 }
 0xfa8   : > { %v4969_v24 = vrot.slane %v4968_v42, 4  ;;  %v4966_v12 = vrot.slane %v4965_v58, 1  ;;  %v9146_v6 = vadd.f32 %v4992_v34, %v4991_v62 }
 0xfa9   : > { %v5124_v60 = vadd.f32 %v5123_v30, %v5122_v53  ;;  %v4996_v27 = vsel %vm9959_vm11, %v4922_v37, 0.0  ;;  %v4960_v19 = vadd.f32 %v4959_v43, %v4958_v44  ;;  %vm9974_vm11 = vmmov %vm9965_vm10 }
 0xfaa   : > { %v4970_v25 = vadd.f32 %v4969_v24, %v4968_v42  ;;  %v4997_v13 = vrot.slane %v4996_v27, 4  ;;  %v4967_v52 = vadd.f32 %v4966_v12, %v4965_v58  ;;  %v4994_v23 = vrot.slane %v9146_v6, 1 }
 0xfab   : > { %v4888_v1 = vpop.permute.xlu0 %4887  ;;  %v5125_v57 = vrot.slane %v5124_v60, 2 }
 0xfac   : > { %v4783_v10 = vpop.permute.xlu1 %4782  ;;  %v4941_v32 = vmul.f32 %v4888_v1, %v9119_v55  ;;  %v4971_v9 = vrot.slane %v4970_v25, 2  ;;  %v4952_v1 = vrot.slane %v4951_v47, 1  ;;  %v4998_v22 = vadd.f32 %v4997_v13, %v4996_v27 }
 0xfad   : > { %v4920_v15 = vmul.f32 %v4783_v10, %v3372_v5  ;;  %v5126_v14 = vadd.f32 %v5125_v57, %v5124_v60 }
 0xfae   : > { %v5129_v59 = vsel %vm9961_vm13, %v4941_v32, 0.0  ;;  %v4972_v40 = vadd.f32 %v4971_v9, %v4970_v25  ;;  %v4953_v21 = vadd.f32 %v4952_v1, %v4951_v47  ;;  %vm9976_vm13 = vmmov %vm9956_vm0 }
 0xfaf   : > { %v4982_v10 = vsel %vm9963_vm1, %v4920_v15, 0.0  ;;  %v5130_v51 = vrot.slane %v5129_v59, 4  ;;  %v5127_v24 = vrot.slane %v5126_v14, 1  ;;  %vm9978_vm1 = vcmask 1044484  }
 0xfb0   : > { %v4798_v18 = vpop.permute.xlu2 %4797  ;;  %v4983_v16 = vrot.slane %v4982_v10, 4  ;;  %v5203_v49 = vsel %vm9965_vm10, %v4960_v19, %v4953_v21  ;;  %vm9980_vm10 = vcmask 1045509  }
 0xfb1   : > { %v4923_v33 = vmul.f32 %v4798_v18, %v9143_v46  ;;  %v5131_v56 = vadd.f32 %v5130_v51, %v5129_v59  ;;  %v4999_v18 = vrot.slane %v4998_v22, 2  ;;  %v5204_v35 = vsel %vm9969_vm3, %v4967_v52, %v5203_v49 }
 0xfb2   : > { %v4984_v8 = vadd.f32 %v4983_v16, %v4982_v10  ;;  %v5128_v45 = vadd.f32 %v5127_v24, %v5126_v14 }
 0xfb3   : > { %v4778_v48 = vpop.permute.xlu0 %4777  ;;  %v5003_v17 = vsel %vm9967_vm9, %v4923_v33, 0.0  ;;  %v5132_v60 = vrot.slane %v5131_v56, 2 }
 0xfb4   : > { %v9123_v7 = vpop.permute.xlu1 %4902  ;;  %v4919_v4 = vmul.f32 %v4778_v48, %v3372_v5  ;;  %v5004_v27 = vrot.slane %v5003_v17, 4 }
 0xfb5   : > { %v4944_v37 = vmul.f32 %v9123_v7, %v9119_v55  ;;  %v5133_v1 = vadd.f32 %v5132_v60, %v5131_v56 }
 0xfb6   : > { %v4975_v50 = vsel %vm9960_vm12, %v4919_v4, 0.0  ;;  %v5005_v3 = vadd.f32 %v5004_v27, %v5003_v17  ;;  %vm9975_vm12 = vcmask 1043459  }
 0xfb7   : > { %v4976_v5 = vrot.slane %v4975_v50, 4  ;;  %v5150_v58 = vsel %vm9970_vm14, %v4944_v37, 0.0  ;;  %vm9982_vm9 = vmmov %vm9975_vm12 }
 0xfb8   : > { %vm9985_vm14 = vmmov %vm9978_vm1 }
 0xfb9   : > { %v4977_v42 = vadd.f32 %v4976_v5, %v4975_v50  ;;  %v5224_v5 = vsel %vm9974_vm11, %v5128_v45, %v5121_v2 }
 0xfbb   : > { %v4898_v31 = vpop.permute.xlu0 %4897  ;;  %v4978_v62 = vrot.slane %v4977_v42, 2 }
 0xfbc   : > { %v9132_v39 = vpop.permute.xlu1 %4907  ;;  %v4943_v11 = vmul.f32 %v4898_v31, %v9119_v55  ;;  %v4973_v31 = vrot.slane %v4972_v40, 1 }
 0xfbd   : > { %v4813_v0 = vpop.permute.xlu2 %4812  ;;  %v4945_v7 = vmul.f32 %v9132_v39, %v9119_v55  ;;  %v4979_v9 = vadd.f32 %v4978_v62, %v4977_v42  ;;  %v5006_v42 = vrot.slane %v5005_v3, 2 }
 0xfbe   : > { %v5143_v30 = vsel %vm9966_vm6, %v4943_v11, 0.0  ;;  %v4926_v61 = vmul.f32 %v4813_v0, %v9143_v46  ;;  %v4974_v15 = vadd.f32 %v4973_v31, %v4972_v40  ;;  %vm9981_vm6 = vcmask 1046534  }
 0xfbf   : > { %v5144_v32 = vrot.slane %v5143_v30, 4  ;;  %v5157_v39 = vsel %vm9973_vm2, %v4945_v7, 0.0  ;;  %v4980_v19 = vrot.slane %v4979_v9, 1  ;;  %v5007_v62 = vadd.f32 %v5006_v42, %v5005_v3  ;;  %vm9989_vm2 = vmmov %vm9982_vm9 }
 0xfc0   : > { %v5024_v43 = vsel %vm9971_vm7, %v4926_v61, 0.0  ;;  %vm9986_vm7 = vcmask 1047559  }
 0xfc1   : > { %v5145_v13 = vadd.f32 %v5144_v32, %v5143_v30  ;;  %v5025_v12 = vrot.slane %v5024_v43, 4  ;;  %v4981_v24 = vadd.f32 %v4980_v19, %v4979_v9  ;;  %v5008_v9 = vrot.slane %v5007_v62, 1 }
 0xfc3   : > { %v5146_v16 = vrot.slane %v5145_v13, 2  ;;  %v5026_v2 = vadd.f32 %v5025_v12, %v5024_v43  ;;  %v4995_v43 = vadd.f32 %v4994_v23, %v9146_v6  ;;  %v5009_v23 = vadd.f32 %v5008_v9, %v5007_v62 }
 0xfc4   : > { %v4808_v36 = vpop.permute.xlu1 %4807 }
 0xfc5   : > { %v4803_v48 = vpop.permute.xlu0 %4802  ;;  %v4925_v53 = vmul.f32 %v4808_v36, %v9143_v46  ;;  %v9168_v36 = vadd.f32 %v4999_v18, %v4998_v22  ;;  %v5158_v22 = vrot.slane %v5157_v39, 4  ;;  %v5147_v61 = vadd.f32 %v5146_v16, %v5145_v13 }
 0xfc6   : > { %v4924_v29 = vmul.f32 %v4803_v48, %v9143_v46  ;;  %v4828_v34 = vpop.permute.xlu2 %4827  ;;  %v4985_v48 = vrot.slane %v4984_v8, 2  ;;  %v5027_v32 = vrot.slane %v5026_v2, 2 }
 0xfc7   : > { %v5017_v4 = vsel %vm9968_vm4, %v4925_v53, 0.0  ;;  %v4929_v10 = vmul.f32 %v4828_v34, %v9143_v46  ;;  %v5134_v53 = vrot.slane %v5133_v1, 1  ;;  %v5001_v60 = vrot.slane %v9168_v36, 1  ;;  %vm9983_vm4 = vmmov %vm9956_vm0 }
 0xfc8   : > { %v5010_v41 = vsel %vm9964_vm5, %v4924_v29, 0.0  ;;  %v5018_v50 = vrot.slane %v5017_v4, 4  ;;  %v5205_v29 = vsel %vm9975_vm12, %v4974_v15, %v5204_v35  ;;  %v4986_v21 = vadd.f32 %v4985_v48, %v4984_v8  ;;  %vm9979_vm5 = vmmov %vm9969_vm3 }
 0xfc9   : > { %v5011_v44 = vrot.slane %v5010_v41, 4  ;;  %v5045_v56 = vsel %vm9976_vm13, %v4929_v10, 0.0  ;;  %v5159_v8 = vadd.f32 %v5158_v22, %v5157_v39  ;;  %v5206_v35 = vsel %vm9978_vm1, %v4981_v24, %v5205_v29  ;;  %vm9984_vm3 = vmmov %vm9974_vm11 }
 0xfca   : > { %v5019_v51 = vadd.f32 %v5018_v50, %v5017_v4  ;;  %v4987_v17 = vrot.slane %v4986_v21, 1  ;;  %v5046_v37 = vrot.slane %v5045_v56, 4  ;;  %v5135_v4 = vadd.f32 %v5134_v53, %v5133_v1  ;;  %vm9991_vm12 = vmmov %vm9981_vm6 }
 0xfcb   : > { %v5012_v57 = vadd.f32 %v5011_v44, %v5010_v41  ;;  %v5148_v50 = vrot.slane %v5147_v61, 1  ;;  %v5028_v48 = vadd.f32 %v5027_v32, %v5026_v2  ;;  %v5002_v3 = vadd.f32 %v5001_v60, %v9168_v36  ;;  %vm9992_vm13 = vmmov %vm9978_vm1 }
 0xfcc   : > { %v5020_v41 = vrot.slane %v5019_v51, 2  ;;  %v4988_v15 = vadd.f32 %v4987_v17, %v4986_v21  ;;  %v5047_v34 = vadd.f32 %v5046_v37, %v5045_v56  ;;  %v5235_v17 = vrot.slane %v9099_v63, 4 }
 0xfcd   : > { %v4913_v38 = vpop.permute.xlu1 %4912  ;;  %v5013_v40 = vrot.slane %v5012_v57, 2  ;;  %v5149_v29 = vadd.f32 %v5148_v50, %v5147_v61  ;;  %vm9990_vm11 = vcmask 1047556  }
 0xfce   : > { %v4946_v47 = vmul.f32 %v4913_v38, %v9119_v55  ;;  %v5151_v55 = vrot.slane %v5150_v58, 4  ;;  %v5207_v1 = vsel %vm9980_vm10, %v4988_v15, %v5206_v35 }
 0xfcf   : > { %v5014_v30 = vadd.f32 %v5013_v40, %v5012_v57  ;;  %v5225_v57 = vsel %vm9979_vm5, %v5135_v4, %v5224_v5  ;;  %v5208_v5 = vsel %vm9981_vm6, %v4995_v43, %v5207_v1 }
 0xfd0   : > { %v5164_v54 = vsel %vm9972_vm8, %v4946_v47, 0.0  ;;  %v5152_v52 = vadd.f32 %v5151_v55, %v5150_v58  ;;  %v5021_v47 = vadd.f32 %v5020_v41, %v5019_v51  ;;  %v5160_v58 = vrot.slane %v5159_v8, 2  ;;  %vm9988_vm8 = vmmov %vm9980_vm10 }
 0xfd1   : > { %v5165_v14 = vrot.slane %v5164_v54, 4  ;;  %v5015_v45 = vrot.slane %v5014_v30, 1  ;;  %v5226_v40 = vsel %vm9982_vm9, %v9151_v26, %v5225_v57  ;;  %v5209_v2 = vsel %vm9986_vm7, %v5002_v3, %v5208_v5  ;;  %vm9994_vm1 = vmmov %vm9988_vm8 }
 0xfd2   : > { %v4818_v25 = vpop.permute.xlu0 %4817  ;;  %v5153_v44 = vrot.slane %v5152_v52, 2  ;;  %v5022_v13 = vrot.slane %v5021_v47, 1  ;;  %v5161_v51 = vadd.f32 %v5160_v58, %v5159_v8  ;;  %v5237_v8 = vrot.slane %v5209_v2, 4  ;;  %vm9997_vm10 = vmmov %vm9981_vm6 }
 0xfd3   : > { %v4927_v28 = vmul.f32 %v4818_v25, %v9143_v46  ;;  %v5166_v38 = vadd.f32 %v5165_v14, %v5164_v54  ;;  %v5016_v55 = vadd.f32 %v5015_v45, %v5014_v30  ;;  %v5029_v14 = vrot.slane %v5028_v48, 1  ;;  %vm9998_vm6 = vmmov %vm9986_vm7 }
 0xfd4   : > { %v5162_v53 = vrot.slane %v5161_v51, 1 }
 0xfd5   : > { %v5031_v59 = vsel %vm9956_vm0, %v4927_v28, 0.0  ;;  %v5167_v27 = vrot.slane %v5166_v38, 2  ;;  %v5210_v22 = vsel %vm9984_vm3, %v5016_v55, %v5009_v23  ;;  %vm9987_vm0 = vmmov %vm9979_vm5 }
 0xfd6   : > { %v5032_v0 = vrot.slane %v5031_v59, 4  ;;  %v5163_v37 = vadd.f32 %v5162_v53, %v5161_v51  ;;  %vm9995_vm5 = vmmov %vm9990_vm11 }
 0xfd7   : > { %v5168_v39 = vadd.f32 %v5167_v27, %v5166_v38  ;;  %v5238_v35 = vsel %vm9995_vm5, %v9099_v63, %v5237_v8  ;;  %v9996_v27 = vld [vmem:[#allocation7_spill] sm:$0xff]  ;;  %vm9999_vm9 = vmmov %vm9995_vm5 }
 0xfd8   : > { %v5033_v49 = vadd.f32 %v5032_v0, %v5031_v59  ;;  %v5154_v59 = vadd.f32 %v5153_v44, %v5152_v52  ;;  %v5048_v0 = vrot.slane %v5047_v34, 2  ;;  %v5236_v44 = vsel %vm9990_vm11, %v5235_v17, %v5209_v2 }
 0xfd9   : > { %v5169_v16 = vrot.slane %v5168_v39, 1  ;;  %v5246_v50 = vperm.slane %v5238_v35, %v9996_v27 }
 0xfda   : > { %v4823_v11 = vpop.permute.xlu0 %4822  ;;  %v5034_v28 = vrot.slane %v5033_v49, 2  ;;  %v5155_v19 = vrot.slane %v5154_v59, 1  ;;  %v5049_v52 = vadd.f32 %v5048_v0, %v5047_v34 }
 0xfdb   : > { %v4928_v33 = vmul.f32 %v4823_v11, %v9143_v46  ;;  %v5023_v11 = vadd.f32 %v5022_v13, %v5021_v47  ;;  %v5170_v30 = vadd.f32 %v5169_v16, %v5168_v39  ;;  %v5273_v3 = vrot.slane %v5246_v50, 4 }
 0xfdc   : > { %v5035_v54 = vadd.f32 %v5034_v28, %v5033_v49  ;;  %v5156_v56 = vadd.f32 %v5155_v19, %v5154_v59  ;;  %v5030_v49 = vadd.f32 %v5029_v14, %v5028_v48  ;;  %v5050_v61 = vrot.slane %v5049_v52, 1 }
 0xfdd   : > { %v5038_v31 = vsel %vm9977_vm15, %v4928_v33, 0.0  ;;  %v5211_v26 = vsel %vm9987_vm0, %v5023_v11, %v5210_v22  ;;  %vm9993_vm15 = vmmov %vm9986_vm7 }
 0xfde   : > { %v5039_v18 = vrot.slane %v5038_v31, 4  ;;  %v5036_v21 = vrot.slane %v5035_v54, 1  ;;  %v5212_v62 = vsel %vm9989_vm2, %v5030_v49, %v5211_v26  ;;  %v5051_v45 = vadd.f32 %v5050_v61, %v5049_v52 }
 0xfe0   : > { %v5040_v25 = vadd.f32 %v5039_v18, %v5038_v31  ;;  %v5037_v31 = vadd.f32 %v5036_v21, %v5035_v54 }
 0xfe2   : > { %v5041_v7 = vrot.slane %v5040_v25, 2  ;;  %v5213_v60 = vsel %vm9992_vm13, %v5037_v31, %v5212_v62 }
 0xfe3   : > { %v4833_v12 = vpop.permute.xlu0 %4832 }
 0xfe4   : > { %v5042_v10 = vadd.f32 %v5041_v7, %v5040_v25  ;;  %v4930_v6 = vmul.f32 %v4833_v12, %v9143_v46  ;;  %v5227_v46 = vsel %vm9985_vm14, %v5149_v29, %v5226_v40  ;;  %v5242_v7 = vperm.slane %v5236_v44, %v9996_v27 }
 0xfe5   : > { %v5228_v24 = vsel %vm9988_vm8, %v5156_v56, %v5227_v46 }
 0xfe6   : > { %v5052_v36 = vsel %vm9983_vm4, %v4930_v6, 0.0  ;;  %v5043_v33 = vrot.slane %v5042_v10, 1  ;;  %v5229_v25 = vsel %vm9991_vm12, %v5163_v37, %v5228_v24  ;;  %v5261_v59 = vrot.slane %v5242_v7, 4  ;;  %vm10000_vm4 = vmmov %vm9995_vm5 }
 0xfe7   : > { %v5053_v42 = vrot.slane %v5052_v36, 4  ;;  %v5230_v32 = vsel %vm9993_vm15, %v5170_v30, %v5229_v25  ;;  %vm10001_vm3 = vmmov %vm10000_vm4 }
 0xfe8   : > { %v5044_v38 = vadd.f32 %v5043_v33, %v5042_v10  ;;  %v5247_v58 = vrot.slane %v5230_v32, 4  ;;  %vm10002_vm14 = vmmov %vm10001_vm3 }
 0xfe9   : > { %v5054_v41 = vadd.f32 %v5053_v42, %v5052_v36  ;;  %vm10003_vm7 = vmmov %vm10001_vm3 }
 0xfea   : > { %v5214_v47 = vsel %vm9994_vm1, %v5044_v38, %v5213_v60  ;;  %vm10004_vm0 = vmmov %vm10001_vm3 }
 0xfeb   : > { %v5055_v18 = vrot.slane %v5054_v41, 2  ;;  %v5215_v34 = vsel %vm9997_vm10, %v5051_v45, %v5214_v47  ;;  %vm10005_vm8 = vmmov %vm10004_vm0  ;;  %v5678_v45 = vld [vmem:[%s9407_s3 + $0x38] sm:$0xff] }
 0xfec   : > { %vm10006_vm2 = vmmov %vm10004_vm0  ;;  %5381 = vmatpush.msra.mxu1 %v5678_v45  ;;  %v5691_v45 = vld [vmem:[%s9409_s5 + $0xa8] sm:$0xff] }
 0xfed   : > { %v5056_v4 = vadd.f32 %v5055_v18, %v5054_v41  ;;  %vm10007_vm11 = vmmov %vm10004_vm0 }
 0xfee   : > { %vm10008_vm12 = vmmov %vm10004_vm0 }
 0xfef   : > { %v5057_v28 = vrot.slane %v5056_v4, 1  ;;  %vm10009_vm13 = vmmov %vm10004_vm0 }
 0xff0   : > { %vm10010_vm15 = vmmov %vm10004_vm0 }
 0xff1   : > { %v5058_v15 = vadd.f32 %v5057_v28, %v5056_v4  ;;  %vm10011_vm1 = vmmov %vm10004_vm0 }
 0xff2   : > { %vm10012_vm5 = vmmov %vm10004_vm0 }
 0xff3   : > { %v5216_v43 = vsel %vm9998_vm6, %v5058_v15, %v5215_v34  ;;  %vm10013_vm10 = vmmov %vm10004_vm0 }
 0xff4   : > { %v5248_v9 = vsel %vm9999_vm9, %v5247_v58, %v5216_v43  ;;  %v5249_v57 = vrot.slane %v5216_v43, 4  ;;  %vm10014_vm6 = vmmov %vm10004_vm0 }
 0xff5   : > { %v5254_v48 = vperm.slane %v5248_v9, %v9996_v27  ;;  %vm10015_vm9 = vmmov %vm10004_vm0 }
 0xff6   : > { %v5250_v1 = vsel %vm10000_vm4, %v5230_v32, %v5249_v57  ;;  %vm10016_vm4 = vmmov %vm10004_vm0  ;;  %v9270_v57 = vld [vmem:[%s9405_s1 + $0x8] sm:$0xff] }
 0xff7   : > { %v5258_v63 = vperm.slane %v5250_v1, %v9996_v27  ;;  %v5259_v13 = vrot.slane %v5254_v48, 4  ;;  %v5262_v54 = vsel %vm10001_vm3, %v5254_v48, %v5261_v59  ;;  %vm10017_vm3 = vmmov %vm10004_vm0  ;;  %v5365_v59 = vperm.slane %v9270_v57, 3 }
 0xff8   : > { %v5270_v55 = vperm.slane %v5262_v54, %v9945_v20 }
 0xff9   : > { %v5260_v39 = vsel %vm10002_vm14, %v5259_v13, %v5242_v7  ;;  %v5271_v10 = vrot.slane %v5258_v63, 4  ;;  %v5274_v12 = vsel %vm10003_vm7, %v5258_v63, %v5273_v3  ;;  %vm10019_vm14 = vmmov %vm10004_vm0  ;;  %v5675_v7 = vld [vmem:[%s9407_s3 + $0x20] sm:$0xff]  ;;  %v10026_v63 = vld [vmem:[#allocation21_spill] sm:$0xff] }
 0xffa   : > { %v5285_v51 = vrot.slane %v5270_v55, 4  ;;  %v5266_v0 = vperm.slane %v5260_v39, %v9945_v20  ;;  %v5282_v29 = vperm.slane %v5274_v12, %v9945_v20  ;;  %vm10020_vm7 = vmmov %vm10004_vm0  ;;  %v10028_v55 = vld [vmem:[#allocation5_spill] sm:$0xff] }
 0xffb   : > { %v5272_v6 = vsel %vm10004_vm0, %v5271_v10, %v5246_v50 }
 0xffc   : > { %v5278_v23 = vperm.slane %v5272_v6, %v9945_v20  ;;  %v5283_v19 = vrot.slane %v5266_v0, 4  ;;  %v5286_v5 = vsel %vm10005_vm8, 0.0, %v5285_v51  ;;  %v5289_v40 = vrot.slane %v5282_v29, 4  ;;  %v5682_v29 = vld [vmem:[%s9408_s4 + $0x30] sm:$0xff]  ;;  %v5681_v6 = vld [vmem:[%s9408_s4 + $0x28] sm:$0xff] }
 0xffd   : > { %v5291_v14 = vsel %vm10006_vm2, %v5285_v51, %v5266_v0  ;;  %v5296_v11 = vrot.slane %v5286_v5, 4  ;;  %vm10022_vm8 = vcmask 64512   ;;  %vm10023_vm2 = vcmask 130048   ;;  %v5683_v0 = vld [vmem:[%s9408_s4 + $0x38] sm:$0xff] }
 0xffe   : > { %v5284_v21 = vsel %vm10007_vm11, 0.0, %v5283_v19  ;;  %v5287_v36 = vrot.slane %v5278_v23, 4  ;;  %v5290_v22 = vsel %vm10008_vm12, 0.0, %v5289_v40  ;;  %v5295_v16 = vperm.slane %v5291_v14, %v9996_v27  ;;  %5437 = vmatpush.msra.mxu2 %v5683_v0 }
 0xfff   : > { %v5297_v33 = vsel %vm10009_vm13, %v5296_v11, %v5284_v21  ;;  %v5302_v42 = vsel %vm10010_vm15, %v5289_v40, %v5278_v23  ;;  %v5307_v53 = vrot.slane %v5290_v22, 4  ;;  %vm10024_vm11 = vcmask 195584   ;;  %v5680_v23 = vld [vmem:[%s9408_s4 + $0x20] sm:$0xff] }
0x1000   : > { %v5288_v52 = vsel %vm10011_vm1, 0.0, %v5287_v36  ;;  %v5301_v46 = vperm.slane %v5297_v33, %v9996_v27  ;;  %v5306_v56 = vperm.slane %v5302_v42, %v9996_v27  ;;  %v5315_v2 = vrot.slane %v5295_v16, 4  ;;  %5438 = vmatpush.msra.mxu2 %v5682_v29 }
0x1001   : > { %v5308_v41 = vsel %vm10012_vm5, %v5307_v53, %v5288_v52  ;;  %vm10025_vm12 = vcmask 261120   ;;  %v5412_v33 = vperm.slane %v9270_v57, 4  ;;  %v5414_v52 = vperm.slane %v9270_v57, 5 }
0x1002   : > { %v5312_v49 = vperm.slane %v5308_v41, %v9996_v27  ;;  %v5316_v26 = vsel %vm10013_vm10, %v5301_v46, %v5315_v2  ;;  %v5327_v31 = vrot.slane %v5306_v56, 4  ;;  %v5313_v24 = vrot.slane %v5301_v46, 4  ;;  %v5676_v27 = vld [vmem:[%s9407_s3 + $0x28] sm:$0xff]  ;;  %vm10027_vm13 = vmmov %vm10025_vm12  ;;  %5439 = vmatpush.msra.mxu2 %v5681_v6  ;;  %v5701_v41 = vld [vmem:[%s9409_s5 + $0xf8] sm:$0xff] }
0x1003   : > { %v5324_v30 = vperm.slane %v5316_v26, %v9945_v20  ;;  %vm10029_vm15 = vmmov %vm10025_vm12  ;;  %v5421_v2 = vperm.slane %v9270_v57, 6  ;;  %5507 = vmatpush.msra.mxu0 %v5701_v41  ;;  %v5699_v26 = vld [vmem:[%s9409_s5 + $0xe8] sm:$0xff] }
0x1004   : > { %v5328_v38 = vsel %vm10014_vm6, %v5312_v49, %v5327_v31  ;;  %v5314_v18 = vsel %vm10015_vm9, %v5313_v24, %v5295_v16  ;;  %v5325_v17 = vrot.slane %v5312_v49, 4  ;;  %5440 = vmatpush.msra.mxu2 %v5680_v23  ;;  %vm10030_vm6 = vmmov %vm10025_vm12  ;;  %v5700_v49 = vld [vmem:[%s9409_s5 + $0xf0] sm:$0xff] }
0x1005   : > { %v5336_v8 = vperm.slane %v5328_v38, %v9945_v20  ;;  %v5343_v37 = vrot.slane %v5324_v30, 4  ;;  %v5320_v61 = vperm.slane %v5314_v18, %v9945_v20  ;;  %5508 = vmatpush.msra.mxu0 %v5700_v49  ;;  %v5697_v18 = vld [vmem:[%s9409_s5 + $0xd8] sm:$0xff] }
0x1006   : > { %v5326_v62 = vsel %vm10016_vm4, %v5325_v17, %v5306_v56 }
0x1007   : > { %v5344_v4 = vsel %vm10017_vm3, %v5336_v8, %v5343_v37  ;;  %v5341_v44 = vrot.slane %v5336_v8, 4  ;;  %v5332_v25 = vperm.slane %v5326_v62, %v9945_v20  ;;  %v5339_v60 = vrot.slane %v5320_v61, 4  ;;  %v5677_v20 = vld [vmem:[%s9407_s3 + $0x30] sm:$0xff]  ;;  %5509 = vmatpush.msra.mxu0 %v5699_v26 }
0x1008   : > { %5354 = vrot.lane.b32.xlu0 %v5344_v4, %s10018_s19  ;;  %5382 = vmatpush.msra.mxu1 %v5677_v20  ;;  %v5696_v8 = vld [vmem:[%s9409_s5 + $0xd0] sm:$0xff]  ;;  %v5694_v4 = vld [vmem:[%s9409_s5 + $0xc0] sm:$0xff]  ;;  %s6079_s19 = scalar_lea.hbm %s9412_s8, 16 }
0x1009   : > { %v5342_v32 = vsel %vm10019_vm14, %v5341_v44, %v5324_v30  ;;  %v5340_v47 = vsel %vm10020_vm7, %v5332_v25, %v5339_v60  ;;  %v5337_v28 = vrot.slane %v5332_v25, 4  ;;  %v5698_v30 = vld [vmem:[%s9409_s5 + $0xe0] sm:$0xff]  ;;  %v5693_v60 = vld [vmem:[%s9409_s5 + $0xb8] sm:$0xff]  ;;  %vm10031_vm7 = vmmov %vm10030_vm6  ;;  %p6081_p1 = scmp.lt.s32.totalorder %s6079_s19, %s6075_s12 }
0x100a   : > { %5350 = vrot.lane.b32.xlu2 %v5342_v32, %s10021_s20  ;;  %5346 = vrot.lane.b32.xlu1 %v5340_v47, %s6135_s10 }
0x100b   : > { %v5338_v35 = vsel %vm10004_vm0, %v5337_v28, %v5320_v61  ;;  %5383 = vmatpush.msra.mxu1 %v5676_v27  ;;  %5510 = vmatpush.msra.mxu0 %v5698_v30  ;;  %v5695_v61 = vld [vmem:[%s9409_s5 + $0xc8] sm:$0xff]  ;;  %v5692_v28 = vld [vmem:[%s9409_s5 + $0xb0] sm:$0xff]  ;;  %vm10032_vm0 = vmmov %vm10030_vm6  ;;  %p6082_p2 = por %p6081_p1, %p6080_p0 }
0x100d   : > { %5384 = vmatpush.msra.mxu1 %v5675_v7  ;;  %5511 = vmatpush.msra.mxu0 %v5697_v18  ;;  %v5690_v7 = vld [vmem:[%s9409_s5 + $0xa0] sm:$0xff]  ;;  %p6083_p3 = pnand %p6082_p2, %p6078_p13 }
0x100e   : > { %v5555_v18 = vld [vmem:[%s9411_s7] sm:$0xff] }
0x100f   : > { %5512 = vmatpush.msra.mxu0 %v5696_v8 }
0x1011   : > { %5513 = vmatpush.msra.mxu0 %v5695_v61 }
0x1013   : > { %5514 = vmatpush.msra.mxu0 %v5694_v4 }
0x1015   : > { %5515 = vmatpush.msra.mxu0 %v5693_v60 }
0x1017   : > { %5516 = vmatpush.msra.mxu0 %v5692_v28 }
0x1019   : > { %5517 = vmatpush.msra.mxu0 %v5691_v45 }
0x101b   : > { %5518 = vmatpush.msra.mxu0 %v5690_v7 }
0x1064   : > { %v5351_v58 = vpop.permute.xlu2 %5350 }
0x107a   : > { %v5355_v50 = vpop.permute.xlu0 %5354 }
0x107c   : > { %v5347_v15 = vpop.permute.xlu1 %5346 }
0x107d   : > { %v5357_v34 = vsel %vm10022_vm8, %v5338_v35, %v5347_v15 }
0x107e   : > { %v5358_v43 = vsel %vm10023_vm2, %v5357_v34, %v5351_v58  ;;  %v5689_v58 = vld [vmem:[%s9409_s5 + $0x98] sm:$0xff] }
0x107f   : > { %v5359_v9 = vsel %vm10024_vm11, %v5358_v43, %v5355_v50  ;;  %v5688_v43 = vld [vmem:[%s9409_s5 + $0x90] sm:$0xff]  ;;  %5519 = vmatpush.msra.mxu0 %v5689_v58 }
0x1080   : > { %5679 = vmatmul.msk.f32.vlgmr.msra.gmra.mxu1 %vm10025_vm12, %v5359_v9  ;;  %vm10033_vm12 = vmmov %vm10032_vm0 }
0x1081   : > { %5520 = vmatpush.msra.mxu0 %v5688_v43 }
0x10fd   : > { %v5386_v48 = vpop.f32.mrf.mxu1 }
0x10fe   : > { %v5387_v1 = vadd.f32 %v5386_v48, %v5365_v59  ;;  %v5687_v59 = vld [vmem:[%s9409_s5 + $0x88] sm:$0xff] }
0x10ff   : > { %5521 = vmatpush.msra.mxu0 %v5687_v59 }
0x1100   : > { %v9274_v13 = vadd.f32 %v5387_v1, %v10026_v63  ;;  %v5686_v63 = vld [vmem:[%s9409_s5 + $0x80] sm:$0xff] }
0x1101   : > { %5522 = vmatpush.msra.mxu0 %v5686_v63 }
0x1102   : > { %v5390_v54 = vsel %vm10027_vm13, %v9274_v13, 0.0 }
0x1103   : > { %5391 = vadd.xlane.f32.xlu1 %v5390_v54 }
0x1176   : > { %v5392_v3 = vpop.xlane.xlu1 %5391 }
0x1177   : > { %v5393_v39 = vmul.f32 %v5392_v3, %v10028_v55 }
0x1179   : > { %v5394_v10 = vsub.f32 %v9274_v13, %v5393_v39 }
0x117b   : > { %v5395_v12 = vmul.f32 %v5394_v10, %v5394_v10 }
0x117d   : > { %v5396_v51 = vsel %vm10029_vm15, %v5395_v12, 0.0 }
0x117e   : > { %5397 = vadd.xlane.f32.xlu2 %v5396_v51 }
0x11f1   : > { %v5398_v19 = vpop.xlane.xlu2 %5397 }
0x11f2   : > { %v5399_v5 = vmul.f32 %v5398_v19, %v10028_v55 }
0x11f4   : > { %v5400_v40 = vadd.f32 1e-05, %v5399_v5 }
0x11f6   : > { %6050 = vrsqrt.f32 %v5400_v40  ;;  %vm5407_vm5 = vweird.f32 %v5400_v40 }
0x11fc   : > { %v6051_v14 = vpop.eup %6050 }
0x11fd   : > { %v5402_v11 = vmul.f32 %v6051_v14, %v5400_v40  ;;  %vm5408_vm1 = vweird.f32 %v6051_v14 }
0x11fe   : > { %vm5409_vm10 = vmor %vm5407_vm5, %vm5408_vm1 }
0x11ff   : > { %v5403_v21 = vmul.f32 %v6051_v14, %v5402_v11 }
0x1201   : > { %v5404_v36 = vmul.f32 0.5, %v5403_v21 }
0x1203   : > { %v5405_v22 = vsub.f32 1.5, %v5404_v36 }
0x1205   : > { %v5406_v16 = vmul.f32 %v6051_v14, %v5405_v22 }
0x1207   : > { %v5410_v42 = vsel %vm5409_vm10, %v6051_v14, %v5406_v16 }
0x1208   : > { %v5411_v53 = vmul.f32 %v5410_v42, %v5394_v10 }
0x120a   : > { %v5413_v46 = vmul.f32 %v5412_v33, %v5411_v53 }
0x120c   : > { %v5415_v56 = vadd.f32 %v5414_v52, %v5413_v46  ;;  %v5506_v52 = vperm.slane %v9270_v57, 7  ;;  %v5557_v57 = vld [vmem:[%s9411_s7 + $0x10] sm:$0xff] }
0x120e   : > { %5684 = vmatmul.msk.f32.vlgmr.msra.gmra.mxu2 %vm10030_vm6, %v5415_v56 }
0x1291   : > { %v5442_v31 = vpop.f32.mrf.mxu2 }
0x1292   : > { %v9307_v24 = vadd.f32 %v5442_v31, %v5421_v2 }
0x1294   : > { %v5446_v38 = vmul.f32 0.70710677, %v9307_v24  ;;  %v5445_v33 = vmul.f32 0.5, %v9307_v24  ;;  %v5558_v24 = vld [vmem:[%s9411_s7 + $0x18] sm:$0xff] }
0x1295   : > { %5574 = vmatpush.msrb.mxu1 %v5558_v24 }
0x1296   : > { %v5447_v17 = vmul.f32 %v5446_v38, %v5446_v38 }
0x1297   : > { %5575 = vmatpush.msrb.mxu1 %v5557_v57 }
0x1298   : > { %v5448_v37 = vmin.f32 %v5447_v17, 16.0 }
0x129a   : > { %v5449_v62 = vmul.f32 2.1237322e-06, %v5448_v37  ;;  %v5460_v44 = vmul.f32 3.8918573e-05, %v5448_v37 }
0x129c   : > { %v5450_v25 = vadd.f32 0.00028619796, %v5449_v62  ;;  %v5461_v32 = vadd.f32 0.001143296, %v5460_v44 }
0x129e   : > { %v5451_v47 = vmul.f32 %v5450_v25, %v5448_v37  ;;  %v5462_v35 = vmul.f32 %v5461_v32, %v5448_v37  ;;  %v5528_v25 = vld [vmem:[%s9410_s6] sm:$0x3] }
0x12a0   : > { %v5463_v20 = vadd.f32 0.014752088, %v5462_v35  ;;  %v5452_v27 = vadd.f32 0.0036580483, %v5451_v47  ;;  %v5551_v47 = vperm.slane %v5528_v25, 0  ;;  %v5553_v35 = vperm.slane %v5528_v25, 1 }
0x12a2   : > { %v5464_v15 = vmul.f32 %v5463_v20, %v5448_v37  ;;  %v5453_v50 = vmul.f32 %v5452_v27, %v5448_v37 }
0x12a4   : > { %v5465_v34 = vadd.f32 0.112945676, %v5464_v15  ;;  %v5454_v1 = vadd.f32 0.05243302, %v5453_v50 }
0x12a6   : > { %v5466_v9 = vmul.f32 %v5465_v34, %v5448_v37  ;;  %v5455_v39 = vmul.f32 %v5454_v1, %v5448_v37 }
0x12a8   : > { %v5467_v48 = vadd.f32 0.4994258, %v5466_v9  ;;  %v5456_v10 = vadd.f32 0.18741608, %v5455_v39 }
0x12aa   : > { %v5468_v54 = vmul.f32 %v5467_v48, %v5448_v37  ;;  %v5457_v51 = vmul.f32 %v5456_v10, %v5448_v37 }
0x12ac   : > { %v5469_v3 = vadd.f32 1.0, %v5468_v54  ;;  %v5458_v23 = vadd.f32 1.1283791, %v5457_v51 }
0x12ae   : > { %6052 = vrcp.f32 %v5469_v3  ;;  %v5481_v6 = vand.u32 2147483648, %v5469_v3  ;;  %v5479_v5 = vand.u32 2147483647, %v5469_v3  ;;  %vm5475_vm4 = vweird.f32 %v5469_v3 }
0x12af   : > { %v5459_v11 = vmul.f32 %v5458_v23, %v5446_v38 }
0x12b0   : > { %v5482_v14 = vor.u32 1.1754944e-38, %v5481_v6  ;;  %vm5480_vm14 = vcmp.eq.f32.partialorder %v5479_v5, 8.507059e+37 }
0x12b4   : > { %v6053_v12 = vpop.eup %6052 }
0x12b5   : > { %v5471_v0 = vmul.f32 %v6053_v12, %v5469_v3  ;;  %vm5476_vm9 = vweird.f32 %v6053_v12 }
0x12b6   : > { %vm5477_vm3 = vmor %vm5475_vm4, %vm5476_vm9 }
0x12b7   : > { %v5472_v29 = vsub.f32 1.0, %v5471_v0 }
0x12b9   : > { %v5473_v19 = vmul.f32 %v6053_v12, %v5472_v29 }
0x12bb   : > { %v5474_v40 = vadd.f32 %v6053_v12, %v5473_v19 }
0x12bd   : > { %v5478_v21 = vsel %vm5477_vm3, %v6053_v12, %v5474_v40 }
0x12be   : > { %v5483_v36 = vsel %vm5480_vm14, %v5482_v14, %v5478_v21 }
0x12bf   : > { %v5484_v22 = vmul.f32 %v5483_v36, %v5459_v11 }
0x12c1   : > { %v5685_v16 = vclamps-f32 %v5484_v22, 1.0 }
0x12c3   : > { %v5487_v42 = vadd.f32 1.0, %v5685_v16 }
0x12c5   : > { %v5488_v53 = vmul.f32 %v5487_v42, %v5445_v33 }
0x12c7   : > { %5523 = vmatmul.f32.vlgmr.msra.gmra.mxu0 %v5488_v53 }
0x1344   : > { %v5524_v46 = vpop.f32.mrf.mxu0 }
0x1345   : > { %v5525_v56 = vadd.f32 %v5524_v46, %v5506_v52 }
0x1347   : > { %v5527_v2 = vadd.f32 %v5525_v56, %v9274_v13  ;;  %v5556_v13 = vld [vmem:[%s9411_s7 + $0x8] sm:$0xff] }
0x1348   : > { %5576 = vmatpush.msrb.mxu1 %v5556_v13 }
0x1349   : > { %v5529_v41 = vsel %vm10031_vm7, %v5527_v2, 0.0 }
0x134a   : > { %5530 = vadd.xlane.f32.xlu0 %v5529_v41  ;;  %5577 = vmatpush.msrb.mxu1 %v5555_v18 }
0x13bd   : > { %v5531_v49 = vpop.xlane.xlu0 %5530 }
0x13be   : > { %v5532_v26 = vmul.f32 %v5531_v49, %v10028_v55 }
0x13c0   : > { %v5533_v31 = vsub.f32 %v5527_v2, %v5532_v26 }
0x13c2   : > { %v5534_v30 = vmul.f32 %v5533_v31, %v5533_v31 }
0x13c4   : > { %v5535_v38 = vsel %vm10032_vm0, %v5534_v30, 0.0 }
0x13c5   : > { %5536 = vadd.xlane.f32.xlu1 %v5535_v38 }
0x1438   : > { %v5537_v17 = vpop.xlane.xlu1 %5536 }
0x1439   : > { %v5538_v8 = vmul.f32 %v5537_v17, %v10028_v55 }
0x143b   : > { %v5539_v37 = vadd.f32 1e-05, %v5538_v8 }
0x143d   : > { %6054 = vrsqrt.f32 %v5539_v37  ;;  %vm5546_vm2 = vweird.f32 %v5539_v37 }
0x1443   : > { %v6055_v61 = vpop.eup %6054 }
0x1444   : > { %v5541_v62 = vmul.f32 %v6055_v61, %v5539_v37  ;;  %vm5547_vm8 = vweird.f32 %v6055_v61 }
0x1445   : > { %vm5548_vm11 = vmor %vm5546_vm2, %vm5547_vm8 }
0x1446   : > { %v5542_v4 = vmul.f32 %v6055_v61, %v5541_v62 }
0x1448   : > { %v5543_v44 = vmul.f32 0.5, %v5542_v4 }
0x144a   : > { %v5544_v60 = vsub.f32 1.5, %v5543_v44 }
0x144c   : > { %v5545_v32 = vmul.f32 %v6055_v61, %v5544_v60 }
0x144e   : > { %v5549_v28 = vsel %vm5548_vm11, %v6055_v61, %v5545_v32 }
0x144f   : > { %v5550_v55 = vmul.f32 %v5549_v28, %v5533_v31 }
0x1451   : > { %v5552_v45 = vmul.f32 %v5551_v47, %v5550_v55 }
0x1453   : > { %v5554_v20 = vadd.f32 %v5553_v35, %v5552_v45 }
0x1455   : > { %5702 = vmatmul.msk.f32.vlgmr.msrb.gmra.mxu1 %vm10033_vm12, %v5554_v20 }
0x14d2   : > { %v5579_v27 = vpop.f32.mrf.mxu1 }
0x14d3   : > { %5582 = vst [vmem:[%s296_s24] sm:$0xff] %v5579_v27 }
0x14d4   : > { %6086 = shalt.err (!%p6083_p3)
}
0x14d5   : > { %5707 = dma.vmem_to_hbm [thread:$0]  (%p6219_p5), %s5597_s25, 128, %s5599_s22, %s5584_s26  }
0x14d6 PF: > { %p5713_p4 = scmp.ge.s32.totalorder %s6121_s30, 2  ;;  %s5610_s13 = sand.u32 1, %s6109_s27  }
0x14d7   : > { %s5611_s20 = scalar_lea.sflag [#allocation3], %s5610_s13 }
0x14d8   : > { %p5710_p7 = pnand %p5713_p4, %p6223_p6 }
0x14da   : > { %p5711_p8 = pneg %p5710_p7 }
0x14dc   : > { %6104 = dma.done.wait (%p5711_p8), %s5611_s20, 128  }
0x14dd   : > { %6106 = vsyncadd (%p5711_p8), %s5611_s20, 4294967168  ;;  %p18_p9 = scmp.ge.s32.totalorder %s6206_s11, 4   ;;  %s10034_s27 = smov %s6113_s28 }
0x14de   : > { %s10035_s28 = smov %s6117_s29  ;;  %s10036_s29 = smov %s6217_s14 }
0x14df   : > { %s10037_s30 = smov %s6206_s11  ;;  %20 = sbr.rel (!%p18_p9) target bundleno = 3 (0x3), region = 92 }
0x14e4   :  { %5617 = vsyncpa [#allocation3], 1 }
0x14e5   :  { %5619 = vsyncpa [#allocation3 + $0x1], 1 }

</bundles_post_ra>
